<compile_context>
chip_gen: v7x
topology: tpu7x:2x2x1
jax: 0.10.0
libtpu: 0.0.40
codegen_flags: <defaults>
</compile_context>

<pallas_src>
import functools

import jax
import jax.numpy as jnp
from jax import lax
from jax.experimental import pallas as pl
from jax.experimental.pallas import tpu as pltpu

jax.config.update("jax_default_matmul_precision", "highest")

# 3x3 tap offsets, (dh, dw), dh-major — must match the mask order and the
# (kh, kw)-major packing of the conv weights.
_TAP_OFFSETS = tuple((dh, dw) for dh in (-1, 0, 1) for dw in (-1, 0, 1))


def _up_block_kernel(x_ref, prev_ref, wup_ref, bup_ref, p_ref, m_ref,
                     w1_ref, b1_ref, g1_ref, be1_ref,
                     w2_ref, b2_ref, g2_ref, be2_ref,
                     o_ref, *, w_hi):
    """Fused convT(2,2) -> concat -> (conv3x3 + BN + ReLU) x2, all in VMEM."""
    f32 = jnp.float32
    c_out = o_ref.shape[0]          # C
    nhw = o_ref.shape[1]            # N * 2H * 2W  (lane axis)

    # ---- 1) ConvTranspose2d(2C->C, k=2, s=2): GEMM + scatter-GEMM shuffle --
    # sub[(kh*2+kw)*C + co, n*H*W + h*W + w] = sum_ci Wup[ci,co,kh,kw]*x[ci,.]
    sub = jnp.dot(wup_ref[...], x_ref[...], preferred_element_type=f32)
    up = jnp.dot(sub[0:c_out, :], p_ref[0], preferred_element_type=f32)
    for t in range(1, 4):
        up = up + jnp.dot(sub[t * c_out:(t + 1) * c_out, :], p_ref[t],
                          preferred_element_type=f32)
    up = up + bup_ref[...]                                     # (C, nhw)

    # ---- 2) channel concat (upsampled first, then skip) in VMEM ------------
    cat = jnp.concatenate([up, prev_ref[...]], axis=0)         # (2C, nhw)

    # ---- 3) conv3x3(pad=1) + BatchNorm(batch stats) + ReLU as one GEMM -----
    def conv3x3_bn_relu(act, w_ref, b_ref, g_ref, be_ref):
        cin = act.shape[0]
        halo = w_hi + 1                        # max |flat shift| of a 3x3 tap
        zpad = jnp.zeros((cin, halo), f32)
        act_pad = jnp.concatenate([zpad, act, zpad], axis=1)   # (cin, nhw+2*halo)

        taps = []
        for idx, (dh, dw) in enumerate(_TAP_OFFSETS):
            d = dh * w_hi + dw                 # flat lane shift for this tap
            if d == 0:
                tap = act
            else:
                tap = act_pad[:, halo + d: halo + d + nhw]     # act[j + d]
                tap = tap * m_ref[idx]         # zero out-of-image positions
            taps.append(tap)
        im2col = jnp.concatenate(taps, axis=0)                 # (9*cin, nhw)

        acc = jnp.dot(w_ref[...], im2col, preferred_element_type=f32)
        acc = acc + b_ref[...]                                 # conv bias

        # BatchNorm over all N*H*W positions per channel (training-mode,
        # biased variance), single fused sum / sum-of-squares pass.
        s1 = jnp.sum(acc, axis=1, keepdims=True)
        s2 = jnp.sum(acc * acc, axis=1, keepdims=True)
        mean = s1 * (1.0 / nhw)
        var = s2 * (1.0 / nhw) - mean * mean
        scale = g_ref[...] * lax.rsqrt(var + 1e-5)
        y = (acc - mean) * scale + be_ref[...]
        return jnp.maximum(y, 0.0)                             # ReLU

    y = conv3x3_bn_relu(cat, w1_ref, b1_ref, g1_ref, be1_ref)
    y = conv3x3_bn_relu(y, w2_ref, b2_ref, g2_ref, be2_ref)
    o_ref[...] = y.astype(o_ref.dtype)


def _zero_index_map(i, *, ndim):
    return (0,) * ndim


def _full_spec(shape):
    return pl.BlockSpec(tuple(shape),
                        functools.partial(_zero_index_map, ndim=len(shape)))


@jax.jit
def up_block_forward(x_nchw, prev_nchw, params):
    """NCHW in / NCHW out forward pass matching the PyTorch up_block."""
    f32 = jnp.float32
    x = x_nchw.astype(f32)
    prev = prev_nchw.astype(f32)
    N, C2, H, W = x.shape
    C = C2 // 2
    H2, W2 = 2 * H, 2 * W
    nhw_lo = N * H * W
    nhw_hi = N * H2 * W2

    # Channels-first, flat-spatial layout: lane axis = N*H*W (lane-dense).
    x_flat = jnp.transpose(x, (1, 0, 2, 3)).reshape(C2, nhw_lo)
    prev_flat = jnp.transpose(prev, (1, 0, 2, 3)).reshape(C, nhw_hi)

    # ConvTranspose2d weight (Cin, Cout, kh, kw) -> rows (kh*2+kw)*C+co, cols ci
    wup = jnp.transpose(params["w_up"].astype(f32), (2, 3, 1, 0)).reshape(4 * C, C2)
    bup = params["b_up"].astype(f32).reshape(C, 1)

    # Conv weights (Cout, Cin, kh, kw) -> (Cout, 9*Cin); taps (kh,kw)-major.
    w1p = jnp.transpose(params["w1"].astype(f32), (0, 2, 3, 1)).reshape(C, 9 * C2)
    w2p = jnp.transpose(params["w2"].astype(f32), (0, 2, 3, 1)).reshape(C, 9 * C)
    col = lambda v: v.astype(f32).reshape(C, 1)

    # 2x2 pixel-shuffle scatter matrices: P[kh*2+kw][i_lo, j_hi] = 1 iff the
    # low-res pixel i_lo lands at high-res flat position j_hi for tap (kh,kw).
    i_lo = jnp.arange(nhw_lo)
    n_i = i_lo // (H * W)
    h_i = (i_lo // W) % H
    w_i = i_lo % W
    pshuf = jnp.stack(
        [jax.nn.one_hot(n_i * (H2 * W2) + (2 * h_i + kh) * W2 + (2 * w_i + kw),
                        nhw_hi, dtype=f32)
         for kh in range(2) for kw in range(2)], axis=0)        # (4, nhw_lo, nhw_hi)

    # 3x3-tap validity masks on the high-res flat index (zero-padding halo).
    j_hi = jnp.arange(nhw_hi)
    hh = (j_hi // W2) % H2
    ww = j_hi % W2
    masks = jnp.stack(
        [(((hh + dh) >= 0) & ((hh + dh) < H2) &
          ((ww + dw) >= 0) & ((ww + dw) < W2)).astype(f32)
         for dh in (-1, 0, 1) for dw in (-1, 0, 1)], axis=0
    ).reshape(9, 1, nhw_hi)

    operands = (x_flat, prev_flat, wup, bup, pshuf, masks,
                w1p, col(params["b1"]), col(params["g1"]), col(params["be1"]),
                w2p, col(params["b2"]), col(params["g2"]), col(params["be2"]))

    out_flat = pl.pallas_call(
        functools.partial(_up_block_kernel, w_hi=W2),
        out_shape=jax.ShapeDtypeStruct((C, nhw_hi), f32),
        grid=(1,),
        in_specs=[_full_spec(op.shape) for op in operands],
        out_specs=_full_spec((C, nhw_hi)),
        compiler_params=pltpu.CompilerParams(
            dimension_semantics=("arbitrary",)),
    )(*operands)

    # (C, N*2H*2W) -> NCHW
    return jnp.transpose(out_flat.reshape(C, N, H2, W2), (1, 0, 2, 3))


# ---------------------------------------------------------------------------
# Pure-JAX reference (f32, HIGHEST precision) for correctness checking.
# ---------------------------------------------------------------------------
def ref_forward(x_nchw, prev_nchw, p):
    hi = lax.Precision.HIGHEST
    x = jnp.transpose(x_nchw, (0, 2, 3, 1)).astype(jnp.float32)
    prev = jnp.transpose(prev_nchw, (0, 2, 3, 1)).astype(jnp.float32)
    N, H, W, Cin = x.shape
    C = Cin // 2

    up = jnp.zeros((N, 2 * H, 2 * W, C), jnp.float32)
    for kh in range(2):
        for kw in range(2):
            r = jnp.einsum("nhwi,io->nhwo", x, p["w_up"][:, :, kh, kw],
                           precision=hi) + p["b_up"]
            up = up.at[:, kh::2, kw::2, :].set(r)
    cat = jnp.concatenate([up, prev], axis=-1)

    def cbr(z, w_oihw, b, g, be):
        w = jnp.transpose(w_oihw, (2, 3, 1, 0))
        y = lax.conv_general_dilated(z, w, (1, 1), "SAME",
                                     dimension_numbers=("NHWC", "HWIO", "NHWC"),
                                     precision=hi) + b
        m = y.mean(axis=(0, 1, 2))
        v = ((y - m) ** 2).mean(axis=(0, 1, 2))
        y = (y - m) / jnp.sqrt(v + 1e-5) * g + be
        return jnp.maximum(y, 0.0)

    y = cbr(cat, p["w1"], p["b1"], p["g1"], p["be1"])
    y = cbr(y, p["w2"], p["b2"], p["g2"], p["be2"])
    return jnp.transpose(y, (0, 3, 1, 2))


if __name__ == "__main__":
    C = 8                  # out_channels
    N, H, W = 2, 8, 8      # low-res input to up-sampling

    key = jax.random.PRNGKey(0)
    ks = jax.random.split(key, 8)

    params = {
        # ConvTranspose2d(2C, C, 2, stride=2): weight (Cin, Cout, kh, kw)
        "w_up": jax.random.normal(ks[0], (2 * C, C, 2, 2), jnp.float32) * 0.1,
        "b_up": jax.random.normal(ks[1], (C,), jnp.float32) * 0.1,
        # Conv2d(2C, C, 3): weight (Cout, Cin, kh, kw)
        "w1": jax.random.normal(ks[2], (C, 2 * C, 3, 3), jnp.float32) * 0.1,
        "b1": jax.random.normal(ks[3], (C,), jnp.float32) * 0.1,
        "g1": jnp.ones((C,), jnp.float32),
        "be1": jnp.zeros((C,), jnp.float32),
        # Conv2d(C, C, 3)
        "w2": jax.random.normal(ks[4], (C, C, 3, 3), jnp.float32) * 0.1,
        "b2": jax.random.normal(ks[5], (C,), jnp.float32) * 0.1,
        "g2": jnp.ones((C,), jnp.float32),
        "be2": jnp.zeros((C,), jnp.float32),
    }

    x = jax.random.normal(ks[6], (N, 2 * C, H, W), jnp.float32)           # NCHW
    prev_x = jax.random.normal(ks[7], (N, C, 2 * H, 2 * W), jnp.float32)  # NCHW

    out = jax.block_until_ready(up_block_forward(x, prev_x, params))
    assert out.shape == (N, C, 2 * H, 2 * W), out.shape

    ref = jax.block_until_ready(ref_forward(x, prev_x, params))
    err = float(jnp.max(jnp.abs(out - ref)))
    assert err < 1e-4, f"max abs error vs reference = {err}"

    print("KERNEL_OK")
</pallas_src>

<mosaic_0001>
module attributes {stable_mosaic.version = 11 : i64} {
  func.func @_up_block_kernel(%arg0: i32, %arg1: memref<16x128xf32, #tpu.memory_space<vmem>>, %arg2: memref<8x512xf32, #tpu.memory_space<vmem>>, %arg3: memref<32x16xf32, #tpu.memory_space<vmem>>, %arg4: memref<8x1xf32, #tpu.memory_space<vmem>>, %arg5: memref<4x128x512xf32, #tpu.memory_space<vmem>>, %arg6: memref<9x1x512xf32, #tpu.memory_space<vmem>>, %arg7: memref<8x144xf32, #tpu.memory_space<vmem>>, %arg8: memref<8x1xf32, #tpu.memory_space<vmem>>, %arg9: memref<8x1xf32, #tpu.memory_space<vmem>>, %arg10: memref<8x1xf32, #tpu.memory_space<vmem>>, %arg11: memref<8x72xf32, #tpu.memory_space<vmem>>, %arg12: memref<8x1xf32, #tpu.memory_space<vmem>>, %arg13: memref<8x1xf32, #tpu.memory_space<vmem>>, %arg14: memref<8x1xf32, #tpu.memory_space<vmem>>, %arg15: memref<8x512xf32, #tpu.memory_space<vmem>>) attributes {dimension_semantics = [#tpu.dimension_semantics<arbitrary>], iteration_bounds = array<i64: 1>, scalar_prefetch = 0 : i64, scratch_operands = 0 : i64, tpu.core_type = #tpu.core_type<tc>, window_params = [{pipeline_mode = #tpu.pipeline_mode<synchronous>, transform_indices = @transform_0, window_bounds = array<i64: 16, 128>}, {pipeline_mode = #tpu.pipeline_mode<synchronous>, transform_indices = @transform_1, window_bounds = array<i64: 8, 512>}, {pipeline_mode = #tpu.pipeline_mode<synchronous>, transform_indices = @transform_2, window_bounds = array<i64: 32, 16>}, {pipeline_mode = #tpu.pipeline_mode<synchronous>, transform_indices = @transform_3, window_bounds = array<i64: 8, 1>}, {pipeline_mode = #tpu.pipeline_mode<synchronous>, transform_indices = @transform_4, window_bounds = array<i64: 4, 128, 512>}, {pipeline_mode = #tpu.pipeline_mode<synchronous>, transform_indices = @transform_5, window_bounds = array<i64: 9, 1, 512>}, {pipeline_mode = #tpu.pipeline_mode<synchronous>, transform_indices = @transform_6, window_bounds = array<i64: 8, 144>}, {pipeline_mode = #tpu.pipeline_mode<synchronous>, transform_indices = @transform_7, window_bounds = array<i64: 8, 1>}, {pipeline_mode = #tpu.pipeline_mode<synchronous>, transform_indices = @transform_8, window_bounds = array<i64: 8, 1>}, {pipeline_mode = #tpu.pipeline_mode<synchronous>, transform_indices = @transform_9, window_bounds = array<i64: 8, 1>}, {pipeline_mode = #tpu.pipeline_mode<synchronous>, transform_indices = @transform_10, window_bounds = array<i64: 8, 72>}, {pipeline_mode = #tpu.pipeline_mode<synchronous>, transform_indices = @transform_11, window_bounds = array<i64: 8, 1>}, {pipeline_mode = #tpu.pipeline_mode<synchronous>, transform_indices = @transform_12, window_bounds = array<i64: 8, 1>}, {pipeline_mode = #tpu.pipeline_mode<synchronous>, transform_indices = @transform_13, window_bounds = array<i64: 8, 1>}, {pipeline_mode = #tpu.pipeline_mode<synchronous>, transform_indices = @transform_14, window_bounds = array<i64: 8, 512>}]} {
    %c0 = arith.constant 0 : index
    %c0_0 = arith.constant 0 : index
    %0 = vector.load %arg3[%c0, %c0_0] : memref<32x16xf32, #tpu.memory_space<vmem>>, vector<32x16xf32>
    %c0_1 = arith.constant 0 : index
    %c0_2 = arith.constant 0 : index
    %1 = vector.load %arg1[%c0_1, %c0_2] : memref<16x128xf32, #tpu.memory_space<vmem>>, vector<16x128xf32>
    %cst = arith.constant dense<0.000000e+00> : vector<32x128xf32>
    %2 = tpu.matmul %0, %1, %cst {dimension_numbers = #tpu.dot_dimension_numbers<[1], [0], [0], [1], [0, 0, 1, 1], [], []>, precision = #tpu.contract_precision<fp32>} : vector<32x16xf32>, vector<16x128xf32>, vector<32x128xf32> -> vector<32x128xf32>
    %3 = vector.extract_strided_slice %2 {offsets = [0, 0], sizes = [8, 128], strides = [1, 1]} : vector<32x128xf32> to vector<8x128xf32>
    %c0_3 = arith.constant 0 : index
    %c0_4 = arith.constant 0 : index
    %c0_5 = arith.constant 0 : index
    %4 = vector.load %arg5[%c0_3, %c0_4, %c0_5] : memref<4x128x512xf32, #tpu.memory_space<vmem>>, vector<1x128x512xf32>
    %5 = vector.shape_cast %4 : vector<1x128x512xf32> to vector<128x512xf32>
    %cst_6 = arith.constant dense<0.000000e+00> : vector<8x512xf32>
    %6 = tpu.matmul %3, %5, %cst_6 {dimension_numbers = #tpu.dot_dimension_numbers<[1], [0], [0], [1], [0, 0, 1, 1], [], []>, precision = #tpu.contract_precision<fp32>} : vector<8x128xf32>, vector<128x512xf32>, vector<8x512xf32> -> vector<8x512xf32>
    %7 = vector.extract_strided_slice %2 {offsets = [8, 0], sizes = [8, 128], strides = [1, 1]} : vector<32x128xf32> to vector<8x128xf32>
    %c1 = arith.constant 1 : index
    %c0_7 = arith.constant 0 : index
    %c0_8 = arith.constant 0 : index
    %8 = vector.load %arg5[%c1, %c0_7, %c0_8] : memref<4x128x512xf32, #tpu.memory_space<vmem>>, vector<1x128x512xf32>
    %9 = vector.shape_cast %8 : vector<1x128x512xf32> to vector<128x512xf32>
    %cst_9 = arith.constant dense<0.000000e+00> : vector<8x512xf32>
    %10 = tpu.matmul %7, %9, %cst_9 {dimension_numbers = #tpu.dot_dimension_numbers<[1], [0], [0], [1], [0, 0, 1, 1], [], []>, precision = #tpu.contract_precision<fp32>} : vector<8x128xf32>, vector<128x512xf32>, vector<8x512xf32> -> vector<8x512xf32>
    %11 = arith.addf %6, %10 : vector<8x512xf32>
    %12 = vector.extract_strided_slice %2 {offsets = [16, 0], sizes = [8, 128], strides = [1, 1]} : vector<32x128xf32> to vector<8x128xf32>
    %c2 = arith.constant 2 : index
    %c0_10 = arith.constant 0 : index
    %c0_11 = arith.constant 0 : index
    %13 = vector.load %arg5[%c2, %c0_10, %c0_11] : memref<4x128x512xf32, #tpu.memory_space<vmem>>, vector<1x128x512xf32>
    %14 = vector.shape_cast %13 : vector<1x128x512xf32> to vector<128x512xf32>
    %cst_12 = arith.constant dense<0.000000e+00> : vector<8x512xf32>
    %15 = tpu.matmul %12, %14, %cst_12 {dimension_numbers = #tpu.dot_dimension_numbers<[1], [0], [0], [1], [0, 0, 1, 1], [], []>, precision = #tpu.contract_precision<fp32>} : vector<8x128xf32>, vector<128x512xf32>, vector<8x512xf32> -> vector<8x512xf32>
    %16 = arith.addf %11, %15 : vector<8x512xf32>
    %17 = vector.extract_strided_slice %2 {offsets = [24, 0], sizes = [8, 128], strides = [1, 1]} : vector<32x128xf32> to vector<8x128xf32>
    %c3 = arith.constant 3 : index
    %c0_13 = arith.constant 0 : index
    %c0_14 = arith.constant 0 : index
    %18 = vector.load %arg5[%c3, %c0_13, %c0_14] : memref<4x128x512xf32, #tpu.memory_space<vmem>>, vector<1x128x512xf32>
    %19 = vector.shape_cast %18 : vector<1x128x512xf32> to vector<128x512xf32>
    %cst_15 = arith.constant dense<0.000000e+00> : vector<8x512xf32>
    %20 = tpu.matmul %17, %19, %cst_15 {dimension_numbers = #tpu.dot_dimension_numbers<[1], [0], [0], [1], [0, 0, 1, 1], [], []>, precision = #tpu.contract_precision<fp32>} : vector<8x128xf32>, vector<128x512xf32>, vector<8x512xf32> -> vector<8x512xf32>
    %21 = arith.addf %16, %20 : vector<8x512xf32>
    %c0_16 = arith.constant 0 : index
    %c0_17 = arith.constant 0 : index
    %22 = vector.load %arg4[%c0_16, %c0_17] : memref<8x1xf32, #tpu.memory_space<vmem>>, vector<8x1xf32>
    %23 = vector.broadcast %22 : vector<8x1xf32> to vector<8x512xf32>
    %24 = arith.addf %21, %23 : vector<8x512xf32>
    %c0_18 = arith.constant 0 : index
    %c0_19 = arith.constant 0 : index
    %25 = vector.load %arg2[%c0_18, %c0_19] : memref<8x512xf32, #tpu.memory_space<vmem>>, vector<8x512xf32>
    %26 = tpu.concatenate %24, %25 in 0 : vector<8x512xf32>, vector<8x512xf32> -> vector<16x512xf32>
    %cst_20 = arith.constant 0.000000e+00 : f32
    %27 = vector.broadcast %cst_20 : f32 to vector<16x17xf32>
    %28 = tpu.concatenate %27, %26, %27 in 1 : vector<16x17xf32>, vector<16x512xf32>, vector<16x17xf32> -> vector<16x546xf32>
    %29 = vector.extract_strided_slice %28 {offsets = [0, 0], sizes = [16, 512], strides = [1, 1]} : vector<16x546xf32> to vector<16x512xf32>
    %c0_21 = arith.constant 0 : index
    %c0_22 = arith.constant 0 : index
    %c0_23 = arith.constant 0 : index
    %30 = vector.load %arg6[%c0_21, %c0_22, %c0_23] : memref<9x1x512xf32, #tpu.memory_space<vmem>>, vector<1x1x512xf32>
    %31 = vector.shape_cast %30 : vector<1x1x512xf32> to vector<1x512xf32>
    %32 = vector.broadcast %31 : vector<1x512xf32> to vector<16x512xf32>
    %33 = arith.mulf %29, %32 : vector<16x512xf32>
    %34 = vector.extract_strided_slice %28 {offsets = [0, 1], sizes = [16, 512], strides = [1, 1]} : vector<16x546xf32> to vector<16x512xf32>
    %c1_24 = arith.constant 1 : index
    %c0_25 = arith.constant 0 : index
    %c0_26 = arith.constant 0 : index
    %35 = vector.load %arg6[%c1_24, %c0_25, %c0_26] : memref<9x1x512xf32, #tpu.memory_space<vmem>>, vector<1x1x512xf32>
    %36 = vector.shape_cast %35 : vector<1x1x512xf32> to vector<1x512xf32>
    %37 = vector.broadcast %36 : vector<1x512xf32> to vector<16x512xf32>
    %38 = arith.mulf %34, %37 : vector<16x512xf32>
    %39 = vector.extract_strided_slice %28 {offsets = [0, 2], sizes = [16, 512], strides = [1, 1]} : vector<16x546xf32> to vector<16x512xf32>
    %c2_27 = arith.constant 2 : index
    %c0_28 = arith.constant 0 : index
    %c0_29 = arith.constant 0 : index
    %40 = vector.load %arg6[%c2_27, %c0_28, %c0_29] : memref<9x1x512xf32, #tpu.memory_space<vmem>>, vector<1x1x512xf32>
    %41 = vector.shape_cast %40 : vector<1x1x512xf32> to vector<1x512xf32>
    %42 = vector.broadcast %41 : vector<1x512xf32> to vector<16x512xf32>
    %43 = arith.mulf %39, %42 : vector<16x512xf32>
    %44 = vector.extract_strided_slice %28 {offsets = [0, 16], sizes = [16, 512], strides = [1, 1]} : vector<16x546xf32> to vector<16x512xf32>
    %c3_30 = arith.constant 3 : index
    %c0_31 = arith.constant 0 : index
    %c0_32 = arith.constant 0 : index
    %45 = vector.load %arg6[%c3_30, %c0_31, %c0_32] : memref<9x1x512xf32, #tpu.memory_space<vmem>>, vector<1x1x512xf32>
    %46 = vector.shape_cast %45 : vector<1x1x512xf32> to vector<1x512xf32>
    %47 = vector.broadcast %46 : vector<1x512xf32> to vector<16x512xf32>
    %48 = arith.mulf %44, %47 : vector<16x512xf32>
    %49 = vector.extract_strided_slice %28 {offsets = [0, 18], sizes = [16, 512], strides = [1, 1]} : vector<16x546xf32> to vector<16x512xf32>
    %c5 = arith.constant 5 : index
    %c0_33 = arith.constant 0 : index
    %c0_34 = arith.constant 0 : index
    %50 = vector.load %arg6[%c5, %c0_33, %c0_34] : memref<9x1x512xf32, #tpu.memory_space<vmem>>, vector<1x1x512xf32>
    %51 = vector.shape_cast %50 : vector<1x1x512xf32> to vector<1x512xf32>
    %52 = vector.broadcast %51 : vector<1x512xf32> to vector<16x512xf32>
    %53 = arith.mulf %49, %52 : vector<16x512xf32>
    %54 = vector.extract_strided_slice %28 {offsets = [0, 32], sizes = [16, 512], strides = [1, 1]} : vector<16x546xf32> to vector<16x512xf32>
    %c6 = arith.constant 6 : index
    %c0_35 = arith.constant 0 : index
    %c0_36 = arith.constant 0 : index
    %55 = vector.load %arg6[%c6, %c0_35, %c0_36] : memref<9x1x512xf32, #tpu.memory_space<vmem>>, vector<1x1x512xf32>
    %56 = vector.shape_cast %55 : vector<1x1x512xf32> to vector<1x512xf32>
    %57 = vector.broadcast %56 : vector<1x512xf32> to vector<16x512xf32>
    %58 = arith.mulf %54, %57 : vector<16x512xf32>
    %59 = vector.extract_strided_slice %28 {offsets = [0, 33], sizes = [16, 512], strides = [1, 1]} : vector<16x546xf32> to vector<16x512xf32>
    %c7 = arith.constant 7 : index
    %c0_37 = arith.constant 0 : index
    %c0_38 = arith.constant 0 : index
    %60 = vector.load %arg6[%c7, %c0_37, %c0_38] : memref<9x1x512xf32, #tpu.memory_space<vmem>>, vector<1x1x512xf32>
    %61 = vector.shape_cast %60 : vector<1x1x512xf32> to vector<1x512xf32>
    %62 = vector.broadcast %61 : vector<1x512xf32> to vector<16x512xf32>
    %63 = arith.mulf %59, %62 : vector<16x512xf32>
    %64 = vector.extract_strided_slice %28 {offsets = [0, 34], sizes = [16, 512], strides = [1, 1]} : vector<16x546xf32> to vector<16x512xf32>
    %c8 = arith.constant 8 : index
    %c0_39 = arith.constant 0 : index
    %c0_40 = arith.constant 0 : index
    %65 = vector.load %arg6[%c8, %c0_39, %c0_40] : memref<9x1x512xf32, #tpu.memory_space<vmem>>, vector<1x1x512xf32>
    %66 = vector.shape_cast %65 : vector<1x1x512xf32> to vector<1x512xf32>
    %67 = vector.broadcast %66 : vector<1x512xf32> to vector<16x512xf32>
    %68 = arith.mulf %64, %67 : vector<16x512xf32>
    %69 = tpu.concatenate %33, %38, %43, %48, %26, %53, %58, %63, %68 in 0 : vector<16x512xf32>, vector<16x512xf32>, vector<16x512xf32>, vector<16x512xf32>, vector<16x512xf32>, vector<16x512xf32>, vector<16x512xf32>, vector<16x512xf32>, vector<16x512xf32> -> vector<144x512xf32>
    %c0_41 = arith.constant 0 : index
    %c0_42 = arith.constant 0 : index
    %70 = vector.load %arg7[%c0_41, %c0_42] : memref<8x144xf32, #tpu.memory_space<vmem>>, vector<8x144xf32>
    %cst_43 = arith.constant dense<0.000000e+00> : vector<8x512xf32>
    %71 = tpu.matmul %70, %69, %cst_43 {dimension_numbers = #tpu.dot_dimension_numbers<[1], [0], [0], [1], [0, 0, 1, 1], [], []>, precision = #tpu.contract_precision<fp32>} : vector<8x144xf32>, vector<144x512xf32>, vector<8x512xf32> -> vector<8x512xf32>
    %c0_44 = arith.constant 0 : index
    %c0_45 = arith.constant 0 : index
    %72 = vector.load %arg8[%c0_44, %c0_45] : memref<8x1xf32, #tpu.memory_space<vmem>>, vector<8x1xf32>
    %73 = vector.broadcast %72 : vector<8x1xf32> to vector<8x512xf32>
    %74 = arith.addf %71, %73 : vector<8x512xf32>
    %cst_46 = arith.constant dense<0.000000e+00> : vector<8xf32>
    %75 = vector.multi_reduction <add>, %74, %cst_46 [1] : vector<8x512xf32> to vector<8xf32>
    %76 = vector.shape_cast %75 : vector<8xf32> to vector<8x1xf32>
    %77 = arith.mulf %74, %74 : vector<8x512xf32>
    %cst_47 = arith.constant dense<0.000000e+00> : vector<8xf32>
    %78 = vector.multi_reduction <add>, %77, %cst_47 [1] : vector<8x512xf32> to vector<8xf32>
    %79 = vector.shape_cast %78 : vector<8xf32> to vector<8x1xf32>
    %cst_48 = arith.constant 0.001953125 : f32
    %80 = vector.broadcast %cst_48 : f32 to vector<8x1xf32>
    %81 = arith.mulf %76, %80 : vector<8x1xf32>
    %cst_49 = arith.constant 0.001953125 : f32
    %82 = vector.broadcast %cst_49 : f32 to vector<8x1xf32>
    %83 = arith.mulf %79, %82 : vector<8x1xf32>
    %84 = arith.mulf %81, %81 : vector<8x1xf32>
    %85 = arith.subf %83, %84 : vector<8x1xf32>
    %c0_50 = arith.constant 0 : index
    %c0_51 = arith.constant 0 : index
    %86 = vector.load %arg9[%c0_50, %c0_51] : memref<8x1xf32, #tpu.memory_space<vmem>>, vector<8x1xf32>
    %cst_52 = arith.constant 9.99999974E-6 : f32
    %87 = vector.broadcast %cst_52 : f32 to vector<8x1xf32>
    %88 = arith.addf %85, %87 : vector<8x1xf32>
    %89 = math.rsqrt %88 : vector<8x1xf32>
    %90 = arith.mulf %86, %89 : vector<8x1xf32>
    %91 = vector.broadcast %81 : vector<8x1xf32> to vector<8x512xf32>
    %92 = arith.subf %74, %91 : vector<8x512xf32>
    %93 = vector.broadcast %90 : vector<8x1xf32> to vector<8x512xf32>
    %94 = arith.mulf %92, %93 : vector<8x512xf32>
    %c0_53 = arith.constant 0 : index
    %c0_54 = arith.constant 0 : index
    %95 = vector.load %arg10[%c0_53, %c0_54] : memref<8x1xf32, #tpu.memory_space<vmem>>, vector<8x1xf32>
    %96 = vector.broadcast %95 : vector<8x1xf32> to vector<8x512xf32>
    %97 = arith.addf %94, %96 : vector<8x512xf32>
    %cst_55 = arith.constant 0.000000e+00 : f32
    %98 = vector.broadcast %cst_55 : f32 to vector<8x512xf32>
    %99 = arith.maximumf %97, %98 : vector<8x512xf32>
    %cst_56 = arith.constant 0.000000e+00 : f32
    %100 = vector.broadcast %cst_56 : f32 to vector<8x17xf32>
    %101 = tpu.concatenate %100, %99, %100 in 1 : vector<8x17xf32>, vector<8x512xf32>, vector<8x17xf32> -> vector<8x546xf32>
    %102 = vector.extract_strided_slice %101 {offsets = [0, 0], sizes = [8, 512], strides = [1, 1]} : vector<8x546xf32> to vector<8x512xf32>
    %c0_57 = arith.constant 0 : index
    %c0_58 = arith.constant 0 : index
    %c0_59 = arith.constant 0 : index
    %103 = vector.load %arg6[%c0_57, %c0_58, %c0_59] : memref<9x1x512xf32, #tpu.memory_space<vmem>>, vector<1x1x512xf32>
    %104 = vector.shape_cast %103 : vector<1x1x512xf32> to vector<1x512xf32>
    %105 = vector.broadcast %104 : vector<1x512xf32> to vector<8x512xf32>
    %106 = arith.mulf %102, %105 : vector<8x512xf32>
    %107 = vector.extract_strided_slice %101 {offsets = [0, 1], sizes = [8, 512], strides = [1, 1]} : vector<8x546xf32> to vector<8x512xf32>
    %c1_60 = arith.constant 1 : index
    %c0_61 = arith.constant 0 : index
    %c0_62 = arith.constant 0 : index
    %108 = vector.load %arg6[%c1_60, %c0_61, %c0_62] : memref<9x1x512xf32, #tpu.memory_space<vmem>>, vector<1x1x512xf32>
    %109 = vector.shape_cast %108 : vector<1x1x512xf32> to vector<1x512xf32>
    %110 = vector.broadcast %109 : vector<1x512xf32> to vector<8x512xf32>
    %111 = arith.mulf %107, %110 : vector<8x512xf32>
    %112 = vector.extract_strided_slice %101 {offsets = [0, 2], sizes = [8, 512], strides = [1, 1]} : vector<8x546xf32> to vector<8x512xf32>
    %c2_63 = arith.constant 2 : index
    %c0_64 = arith.constant 0 : index
    %c0_65 = arith.constant 0 : index
    %113 = vector.load %arg6[%c2_63, %c0_64, %c0_65] : memref<9x1x512xf32, #tpu.memory_space<vmem>>, vector<1x1x512xf32>
    %114 = vector.shape_cast %113 : vector<1x1x512xf32> to vector<1x512xf32>
    %115 = vector.broadcast %114 : vector<1x512xf32> to vector<8x512xf32>
    %116 = arith.mulf %112, %115 : vector<8x512xf32>
    %117 = vector.extract_strided_slice %101 {offsets = [0, 16], sizes = [8, 512], strides = [1, 1]} : vector<8x546xf32> to vector<8x512xf32>
    %c3_66 = arith.constant 3 : index
    %c0_67 = arith.constant 0 : index
    %c0_68 = arith.constant 0 : index
    %118 = vector.load %arg6[%c3_66, %c0_67, %c0_68] : memref<9x1x512xf32, #tpu.memory_space<vmem>>, vector<1x1x512xf32>
    %119 = vector.shape_cast %118 : vector<1x1x512xf32> to vector<1x512xf32>
    %120 = vector.broadcast %119 : vector<1x512xf32> to vector<8x512xf32>
    %121 = arith.mulf %117, %120 : vector<8x512xf32>
    %122 = vector.extract_strided_slice %101 {offsets = [0, 18], sizes = [8, 512], strides = [1, 1]} : vector<8x546xf32> to vector<8x512xf32>
    %c5_69 = arith.constant 5 : index
    %c0_70 = arith.constant 0 : index
    %c0_71 = arith.constant 0 : index
    %123 = vector.load %arg6[%c5_69, %c0_70, %c0_71] : memref<9x1x512xf32, #tpu.memory_space<vmem>>, vector<1x1x512xf32>
    %124 = vector.shape_cast %123 : vector<1x1x512xf32> to vector<1x512xf32>
    %125 = vector.broadcast %124 : vector<1x512xf32> to vector<8x512xf32>
    %126 = arith.mulf %122, %125 : vector<8x512xf32>
    %127 = vector.extract_strided_slice %101 {offsets = [0, 32], sizes = [8, 512], strides = [1, 1]} : vector<8x546xf32> to vector<8x512xf32>
    %c6_72 = arith.constant 6 : index
    %c0_73 = arith.constant 0 : index
    %c0_74 = arith.constant 0 : index
    %128 = vector.load %arg6[%c6_72, %c0_73, %c0_74] : memref<9x1x512xf32, #tpu.memory_space<vmem>>, vector<1x1x512xf32>
    %129 = vector.shape_cast %128 : vector<1x1x512xf32> to vector<1x512xf32>
    %130 = vector.broadcast %129 : vector<1x512xf32> to vector<8x512xf32>
    %131 = arith.mulf %127, %130 : vector<8x512xf32>
    %132 = vector.extract_strided_slice %101 {offsets = [0, 33], sizes = [8, 512], strides = [1, 1]} : vector<8x546xf32> to vector<8x512xf32>
    %c7_75 = arith.constant 7 : index
    %c0_76 = arith.constant 0 : index
    %c0_77 = arith.constant 0 : index
    %133 = vector.load %arg6[%c7_75, %c0_76, %c0_77] : memref<9x1x512xf32, #tpu.memory_space<vmem>>, vector<1x1x512xf32>
    %134 = vector.shape_cast %133 : vector<1x1x512xf32> to vector<1x512xf32>
    %135 = vector.broadcast %134 : vector<1x512xf32> to vector<8x512xf32>
    %136 = arith.mulf %132, %135 : vector<8x512xf32>
    %137 = vector.extract_strided_slice %101 {offsets = [0, 34], sizes = [8, 512], strides = [1, 1]} : vector<8x546xf32> to vector<8x512xf32>
    %c8_78 = arith.constant 8 : index
    %c0_79 = arith.constant 0 : index
    %c0_80 = arith.constant 0 : index
    %138 = vector.load %arg6[%c8_78, %c0_79, %c0_80] : memref<9x1x512xf32, #tpu.memory_space<vmem>>, vector<1x1x512xf32>
    %139 = vector.shape_cast %138 : vector<1x1x512xf32> to vector<1x512xf32>
    %140 = vector.broadcast %139 : vector<1x512xf32> to vector<8x512xf32>
    %141 = arith.mulf %137, %140 : vector<8x512xf32>
    %142 = tpu.concatenate %106, %111, %116, %121, %99, %126, %131, %136, %141 in 0 : vector<8x512xf32>, vector<8x512xf32>, vector<8x512xf32>, vector<8x512xf32>, vector<8x512xf32>, vector<8x512xf32>, vector<8x512xf32>, vector<8x512xf32>, vector<8x512xf32> -> vector<72x512xf32>
    %c0_81 = arith.constant 0 : index
    %c0_82 = arith.constant 0 : index
    %143 = vector.load %arg11[%c0_81, %c0_82] : memref<8x72xf32, #tpu.memory_space<vmem>>, vector<8x72xf32>
    %cst_83 = arith.constant dense<0.000000e+00> : vector<8x512xf32>
    %144 = tpu.matmul %143, %142, %cst_83 {dimension_numbers = #tpu.dot_dimension_numbers<[1], [0], [0], [1], [0, 0, 1, 1], [], []>, precision = #tpu.contract_precision<fp32>} : vector<8x72xf32>, vector<72x512xf32>, vector<8x512xf32> -> vector<8x512xf32>
    %c0_84 = arith.constant 0 : index
    %c0_85 = arith.constant 0 : index
    %145 = vector.load %arg12[%c0_84, %c0_85] : memref<8x1xf32, #tpu.memory_space<vmem>>, vector<8x1xf32>
    %146 = vector.broadcast %145 : vector<8x1xf32> to vector<8x512xf32>
    %147 = arith.addf %144, %146 : vector<8x512xf32>
    %cst_86 = arith.constant dense<0.000000e+00> : vector<8xf32>
    %148 = vector.multi_reduction <add>, %147, %cst_86 [1] : vector<8x512xf32> to vector<8xf32>
    %149 = vector.shape_cast %148 : vector<8xf32> to vector<8x1xf32>
    %150 = arith.mulf %147, %147 : vector<8x512xf32>
    %cst_87 = arith.constant dense<0.000000e+00> : vector<8xf32>
    %151 = vector.multi_reduction <add>, %150, %cst_87 [1] : vector<8x512xf32> to vector<8xf32>
    %152 = vector.shape_cast %151 : vector<8xf32> to vector<8x1xf32>
    %cst_88 = arith.constant 0.001953125 : f32
    %153 = vector.broadcast %cst_88 : f32 to vector<8x1xf32>
    %154 = arith.mulf %149, %153 : vector<8x1xf32>
    %cst_89 = arith.constant 0.001953125 : f32
    %155 = vector.broadcast %cst_89 : f32 to vector<8x1xf32>
    %156 = arith.mulf %152, %155 : vector<8x1xf32>
    %157 = arith.mulf %154, %154 : vector<8x1xf32>
    %158 = arith.subf %156, %157 : vector<8x1xf32>
    %c0_90 = arith.constant 0 : index
    %c0_91 = arith.constant 0 : index
    %159 = vector.load %arg13[%c0_90, %c0_91] : memref<8x1xf32, #tpu.memory_space<vmem>>, vector<8x1xf32>
    %cst_92 = arith.constant 9.99999974E-6 : f32
    %160 = vector.broadcast %cst_92 : f32 to vector<8x1xf32>
    %161 = arith.addf %158, %160 : vector<8x1xf32>
    %162 = math.rsqrt %161 : vector<8x1xf32>
    %163 = arith.mulf %159, %162 : vector<8x1xf32>
    %164 = vector.broadcast %154 : vector<8x1xf32> to vector<8x512xf32>
    %165 = arith.subf %147, %164 : vector<8x512xf32>
    %166 = vector.broadcast %163 : vector<8x1xf32> to vector<8x512xf32>
    %167 = arith.mulf %165, %166 : vector<8x512xf32>
    %c0_93 = arith.constant 0 : index
    %c0_94 = arith.constant 0 : index
    %168 = vector.load %arg14[%c0_93, %c0_94] : memref<8x1xf32, #tpu.memory_space<vmem>>, vector<8x1xf32>
    %169 = vector.broadcast %168 : vector<8x1xf32> to vector<8x512xf32>
    %170 = arith.addf %167, %169 : vector<8x512xf32>
    %cst_95 = arith.constant 0.000000e+00 : f32
    %171 = vector.broadcast %cst_95 : f32 to vector<8x512xf32>
    %172 = arith.maximumf %170, %171 : vector<8x512xf32>
    %c0_96 = arith.constant 0 : index
    %c0_97 = arith.constant 0 : index
    %173 = vector.load %arg15[%c0_96, %c0_97] : memref<8x512xf32, #tpu.memory_space<vmem>>, vector<8x512xf32>
    tpu.vector_store %arg15[%c0_96, %c0_97], %172 {strides = array<i32>} : memref<8x512xf32, #tpu.memory_space<vmem>>, vector<8x512xf32>,
    return
  }
  func.func @transform_0(%arg0: i32) -> (i32, i32) {
    %c0_i32 = arith.constant 0 : i32
    %c0_i32_0 = arith.constant 0 : i32
    %c0_i32_1 = arith.constant 0 : i32
    return %c0_i32, %c0_i32_0 : i32, i32
  }
  func.func @transform_1(%arg0: i32) -> (i32, i32) {
    %c0_i32 = arith.constant 0 : i32
    %c0_i32_0 = arith.constant 0 : i32
    %c0_i32_1 = arith.constant 0 : i32
    return %c0_i32, %c0_i32_0 : i32, i32
  }
  func.func @transform_2(%arg0: i32) -> (i32, i32) {
    %c0_i32 = arith.constant 0 : i32
    %c0_i32_0 = arith.constant 0 : i32
    %c0_i32_1 = arith.constant 0 : i32
    return %c0_i32, %c0_i32_0 : i32, i32
  }
  func.func @transform_3(%arg0: i32) -> (i32, i32) {
    %c0_i32 = arith.constant 0 : i32
    %c0_i32_0 = arith.constant 0 : i32
    %c0_i32_1 = arith.constant 0 : i32
    return %c0_i32, %c0_i32_0 : i32, i32
  }
  func.func @transform_4(%arg0: i32) -> (i32, i32, i32) {
    %c0_i32 = arith.constant 0 : i32
    %c0_i32_0 = arith.constant 0 : i32
    %c0_i32_1 = arith.constant 0 : i32
    %c0_i32_2 = arith.constant 0 : i32
    return %c0_i32, %c0_i32_0, %c0_i32_1 : i32, i32, i32
  }
  func.func @transform_5(%arg0: i32) -> (i32, i32, i32) {
    %c0_i32 = arith.constant 0 : i32
    %c0_i32_0 = arith.constant 0 : i32
    %c0_i32_1 = arith.constant 0 : i32
    %c0_i32_2 = arith.constant 0 : i32
    return %c0_i32, %c0_i32_0, %c0_i32_1 : i32, i32, i32
  }
  func.func @transform_6(%arg0: i32) -> (i32, i32) {
    %c0_i32 = arith.constant 0 : i32
    %c0_i32_0 = arith.constant 0 : i32
    %c0_i32_1 = arith.constant 0 : i32
    return %c0_i32, %c0_i32_0 : i32, i32
  }
  func.func @transform_7(%arg0: i32) -> (i32, i32) {
    %c0_i32 = arith.constant 0 : i32
    %c0_i32_0 = arith.constant 0 : i32
    %c0_i32_1 = arith.constant 0 : i32
    return %c0_i32, %c0_i32_0 : i32, i32
  }
  func.func @transform_8(%arg0: i32) -> (i32, i32) {
    %c0_i32 = arith.constant 0 : i32
    %c0_i32_0 = arith.constant 0 : i32
    %c0_i32_1 = arith.constant 0 : i32
    return %c0_i32, %c0_i32_0 : i32, i32
  }
  func.func @transform_9(%arg0: i32) -> (i32, i32) {
    %c0_i32 = arith.constant 0 : i32
    %c0_i32_0 = arith.constant 0 : i32
    %c0_i32_1 = arith.constant 0 : i32
    return %c0_i32, %c0_i32_0 : i32, i32
  }
  func.func @transform_10(%arg0: i32) -> (i32, i32) {
    %c0_i32 = arith.constant 0 : i32
    %c0_i32_0 = arith.constant 0 : i32
    %c0_i32_1 = arith.constant 0 : i32
    return %c0_i32, %c0_i32_0 : i32, i32
  }
  func.func @transform_11(%arg0: i32) -> (i32, i32) {
    %c0_i32 = arith.constant 0 : i32
    %c0_i32_0 = arith.constant 0 : i32
    %c0_i32_1 = arith.constant 0 : i32
    return %c0_i32, %c0_i32_0 : i32, i32
  }
  func.func @transform_12(%arg0: i32) -> (i32, i32) {
    %c0_i32 = arith.constant 0 : i32
    %c0_i32_0 = arith.constant 0 : i32
    %c0_i32_1 = arith.constant 0 : i32
    return %c0_i32, %c0_i32_0 : i32, i32
  }
  func.func @transform_13(%arg0: i32) -> (i32, i32) {
    %c0_i32 = arith.constant 0 : i32
    %c0_i32_0 = arith.constant 0 : i32
    %c0_i32_1 = arith.constant 0 : i32
    return %c0_i32, %c0_i32_0 : i32, i32
  }
  func.func @transform_14(%arg0: i32) -> (i32, i32) {
    %c0_i32 = arith.constant 0 : i32
    %c0_i32_0 = arith.constant 0 : i32
    %c0_i32_1 = arith.constant 0 : i32
    return %c0_i32, %c0_i32_0 : i32, i32
  }
}

</mosaic_0001>

<bundles_post_ra>
// kernel: up_block_forward.1
= control target key start
LH: loop header
LB: loop body
LE: loop exit
PB: predicated region body
PF: predicated region fallthrough
CT: control target
= control target key end

     0   :  { %vm53_vm0 = vcmask 130048   ;;  %s14700_s17 = smov 17   ;;  %s14701_s22 = smov 1   ;;  %vm7799_vm1 = vcmask 138240   ;;  %vm7877_vm2 = vcmask 7168   ;;  %vm7923_vm3 = vcmask 15360   ;;  %s22477_s0 = inlined_call_operand.vmem [shape: f32[16,128], index: 0, kind: input, shape index: {}]   ;;  %s22478_s2 = inlined_call_operand.vmem [shape: f32[32,16], index: 2, kind: input, shape index: {}]   ;;  %s22479_s4 = inlined_call_operand.vmem [shape: f32[4,128,512], index: 4, kind: input, shape index: {}]   ;;  %s22480_s3 = inlined_call_operand.vmem [shape: f32[8,1], index: 3, kind: input, shape index: {}]   ;;  %s22481_s1 = inlined_call_operand.vmem [shape: f32[8,512], index: 1, kind: input, shape index: {}]   ;;  %s22482_s5 = inlined_call_operand.vmem [shape: f32[9,1,512], index: 5, kind: input, shape index: {}]   ;;  %s22483_s6 = inlined_call_operand.vmem [shape: f32[8,144], index: 6, kind: input, shape index: {}]   ;;  %s22484_s7 = inlined_call_operand.vmem [shape: f32[8,1], index: 7, kind: input, shape index: {}]   ;;  %s22485_s9 = inlined_call_operand.vmem [shape: f32[8,1], index: 9, kind: input, shape index: {}]   ;;  %s22486_s8 = inlined_call_operand.vmem [shape: f32[8,1], index: 8, kind: input, shape index: {}]   ;;  %s22487_s11 = inlined_call_operand.vmem [shape: f32[8,1], index: 11, kind: input, shape index: {}]   ;;  %s22488_s10 = inlined_call_operand.vmem [shape: f32[8,72], index: 10, kind: input, shape index: {}]   ;;  %s22489_s13 = inlined_call_operand.vmem [shape: f32[8,1], index: 13, kind: input, shape index: {}]   ;;  %s22490_s12 = inlined_call_operand.vmem [shape: f32[8,1], index: 12, kind: input, shape index: {}]   ;;  %s22491_s14 = inlined_call_operand.vmem [shape: f32[8,512], index: 14, kind: output, shape index: {}]  }
   0x1   :  { %v51_v0 = vld [vmem:[%s22477_s0] sm:$0xff]  ;;  %v52_v1 = vld [vmem:[%s22477_s0 + $0x8] sm:$0xff]  ;;  %v49_v7 = vld [vmem:[%s22478_s2 + $0x10] sm:$0xff]  ;;  %s14702_s26 = smov 2   ;;  %s14703_s29 = smov 16   ;;  %vm8014_vm4 = vcmask 146432  }
   0x2   :  { %v47_v2 = vld [vmem:[%s22478_s2] sm:$0xff]  ;;  %v67_v3 = vand.u32 4294901760, %v51_v0  ;;  %v70_v4 = vand.u32 4294901760, %v52_v1  ;;  %v48_v6 = vld [vmem:[%s22478_s2 + $0x8] sm:$0xff]  ;;  %v50_v8 = vld [vmem:[%s22478_s2 + $0x18] sm:$0xff]  ;;  %v61_v11 = vsel %vm53_vm0, %v49_v7, 0 }
   0x3   :  { %v55_v5 = vsel %vm53_vm0, %v47_v2, 0  ;;  %v58_v10 = vsel %vm53_vm0, %v48_v6, 0  ;;  %v64_v12 = vsel %vm53_vm0, %v50_v8, 0  ;;  %v12037_v13 = vld [vmem:[%s22479_s4 + $0x208] sm:$0xff]  ;;  %v14829_v19 = vand.u32 4294901760, %v61_v11  ;;  %v14871_v38 = vld [vmem:[%s22479_s4 + $0x218] sm:$0xff] }
   0x4   :  { %v14809_v9 = vand.u32 4294901760, %v55_v5  ;;  %v14817_v14 = vpack.c.bf16 %v70_v4, %v67_v3  ;;  %v14819_v15 = vsub.f32 %v51_v0, %v67_v3  ;;  %v14821_v16 = vsub.f32 %v52_v1, %v70_v4  ;;  %v12041_v18 = vld [vmem:[%s22479_s4 + $0x228] sm:$0xff]  ;;  %v14876_v39 = vld [vmem:[%s22479_s4 + $0x238] sm:$0xff]  ;;  %v12036_v44 = vld [vmem:[%s22479_s4 + $0x200] sm:$0xff]  ;;  %s14704_s15 = smov 18   ;;  %s14705_s18 = smov 32  }
   0x5   :  { %v14823_v17 = vand.u32 4294901760, %v58_v10  ;;  %v14831_v20 = vand.u32 4294901760, %v64_v12  ;;  %v783_v22 = vand.u32 4294901760, %v12037_v13  ;;  %v14843_v26 = vsub.f32 %v61_v11, %v14829_v19  ;;  %v12040_v45 = vld [vmem:[%s22479_s4 + $0x220] sm:$0xff]  ;;  %v14901_v50 = vld [vmem:[%s22479_s4 + $0x210] sm:$0xff]  ;;  %v12045_v59 = vld [vmem:[%s22479_s4 + $0x248] sm:$0xff] }
   0x6   :  { %12285 = vmatprep.mubr.f32.mxu0 %v14809_v9  ;;  %v14834_v21 = vsub.f32 %v55_v5, %v14809_v9  ;;  %v176_v23 = vand.u32 4294901760, %v14819_v15  ;;  %v183_v24 = vand.u32 4294901760, %v14821_v16  ;;  %12332 = vmatprep.subr.bf16.mxu1 %v14817_v14  ;;  %v787_v29 = vand.u32 4294901760, %v12041_v18  ;;  %v14908_v55 = vld [vmem:[%s22479_s4 + $0x230] sm:$0xff]  ;;  %v12049_v60 = vld [vmem:[%s22479_s4 + $0x268] sm:$0xff]  ;;  %v14930_v1 = vld [vmem:[%s22479_s4 + $0x258] sm:$0xff] }
   0x7   :  { %v14839_v25 = vsub.f32 %v58_v10, %v14823_v17  ;;  %v14846_v27 = vsub.f32 %v64_v12, %v14831_v20  ;;  %12334 = vmatpush3.bf16.msra.mxu1 %v14817_v14  ;;  %v14858_v32 = vpack.c.bf16 %v14821_v16, %v14819_v15  ;;  %v22501_v34 = vand.u32 4294901760, %v14843_v26  ;;  %v14935_v2 = vld [vmem:[%s22479_s4 + $0x278] sm:$0xff]  ;;  %v12044_v3 = vld [vmem:[%s22479_s4 + $0x240] sm:$0xff]  ;;  %s14706_s21 = smov 33   ;;  %s14707_s24 = smov 34  }
   0x8   :  { %v22505_v28 = vand.u32 4294901760, %v14834_v21  ;;  %v177_v30 = vsub.f32 %v14819_v15, %v176_v23  ;;  %v184_v31 = vsub.f32 %v14821_v16, %v183_v24  ;;  %v14866_v37 = vpack.c.bf16 %v787_v29, %v783_v22  ;;  %v12048_v8 = vld [vmem:[%s22479_s4 + $0x260] sm:$0xff]  ;;  %s14708_s0 = smov 127   ;;  %s14709_s25 = smov 126  }
   0x9   :  { %v22504_v33 = vand.u32 4294901760, %v14839_v25  ;;  %v22500_v35 = vand.u32 4294901760, %v14846_v27  ;;  %v14881_v43 = vsub.f32 %v12037_v13, %v783_v22  ;;  %v156_v47 = vsub.f32 %v14843_v26, %v22501_v34  ;;  %v14959_v13 = vld [vmem:[%s22479_s4 + $0x250] sm:$0xff]  ;;  %v12060_v15 = vld [vmem:[%s22479_s4 + $0x2c0] sm:$0xff]  ;;  %s14711_s2 = smov 110   ;;  %s14713_s27 = smov 95  }
   0xa   :  { %v136_v36 = vsub.f32 %v14834_v21, %v22505_v28  ;;  %23601 = vst [vmem:[#allocation2_spill] sm:$0xff] %v14866_v37  ;;  %v178_v40 = vand.u32 4294901760, %v177_v30  ;;  %v185_v41 = vand.u32 4294901760, %v184_v31  ;;  %12356 = vmatprep.subr.bf16.mxu1 %v14866_v37  ;;  %v14896_v49 = vsub.f32 %v12041_v18, %v787_v29  ;;  %v14972_v31 = vld [vmem:[%s22479_s4 + $0x270] sm:$0xff]  ;;  %v12073_v37 = vld [vmem:[%s22479_s4 + $0x328] sm:$0xff]  ;;  %s14714_s28 = smov 94  }
   0xb   :  { %v146_v42 = vsub.f32 %v14839_v25, %v22504_v33  ;;  %23602 = vst [vmem:[#allocation3_spill] sm:$0xff] %v14881_v43  ;;  %v166_v48 = vsub.f32 %v14846_v27, %v22500_v35  ;;  %v22499_v53 = vand.u32 4294901760, %v14871_v38  ;;  %v22498_v54 = vand.u32 4294901760, %v14876_v39  ;;  %v15070_v35 = vld [vmem:[%s22479_s4 + $0x2d8] sm:$0xff]  ;;  %v15126_v28 = vld [vmem:[%s22479_s4 + $0x2f0] sm:$0xff] }
   0xc   :  { %v137_v46 = vand.u32 4294901760, %v136_v36  ;;  %23603 = vst [vmem:[#allocation4_spill] sm:$0xff] %v14896_v49  ;;  %v12335_v51 = vpack.c.bf16 %v185_v41, %v178_v40  ;;  %v157_v56 = vand.u32 4294901760, %v156_v47  ;;  %v785_v57 = vand.u32 4294901760, %v12036_v44 }
   0xd   :  { %v147_v52 = vand.u32 4294901760, %v146_v42  ;;  %v789_v58 = vand.u32 4294901760, %v12040_v45  ;;  %v167_v61 = vand.u32 4294901760, %v166_v48  ;;  %v14919_v62 = vsub.f32 %v14871_v38, %v22499_v53 }
   0xe   :  { %12275 = vmatprep.mubr.f32.mxu1 %v137_v46  ;;  %12336 = vmatprep.subr.bf16.mxu0 %v12335_v51  ;;  %v14924_v63 = vsub.f32 %v14876_v39, %v22498_v54  ;;  %v22497_v0 = vand.u32 4294901760, %v14901_v50  ;;  %v14942_v5 = vsub.f32 %v12036_v44, %v785_v57  ;;  %v22495_v7 = vand.u32 4294901760, %v14908_v55  ;;  %v12053_v44 = vld [vmem:[%s22479_s4 + $0x288] sm:$0xff]  ;;  %v14990_v46 = vld [vmem:[%s22479_s4 + $0x298] sm:$0xff] }
   0xf   :  { %12276 = vmatmul.mubr.f32.vlgmr.msra.gmra.mrb[0].mxu1 %v147_v52  ;;  %12338 = vmatpush3.bf16.msra.mxu0 %v12335_v51  ;;  %v14940_v4 = vpack.c.bf16 %v789_v58, %v785_v57  ;;  %v14944_v6 = vsub.f32 %v12040_v45, %v789_v58  ;;  %v791_v11 = vand.u32 4294901760, %v12045_v59  ;;  %v795_v12 = vand.u32 4294901760, %v12049_v60  ;;  %v12057_v45 = vld [vmem:[%s22479_s4 + $0x2a8] sm:$0xff]  ;;  %v15008_v52 = vld [vmem:[%s22479_s4 + $0x2b8] sm:$0xff] }
  0x10   :  { %12278 = vmatprep.mubr.f32.mxu1 %v157_v56  ;;  %23605 = vst [vmem:[#allocation6_spill] sm:$0xff] %v14942_v5  ;;  %12340 = vmatprep.subr.bf16.mxu0 %v14858_v32  ;;  %v14954_v10 = vsub.f32 %v14901_v50, %v22497_v0  ;;  %v14965_v18 = vsub.f32 %v14908_v55, %v22495_v7  ;;  %v22494_v22 = vand.u32 4294901760, %v14930_v1  ;;  %v22492_v29 = vand.u32 4294901760, %v14935_v2  ;;  %v12065_v7 = vld [vmem:[%s22479_s4 + $0x2e8] sm:$0xff] }
  0x11   :  { %23604 = vst [vmem:[#allocation5_spill] sm:$0xff] %v14940_v4  ;;  %12358 = vmatpush1.bf16.msra.mxu1 %v14940_v4  ;;  %v793_v30 = vand.u32 4294901760, %v12044_v3  ;;  %v14975_v36 = vpack.c.bf16 %v795_v12, %v791_v11  ;;  %v14977_v40 = vsub.f32 %v12045_v59, %v791_v11  ;;  %v14979_v41 = vsub.f32 %v12049_v60, %v795_v12  ;;  %v12069_v4 = vld [vmem:[%s22479_s4 + $0x308] sm:$0xff] }
  0x12   :  { %23606 = vst [vmem:[#allocation7_spill] sm:$0xff] %v14954_v10  ;;  %12286 = vmatmul.mubr.f32.vlgmr.msra.gmra.mrb[0].mxu0 %v14823_v17  ;;  %v797_v42 = vand.u32 4294901760, %v12048_v8  ;;  %v14997_v47 = vsub.f32 %v14930_v1, %v22494_v22  ;;  %v15002_v48 = vsub.f32 %v14935_v2, %v22492_v29  ;;  %v22493_v51 = vand.u32 4294901760, %v14959_v13  ;;  %v12056_v29 = vld [vmem:[%s22479_s4 + $0x2a0] sm:$0xff]  ;;  %v12061_v22 = vld [vmem:[%s22479_s4 + $0x2c8] sm:$0xff] }
  0x13   :  { %12279 = vmatmul.mubr.f32.gmra.mrb[2].mxu1 %v167_v61  ;;  %23607 = vst [vmem:[#allocation8_spill] sm:$0xff] %v14975_v36  ;;  %23608 = vst [vmem:[#allocation9_spill] sm:$0xff] %v14977_v40  ;;  %12342 = vmatpush3.bf16.msra.mxu0 %v14858_v32  ;;  %v12052_v32 = vld [vmem:[%s22479_s4 + $0x280] sm:$0xff]  ;;  %v15017_v57 = vsub.f32 %v12044_v3, %v793_v30  ;;  %v22496_v59 = vand.u32 4294901760, %v14972_v31  ;;  %v799_v61 = vand.u32 4294901760, %v12053_v44  ;;  %v803_v11 = vand.u32 4294901760, %v12057_v45 }
  0x14   :  { %23609 = vst [vmem:[#allocation10_spill] sm:$0xff] %v14979_v41  ;;  %12288 = vmatprep.mubr.f32.mxu0 %v14829_v19  ;;  %12344 = vmatprep.subr.bf16.mxu0 %v14817_v14  ;;  %v15015_v56 = vpack.c.bf16 %v797_v42, %v793_v30  ;;  %v15019_v58 = vsub.f32 %v12048_v8, %v797_v42  ;;  %v22503_v12 = vand.u32 4294901760, %v14990_v46  ;;  %v15034_v3 = vld [vmem:[%s22479_s4 + $0x290] sm:$0xff]  ;;  %v22502_v30 = vand.u32 4294901760, %v15008_v52 }
  0x15   :  { %12360 = vmatprep.subr.bf16.mxu1 %v14975_v36  ;;  %23611 = vst [vmem:[#allocation12_spill] sm:$0xff] %v15017_v57  ;;  %v15025_v60 = vsub.f32 %v14959_v13, %v22493_v51  ;;  %v15041_v8 = vsub.f32 %v14972_v31, %v22496_v59  ;;  %v801_v42 = vand.u32 4294901760, %v12052_v32  ;;  %v15047_v51 = vld [vmem:[%s22479_s4 + $0x2b0] sm:$0xff]  ;;  %v15056_v59 = vpack.c.bf16 %v803_v11, %v799_v61 }
  0x16   :  { %23610 = vst [vmem:[#allocation11_spill] sm:$0xff] %v15015_v56  ;;  %23612 = vst [vmem:[#allocation13_spill] sm:$0xff] %v15019_v58  ;;  %12289 = vmatmul.mubr.f32.gmra.mrb[2].mxu0 %v14831_v20  ;;  %12362 = vmatpush1.bf16.msra.mxu1 %v15015_v56  ;;  %v15058_v0 = vsub.f32 %v12053_v44, %v799_v61  ;;  %v15060_v54 = vsub.f32 %v12057_v45, %v803_v11  ;;  %v805_v45 = vand.u32 4294901760, %v12056_v29  ;;  %v15088_v11 = vld [vmem:[%s22479_s4 + $0x2f8] sm:$0xff]  ;;  %vm8060_vm5 = vcmask 261120  }
  0x17   :  { %23613 = vst [vmem:[#allocation14_spill] sm:$0xff] %v15025_v60  ;;  %23614 = vst [vmem:[#allocation15_spill] sm:$0xff] %v15041_v8  ;;  %12295 = vmatprep.mubr.f32.mxu0 %v14834_v21  ;;  %v15065_v53 = vsub.f32 %v14990_v46, %v22503_v12  ;;  %v15076_v34 = vpack.c.bf16 %v183_v24, %v176_v23  ;;  %v15081_v44 = vsub.f32 %v15008_v52, %v22502_v30  ;;  %vm8106_vm6 = vcmask 269312  }
  0x18   :  { %23615 = vst [vmem:[#allocation16_spill] sm:$0xff] %v15056_v59  ;;  %23616 = vst [vmem:[#allocation17_spill] sm:$0xff] %v15058_v0  ;;  %v15083_v61 = vsub.f32 %v12052_v32, %v801_v42  ;;  %12364 = vmatprep.subr.bf16.mxu1 %v15056_v59  ;;  %v22510_v16 = vand.u32 4294901760, %v15034_v3  ;;  %v807_v24 = vand.u32 4294901760, %v12061_v22  ;;  %v811_v30 = vand.u32 4294901760, %v12065_v7  ;;  %v12064_v32 = vld [vmem:[%s22479_s4 + $0x2e0] sm:$0xff] }
  0x19   :  { %23617 = vst [vmem:[#allocation18_spill] sm:$0xff] %v15060_v54  ;;  %23618 = vst [vmem:[#allocation19_spill] sm:$0xff] %v15065_v53  ;;  %v15100_v12 = vpack.c.bf16 %v805_v45, %v801_v42  ;;  %v15102_v33 = vsub.f32 %v12056_v29, %v805_v45  ;;  %v23624_v59 = vand.u32 4294901760, %v15047_v51  ;;  %v809_v29 = vand.u32 4294901760, %v12060_v15  ;;  %v15121_v45 = vld [vmem:[%s22479_s4 + $0x2d0] sm:$0xff] }
  0x1a   :  { %23619 = vst [vmem:[#allocation20_spill] sm:$0xff] %v15081_v44  ;;  %23620 = vst [vmem:[#allocation21_spill] sm:$0xff] %v15083_v61  ;;  %12296 = vmatmul.mubr.f32.vlgmr.msra.gmra.mrb[0].mxu0 %v14839_v25  ;;  %v15110_v23 = vsub.f32 %v15034_v3, %v22510_v16  ;;  %v15130_v16 = vpack.c.bf16 %v811_v30, %v807_v24  ;;  %v15134_v42 = vsub.f32 %v12065_v7, %v811_v30  ;;  %v12072_v61 = vld [vmem:[%s22479_s4 + $0x320] sm:$0xff]  ;;  %vm8152_vm7 = vcmask 277504  }
  0x1b   :  { %23621 = vst [vmem:[#allocation22_spill] sm:$0xff] %v15100_v12  ;;  %23622 = vst [vmem:[#allocation23_spill] sm:$0xff] %v15102_v33  ;;  %12346 = vmatpush3.bf16.msra.mxu0 %v14817_v14  ;;  %12298 = vmatprep.mubr.f32.mxu0 %v14843_v26  ;;  %v15115_v56 = vsub.f32 %v15047_v51, %v23624_v59  ;;  %v15132_v59 = vsub.f32 %v12061_v22, %v807_v24  ;;  %v813_v36 = vand.u32 4294901760, %v12064_v32  ;;  %vm8436_vm8 = vcmask 777216  }
  0x1c   :  { %23623 = vst [vmem:[#allocation24_spill] sm:$0xff] %v15110_v23  ;;  %12348 = vmatprep.subr.bf16.mxu0 %v15076_v34  ;;  %12366 = vmatpush1.bf16.msra.mxu1 %v15100_v12  ;;  %23626 = vst [vmem:[#allocation26_spill] sm:$0xff] %v15130_v16  ;;  %v23629_v12 = vand.u32 4294901760, %v15070_v35  ;;  %v23631_v7 = vand.u32 4294901760, %v15088_v11  ;;  %v15157_v24 = vsub.f32 %v12060_v15, %v809_v29  ;;  %v1664_v15 = vand.u32 4294901760, %v15121_v45 }
  0x1d   :  { %23625 = vst [vmem:[#allocation25_spill] sm:$0xff] %v15115_v56  ;;  %23627 = vst [vmem:[#allocation27_spill] sm:$0xff] %v15132_v59  ;;  %v15145_v56 = vld [vmem:[%s22479_s4 + $0x318] sm:$0xff]  ;;  %v12068_v59 = vld [vmem:[%s22479_s4 + $0x300] sm:$0xff]  ;;  %12368 = vmatprep.subr.bf16.mxu1 %v15130_v16  ;;  %v819_v23 = vand.u32 4294901760, %v12073_v37  ;;  %v821_v44 = vand.u32 4294901760, %v12072_v61 }
  0x1e   :  { %23628 = vst [vmem:[#allocation28_spill] sm:$0xff] %v15134_v42  ;;  %v15150_v22 = vsub.f32 %v15070_v35, %v23629_v12  ;;  %v15155_v30 = vsub.f32 %v15088_v11, %v23631_v7  ;;  %23633 = vst [vmem:[#allocation31_spill] sm:$0xff] %v15157_v24  ;;  %v15162_v42 = vld [vmem:[%s22479_s4 + $0x338] sm:$0xff]  ;;  %12299 = vmatmul.mubr.f32.gmra.mrb[2].mxu0 %v14846_v27  ;;  %v15169_v12 = vpack.c.bf16 %v813_v36, %v809_v29  ;;  %v12074_v16 = vld [vmem:[%s22479_s4 + $0x330] sm:$0xff]  ;;  %vm8201_vm9 = vcmask 1039360  }
  0x1f   :  { %v1668_v7 = vand.u32 4294901760, %v15126_v28  ;;  %v23636_v24 = vand.u32 4294901760, %v14834_v21  ;;  %v1670_v33 = vand.u32 4294901760, %v15145_v56  ;;  %v1674_v29 = vand.u32 4294901760, %v15162_v42 }
  0x20   :  { %23630 = vst [vmem:[#allocation29_spill] sm:$0xff] %v15150_v22  ;;  %23632 = vst [vmem:[#allocation30_spill] sm:$0xff] %v15155_v30  ;;  %v15171_v22 = vsub.f32 %v12064_v32, %v813_v36  ;;  %v815_v30 = vand.u32 4294901760, %v12069_v4  ;;  %12370 = vmatpush1.bf16.msra.mxu1 %v15169_v12  ;;  %v15183_v36 = vsub.f32 %v15121_v45, %v1664_v15  ;;  %v817_v21 = vand.u32 4294901760, %v12068_v59 }
  0x21   :  { %23634 = vst [vmem:[#allocation32_spill] sm:$0xff] %v15169_v12  ;;  %12305 = vmatprep.mubr.f32.mxu0 %v23636_v24  ;;  %v15186_v32 = vsub.f32 %v15126_v28, %v1668_v7  ;;  %v12070_v24 = vld [vmem:[%s22479_s4 + $0x310] sm:$0xff]  ;;  %v15199_v45 = vsub.f32 %v12073_v37, %v819_v23  ;;  %v23642_v28 = vand.u32 4294901760, %v14839_v25  ;;  %v23646_v54 = vand.u32 4294901760, %v14843_v26 }
  0x22   :  { %23635 = vst [vmem:[#allocation33_spill] sm:$0xff] %v15171_v22  ;;  %23637 = vst [vmem:[#allocation34_spill] sm:$0xff] %v15183_v36  ;;  %v15195_v22 = vpack.c.bf16 %v819_v23, %v815_v30  ;;  %v15197_v12 = vsub.f32 %v12069_v4, %v815_v30  ;;  %v15207_v36 = vsub.f32 %v15162_v42, %v1674_v29  ;;  %v1672_v4 = vand.u32 4294901760, %v12070_v24 }
  0x23   :  { %23638 = vst [vmem:[#allocation35_spill] sm:$0xff] %v15186_v32  ;;  %23641 = vst [vmem:[#allocation38_spill] sm:$0xff] %v15199_v45  ;;  %12306 = vmatmul.mubr.f32.vlgmr.msra.gmra.mrb[0].mxu0 %v23642_v28  ;;  %v15204_v32 = vsub.f32 %v15145_v56, %v1670_v33  ;;  %v15209_v53 = vsub.f32 %v12068_v59, %v817_v21  ;;  %v1676_v37 = vand.u32 4294901760, %v12074_v16  ;;  %v23651_v59 = vand.u32 4294901760, %v14846_v27 }
  0x24   :  { %23639 = vst [vmem:[#allocation36_spill] sm:$0xff] %v15195_v22  ;;  %23640 = vst [vmem:[#allocation37_spill] sm:$0xff] %v15197_v12  ;;  %12350 = vmatpush3.bf16.msra.mxu0 %v15076_v34  ;;  %12308 = vmatprep.mubr.f32.mxu0 %v23646_v54  ;;  %v15216_v25 = vpack.c.bf16 %v821_v44, %v817_v21  ;;  %v15218_v56 = vsub.f32 %v12072_v61, %v821_v44  ;;  %v23652_v26 = vand.u32 4294901760, %v14871_v38  ;;  %v15320_v21 = vld [vmem:[%s22479_s4 + $0x340] sm:$0xff]  ;;  %vm8248_vm10 = vcmask 1031168  }
  0x25   :  { %23643 = vst [vmem:[#allocation39_spill] sm:$0xff] %v15204_v32  ;;  %23644 = vst [vmem:[#allocation40_spill] sm:$0xff] %v15207_v36  ;;  %12352 = vmatprep.subr.bf16.mxu0 %v14817_v14  ;;  %12372 = vmatprep.subr.bf16.mxu1 %v15195_v22  ;;  %v15220_v23 = vsub.f32 %v12070_v24, %v1672_v4  ;;  %v15222_v42 = vsub.f32 %v12074_v16, %v1676_v37  ;;  %v23653_v34 = vand.u32 4294901760, %v14876_v39  ;;  %v15325_v24 = vld [vmem:[%s22479_s4 + $0x360] sm:$0xff]  ;;  %vm8295_vm11 = vcmask 916480  }
  0x26   :  { %23645 = vst [vmem:[#allocation41_spill] sm:$0xff] %v15209_v53  ;;  %23647 = vst [vmem:[#allocation42_spill] sm:$0xff] %v15216_v25  ;;  %12374 = vmatpush1.bf16.msra.mxu1 %v15216_v25  ;;  %v23655_v27 = vand.u32 4294901760, %v14901_v50  ;;  %v23656_v38 = vand.u32 4294901760, %v14908_v55  ;;  %v23658_v39 = vand.u32 4294901760, %v14930_v1  ;;  %v23659_v61 = vand.u32 4294901760, %v14935_v2 }
  0x27   :  { %23648 = vst [vmem:[#allocation43_spill] sm:$0xff] %v15218_v56  ;;  %23649 = vst [vmem:[#allocation44_spill] sm:$0xff] %v15220_v23  ;;  %12309 = vmatmul.mubr.f32.gmra.mrb[2].mxu0 %v23651_v59  ;;  %v15232_v54 = vpack.c.bf16 %v23653_v34, %v23652_v26  ;;  %v23664_v55 = vand.u32 4294901760, %v14990_v46  ;;  %v23665_v1 = vand.u32 4294901760, %v15008_v52  ;;  %v23671_v46 = vand.u32 4294901760, %v15088_v11  ;;  %v15333_v59 = vld [vmem:[%s22479_s4 + $0x350] sm:$0xff] }
  0x28   :  { %23650 = vst [vmem:[#allocation45_spill] sm:$0xff] %v15222_v42  ;;  %12315 = vmatprep.mubr.f32.mxu0 %v14809_v9  ;;  %v15244_v44 = vpack.c.bf16 %v23656_v38, %v23655_v27  ;;  %v15250_v16 = vpack.c.bf16 %v23659_v61, %v23658_v39  ;;  %v15284_v52 = vpack.c.bf16 %v1668_v7, %v1664_v15  ;;  %v15314_v7 = vld [vmem:[%s22479_s4 + $0x378] sm:$0xff]  ;;  %v15338_v26 = vld [vmem:[%s22479_s4 + $0x370] sm:$0xff]  ;;  %v22540_v27 = vand.u32 4294901760, %v15333_v59  ;;  %v12096_v22 = vld [vmem:[%s22479_s4 + $0x3e0] sm:$0xff] }
  0x29   :  { %23654 = vst [vmem:[#allocation46_spill] sm:$0xff] %v15232_v54  ;;  %v15266_v2 = vpack.c.bf16 %v23665_v1, %v23664_v55  ;;  %v22542_v28 = vand.u32 4294901760, %v15314_v7  ;;  %v22539_v38 = vand.u32 4294901760, %v15338_v26  ;;  %v15373_v55 = vld [vmem:[%s22479_s4 + $0x398] sm:$0xff]  ;;  %v22609_v56 = vand.u32 4294901760, %v14919_v62 }
  0x2a   :  { %23657 = vst [vmem:[#allocation47_spill] sm:$0xff] %v15244_v44  ;;  %23660 = vst [vmem:[#allocation48_spill] sm:$0xff] %v15250_v16  ;;  %v22610_v36 = vand.u32 4294901760, %v14924_v63  ;;  %vm8342_vm12 = vcmask 900096   ;;  %vm8389_vm13 = vcmask 785408   ;;  %vm8483_vm14 = vcmask 769024  }
  0x2b   :  { %12316 = vmatmul.mubr.f32.vlgmr.msra.gmra.mrb[0].mxu0 %v14823_v17  ;;  %23666 = vst [vmem:[#allocation50_spill] sm:$0xff] %v15266_v2  ;;  %23673 = vst [vmem:[#allocation53_spill] sm:$0xff] %v15284_v52  ;;  %v15380_v1 = vpack.c.bf16 %v22539_v38, %v22540_v27  ;;  %v15398_v38 = vld [vmem:[%s22479_s4 + $0x3a0] sm:$0xff]  ;;  %vm10629_vm15 = vcmask 588800  }
  0x2c   :  { %12354 = vmatpush3.bf16.msra.mxu0 %v14817_v14  ;;  %12318 = vmatprep.mubr.f32.mxu0 %v14829_v19  ;;  %v23662_v14 = vand.u32 4294901760, %v14972_v31  ;;  %v23670_v31 = vand.u32 4294901760, %v15070_v35  ;;  %v15297_v35 = vld [vmem:[%s22479_s4 + $0x348] sm:$0xff]  ;;  %v1761_v32 = vsub.f32 %v14924_v63, %v22610_v36 }
  0x2d   :  { %12548 = vmatprep.subr.bf16.mxu0 %v15232_v54  ;;  %v22545_v11 = vand.u32 4294901760, %v15297_v35  ;;  %23679 = vst [vmem:[#allocation59_spill] sm:$0xff] %v15380_v1 }
  0x2e   :  { %v15281_v30 = vpack.c.bf16 %v23671_v46, %v23670_v31  ;;  %v15387_v31 = vld [vmem:[%s22479_s4 + $0x3b8] sm:$0xff]  ;;  %v22559_v46 = vand.u32 4294901760, %v15373_v55 }
  0x2f   :  { %12319 = vmatmul.mubr.f32.gmra.mrb[2].mxu0 %v14831_v20  ;;  %v22558_v27 = vand.u32 4294901760, %v15387_v31 }
  0x30   :  { %12325 = vmatprep.mubr.f32.mxu0 %v14809_v9  ;;  %v23661_v9 = vand.u32 4294901760, %v14959_v13  ;;  %23672 = vst [vmem:[#allocation52_spill] sm:$0xff] %v15281_v30 }
  0x32   :  { %v15259_v50 = vpack.c.bf16 %v23662_v14, %v23661_v9  ;;  %v15363_v9 = vld [vmem:[%s22479_s4 + $0x388] sm:$0xff] }
  0x33   :  { %12326 = vmatmul.mubr.f32.vlgmr.msra.gmra.mrb[0].mxu0 %v14823_v17  ;;  %v23667_v17 = vand.u32 4294901760, %v15034_v3  ;;  %v15302_v3 = vld [vmem:[%s22479_s4 + $0x368] sm:$0xff] }
  0x34   :  { %12328 = vmatprep.mubr.f32.mxu0 %v14829_v19  ;;  %12550 = vmatpush1.bf16.msra.mxu0 %v15244_v44  ;;  %23663 = vst [vmem:[#allocation49_spill] sm:$0xff] %v15259_v50  ;;  %v23668_v19 = vand.u32 4294901760, %v15047_v51  ;;  %v15290_v51 = vpack.c.bf16 %v1676_v37, %v1672_v4  ;;  %v22544_v15 = vand.u32 4294901760, %v15302_v3  ;;  %v22541_v4 = vand.u32 4294901760, %v15320_v21  ;;  %v15368_v14 = vld [vmem:[%s22479_s4 + $0x3a8] sm:$0xff] }
  0x35   :  { %12552 = vmatprep.subr.bf16.mxu0 %v15250_v16  ;;  %v22538_v37 = vand.u32 4294901760, %v15325_v24 }
  0x36   :  { %v15274_v13 = vpack.c.bf16 %v23668_v19, %v23667_v17  ;;  %23675 = vst [vmem:[#allocation55_spill] sm:$0xff] %v15290_v51  ;;  %v15344_v34 = vpack.c.bf16 %v22544_v15, %v22545_v11  ;;  %v22555_v17 = vand.u32 4294901760, %v15363_v9  ;;  %v22554_v19 = vand.u32 4294901760, %v15368_v14  ;;  %v15413_v15 = vld [vmem:[%s22479_s4 + $0x3b0] sm:$0xff] }
  0x37   :  { %12329 = vmatmul.mubr.f32.gmra.mrb[2].mxu0 %v14831_v20  ;;  %v15287_v20 = vpack.c.bf16 %v1674_v29, %v1670_v33  ;;  %v15307_v33 = vld [vmem:[%s22479_s4 + $0x358] sm:$0xff]  ;;  %v15358_v61 = vpack.c.bf16 %v22538_v37, %v22541_v4  ;;  %v15393_v37 = vld [vmem:[%s22479_s4 + $0x380] sm:$0xff]  ;;  %v1692_v4 = vand.u32 4294901760, %v15413_v15 }
  0x38   :  { %12554 = vmatpush1.bf16.msra.mxu0 %v15259_v50  ;;  %23669 = vst [vmem:[#allocation51_spill] sm:$0xff] %v15274_v13  ;;  %v22543_v29 = vand.u32 4294901760, %v15307_v33  ;;  %23676 = vst [vmem:[#allocation56_spill] sm:$0xff] %v15344_v34  ;;  %12376 = vmatprep.subr.bf16.mxu1 %v15344_v34  ;;  %v15420_v11 = vpack.c.bf16 %v22554_v19, %v22555_v17  ;;  %v12093_v19 = vld [vmem:[%s22479_s4 + $0x3c8] sm:$0xff]  ;;  %v22597_v50 = vand.u32 4294901760, %v14881_v43 }
  0x39   :  { %12556 = vmatprep.subr.bf16.mxu0 %v15266_v2  ;;  %23674 = vst [vmem:[#allocation54_spill] sm:$0xff] %v15287_v20  ;;  %23678 = vst [vmem:[#allocation58_spill] sm:$0xff] %v15358_v61  ;;  %12378 = vmatpush1.bf16.msra.mxu1 %v15358_v61  ;;  %v15428_v61 = vpack.c.bf16 %v22558_v27, %v22559_v46  ;;  %v12097_v17 = vld [vmem:[%s22479_s4 + $0x3e8] sm:$0xff]  ;;  %v839_v46 = vand.u32 4294901760, %v12093_v19  ;;  %v12098_v2 = vld [vmem:[%s22479_s4 + $0x3f0] sm:$0xff] }
  0x3a   :  { %v15352_v39 = vpack.c.bf16 %v22542_v28, %v22543_v29  ;;  %v15408_v29 = vld [vmem:[%s22479_s4 + $0x390] sm:$0xff]  ;;  %23680 = vst [vmem:[#allocation60_spill] sm:$0xff] %v15420_v11  ;;  %12380 = vmatprep.subr.bf16.mxu1 %v15420_v11  ;;  %v843_v25 = vand.u32 4294901760, %v12097_v17  ;;  %v1700_v44 = vand.u32 4294901760, %v12098_v2  ;;  %v894_v23 = vsub.f32 %v14881_v43, %v22597_v50 }
  0x3b   :  { %v1688_v28 = vand.u32 4294901760, %v15408_v29  ;;  %23681 = vst [vmem:[#allocation61_spill] sm:$0xff] %v15428_v61  ;;  %v1749_v50 = vsub.f32 %v14919_v62, %v22609_v56  ;;  %v23693_v43 = vand.u32 4294901760, %v15302_v3 }
  0x3c   :  { %12558 = vmatpush1.bf16.msra.mxu0 %v15274_v13  ;;  %23677 = vst [vmem:[#allocation57_spill] sm:$0xff] %v15352_v39  ;;  %v12094_v13 = vld [vmem:[%s22479_s4 + $0x3d0] sm:$0xff]  ;;  %v15467_v16 = vpack.c.bf16 %v843_v25, %v839_v46  ;;  %v895_v45 = vand.u32 4294901760, %v894_v23  ;;  %v23698_v23 = vand.u32 4294901760, %v15320_v21 }
  0x3d   :  { %12560 = vmatprep.subr.bf16.mxu0 %v15281_v30  ;;  %v15446_v27 = vpack.c.bf16 %v1692_v4, %v1688_v28  ;;  %v845_v30 = vand.u32 4294901760, %v12096_v22 }
  0x3e   :  { %23686 = vst [vmem:[#allocation64_spill] sm:$0xff] %v15467_v16 }
  0x3f   :  { %23685 = vst [vmem:[#allocation63_spill] sm:$0xff] %v15446_v27 }
  0x40   :  { %12562 = vmatpush1.bf16.msra.mxu0 %v15284_v52 }
  0x41   :  { %12564 = vmatprep.subr.bf16.mxu0 %v15287_v20  ;;  %v12092_v20 = vld [vmem:[%s22479_s4 + $0x3c0] sm:$0xff] }
  0x42   :  { %v841_v52 = vand.u32 4294901760, %v12092_v20 }
  0x44   :  { %12566 = vmatpush1.bf16.msra.mxu0 %v15290_v51  ;;  %v12095_v51 = vld [vmem:[%s22479_s4 + $0x3d8] sm:$0xff]  ;;  %v15472_v42 = vpack.c.bf16 %v845_v30, %v841_v52 }
  0x45   :  { %12568 = vmatprep.subr.bf16.mxu0 %v15352_v39  ;;  %v23682_v39 = vand.u32 4294901760, %v15393_v37 }
  0x46   :  { %23688 = vst [vmem:[#allocation66_spill] sm:$0xff] %v15472_v42 }
  0x48   :  { %12570 = vmatpush1.bf16.msra.mxu0 %v15380_v1  ;;  %v23683_v1 = vand.u32 4294901760, %v15398_v38 }
  0x49   :  { %12572 = vmatprep.subr.bf16.mxu0 %v15428_v61  ;;  %v1696_v61 = vand.u32 4294901760, %v12094_v13 }
  0x4a   :  { %v15434_v34 = vpack.c.bf16 %v23683_v1, %v23682_v39  ;;  %v12099_v39 = vld [vmem:[%s22479_s4 + $0x3f8] sm:$0xff]  ;;  %v1694_v1 = vand.u32 4294901760, %v12095_v51 }
  0x4b   :  { %v1698_v11 = vand.u32 4294901760, %v12099_v39  ;;  %v15479_v53 = vpack.c.bf16 %v1700_v44, %v1696_v61 }
  0x4c   :  { %23684 = vst [vmem:[#allocation62_spill] sm:$0xff] %v15434_v34  ;;  %12382 = vmatpush1.bf16.msra.mxu1 %v15434_v34  ;;  %12574 = vmatpush1.bf16.msra.mxu0 %v15446_v27  ;;  %v22602_v34 = vand.u32 4294901760, %v14896_v49 }
  0x4d   :  { %v15470_v54 = vpack.c.bf16 %v1698_v11, %v1694_v1  ;;  %12384 = vmatprep.subr.bf16.mxu1 %v15467_v16  ;;  %23689 = vst [vmem:[#allocation67_spill] sm:$0xff] %v15479_v53  ;;  %v15509_v16 = vsub.f32 %v15302_v3, %v23693_v43  ;;  %v23701_v3 = vand.u32 4294901760, %v15333_v59 }
  0x4e   :  { %v906_v27 = vsub.f32 %v14896_v49, %v22602_v34  ;;  %v23691_v49 = vand.u32 4294901760, %v15297_v35 }
  0x4f   :  { %23687 = vst [vmem:[#allocation65_spill] sm:$0xff] %v15470_v54  ;;  %12576 = vmatprep.subr.bf16.mxu0 %v15470_v54  ;;  %v23690_v54 = vand.u32 4294901760, %v14942_v5  ;;  %23694 = vst [vmem:[#allocation69_spill] sm:$0xff] %v15509_v16 }
  0x50   :  { %12386 = vmatpush1.bf16.msra.mxu1 %v15472_v42  ;;  %12578 = vmatpush1.bf16.msra.mxu0 %v15479_v53  ;;  %v907_v34 = vand.u32 4294901760, %v906_v27  ;;  %v15504_v56 = vsub.f32 %v15297_v35, %v23691_v49  ;;  %v23695_v27 = vand.u32 4294901760, %v15307_v33  ;;  %v23696_v53 = vand.u32 4294901760, %v15314_v7 }
  0x51   :  { %v900_v42 = vsub.f32 %v14942_v5, %v23690_v54  ;;  %v15524_v49 = vsub.f32 %v15320_v21, %v23698_v23  ;;  %v23699_v35 = vand.u32 4294901760, %v15325_v24  ;;  %v23705_v23 = vand.u32 4294901760, %v15368_v14 }
  0x52   :  { %23692 = vst [vmem:[#allocation68_spill] sm:$0xff] %v15504_v56  ;;  %v15514_v36 = vsub.f32 %v15307_v33, %v23695_v27  ;;  %v15519_v54 = vsub.f32 %v15314_v7, %v23696_v53  ;;  %v15534_v33 = vsub.f32 %v15333_v59, %v23701_v3  ;;  %v23702_v27 = vand.u32 4294901760, %v15338_v26 }
  0x53   :  { %v15529_v43 = vsub.f32 %v15325_v24, %v23699_v35  ;;  %v23703_v7 = vand.u32 4294901760, %v15363_v9  ;;  %v15549_v24 = vsub.f32 %v15368_v14, %v23705_v23  ;;  %v23707_v35 = vand.u32 4294901760, %v15373_v55 }
  0x54   :  { %23697 = vst [vmem:[#allocation70_spill] sm:$0xff] %v15519_v54  ;;  %v15539_v53 = vsub.f32 %v15338_v26, %v23702_v27  ;;  %v23709_v3 = vand.u32 4294901760, %v15387_v31  ;;  %v23711_v27 = vand.u32 4294901760, %v15393_v37  ;;  %v15572_v23 = vsub.f32 %v15408_v29, %v1688_v28 }
  0x55   :  { %23700 = vst [vmem:[#allocation71_spill] sm:$0xff] %v15529_v43  ;;  %v15544_v21 = vsub.f32 %v15363_v9, %v23703_v7  ;;  %23706 = vst [vmem:[#allocation73_spill] sm:$0xff] %v15549_v24  ;;  %v15554_v59 = vsub.f32 %v15373_v55, %v23707_v35  ;;  %v23713_v7 = vand.u32 4294901760, %v15398_v38  ;;  %v15575_v55 = vsub.f32 %v15413_v15, %v1692_v4 }
  0x56   :  { %v15559_v26 = vsub.f32 %v15387_v31, %v23709_v3  ;;  %v15564_v9 = vsub.f32 %v15393_v37, %v23711_v27  ;;  %23715 = vst [vmem:[#allocation78_spill] sm:$0xff] %v15572_v23  ;;  %v15577_v35 = vsub.f32 %v12093_v19, %v839_v46  ;;  %v15579_v31 = vsub.f32 %v12097_v17, %v843_v25 }
  0x57   :  { %23704 = vst [vmem:[#allocation72_spill] sm:$0xff] %v15544_v21  ;;  %23708 = vst [vmem:[#allocation74_spill] sm:$0xff] %v15554_v59  ;;  %v15569_v14 = vsub.f32 %v15398_v38, %v23713_v7  ;;  %v15581_v3 = vsub.f32 %v12095_v51, %v1694_v1  ;;  %v15583_v5 = vsub.f32 %v12099_v39, %v1698_v11  ;;  %v1750_v28 = vand.u32 4294901760, %v1749_v50 }
  0x58   :  { %23710 = vst [vmem:[#allocation75_spill] sm:$0xff] %v15559_v26  ;;  %23712 = vst [vmem:[#allocation76_spill] sm:$0xff] %v15564_v9  ;;  %v15585_v37 = vsub.f32 %v12092_v20, %v841_v52  ;;  %v15587_v27 = vsub.f32 %v12096_v22, %v845_v30  ;;  %v15589_v38 = vsub.f32 %v12094_v13, %v1696_v61  ;;  %v1762_v15 = vand.u32 4294901760, %v1761_v32 }
  0x59   :  { %23714 = vst [vmem:[#allocation77_spill] sm:$0xff] %v15569_v14  ;;  %23716 = vst [vmem:[#allocation79_spill] sm:$0xff] %v15575_v55  ;;  %v15591_v7 = vsub.f32 %v12098_v2, %v1700_v44  ;;  %v12387_v29 = vpack.c.bf16 %v907_v34, %v895_v45  ;;  %v22625_v4 = vmov 0.0   ;;  %v901_v25 = vand.u32 4294901760, %v900_v42 }
  0x5a   :  { %23717 = vst [vmem:[#allocation80_spill] sm:$0xff] %v15581_v3  ;;  %23718 = vst [vmem:[#allocation81_spill] sm:$0xff] %v15585_v37  ;;  %879 = vmatprep.mubr.f32.mxu1 %v22625_v4  ;;  %1734 = vmatprep.mubr.f32.mxu0 %v22625_v4  ;;  %v23722_v51 = vand.u32 4294901760, %v14944_v6  ;;  %v23723_v22 = vand.u32 4294901760, %v14954_v10  ;;  %v23724_v44 = vand.u32 4294901760, %v14965_v18  ;;  %v12579_v32 = vpack.c.bf16 %v1762_v15, %v1750_v28 }
  0x5b   :  { %23719 = vst [vmem:[#allocation82_spill] sm:$0xff] %v15587_v27  ;;  %23720 = vst [vmem:[#allocation83_spill] sm:$0xff] %v15589_v38  ;;  %12388 = vmatprep.subr.bf16.mxu1 %v12387_v29  ;;  %v22621_v50 = vand.u32 4294901760, %v14977_v40  ;;  %v22620_v2 = vand.u32 4294901760, %v14979_v41  ;;  %v22619_v42 = vand.u32 4294901760, %v14997_v47  ;;  %v22617_v34 = vand.u32 4294901760, %v15002_v48 }
  0x5c   :  { %23721 = vst [vmem:[#allocation84_spill] sm:$0xff] %v15591_v7  ;;  %v912_v52 = vsub.f32 %v14944_v6, %v23722_v51  ;;  %v1755_v13 = vsub.f32 %v14954_v10, %v23723_v22  ;;  %v1767_v45 = vsub.f32 %v14965_v18, %v23724_v44  ;;  %12580 = vmatprep.subr.bf16.mxu0 %v12579_v32  ;;  %v22616_v46 = vand.u32 4294901760, %v15017_v57 }
  0x5d   :  { %v918_v61 = vsub.f32 %v14977_v40, %v22621_v50  ;;  %v930_v17 = vsub.f32 %v14979_v41, %v22620_v2  ;;  %v1773_v19 = vsub.f32 %v14997_v47, %v22619_v42  ;;  %v1785_v29 = vsub.f32 %v15002_v48, %v22617_v34  ;;  %v23733_v42 = vld [vmem:[#allocation21_spill] sm:$0xff]  ;;  %v23778_v40 = vld [vmem:[#allocation23_spill] sm:$0xff] }
  0x5e   :  { %v913_v30 = vand.u32 4294901760, %v912_v52  ;;  %v1756_v20 = vand.u32 4294901760, %v1755_v13  ;;  %v1768_v11 = vand.u32 4294901760, %v1767_v45  ;;  %v22615_v28 = vand.u32 4294901760, %v15019_v58 }
  0x5f   :  { %v919_v15 = vand.u32 4294901760, %v918_v61  ;;  %v931_v51 = vand.u32 4294901760, %v930_v17  ;;  %v1774_v52 = vand.u32 4294901760, %v1773_v19  ;;  %v924_v22 = vsub.f32 %v15017_v57, %v22616_v46  ;;  %v23782_v57 = vld [vmem:[#allocation29_spill] sm:$0xff] }
  0x60   :  { %v15618_v39 = vpack.c.bf16 %v913_v30, %v901_v25  ;;  %v15620_v1 = vpack.c.bf16 %v1768_v11, %v1756_v20  ;;  %v1786_v13 = vand.u32 4294901760, %v1785_v29  ;;  %v936_v25 = vsub.f32 %v15019_v58, %v22615_v28  ;;  %v23728_v11 = vld [vmem:[#allocation18_spill] sm:$0xff] }
  0x61   :  { %v22618_v44 = vand.u32 4294901760, %v15025_v60  ;;  %v22622_v45 = vand.u32 4294901760, %v15041_v8  ;;  %v15634_v32 = vpack.c.bf16 %v931_v51, %v919_v15  ;;  %v925_v30 = vand.u32 4294901760, %v924_v22  ;;  %v23730_v22 = vld [vmem:[#allocation19_spill] sm:$0xff]  ;;  %v23783_v58 = vld [vmem:[#allocation30_spill] sm:$0xff] }
  0x62   :  { %23725 = vst [vmem:[#allocation85_spill] sm:$0xff] %v15618_v39  ;;  %23726 = vst [vmem:[#allocation86_spill] sm:$0xff] %v15620_v1  ;;  %v22623_v20 = vand.u32 4294901760, %v15058_v0  ;;  %v22624_v61 = vand.u32 4294901760, %v23728_v11  ;;  %v15638_v17 = vpack.c.bf16 %v1786_v13, %v1774_v52  ;;  %v937_v19 = vand.u32 4294901760, %v936_v25  ;;  %v23731_v13 = vld [vmem:[#allocation20_spill] sm:$0xff] }
  0x63   :  { %23727 = vst [vmem:[#allocation87_spill] sm:$0xff] %v15634_v32  ;;  %v1779_v29 = vsub.f32 %v15025_v60, %v22618_v44  ;;  %v1791_v28 = vsub.f32 %v15041_v8, %v22622_v45  ;;  %v22627_v52 = vand.u32 4294901760, %v23730_v22  ;;  %v22629_v25 = vand.u32 4294901760, %v23731_v13  ;;  %v23738_v32 = vld [vmem:[#allocation25_spill] sm:$0xff] }
  0x64   :  { %23729 = vst [vmem:[#allocation88_spill] sm:$0xff] %v15638_v17  ;;  %v942_v15 = vsub.f32 %v15058_v0, %v22623_v20  ;;  %v954_v51 = vsub.f32 %v23728_v11, %v22624_v61  ;;  %v15654_v46 = vpack.c.bf16 %v937_v19, %v925_v30  ;;  %v22628_v2 = vand.u32 4294901760, %v23733_v42  ;;  %v23735_v19 = vld [vmem:[#allocation23_spill] sm:$0xff]  ;;  %v23784_v60 = vld [vmem:[#allocation33_spill] sm:$0xff]  ;;  %v23785_v0 = vld [vmem:[#allocation34_spill] sm:$0xff] }
  0x65   :  { %v1780_v34 = vand.u32 4294901760, %v1779_v29  ;;  %v1792_v44 = vand.u32 4294901760, %v1791_v28  ;;  %v1797_v20 = vsub.f32 %v23730_v22, %v22627_v52  ;;  %v1809_v61 = vsub.f32 %v23731_v13, %v22629_v25  ;;  %v23736_v29 = vld [vmem:[#allocation24_spill] sm:$0xff]  ;;  %v23786_v11 = vld [vmem:[#allocation35_spill] sm:$0xff]  ;;  %v23787_v22 = vld [vmem:[#allocation37_spill] sm:$0xff] }
  0x66   :  { %23732 = vst [vmem:[#allocation89_spill] sm:$0xff] %v15654_v46  ;;  %v943_v50 = vand.u32 4294901760, %v942_v15  ;;  %v955_v45 = vand.u32 4294901760, %v954_v51  ;;  %v948_v30 = vsub.f32 %v23733_v42, %v22628_v2  ;;  %v22630_v28 = vand.u32 4294901760, %v23735_v19  ;;  %v23739_v2 = vld [vmem:[#allocation27_spill] sm:$0xff] }
  0x67   :  { %v15663_v4 = vpack.c.bf16 %v1792_v44, %v1780_v34  ;;  %v22632_v46 = vand.u32 4294901760, %v23736_v29  ;;  %v1798_v51 = vand.u32 4294901760, %v1797_v20  ;;  %v1810_v17 = vand.u32 4294901760, %v1809_v61  ;;  %v23742_v61 = vld [vmem:[#allocation29_spill] sm:$0xff] }
  0x68   :  { %v15670_v15 = vpack.c.bf16 %v955_v45, %v943_v50  ;;  %v22634_v52 = vand.u32 4294901760, %v23738_v32  ;;  %v949_v1 = vand.u32 4294901760, %v948_v30  ;;  %v960_v34 = vsub.f32 %v23735_v19, %v22630_v28  ;;  %v23741_v45 = vld [vmem:[#allocation28_spill] sm:$0xff]  ;;  %v23743_v19 = vld [vmem:[#allocation30_spill] sm:$0xff] }
  0x69   :  { %23734 = vst [vmem:[#allocation90_spill] sm:$0xff] %v15663_v4  ;;  %v1803_v44 = vsub.f32 %v23736_v29, %v22632_v46  ;;  %v22636_v25 = vand.u32 4294901760, %v23739_v2  ;;  %v15680_v4 = vpack.c.bf16 %v1810_v17, %v1798_v51  ;;  %v22640_v20 = vand.u32 4294901760, %v23741_v45 }
  0x6a   :  { %23737 = vst [vmem:[#allocation91_spill] sm:$0xff] %v15670_v15  ;;  %v1815_v50 = vsub.f32 %v23738_v32, %v22634_v52  ;;  %v22641_v30 = vand.u32 4294901760, %v23742_v61  ;;  %v961_v15 = vand.u32 4294901760, %v960_v34  ;;  %v22643_v46 = vand.u32 4294901760, %v23743_v19  ;;  %v23744_v52 = vld [vmem:[#allocation31_spill] sm:$0xff] }
  0x6b   :  { %23740 = vst [vmem:[#allocation92_spill] sm:$0xff] %v15680_v4  ;;  %v1804_v39 = vand.u32 4294901760, %v1803_v44  ;;  %v966_v28 = vsub.f32 %v23739_v2, %v22636_v25  ;;  %v978_v17 = vsub.f32 %v23741_v45, %v22640_v20  ;;  %v22646_v4 = vand.u32 4294901760, %v23744_v52  ;;  %v23746_v25 = vld [vmem:[#allocation33_spill] sm:$0xff] }
  0x6c   :  { %v1816_v29 = vand.u32 4294901760, %v1815_v50  ;;  %v1821_v51 = vsub.f32 %v23742_v61, %v22641_v30  ;;  %v15698_v32 = vpack.c.bf16 %v961_v15, %v949_v1  ;;  %v1833_v44 = vsub.f32 %v23743_v19, %v22643_v46 }
  0x6d   :  { %v967_v34 = vand.u32 4294901760, %v966_v28  ;;  %v22645_v2 = vand.u32 4294901760, %v23746_v25  ;;  %v979_v42 = vand.u32 4294901760, %v978_v17  ;;  %v972_v20 = vsub.f32 %v23744_v52, %v22646_v4  ;;  %v23748_v28 = vld [vmem:[#allocation34_spill] sm:$0xff] }
  0x6e   :  { %23745 = vst [vmem:[#allocation28_spill] sm:$0xff] %v15698_v32  ;;  %v15704_v50 = vpack.c.bf16 %v1816_v29, %v1804_v39  ;;  %v1822_v13 = vand.u32 4294901760, %v1821_v51  ;;  %v1834_v30 = vand.u32 4294901760, %v1833_v44  ;;  %v22647_v15 = vand.u32 4294901760, %v23748_v28  ;;  %v23749_v32 = vld [vmem:[#allocation35_spill] sm:$0xff]  ;;  %v23751_v29 = vld [vmem:[#allocation38_spill] sm:$0xff] }
  0x6f   :  { %v984_v1 = vsub.f32 %v23746_v25, %v22645_v2  ;;  %v22650_v61 = vand.u32 4294901760, %v23749_v32  ;;  %v15714_v46 = vpack.c.bf16 %v979_v42, %v967_v34  ;;  %v973_v19 = vand.u32 4294901760, %v972_v20  ;;  %v23753_v34 = vld [vmem:[#allocation39_spill] sm:$0xff] }
  0x70   :  { %23747 = vst [vmem:[#allocation31_spill] sm:$0xff] %v15704_v50  ;;  %v22651_v39 = vand.u32 4294901760, %v15197_v12  ;;  %v22652_v17 = vand.u32 4294901760, %v23751_v29  ;;  %v15718_v51 = vpack.c.bf16 %v1834_v30, %v1822_v13  ;;  %v1827_v44 = vsub.f32 %v23748_v28, %v22647_v15  ;;  %v23754_v30 = vld [vmem:[#allocation40_spill] sm:$0xff] }
  0x71   :  { %23750 = vst [vmem:[#allocation93_spill] sm:$0xff] %v15714_v46  ;;  %v985_v50 = vand.u32 4294901760, %v984_v1  ;;  %v1839_v2 = vsub.f32 %v23749_v32, %v22650_v61  ;;  %v22657_v13 = vand.u32 4294901760, %v23753_v34  ;;  %v22660_v1 = vand.u32 4294901760, %v23754_v30  ;;  %v23756_v46 = vld [vmem:[#allocation41_spill] sm:$0xff] }
  0x72   :  { %23752 = vst [vmem:[#allocation94_spill] sm:$0xff] %v15718_v51  ;;  %v990_v42 = vsub.f32 %v15197_v12, %v22651_v39  ;;  %v1002_v20 = vsub.f32 %v23751_v29, %v22652_v17  ;;  %v1828_v51 = vand.u32 4294901760, %v1827_v44  ;;  %v22659_v28 = vand.u32 4294901760, %v23756_v46  ;;  %v23759_v44 = vld [vmem:[#allocation44_spill] sm:$0xff]  ;;  %v23761_v32 = vld [vmem:[#allocation45_spill] sm:$0xff] }
  0x73   :  { %v15734_v4 = vpack.c.bf16 %v985_v50, %v973_v19  ;;  %v1840_v15 = vand.u32 4294901760, %v1839_v2  ;;  %v1845_v39 = vsub.f32 %v23753_v34, %v22657_v13  ;;  %v1857_v17 = vsub.f32 %v23754_v30, %v22660_v1  ;;  %v23758_v50 = vld [vmem:[#allocation43_spill] sm:$0xff] }
  0x74   :  { %v991_v25 = vand.u32 4294901760, %v990_v42  ;;  %v1003_v61 = vand.u32 4294901760, %v1002_v20  ;;  %v996_v19 = vsub.f32 %v23756_v46, %v22659_v28  ;;  %v22661_v2 = vand.u32 4294901760, %v23758_v50 }
  0x75   :  { %23755 = vst [vmem:[#allocation40_spill] sm:$0xff] %v15734_v4  ;;  %v15743_v29 = vpack.c.bf16 %v1840_v15, %v1828_v51  ;;  %v22662_v4 = vand.u32 4294901760, %v23759_v44  ;;  %v1846_v20 = vand.u32 4294901760, %v1845_v39  ;;  %v1858_v12 = vand.u32 4294901760, %v1857_v17 }
  0x76   :  { %v15750_v42 = vpack.c.bf16 %v1003_v61, %v991_v25  ;;  %v22663_v13 = vand.u32 4294901760, %v23761_v32  ;;  %v997_v34 = vand.u32 4294901760, %v996_v19  ;;  %v1008_v15 = vsub.f32 %v23758_v50, %v22661_v2 }
  0x77   :  { %23757 = vst [vmem:[#allocation41_spill] sm:$0xff] %v15743_v29  ;;  %v1851_v51 = vsub.f32 %v23759_v44, %v22662_v4  ;;  %v22664_v28 = vand.u32 4294901760, %v15504_v56  ;;  %v15760_v1 = vpack.c.bf16 %v1858_v12, %v1846_v20  ;;  %v22667_v61 = vand.u32 4294901760, %v15509_v16 }
  0x78   :  { %23760 = vst [vmem:[#allocation43_spill] sm:$0xff] %v15750_v42  ;;  %v1863_v25 = vsub.f32 %v23761_v32, %v22663_v13  ;;  %v22668_v39 = vand.u32 4294901760, %v15514_v36  ;;  %v1009_v17 = vand.u32 4294901760, %v1008_v15  ;;  %v22669_v4 = vand.u32 4294901760, %v15519_v54 }
  0x79   :  { %23762 = vst [vmem:[#allocation95_spill] sm:$0xff] %v15760_v1  ;;  %v1852_v19 = vand.u32 4294901760, %v1851_v51  ;;  %v1014_v2 = vsub.f32 %v15504_v56, %v22664_v28  ;;  %v1026_v12 = vsub.f32 %v15509_v16, %v22667_v61  ;;  %v22672_v13 = vand.u32 4294901760, %v15524_v49 }
  0x7a   :  { %v1864_v42 = vand.u32 4294901760, %v1863_v25  ;;  %v1869_v20 = vsub.f32 %v15514_v36, %v22668_v39  ;;  %v15778_v1 = vpack.c.bf16 %v1009_v17, %v997_v34  ;;  %v1881_v51 = vsub.f32 %v15519_v54, %v22669_v4 }
  0x7b   :  { %v1015_v15 = vand.u32 4294901760, %v1014_v2  ;;  %v22670_v28 = vand.u32 4294901760, %v15529_v43  ;;  %v1027_v29 = vand.u32 4294901760, %v1026_v12  ;;  %v1020_v61 = vsub.f32 %v15524_v49, %v22672_v13 }
  0x7c   :  { %23763 = vst [vmem:[#allocation96_spill] sm:$0xff] %v15778_v1  ;;  %v15784_v25 = vpack.c.bf16 %v1864_v42, %v1852_v19  ;;  %v1870_v56 = vand.u32 4294901760, %v1869_v20  ;;  %v1882_v39 = vand.u32 4294901760, %v1881_v51  ;;  %v22671_v2 = vand.u32 4294901760, %v15534_v33 }
  0x7d   :  { %v1032_v34 = vsub.f32 %v15529_v43, %v22670_v28  ;;  %v22673_v17 = vand.u32 4294901760, %v15539_v53  ;;  %v15794_v4 = vpack.c.bf16 %v1027_v29, %v1015_v15  ;;  %v1021_v1 = vand.u32 4294901760, %v1020_v61 }
  0x7e   :  { %23764 = vst [vmem:[#allocation97_spill] sm:$0xff] %v15784_v25  ;;  %v22674_v42 = vand.u32 4294901760, %v15544_v21  ;;  %v22675_v19 = vand.u32 4294901760, %v15549_v24  ;;  %v15798_v12 = vpack.c.bf16 %v1882_v39, %v1870_v56  ;;  %v1875_v51 = vsub.f32 %v15534_v33, %v22671_v2 }
  0x7f   :  { %23765 = vst [vmem:[#allocation98_spill] sm:$0xff] %v15794_v4  ;;  %v1033_v20 = vand.u32 4294901760, %v1032_v34  ;;  %v1887_v28 = vsub.f32 %v15539_v53, %v22673_v17  ;;  %v22676_v56 = vand.u32 4294901760, %v15554_v59  ;;  %v22678_v39 = vand.u32 4294901760, %v15559_v26 }
  0x80   :  { %23766 = vst [vmem:[#allocation99_spill] sm:$0xff] %v15798_v12  ;;  %v1038_v29 = vsub.f32 %v15544_v21, %v22674_v42  ;;  %v1050_v61 = vsub.f32 %v15549_v24, %v22675_v19  ;;  %v1876_v34 = vand.u32 4294901760, %v1875_v51  ;;  %v22677_v13 = vand.u32 4294901760, %v15564_v9 }
  0x81   :  { %v15814_v15 = vpack.c.bf16 %v1033_v20, %v1021_v1  ;;  %v1888_v2 = vand.u32 4294901760, %v1887_v28  ;;  %v1893_v42 = vsub.f32 %v15554_v59, %v22676_v56  ;;  %v1905_v19 = vsub.f32 %v15559_v26, %v22678_v39 }
  0x82   :  { %v1039_v12 = vand.u32 4294901760, %v1038_v29  ;;  %v1051_v17 = vand.u32 4294901760, %v1050_v61  ;;  %v1044_v1 = vsub.f32 %v15564_v9, %v22677_v13  ;;  %v22679_v28 = vand.u32 4294901760, %v15569_v14 }
  0x83   :  { %23767 = vst [vmem:[#allocation100_spill] sm:$0xff] %v15814_v15  ;;  %v15823_v4 = vpack.c.bf16 %v1888_v2, %v1876_v34  ;;  %v22680_v20 = vand.u32 4294901760, %v15572_v23  ;;  %v1894_v29 = vand.u32 4294901760, %v1893_v42  ;;  %v1906_v61 = vand.u32 4294901760, %v1905_v19 }
  0x84   :  { %v15830_v51 = vpack.c.bf16 %v1051_v17, %v1039_v12  ;;  %v22681_v56 = vand.u32 4294901760, %v15575_v55  ;;  %v1045_v15 = vand.u32 4294901760, %v1044_v1  ;;  %v1056_v2 = vsub.f32 %v15569_v14, %v22679_v28 }
  0x85   :  { %23768 = vst [vmem:[#allocation101_spill] sm:$0xff] %v15823_v4  ;;  %v1899_v34 = vsub.f32 %v15572_v23, %v22680_v20  ;;  %v22682_v13 = vand.u32 4294901760, %v15577_v35  ;;  %v15840_v39 = vpack.c.bf16 %v1906_v61, %v1894_v29  ;;  %v22683_v42 = vand.u32 4294901760, %v15579_v31 }
  0x86   :  { %23769 = vst [vmem:[#allocation102_spill] sm:$0xff] %v15830_v51  ;;  %v1911_v17 = vsub.f32 %v15575_v55, %v22681_v56  ;;  %v22684_v19 = vand.u32 4294901760, %v15581_v3  ;;  %v1057_v12 = vand.u32 4294901760, %v1056_v2  ;;  %v22685_v20 = vand.u32 4294901760, %v15583_v5 }
  0x87   :  { %23770 = vst [vmem:[#allocation103_spill] sm:$0xff] %v15840_v39  ;;  %v1900_v1 = vand.u32 4294901760, %v1899_v34  ;;  %v1062_v28 = vsub.f32 %v15577_v35, %v22682_v13  ;;  %v1074_v29 = vsub.f32 %v15579_v31, %v22683_v42  ;;  %v22687_v56 = vand.u32 4294901760, %v15585_v37 }
  0x88   :  { %v1912_v51 = vand.u32 4294901760, %v1911_v17  ;;  %v1917_v61 = vsub.f32 %v15581_v3, %v22684_v19  ;;  %v15858_v39 = vpack.c.bf16 %v1057_v12, %v1045_v15  ;;  %v1929_v34 = vsub.f32 %v15583_v5, %v22685_v20 }
  0x89   :  { %v1063_v2 = vand.u32 4294901760, %v1062_v28  ;;  %v22686_v13 = vand.u32 4294901760, %v15587_v27  ;;  %v1075_v4 = vand.u32 4294901760, %v1074_v29  ;;  %v1068_v42 = vsub.f32 %v15585_v37, %v22687_v56 }
  0x8a   :  { %23771 = vst [vmem:[#allocation104_spill] sm:$0xff] %v15858_v39  ;;  %v15864_v17 = vpack.c.bf16 %v1912_v51, %v1900_v1  ;;  %v1918_v25 = vand.u32 4294901760, %v1917_v61  ;;  %v1930_v19 = vand.u32 4294901760, %v1929_v34  ;;  %v22688_v28 = vand.u32 4294901760, %v15589_v38  ;;  %v23773_v51 = vld [vmem:[#allocation3_spill] sm:$0xff]  ;;  %v23774_v1 = vld [vmem:[#allocation4_spill] sm:$0xff] }
  0x8b   :  { %v1080_v15 = vsub.f32 %v15587_v27, %v22686_v13  ;;  %v22689_v12 = vand.u32 4294901760, %v15591_v7  ;;  %v15874_v20 = vpack.c.bf16 %v1075_v4, %v1063_v2  ;;  %v1069_v39 = vand.u32 4294901760, %v1068_v42  ;;  %v23775_v4 = vld [vmem:[#allocation6_spill] sm:$0xff]  ;;  %v23777_v61 = vld [vmem:[#allocation21_spill] sm:$0xff] }
  0x8c   :  { %23772 = vst [vmem:[#allocation105_spill] sm:$0xff] %v15864_v17  ;;  %v15880_v17 = vpack.c.bf16 %v1930_v19, %v1918_v25  ;;  %v1923_v13 = vsub.f32 %v15589_v38, %v22688_v28  ;;  %v23788_v2 = vld [vmem:[#allocation38_spill] sm:$0xff] }
  0x8d   :  { %v1081_v34 = vand.u32 4294901760, %v1080_v15  ;;  %v1935_v56 = vsub.f32 %v15591_v7, %v22689_v12 }
  0x8e   :  { %v1924_v15 = vand.u32 4294901760, %v1923_v13  ;;  %v23780_v13 = vld [vmem:[#allocation25_spill] sm:$0xff] }
  0x8f   :  { %v15896_v19 = vpack.c.bf16 %v1081_v34, %v1069_v39  ;;  %v1936_v28 = vand.u32 4294901760, %v1935_v56  ;;  %v23779_v39 = vld [vmem:[#allocation24_spill] sm:$0xff] }
  0x90   :  { %v23790_v34 = vld [vmem:[#allocation68_spill] sm:$0xff] }
  0x91   :  { %v15908_v25 = vpack.c.bf16 %v1936_v28, %v1924_v15  ;;  %v23789_v28 = vld [vmem:[#allocation39_spill] sm:$0xff] }
  0xe2   :  { %v12277_v21 = vpop.f32.mrb[0].mxu1 }
  0xe3   :  { %v139_v56 = vpop.f32.mrb[1].mxu1 }
  0xe6   :  { %v12280_v59 = vpop.f32.mrb[2].mxu1 }
  0xe7   :  { %v159_v26 = vpop.f32.mrb[3].mxu1 }
 0x106   :  { %v12327_v29 = vpop.f32.mrb[0].mxu0 }
 0x107   :  { %v14515_v9 = vadd.f32 %v12327_v29, %v12277_v21  ;;  %v632_v14 = vpop.f32.mrb[1].mxu0 }
 0x108   :  { %v15952_v12 = vadd.f32 %v632_v14, %v139_v56  ;;  %v23795_v14 = vld [vmem:[#allocation85_spill] sm:$0xff]  ;;  %v23796_v56 = vld [vmem:[#allocation86_spill] sm:$0xff] }
 0x109   :  { %v15954_v23 = vand.u32 4294901760, %v14515_v9 }
 0x10a   :  { %23791 = vst [vmem:[#allocation3_spill] sm:$0xff] %v15952_v12  ;;  %v12330_v42 = vpop.f32.mrb[2].mxu0  ;;  %v23810_v12 = vld [vmem:[#allocation43_spill] sm:$0xff] }
 0x10b   :  { %23792 = vst [vmem:[#allocation4_spill] sm:$0xff] %v15954_v23  ;;  %v15957_v10 = vsub.f32 %v14515_v9, %v15954_v23  ;;  %v15959_v3 = vadd.f32 %v12330_v42, %v12280_v59  ;;  %v644_v41 = vpop.f32.mrb[3].mxu0  ;;  %v23797_v9 = vld [vmem:[#allocation87_spill] sm:$0xff]  ;;  %v23798_v59 = vld [vmem:[#allocation88_spill] sm:$0xff]  ;;  %v23799_v42 = vmov 0.0  }
 0x10c   :  { %v15961_v37 = vadd.f32 %v644_v41, %v159_v26  ;;  %v23800_v41 = vld [vmem:[#allocation89_spill] sm:$0xff]  ;;  %v23801_v26 = vld [vmem:[#allocation90_spill] sm:$0xff] }
 0x10d   :  { %23793 = vst [vmem:[#allocation6_spill] sm:$0xff] %v15959_v3  ;;  %v15964_v15 = vand.u32 4294901760, %v15957_v10  ;;  %v23802_v3 = vld [vmem:[#allocation91_spill] sm:$0xff] }
 0x10e   :  { %23794 = vst [vmem:[#allocation21_spill] sm:$0xff] %v15961_v37  ;;  %v23809_v37 = vld [vmem:[#allocation41_spill] sm:$0xff] }
 0x10f   :  { %v883_v21 = vsub.f32 %v15957_v10, %v15964_v15 }
 0x111   :  { %v884_v29 = vand.u32 4294901760, %v883_v21  ;;  %v23803_v21 = vld [vmem:[#allocation92_spill] sm:$0xff] }
 0x113   :  { %885 = vmatmul.mubr.f32.vlgmr.msra.gmra.mrb[4].mxu1 %v884_v29  ;;  %1740 = vmatmul.mubr.f32.vlgmr.msra.gmra.mrb[4].mxu0 %v884_v29  ;;  %v23804_v29 = vld [vmem:[#allocation28_spill] sm:$0xff] }
 0x114   :  { %12390 = vmatpush1.bf16.msra.mxu1 %v23795_v14  ;;  %12582 = vmatpush1.bf16.msra.mxu0 %v23796_v56  ;;  %v23805_v14 = vld [vmem:[#allocation31_spill] sm:$0xff]  ;;  %v23806_v56 = vld [vmem:[#allocation93_spill] sm:$0xff] }
 0x115   :  { %12392 = vmatprep.subr.bf16.mxu1 %v23797_v9  ;;  %12584 = vmatprep.subr.bf16.mxu0 %v23798_v59  ;;  %v23807_v9 = vld [vmem:[#allocation94_spill] sm:$0xff]  ;;  %v23808_v59 = vld [vmem:[#allocation40_spill] sm:$0xff] }
 0x116   :  { %1115 = vmatprep.mubr.f32.mxu1 %v23799_v42  ;;  %1970 = vmatprep.mubr.f32.mxu0 %v23799_v42 }
 0x118   :  { %12394 = vmatpush1.bf16.msra.mxu1 %v23800_v41  ;;  %12586 = vmatpush1.bf16.msra.mxu0 %v23801_v26  ;;  %v23811_v41 = vld [vmem:[#allocation95_spill] sm:$0xff]  ;;  %v23812_v26 = vld [vmem:[#allocation96_spill] sm:$0xff] }
 0x119   :  { %12396 = vmatprep.subr.bf16.mxu1 %v23802_v3  ;;  %12588 = vmatprep.subr.bf16.mxu0 %v23803_v21  ;;  %v23813_v3 = vld [vmem:[#allocation97_spill] sm:$0xff]  ;;  %v23814_v21 = vld [vmem:[#allocation98_spill] sm:$0xff] }
 0x11c   :  { %12398 = vmatpush1.bf16.msra.mxu1 %v23804_v29  ;;  %12590 = vmatpush1.bf16.msra.mxu0 %v23805_v14  ;;  %v23815_v29 = vld [vmem:[#allocation99_spill] sm:$0xff]  ;;  %v23816_v14 = vld [vmem:[#allocation100_spill] sm:$0xff] }
 0x11d   :  { %12400 = vmatprep.subr.bf16.mxu1 %v23806_v56  ;;  %12592 = vmatprep.subr.bf16.mxu0 %v23807_v9  ;;  %v23817_v56 = vld [vmem:[#allocation101_spill] sm:$0xff]  ;;  %v23818_v9 = vld [vmem:[#allocation102_spill] sm:$0xff] }
 0x120   :  { %12402 = vmatpush1.bf16.msra.mxu1 %v23808_v59  ;;  %12594 = vmatpush1.bf16.msra.mxu0 %v23809_v37  ;;  %v23819_v59 = vld [vmem:[#allocation103_spill] sm:$0xff]  ;;  %v23820_v37 = vld [vmem:[#allocation104_spill] sm:$0xff] }
 0x121   :  { %12404 = vmatprep.subr.bf16.mxu1 %v23810_v12  ;;  %12596 = vmatprep.subr.bf16.mxu0 %v23811_v41  ;;  %v23821_v12 = vld [vmem:[#allocation105_spill] sm:$0xff]  ;;  %v23822_v41 = vpack.c.bf16 %v23774_v1, %v23773_v51 }
 0x124   :  { %12406 = vmatpush1.bf16.msra.mxu1 %v23812_v26  ;;  %12598 = vmatpush1.bf16.msra.mxu0 %v23813_v3  ;;  %v23823_v26 = vpack.c.bf16 %v14924_v63, %v14919_v62  ;;  %v23828_v3 = vld [vmem:[#allocation9_spill] sm:$0xff] }
 0x125   :  { %12408 = vmatprep.subr.bf16.mxu1 %v23814_v21  ;;  %12600 = vmatprep.subr.bf16.mxu0 %v23815_v29  ;;  %v23830_v29 = vpack.c.bf16 %v15002_v48, %v14997_v47 }
 0x128   :  { %12410 = vmatpush1.bf16.msra.mxu1 %v23816_v14  ;;  %12602 = vmatpush1.bf16.msra.mxu0 %v23817_v56  ;;  %v23831_v14 = vld [vmem:[#allocation13_spill] sm:$0xff]  ;;  %v23832_v56 = vld [vmem:[#allocation12_spill] sm:$0xff] }
 0x129   :  { %12412 = vmatprep.subr.bf16.mxu1 %v23818_v9  ;;  %12604 = vmatprep.subr.bf16.mxu0 %v23819_v59  ;;  %v23833_v9 = vpack.c.bf16 %v23831_v14, %v23832_v56  ;;  %v23834_v59 = vld [vmem:[#allocation14_spill] sm:$0xff] }
 0x12c   :  { %12414 = vmatpush1.bf16.msra.mxu1 %v23820_v37  ;;  %12606 = vmatpush1.bf16.msra.mxu0 %v23821_v12  ;;  %v23835_v37 = vpack.c.bf16 %v15041_v8, %v23834_v59  ;;  %v23836_v12 = vld [vmem:[#allocation18_spill] sm:$0xff] }
 0x12d   :  { %12416 = vmatprep.subr.bf16.mxu1 %v15874_v20  ;;  %12608 = vmatprep.subr.bf16.mxu0 %v15880_v17  ;;  %v23824_v20 = vpack.c.bf16 %v14944_v6, %v23775_v4  ;;  %v23825_v17 = vld [vmem:[#allocation7_spill] sm:$0xff] }
 0x130   :  { %12418 = vmatpush1.bf16.msra.mxu1 %v15896_v19  ;;  %12610 = vmatpush1.bf16.msra.mxu0 %v15908_v25  ;;  %v23826_v19 = vpack.c.bf16 %v14965_v18, %v23825_v17  ;;  %v23827_v25 = vld [vmem:[#allocation10_spill] sm:$0xff] }
 0x131   :  { %12420 = vmatprep.subr.bf16.mxu1 %v23822_v41  ;;  %12612 = vmatprep.subr.bf16.mxu0 %v23823_v26  ;;  %v23829_v21 = vpack.c.bf16 %v23827_v25, %v23828_v3  ;;  %v23837_v41 = vld [vmem:[#allocation17_spill] sm:$0xff] }
 0x132   :  { %v23838_v26 = vpack.c.bf16 %v23836_v12, %v23837_v41 }
 0x133   :  { %1117 = vmatmul.mubr.f32.vlgmr.msra.gmra.mrb[4].mxu1 %v15954_v23  ;;  %1972 = vmatmul.mubr.f32.vlgmr.msra.gmra.mrb[4].mxu0 %v15954_v23  ;;  %v23843_v23 = vpack.c.bf16 %v23780_v13, %v23779_v39 }
 0x134   :  { %12422 = vmatpush1.bf16.msra.mxu1 %v23824_v20  ;;  %12614 = vmatpush1.bf16.msra.mxu0 %v23826_v19  ;;  %v23839_v20 = vld [vmem:[#allocation20_spill] sm:$0xff]  ;;  %v23840_v19 = vld [vmem:[#allocation19_spill] sm:$0xff] }
 0x135   :  { %12424 = vmatprep.subr.bf16.mxu1 %v23829_v21  ;;  %12616 = vmatprep.subr.bf16.mxu0 %v23830_v29  ;;  %v23841_v21 = vpack.c.bf16 %v23839_v20, %v23840_v19  ;;  %v23842_v29 = vpack.c.bf16 %v23778_v40, %v23777_v61 }
 0x136   :  { %1251 = vmatprep.mubr.f32.mxu1 %v23799_v42  ;;  %2106 = vmatprep.mubr.f32.mxu0 %v23799_v42 }
 0x138   :  { %12426 = vmatpush1.bf16.msra.mxu1 %v23833_v9  ;;  %12618 = vmatpush1.bf16.msra.mxu0 %v23835_v37  ;;  %v23844_v9 = vld [vmem:[#allocation27_spill] sm:$0xff]  ;;  %v23846_v37 = vpack.c.bf16 %v23783_v58, %v23782_v57 }
 0x139   :  { %12428 = vmatprep.subr.bf16.mxu1 %v23838_v26  ;;  %12620 = vmatprep.subr.bf16.mxu0 %v23841_v21  ;;  %v23845_v8 = vpack.c.bf16 %v23741_v45, %v23844_v9  ;;  %v23847_v26 = vpack.c.bf16 %v23784_v60, %v23744_v52  ;;  %v23848_v21 = vpack.c.bf16 %v23786_v11, %v23785_v0 }
 0x13c   :  { %12430 = vmatpush1.bf16.msra.mxu1 %v23842_v29  ;;  %12622 = vmatpush1.bf16.msra.mxu0 %v23843_v23  ;;  %v23849_v29 = vpack.c.bf16 %v23788_v2, %v23787_v22  ;;  %v23850_v23 = vpack.c.bf16 %v23754_v30, %v23789_v28 }
 0x13d   :  { %12432 = vmatprep.subr.bf16.mxu1 %v23845_v8  ;;  %12624 = vmatprep.subr.bf16.mxu0 %v23846_v37  ;;  %v23851_v8 = vpack.c.bf16 %v23758_v50, %v23756_v46  ;;  %v23852_v37 = vpack.c.bf16 %v23761_v32, %v23759_v44  ;;  %v23860_v44 = vld [vmem:[#allocation74_spill] sm:$0xff] }
 0x140   :  { %12434 = vmatpush1.bf16.msra.mxu1 %v23847_v26  ;;  %12626 = vmatpush1.bf16.msra.mxu0 %v23848_v21  ;;  %v23853_v26 = vpack.c.bf16 %v15509_v16, %v23790_v34  ;;  %v23854_v21 = vpack.c.bf16 %v15519_v54, %v15514_v36  ;;  %v23863_v34 = vld [vmem:[#allocation76_spill] sm:$0xff] }
 0x141   :  { %12436 = vmatprep.subr.bf16.mxu1 %v23849_v29  ;;  %12628 = vmatprep.subr.bf16.mxu0 %v23850_v23  ;;  %v23855_v29 = vpack.c.bf16 %v15529_v43, %v15524_v49  ;;  %v23856_v23 = vpack.c.bf16 %v15539_v53, %v15534_v33 }
 0x144   :  { %12438 = vmatpush1.bf16.msra.mxu1 %v23851_v8  ;;  %12630 = vmatpush1.bf16.msra.mxu0 %v23852_v37  ;;  %v23857_v8 = vld [vmem:[#allocation72_spill] sm:$0xff]  ;;  %v23859_v37 = vld [vmem:[#allocation75_spill] sm:$0xff] }
 0x145   :  { %12440 = vmatprep.subr.bf16.mxu1 %v23853_v26  ;;  %12632 = vmatprep.subr.bf16.mxu0 %v23854_v21  ;;  %v23858_v32 = vpack.c.bf16 %v15549_v24, %v23857_v8  ;;  %v23861_v16 = vpack.c.bf16 %v23859_v37, %v23860_v44  ;;  %v23862_v26 = vld [vmem:[#allocation77_spill] sm:$0xff]  ;;  %v23865_v21 = vld [vmem:[#allocation78_spill] sm:$0xff] }
 0x146   :  { %v23864_v54 = vpack.c.bf16 %v23862_v26, %v23863_v34  ;;  %v23866_v43 = vpack.c.bf16 %v15575_v55, %v23865_v21  ;;  %v23874_v55 = vld [vmem:[#allocation46_spill] sm:$0xff] }
 0x148   :  { %12442 = vmatpush1.bf16.msra.mxu1 %v23855_v29  ;;  %12634 = vmatpush1.bf16.msra.mxu0 %v23856_v23  ;;  %v23867_v29 = vpack.c.bf16 %v15579_v31, %v15577_v35  ;;  %v23868_v23 = vld [vmem:[#allocation80_spill] sm:$0xff] }
 0x149   :  { %12444 = vmatprep.subr.bf16.mxu1 %v23858_v32  ;;  %12636 = vmatprep.subr.bf16.mxu0 %v23861_v16  ;;  %v23869_v24 = vpack.c.bf16 %v15583_v5, %v23868_v23  ;;  %v23870_v32 = vld [vmem:[#allocation81_spill] sm:$0xff]  ;;  %v23872_v16 = vpack.c.bf16 %v15591_v7, %v15589_v38  ;;  %v23889_v38 = vld [vmem:[#allocation36_spill] sm:$0xff] }
 0x14a   :  { %v23871_v37 = vpack.c.bf16 %v15587_v27, %v23870_v32  ;;  %v23878_v27 = vld [vmem:[#allocation48_spill] sm:$0xff]  ;;  %v23888_v7 = vld [vmem:[#allocation53_spill] sm:$0xff]  ;;  %v23907_v32 = vld [vmem:[#allocation66_spill] sm:$0xff] }
 0x14c   :  { %12446 = vmatpush1.bf16.msra.mxu1 %v23864_v54  ;;  %12638 = vmatpush1.bf16.msra.mxu0 %v23866_v43  ;;  %v23873_v54 = vld [vmem:[#allocation2_spill] sm:$0xff]  ;;  %v23875_v43 = vld [vmem:[#allocation5_spill] sm:$0xff] }
 0x14d   :  { %12448 = vmatprep.subr.bf16.mxu1 %v23867_v29  ;;  %12640 = vmatprep.subr.bf16.mxu0 %v23869_v24  ;;  %v23876_v29 = vld [vmem:[#allocation47_spill] sm:$0xff]  ;;  %v23877_v24 = vld [vmem:[#allocation8_spill] sm:$0xff] }
 0x150   :  { %12450 = vmatpush1.bf16.msra.mxu1 %v23871_v37  ;;  %12642 = vmatpush1.bf16.msra.mxu0 %v23872_v16  ;;  %v23879_v37 = vld [vmem:[#allocation11_spill] sm:$0xff]  ;;  %v23880_v16 = vld [vmem:[#allocation49_spill] sm:$0xff] }
 0x151   :  { %12452 = vmatprep.subr.bf16.mxu1 %v23873_v54  ;;  %12644 = vmatprep.subr.bf16.mxu0 %v23874_v55  ;;  %v23881_v55 = vld [vmem:[#allocation16_spill] sm:$0xff]  ;;  %v23882_v54 = vld [vmem:[#allocation50_spill] sm:$0xff] }
 0x153   :  { %1254 = vmatmul.mubr.f32.vlgmr.msra.gmra.mrb[4].mxu1 %v15957_v10  ;;  %2109 = vmatmul.mubr.f32.vlgmr.msra.gmra.mrb[4].mxu0 %v15957_v10  ;;  %v23883_v10 = vld [vmem:[#allocation22_spill] sm:$0xff] }
 0x154   :  { %12454 = vmatpush1.bf16.msra.mxu1 %v23875_v43  ;;  %12646 = vmatpush1.bf16.msra.mxu0 %v23876_v29  ;;  %v23884_v43 = vld [vmem:[#allocation51_spill] sm:$0xff]  ;;  %v23885_v29 = vld [vmem:[#allocation26_spill] sm:$0xff] }
 0x155   :  { %12456 = vmatprep.subr.bf16.mxu1 %v23877_v24  ;;  %12648 = vmatprep.subr.bf16.mxu0 %v23878_v27  ;;  %v23886_v24 = vld [vmem:[#allocation52_spill] sm:$0xff] }
 0x156   :  { %1356 = vmatprep.mubr.f32.mxu1 %v23799_v42  ;;  %2211 = vmatprep.mubr.f32.mxu0 %v23799_v42  ;;  %v23887_v27 = vld [vmem:[#allocation32_spill] sm:$0xff] }
 0x158   :  { %12458 = vmatpush1.bf16.msra.mxu1 %v23879_v37  ;;  %12650 = vmatpush1.bf16.msra.mxu0 %v23880_v16  ;;  %v23890_v37 = vld [vmem:[#allocation54_spill] sm:$0xff] }
 0x159   :  { %12460 = vmatprep.subr.bf16.mxu1 %v23881_v55  ;;  %12652 = vmatprep.subr.bf16.mxu0 %v23882_v54  ;;  %v23891_v16 = vld [vmem:[#allocation42_spill] sm:$0xff]  ;;  %v23892_v55 = vld [vmem:[#allocation55_spill] sm:$0xff]  ;;  %v23893_v54 = vld [vmem:[#allocation56_spill] sm:$0xff] }
 0x15c   :  { %12462 = vmatpush1.bf16.msra.mxu1 %v23883_v10  ;;  %12654 = vmatpush1.bf16.msra.mxu0 %v23884_v43  ;;  %v23894_v10 = vld [vmem:[#allocation57_spill] sm:$0xff]  ;;  %v23895_v43 = vld [vmem:[#allocation58_spill] sm:$0xff] }
 0x15d   :  { %12464 = vmatprep.subr.bf16.mxu1 %v23885_v29  ;;  %12656 = vmatprep.subr.bf16.mxu0 %v23886_v24  ;;  %v23896_v29 = vld [vmem:[#allocation59_spill] sm:$0xff]  ;;  %v23897_v24 = vld [vmem:[#allocation60_spill] sm:$0xff] }
 0x160   :  { %12466 = vmatpush1.bf16.msra.mxu1 %v23887_v27  ;;  %12658 = vmatpush1.bf16.msra.mxu0 %v23888_v7  ;;  %v23898_v27 = vld [vmem:[#allocation61_spill] sm:$0xff]  ;;  %v23899_v7 = vld [vmem:[#allocation62_spill] sm:$0xff] }
 0x161   :  { %12468 = vmatprep.subr.bf16.mxu1 %v23889_v38  ;;  %12660 = vmatprep.subr.bf16.mxu0 %v23890_v37  ;;  %v23900_v38 = vld [vmem:[#allocation63_spill] sm:$0xff]  ;;  %v23901_v37 = vld [vmem:[#allocation64_spill] sm:$0xff] }
 0x164   :  { %12470 = vmatpush1.bf16.msra.mxu1 %v23891_v16  ;;  %12662 = vmatpush1.bf16.msra.mxu0 %v23892_v55  ;;  %v23902_v16 = vld [vmem:[#allocation65_spill] sm:$0xff] }
 0x165   :  { %12472 = vmatprep.subr.bf16.mxu1 %v23893_v54  ;;  %12664 = vmatprep.subr.bf16.mxu0 %v23894_v10  ;;  %v23903_v54 = vand.u32 4294901760, %v23773_v51  ;;  %v23904_v10 = vand.u32 4294901760, %v23774_v1  ;;  %v23912_v51 = vand.u32 4294901760, %v14965_v18  ;;  %v23918_v18 = vand.u32 4294901760, %v23831_v14 }
 0x166   :  { %v23926_v14 = vand.u32 4294901760, %v23777_v61 }
 0x167   :  { %v12483_v55 = vpack.c.bf16 %v23904_v10, %v23903_v54 }
 0x168   :  { %12474 = vmatpush1.bf16.msra.mxu1 %v23895_v43  ;;  %12666 = vmatpush1.bf16.msra.mxu0 %v23896_v29  ;;  %v23905_v43 = vand.u32 4294901760, %v14919_v62  ;;  %v23906_v29 = vand.u32 4294901760, %v14924_v63  ;;  %v23913_v62 = vand.u32 4294901760, %v23828_v3  ;;  %v23914_v63 = vand.u32 4294901760, %v23827_v25 }
 0x169   :  { %12476 = vmatprep.subr.bf16.mxu1 %v23897_v24  ;;  %12668 = vmatprep.subr.bf16.mxu0 %v23898_v27  ;;  %v23908_v27 = vld [vmem:[#allocation67_spill] sm:$0xff] }
 0x16a   :  { %v12675_v24 = vpack.c.bf16 %v23906_v29, %v23905_v43  ;;  %v12487_v54 = vpack.c.bf16 %v23914_v63, %v23913_v62  ;;  %v23915_v43 = vand.u32 4294901760, %v14997_v47  ;;  %v23916_v29 = vand.u32 4294901760, %v15002_v48  ;;  %v23934_v62 = vld [vmem:[#allocation3_spill] sm:$0xff] }
 0x16b   :  { %v23922_v47 = vand.u32 4294901760, %v23837_v41  ;;  %v23923_v48 = vand.u32 4294901760, %v23836_v12  ;;  %v23928_v41 = vand.u32 4294901760, %v23779_v39  ;;  %v23929_v12 = vand.u32 4294901760, %v23780_v13 }
 0x16c   :  { %12478 = vmatpush1.bf16.msra.mxu1 %v23899_v7  ;;  %12670 = vmatpush1.bf16.msra.mxu0 %v23900_v38  ;;  %v23909_v38 = vand.u32 4294901760, %v23775_v4  ;;  %v12679_v4 = vpack.c.bf16 %v23916_v29, %v23915_v43  ;;  %v23936_v39 = vand.u32 4294901760, %v23744_v52  ;;  %v23937_v13 = vand.u32 4294901760, %v23784_v60 }
 0x16d   :  { %12480 = vmatprep.subr.bf16.mxu1 %v23901_v37  ;;  %12672 = vmatprep.subr.bf16.mxu0 %v23902_v16  ;;  %v23910_v37 = vand.u32 4294901760, %v14944_v6  ;;  %v23911_v16 = vand.u32 4294901760, %v23825_v17  ;;  %v23917_v6 = vand.u32 4294901760, %v23832_v56  ;;  %v23920_v17 = vld [vmem:[#allocation15_spill] sm:$0xff]  ;;  %v23942_v29 = vand.u32 4294901760, %v23789_v28 }
 0x16e   :  { %v23921_v25 = vand.u32 4294901760, %v23920_v17  ;;  %v12497_v63 = vpack.c.bf16 %v23937_v13, %v23936_v39  ;;  %v657_v17 = vld [vmem:[%s22479_s4 + $0x18] sm:$0xff]  ;;  %v23964_v39 = vand.u32 4294901760, %v23857_v8  ;;  %v23970_v8 = vand.u32 4294901760, %v23863_v34  ;;  %v667_v34 = vld [vmem:[%s22479_s4 + $0x68] sm:$0xff] }
 0x16f   :  { %v12485_v7 = vpack.c.bf16 %v23910_v37, %v23909_v38  ;;  %v12677_v1 = vpack.c.bf16 %v23912_v51, %v23911_v16  ;;  %v23919_v38 = vand.u32 4294901760, %v23834_v59  ;;  %v23927_v59 = vand.u32 4294901760, %v23778_v40  ;;  %v23965_v13 = vld [vmem:[#allocation73_spill] sm:$0xff] }
 0x170   :  { %12482 = vmatpush1.bf16.msra.mxu1 %v23907_v32  ;;  %12674 = vmatpush1.bf16.msra.mxu0 %v23908_v27  ;;  %v12685_v16 = vpack.c.bf16 %v23929_v12, %v23928_v41  ;;  %v23932_v51 = vand.u32 4294901760, %v23782_v57  ;;  %v16197_v40 = vand.u32 4294901760, %v23934_v62  ;;  %v23940_v57 = vand.u32 4294901760, %v23787_v22  ;;  %v23960_v12 = vld [vmem:[#allocation71_spill] sm:$0xff] }
 0x171   :  { %12484 = vmatprep.subr.bf16.mxu1 %v12483_v55  ;;  %12676 = vmatprep.subr.bf16.mxu0 %v12675_v24  ;;  %v12489_v55 = vpack.c.bf16 %v23918_v18, %v23917_v6  ;;  %v12681_v3 = vpack.c.bf16 %v23921_v25, %v23919_v38  ;;  %v12491_v24 = vpack.c.bf16 %v23923_v48, %v23922_v47  ;;  %v23946_v22 = vand.u32 4294901760, %v23758_v50  ;;  %v23947_v6 = vld [vmem:[#allocation44_spill] sm:$0xff]  ;;  %v23949_v18 = vld [vmem:[#allocation45_spill] sm:$0xff]  ;;  %v659_v38 = vld [vmem:[%s22479_s4 + $0x28] sm:$0xff] }
 0x172   :  { %v12493_v37 = vpack.c.bf16 %v23927_v59, %v23926_v14  ;;  %23935 = vst [vmem:[#allocation23_spill] sm:$0xff] %v16197_v40  ;;  %v16217_v60 = vsub.f32 %v23934_v62, %v16197_v40  ;;  %v23948_v28 = vand.u32 4294901760, %v23947_v6  ;;  %v23951_v50 = vld [vmem:[#allocation68_spill] sm:$0xff]  ;;  %v654_v14 = vld [vmem:[%s22479_s4] sm:$0xff]  ;;  %v23959_v41 = vand.u32 4294901760, %v15524_v49 }
 0x173   :  { %1360 = vmatmul.mubr.f32.vlgmr.msra.gmra.mrb[4].mxu1 %v15964_v15  ;;  %2215 = vmatmul.mubr.f32.vlgmr.msra.gmra.mrb[4].mxu0 %v15964_v15  ;;  %v23925_v15 = vand.u32 4294901760, %v23839_v20  ;;  %v23930_v20 = vand.u32 4294901760, %v23844_v9  ;;  %v23938_v9 = vand.u32 4294901760, %v23785_v0  ;;  %v655_v0 = vld [vmem:[%s22479_s4 + $0x8] sm:$0xff]  ;;  %v23952_v25 = vand.u32 4294901760, %v23951_v50  ;;  %v658_v59 = vld [vmem:[%s22479_s4 + $0x20] sm:$0xff] }
 0x174   :  { %12486 = vmatpush1.bf16.msra.mxu1 %v12485_v7  ;;  %12678 = vmatpush1.bf16.msra.mxu0 %v12677_v1  ;;  %v23924_v7 = vand.u32 4294901760, %v23840_v19  ;;  %v23931_v19 = vand.u32 4294901760, %v23741_v45  ;;  %v23933_v1 = vand.u32 4294901760, %v23783_v58  ;;  %v23939_v45 = vand.u32 4294901760, %v23786_v11  ;;  %23944 = vst [vmem:[#allocation24_spill] sm:$0xff] %v16217_v60 }
 0x175   :  { %12488 = vmatprep.subr.bf16.mxu1 %v12487_v54  ;;  %12680 = vmatprep.subr.bf16.mxu0 %v12679_v4  ;;  %v23941_v58 = vand.u32 4294901760, %v23788_v2  ;;  %v23943_v4 = vand.u32 4294901760, %v23754_v30  ;;  %v23945_v11 = vand.u32 4294901760, %v23756_v46  ;;  %v23950_v30 = vand.u32 4294901760, %v23949_v18  ;;  %v661_v46 = vld [vmem:[%s22479_s4 + $0x38] sm:$0xff]  ;;  %v663_v18 = vld [vmem:[%s22479_s4 + $0x48] sm:$0xff] }
 0x176   :  { %v12683_v56 = vpack.c.bf16 %v23925_v15, %v23924_v7  ;;  %1526 = vmatprep.mubr.f32.mxu1 %v23799_v42  ;;  %2381 = vmatprep.mubr.f32.mxu0 %v23799_v42  ;;  %v12495_v10 = vpack.c.bf16 %v23931_v19, %v23930_v20  ;;  %v12687_v61 = vpack.c.bf16 %v23933_v1, %v23932_v51  ;;  %v23956_v7 = vld [vmem:[#allocation70_spill] sm:$0xff]  ;;  %v23963_v19 = vand.u32 4294901760, %v15539_v53  ;;  %v656_v53 = vld [vmem:[%s22479_s4 + $0x10] sm:$0xff] }
 0x177   :  { %v12689_v54 = vpack.c.bf16 %v23939_v45, %v23938_v9  ;;  %v12499_v43 = vpack.c.bf16 %v23941_v58, %v23940_v57  ;;  %v12691_v52 = vpack.c.bf16 %v23943_v4, %v23942_v29  ;;  %v12501_v2 = vpack.c.bf16 %v23946_v22, %v23945_v11  ;;  %v23968_v45 = vld [vmem:[#allocation75_spill] sm:$0xff] }
 0x178   :  { %12490 = vmatpush1.bf16.msra.mxu1 %v12489_v55  ;;  %12682 = vmatpush1.bf16.msra.mxu0 %v12681_v3  ;;  %v12693_v55 = vpack.c.bf16 %v23950_v30, %v23948_v28  ;;  %v23953_v3 = vld [vmem:[#allocation69_spill] sm:$0xff]  ;;  %v23957_v15 = vand.u32 4294901760, %v23956_v7  ;;  %v2493_v51 = vand.u32 4294901760, %v655_v0  ;;  %v2497_v1 = vand.u32 4294901760, %v659_v38 }
 0x179   :  { %12492 = vmatprep.subr.bf16.mxu1 %v12491_v24  ;;  %12684 = vmatprep.subr.bf16.mxu0 %v12683_v56  ;;  %v23954_v47 = vand.u32 4294901760, %v23953_v3  ;;  %v23955_v24 = vand.u32 4294901760, %v15514_v36  ;;  %v23962_v36 = vand.u32 4294901760, %v15534_v33  ;;  %v3352_v62 = vand.u32 4294901760, %v661_v46 }
 0x17a   :  { %v23967_v49 = vand.u32 4294901760, %v23860_v44  ;;  %v2495_v33 = vand.u32 4294901760, %v654_v14  ;;  %v2499_v58 = vand.u32 4294901760, %v658_v59  ;;  %v23971_v29 = vand.u32 4294901760, %v23862_v26 }
 0x17b   :  { %v12503_v48 = vpack.c.bf16 %v23954_v47, %v23952_v25  ;;  %v12695_v56 = vpack.c.bf16 %v23957_v15, %v23955_v24  ;;  %v23972_v4 = vand.u32 4294901760, %v23865_v21  ;;  %v23976_v6 = vand.u32 4294901760, %v15579_v31  ;;  %v23981_v25 = vld [vmem:[#allocation82_spill] sm:$0xff]  ;;  %v23983_v31 = vld [vmem:[#allocation83_spill] sm:$0xff]  ;;  %v24023_v15 = vld [vmem:[#allocation48_spill] sm:$0xff] }
 0x17c   :  { %12494 = vmatpush1.bf16.msra.mxu1 %v12493_v37  ;;  %12686 = vmatpush1.bf16.msra.mxu0 %v12685_v16  ;;  %v16254_v37 = vand.u32 4294901760, %v16217_v60  ;;  %v23961_v16 = vand.u32 4294901760, %v23960_v12  ;;  %v12509_v44 = vpack.c.bf16 %v23971_v29, %v23970_v8  ;;  %v23977_v26 = vand.u32 4294901760, %v23868_v23  ;;  %v665_v12 = vld [vmem:[%s22479_s4 + $0x58] sm:$0xff] }
 0x17d   :  { %12496 = vmatprep.subr.bf16.mxu1 %v12495_v10  ;;  %12688 = vmatprep.subr.bf16.mxu0 %v12687_v61  ;;  %v12697_v10 = vpack.c.bf16 %v23963_v19, %v23962_v36  ;;  %v3348_v61 = vand.u32 4294901760, %v657_v17  ;;  %v23978_v21 = vand.u32 4294901760, %v15583_v5  ;;  %v23984_v47 = vand.u32 4294901760, %v23983_v31  ;;  %v677_v29 = vld [vmem:[%s22479_s4 + $0xb8] sm:$0xff] }
 0x17e   :  { %23958 = vst [vmem:[#allocation25_spill] sm:$0xff] %v16254_v37  ;;  %v12505_v20 = vpack.c.bf16 %v23961_v16, %v23959_v41  ;;  %v3350_v23 = vand.u32 4294901760, %v656_v53  ;;  %v669_v16 = vld [vmem:[%s22479_s4 + $0x78] sm:$0xff]  ;;  %v16320_v36 = vsub.f32 %v655_v0, %v2493_v51  ;;  %v16322_v19 = vpack.c.bf16 %v2499_v58, %v2495_v33 }
 0x17f   :  { %v12703_v30 = vpack.c.bf16 %v23978_v21, %v23977_v26  ;;  %v16312_v41 = vpack.c.bf16 %v3352_v62, %v3348_v61  ;;  %v16334_v0 = vsub.f32 %v661_v46, %v3352_v62  ;;  %v16344_v8 = vsub.f32 %v658_v59, %v2499_v58  ;;  %v675_v62 = vld [vmem:[%s22479_s4 + $0xa8] sm:$0xff] }
 0x180   :  { %12498 = vmatpush1.bf16.msra.mxu1 %v12497_v63  ;;  %12690 = vmatpush1.bf16.msra.mxu0 %v12689_v54  ;;  %v23966_v63 = vand.u32 4294901760, %v23965_v13  ;;  %v23969_v54 = vand.u32 4294901760, %v23968_v45  ;;  %23989 = vst [vmem:[#allocation33_spill] sm:$0xff] %v16322_v19  ;;  %v2505_v13 = vand.u32 4294901760, %v667_v34  ;;  %v16330_v45 = vsub.f32 %v659_v38, %v2497_v1 }
 0x181   :  { %12500 = vmatprep.subr.bf16.mxu1 %v12499_v43  ;;  %12692 = vmatprep.subr.bf16.mxu0 %v12691_v52  ;;  %v660_v43 = vld [vmem:[%s22479_s4 + $0x30] sm:$0xff]  ;;  %v23973_v52 = vld [vmem:[#allocation79_spill] sm:$0xff]  ;;  %23988 = vst [vmem:[#allocation30_spill] sm:$0xff] %v16312_v41  ;;  %23992 = vst [vmem:[#allocation37_spill] sm:$0xff] %v16334_v0  ;;  %v3368_v21 = vand.u32 4294901760, %v677_v29 }
 0x182   :  { %v12507_v9 = vpack.c.bf16 %v23966_v63, %v23964_v39  ;;  %v12699_v57 = vpack.c.bf16 %v23969_v54, %v23967_v49  ;;  %v23974_v11 = vand.u32 4294901760, %v23973_v52  ;;  %v3354_v5 = vand.u32 4294901760, %v660_v43  ;;  %v662_v63 = vld [vmem:[%s22479_s4 + $0x40] sm:$0xff]  ;;  %23990 = vst [vmem:[#allocation34_spill] sm:$0xff] %v16330_v45  ;;  %23994 = vst [vmem:[#allocation39_spill] sm:$0xff] %v16344_v8 }
 0x183   :  { %v2501_v39 = vand.u32 4294901760, %v663_v18  ;;  %v666_v49 = vld [vmem:[%s22479_s4 + $0x60] sm:$0xff]  ;;  %v16342_v54 = vsub.f32 %v654_v14, %v2495_v33  ;;  %v2503_v46 = vand.u32 4294901760, %v662_v63 }
 0x184   :  { %12502 = vmatpush1.bf16.msra.mxu1 %v12501_v2  ;;  %12694 = vmatpush1.bf16.msra.mxu0 %v12693_v55  ;;  %v12701_v22 = vpack.c.bf16 %v23974_v11, %v23972_v4  ;;  %v23975_v2 = vand.u32 4294901760, %v15577_v35  ;;  %v23979_v55 = vld [vmem:[#allocation81_spill] sm:$0xff]  ;;  %v23982_v35 = vand.u32 4294901760, %v23981_v25  ;;  %v16346_v38 = vpack.c.bf16 %v3354_v5, %v3350_v23  ;;  %v670_v52 = vld [vmem:[%s22479_s4 + $0x80] sm:$0xff] }
 0x185   :  { %12504 = vmatprep.subr.bf16.mxu1 %v12503_v48  ;;  %12696 = vmatprep.subr.bf16.mxu0 %v12695_v56  ;;  %v23980_v50 = vand.u32 4294901760, %v23979_v55  ;;  %v23985_v48 = vld [vmem:[#allocation84_spill] sm:$0xff]  ;;  %v16310_v56 = vpack.c.bf16 %v2497_v1, %v2493_v51  ;;  %23993 = vst [vmem:[#allocation38_spill] sm:$0xff] %v16342_v54  ;;  %v2507_v1 = vand.u32 4294901760, %v666_v49  ;;  %v16356_v14 = vsub.f32 %v660_v43, %v3354_v5  ;;  %v674_v11 = vld [vmem:[%s22479_s4 + $0xa0] sm:$0xff] }
 0x186   :  { %v12511_v28 = vpack.c.bf16 %v23976_v6, %v23975_v2  ;;  %v23986_v24 = vand.u32 4294901760, %v23985_v48  ;;  %v668_v51 = vld [vmem:[%s22479_s4 + $0x70] sm:$0xff]  ;;  %23995 = vst [vmem:[#allocation85_spill] sm:$0xff] %v16346_v38  ;;  %v16358_v59 = vpack.c.bf16 %v2505_v13, %v2501_v39  ;;  %v16366_v4 = vsub.f32 %v663_v18, %v2501_v39  ;;  %v683_v48 = vld [vmem:[%s22479_s4 + $0xe8] sm:$0xff] }
 0x187   :  { %v12513_v3 = vpack.c.bf16 %v23982_v35, %v23980_v50  ;;  %23987 = vst [vmem:[#allocation29_spill] sm:$0xff] %v16310_v56  ;;  %23997 = vst [vmem:[#allocation87_spill] sm:$0xff] %v16356_v14  ;;  %v3362_v58 = vand.u32 4294901760, %v668_v51  ;;  %v16382_v18 = vpack.c.bf16 %v2507_v1, %v2503_v46  ;;  %v676_v55 = vld [vmem:[%s22479_s4 + $0xb0] sm:$0xff]  ;;  %v16392_v50 = vsub.f32 %v666_v49, %v2507_v1 }
 0x188   :  { %v12705_v7 = vpack.c.bf16 %v23986_v24, %v23984_v47  ;;  %12506 = vmatpush1.bf16.msra.mxu1 %v12505_v20  ;;  %12698 = vmatpush1.bf16.msra.mxu0 %v12697_v10  ;;  %v16332_v20 = vsub.f32 %v657_v17, %v3348_v61  ;;  %v664_v10 = vld [vmem:[%s22479_s4 + $0x50] sm:$0xff]  ;;  %v16348_v17 = vsub.f32 %v656_v53, %v3350_v23  ;;  %v671_v61 = vld [vmem:[%s22479_s4 + $0x88] sm:$0xff]  ;;  %v673_v53 = vld [vmem:[%s22479_s4 + $0x98] sm:$0xff]  ;;  %v2511_v35 = vand.u32 4294901760, %v670_v52 }
 0x189   :  { %12508 = vmatprep.subr.bf16.mxu1 %v12507_v9  ;;  %12700 = vmatprep.subr.bf16.mxu0 %v12699_v57  ;;  %v3356_v9 = vand.u32 4294901760, %v665_v12  ;;  %v3360_v57 = vand.u32 4294901760, %v669_v16  ;;  %23998 = vst [vmem:[#allocation88_spill] sm:$0xff] %v16358_v59  ;;  %v3358_v33 = vand.u32 4294901760, %v664_v10  ;;  %23999 = vst [vmem:[#allocation89_spill] sm:$0xff] %v16366_v4  ;;  %v2509_v6 = vand.u32 4294901760, %v671_v61 }
 0x18a   :  { %23991 = vst [vmem:[#allocation35_spill] sm:$0xff] %v16332_v20  ;;  %23996 = vst [vmem:[#allocation86_spill] sm:$0xff] %v16348_v17  ;;  %v3364_v26 = vand.u32 4294901760, %v673_v53  ;;  %v2515_v31 = vand.u32 4294901760, %v674_v11  ;;  %v679_v47 = vld [vmem:[%s22479_s4 + $0xc8] sm:$0xff]  ;;  %v24008_v24 = vld [vmem:[#allocation2_spill] sm:$0xff]  ;;  %v16446_v40 = vsub.f32 %v670_v52, %v2511_v35 }
 0x18b   :  { %v16370_v43 = vsub.f32 %v665_v12, %v3356_v9  ;;  %v16380_v2 = vsub.f32 %v669_v16, %v3360_v57  ;;  %24004 = vst [vmem:[#allocation31_spill] sm:$0xff] %v16382_v18  ;;  %24006 = vst [vmem:[#allocation94_spill] sm:$0xff] %v16392_v50  ;;  %v16394_v25 = vpack.c.bf16 %v3362_v58, %v3358_v33  ;;  %v24009_v23 = vld [vmem:[#allocation46_spill] sm:$0xff]  ;;  %v681_v12 = vld [vmem:[%s22479_s4 + $0xd8] sm:$0xff]  ;;  %v3370_v49 = vand.u32 4294901760, %v676_v55 }
 0x18c   :  { %12510 = vmatpush1.bf16.msra.mxu1 %v12509_v44  ;;  %12702 = vmatpush1.bf16.msra.mxu0 %v12701_v22  ;;  %v16368_v44 = vsub.f32 %v667_v34, %v2505_v13  ;;  %v16378_v22 = vpack.c.bf16 %v3360_v57, %v3356_v9  ;;  %v16384_v34 = vsub.f32 %v662_v63, %v2503_v46  ;;  %v685_v16 = vld [vmem:[%s22479_s4 + $0xf8] sm:$0xff]  ;;  %v24015_v9 = vld [vmem:[#allocation4_spill] sm:$0xff]  ;;  %v2517_v1 = vand.u32 4294901760, %v679_v47 }
 0x18d   :  { %12512 = vmatprep.subr.bf16.mxu1 %v12511_v28  ;;  %12704 = vmatprep.subr.bf16.mxu0 %v12703_v30  ;;  %24001 = vst [vmem:[#allocation91_spill] sm:$0xff] %v16370_v43  ;;  %24003 = vst [vmem:[#allocation28_spill] sm:$0xff] %v16380_v2  ;;  %v2513_v28 = vand.u32 4294901760, %v675_v62  ;;  %v672_v30 = vld [vmem:[%s22479_s4 + $0x90] sm:$0xff]  ;;  %v16408_v5 = vsub.f32 %v671_v61, %v2509_v6  ;;  %v16428_v57 = vpack.c.bf16 %v3368_v21, %v3364_v26 }
 0x18e   :  { %24000 = vst [vmem:[#allocation90_spill] sm:$0xff] %v16368_v44  ;;  %24002 = vst [vmem:[#allocation92_spill] sm:$0xff] %v16378_v22  ;;  %v3366_v63 = vand.u32 4294901760, %v672_v30  ;;  %v16430_v46 = vsub.f32 %v673_v53, %v3364_v26  ;;  %v2521_v61 = vand.u32 4294901760, %v683_v48  ;;  %v3372_v53 = vand.u32 4294901760, %v681_v12 }
 0x18f   :  { %24005 = vst [vmem:[#allocation93_spill] sm:$0xff] %v16384_v34  ;;  %24007 = vst [vmem:[#allocation40_spill] sm:$0xff] %v16394_v25  ;;  %v16416_v39 = vpack.c.bf16 %v2513_v28, %v2509_v6  ;;  %v16418_v13 = vsub.f32 %v675_v62, %v2513_v28  ;;  %v680_v62 = vld [vmem:[%s22479_s4 + $0xd0] sm:$0xff]  ;;  %v24019_v6 = vld [vmem:[#allocation47_spill] sm:$0xff]  ;;  %v16440_v28 = vsub.f32 %v677_v29, %v3368_v21  ;;  %v3376_v26 = vand.u32 4294901760, %v685_v16 }
 0x190   :  { %12514 = vmatpush1.bf16.msra.mxu1 %v12513_v3  ;;  %12706 = vmatpush1.bf16.msra.mxu0 %v12705_v7  ;;  %v16404_v3 = vsub.f32 %v664_v10, %v3358_v33  ;;  %v16406_v7 = vsub.f32 %v668_v51, %v3362_v58  ;;  %24012 = vst [vmem:[#allocation95_spill] sm:$0xff] %v16408_v5  ;;  %v678_v10 = vld [vmem:[%s22479_s4 + $0xc0] sm:$0xff]  ;;  %24016 = vst [vmem:[#allocation98_spill] sm:$0xff] %v16428_v57  ;;  %v684_v33 = vld [vmem:[%s22479_s4 + $0xf0] sm:$0xff]  ;;  %v3374_v52 = vand.u32 4294901760, %v680_v62 }
 0x191   :  { %12516 = vmatprep.subr.bf16.mxu1 %v24008_v24  ;;  %12708 = vmatprep.subr.bf16.mxu0 %v24009_v23  ;;  %24013 = vst [vmem:[#allocation96_spill] sm:$0xff] %v16416_v39  ;;  %24014 = vst [vmem:[#allocation97_spill] sm:$0xff] %v16418_v13  ;;  %v682_v51 = vld [vmem:[%s22479_s4 + $0xe0] sm:$0xff]  ;;  %v24018_v58 = vld [vmem:[#allocation5_spill] sm:$0xff]  ;;  %v16442_v24 = vpack.c.bf16 %v2515_v31, %v2511_v35  ;;  %v2519_v13 = vand.u32 4294901760, %v678_v10  ;;  %v16458_v21 = vpack.c.bf16 %v3370_v49, %v3366_v63 }
 0x192   :  { %24010 = vst [vmem:[#allocation41_spill] sm:$0xff] %v16404_v3  ;;  %24011 = vst [vmem:[#allocation43_spill] sm:$0xff] %v16406_v7  ;;  %v24022_v23 = vld [vmem:[#allocation8_spill] sm:$0xff]  ;;  %v2523_v5 = vand.u32 4294901760, %v682_v51  ;;  %v691_v29 = vld [vmem:[%s22479_s4 + $0x128] sm:$0xff]  ;;  %v16462_v35 = vsub.f32 %v676_v55, %v3370_v49  ;;  %v16478_v55 = vpack.c.bf16 %v3376_v26, %v3372_v53  ;;  %v16480_v49 = vsub.f32 %v681_v12, %v3372_v53 }
 0x193   :  { %1528 = vmatmul.mubr.f32.vlgmr.msra.gmra.mrb[4].mxu1 %v24015_v9  ;;  %2383 = vmatmul.mubr.f32.vlgmr.msra.gmra.mrb[4].mxu0 %v24015_v9  ;;  %24017 = vst [vmem:[#allocation99_spill] sm:$0xff] %v16430_v46  ;;  %24020 = vst [vmem:[#allocation100_spill] sm:$0xff] %v16440_v28  ;;  %v16448_v46 = vsub.f32 %v674_v11, %v2515_v31  ;;  %v3378_v11 = vand.u32 4294901760, %v684_v33  ;;  %v16464_v31 = vpack.c.bf16 %v2521_v61, %v2517_v1  ;;  %v688_v53 = vld [vmem:[%s22479_s4 + $0x110] sm:$0xff] }
 0x194   :  { %12518 = vmatpush1.bf16.msra.mxu1 %v24018_v58  ;;  %12710 = vmatpush1.bf16.msra.mxu0 %v24019_v6  ;;  %24021 = vst [vmem:[#allocation101_spill] sm:$0xff] %v16442_v24  ;;  %24024 = vst [vmem:[#allocation102_spill] sm:$0xff] %v16446_v40  ;;  %v687_v58 = vld [vmem:[%s22479_s4 + $0x108] sm:$0xff]  ;;  %v16466_v6 = vsub.f32 %v679_v47, %v2517_v1  ;;  %v689_v24 = vld [vmem:[%s22479_s4 + $0x118] sm:$0xff]  ;;  %v2529_v1 = vand.u32 4294901760, %v691_v29  ;;  %v16494_v12 = vsub.f32 %v678_v10, %v2519_v13 }
 0x195   :  { %12520 = vmatprep.subr.bf16.mxu1 %v24022_v23  ;;  %12712 = vmatprep.subr.bf16.mxu0 %v24023_v15  ;;  %24025 = vst [vmem:[#allocation103_spill] sm:$0xff] %v16448_v46  ;;  %24026 = vst [vmem:[#allocation104_spill] sm:$0xff] %v16458_v21  ;;  %v16460_v15 = vsub.f32 %v672_v30, %v3366_v63  ;;  %v16468_v23 = vsub.f32 %v683_v48, %v2521_v61  ;;  %v693_v21 = vld [vmem:[%s22479_s4 + $0x138] sm:$0xff]  ;;  %v24032_v30 = vld [vmem:[#allocation11_spill] sm:$0xff]  ;;  %v2525_v47 = vand.u32 4294901760, %v687_v58 }
 0x196   :  { %1630 = vmatprep.mubr.f32.mxu1 %v23799_v42  ;;  %2485 = vmatprep.mubr.f32.mxu0 %v23799_v42  ;;  %24028 = vst [vmem:[#allocation7_spill] sm:$0xff] %v16462_v35  ;;  %24029 = vst [vmem:[#allocation10_spill] sm:$0xff] %v16464_v31  ;;  %v24033_v63 = vld [vmem:[#allocation49_spill] sm:$0xff]  ;;  %v686_v48 = vld [vmem:[%s22479_s4 + $0x100] sm:$0xff]  ;;  %v16504_v31 = vpack.c.bf16 %v3378_v11, %v3374_v52  ;;  %v16512_v10 = vsub.f32 %v680_v62, %v3374_v52 }
 0x197   :  { %24027 = vst [vmem:[#allocation105_spill] sm:$0xff] %v16460_v15  ;;  %24030 = vst [vmem:[#allocation9_spill] sm:$0xff] %v16466_v6  ;;  %v690_v61 = vld [vmem:[%s22479_s4 + $0x120] sm:$0xff]  ;;  %v16526_v62 = vsub.f32 %v687_v58, %v2525_v47 }
 0x198   :  { %24031 = vst [vmem:[#allocation13_spill] sm:$0xff] %v16468_v23  ;;  %12522 = vmatpush1.bf16.msra.mxu1 %v24032_v30  ;;  %12714 = vmatpush1.bf16.msra.mxu0 %v24033_v63  ;;  %24034 = vst [vmem:[#allocation12_spill] sm:$0xff] %v16478_v55  ;;  %v24036_v23 = vld [vmem:[#allocation16_spill] sm:$0xff]  ;;  %v24037_v6 = vld [vmem:[#allocation50_spill] sm:$0xff]  ;;  %v16490_v30 = vsub.f32 %v685_v16, %v3376_v26  ;;  %v16492_v63 = vpack.c.bf16 %v2523_v5, %v2519_v13 }
 0x199   :  { %24035 = vst [vmem:[#allocation14_spill] sm:$0xff] %v16480_v49  ;;  %12524 = vmatprep.subr.bf16.mxu1 %v24036_v23  ;;  %12716 = vmatprep.subr.bf16.mxu0 %v24037_v6  ;;  %24040 = vst [vmem:[#allocation20_spill] sm:$0xff] %v16494_v12  ;;  %v692_v49 = vld [vmem:[%s22479_s4 + $0x130] sm:$0xff]  ;;  %v16502_v55 = vsub.f32 %v682_v51, %v2523_v5  ;;  %v3380_v23 = vand.u32 4294901760, %v689_v24  ;;  %v3384_v6 = vand.u32 4294901760, %v693_v21  ;;  %v695_v16 = vld [vmem:[%s22479_s4 + $0x148] sm:$0xff] }
 0x19a   :  { %24038 = vst [vmem:[#allocation18_spill] sm:$0xff] %v16490_v30  ;;  %24039 = vst [vmem:[#allocation17_spill] sm:$0xff] %v16492_v63  ;;  %v699_v13 = vld [vmem:[%s22479_s4 + $0x168] sm:$0xff]  ;;  %v16514_v26 = vsub.f32 %v684_v33, %v3378_v11  ;;  %v2527_v12 = vand.u32 4294901760, %v686_v48  ;;  %v2531_v30 = vand.u32 4294901760, %v690_v61  ;;  %v697_v5 = vld [vmem:[%s22479_s4 + $0x158] sm:$0xff]  ;;  %v16524_v63 = vpack.c.bf16 %v2529_v1, %v2525_v47 }
 0x19b   :  { %24041 = vst [vmem:[#allocation19_spill] sm:$0xff] %v16502_v55  ;;  %24042 = vst [vmem:[#allocation27_spill] sm:$0xff] %v16504_v31  ;;  %v701_v51 = vld [vmem:[%s22479_s4 + $0x178] sm:$0xff]  ;;  %v24045_v55 = vld [vmem:[#allocation22_spill] sm:$0xff]  ;;  %v3382_v33 = vand.u32 4294901760, %v688_v53  ;;  %v3386_v52 = vand.u32 4294901760, %v692_v49  ;;  %v16532_v35 = vsub.f32 %v689_v24, %v3380_v23  ;;  %v16542_v47 = vsub.f32 %v693_v21, %v3384_v6 }
 0x19c   :  { %24043 = vst [vmem:[#allocation72_spill] sm:$0xff] %v16512_v10  ;;  %24044 = vst [vmem:[#allocation74_spill] sm:$0xff] %v16514_v26  ;;  %12526 = vmatpush1.bf16.msra.mxu1 %v24045_v55  ;;  %v24046_v31 = vld [vmem:[#allocation51_spill] sm:$0xff]  ;;  %v24049_v11 = vld [vmem:[#allocation26_spill] sm:$0xff]  ;;  %v16530_v10 = vsub.f32 %v691_v29, %v2529_v1  ;;  %v2533_v15 = vand.u32 4294901760, %v695_v16  ;;  %v2537_v46 = vand.u32 4294901760, %v699_v13  ;;  %v16540_v55 = vpack.c.bf16 %v3384_v6, %v3380_v23 }
 0x19d   :  { %12718 = vmatpush1.bf16.msra.mxu0 %v24046_v31  ;;  %24047 = vst [vmem:[#allocation77_spill] sm:$0xff] %v16524_v63  ;;  %24048 = vst [vmem:[#allocation76_spill] sm:$0xff] %v16526_v62  ;;  %12528 = vmatprep.subr.bf16.mxu1 %v24049_v11  ;;  %v24050_v26 = vld [vmem:[#allocation52_spill] sm:$0xff]  ;;  %v694_v31 = vld [vmem:[%s22479_s4 + $0x140] sm:$0xff]  ;;  %v3388_v11 = vand.u32 4294901760, %v697_v5  ;;  %v16544_v29 = vpack.c.bf16 %v2531_v30, %v2527_v12  ;;  %v16546_v24 = vsub.f32 %v686_v48, %v2527_v12 }
 0x19e   :  { %12720 = vmatprep.subr.bf16.mxu0 %v24050_v26  ;;  %24051 = vst [vmem:[#allocation78_spill] sm:$0xff] %v16530_v10  ;;  %24052 = vst [vmem:[#allocation80_spill] sm:$0xff] %v16532_v35  ;;  %v698_v58 = vld [vmem:[%s22479_s4 + $0x160] sm:$0xff]  ;;  %v3392_v26 = vand.u32 4294901760, %v701_v51  ;;  %v16548_v1 = vsub.f32 %v690_v61, %v2531_v30  ;;  %v16550_v35 = vsub.f32 %v688_v53, %v3382_v33  ;;  %v696_v10 = vld [vmem:[%s22479_s4 + $0x150] sm:$0xff]  ;;  %v2535_v12 = vand.u32 4294901760, %v694_v31 }
 0x19f   :  { %24053 = vst [vmem:[#allocation66_spill] sm:$0xff] %v16540_v55  ;;  %24054 = vst [vmem:[#allocation67_spill] sm:$0xff] %v16542_v47  ;;  %v700_v23 = vld [vmem:[%s22479_s4 + $0x170] sm:$0xff]  ;;  %v703_v21 = vld [vmem:[%s22479_s4 + $0x188] sm:$0xff]  ;;  %v16563_v61 = vpack.c.bf16 %v3386_v52, %v3382_v33  ;;  %v16565_v30 = vsub.f32 %v692_v49, %v3386_v52  ;;  %v2539_v53 = vand.u32 4294901760, %v698_v58  ;;  %v16578_v49 = vpack.c.bf16 %v2537_v46, %v2533_v15 }
 0x1a0   :  { %24055 = vst [vmem:[#allocation15_spill] sm:$0xff] %v16544_v29  ;;  %24056 = vst [vmem:[#allocation3_spill] sm:$0xff] %v16546_v24  ;;  %v24059_v6 = vld [vmem:[#allocation32_spill] sm:$0xff]  ;;  %v24060_v48 = vld [vmem:[#allocation53_spill] sm:$0xff]  ;;  %v16580_v52 = vsub.f32 %v695_v16, %v2533_v15  ;;  %v16586_v47 = vsub.f32 %v697_v5, %v3388_v11  ;;  %v3390_v62 = vand.u32 4294901760, %v696_v10 }
 0x1a1   :  { %24057 = vst [vmem:[#allocation44_spill] sm:$0xff] %v16548_v1  ;;  %24058 = vst [vmem:[#allocation45_spill] sm:$0xff] %v16550_v35  ;;  %12530 = vmatpush1.bf16.msra.mxu1 %v24059_v6  ;;  %12722 = vmatpush1.bf16.msra.mxu0 %v24060_v48  ;;  %v707_v35 = vld [vmem:[%s22479_s4 + $0x1a8] sm:$0xff]  ;;  %v705_v1 = vld [vmem:[%s22479_s4 + $0x198] sm:$0xff]  ;;  %v16582_v48 = vsub.f32 %v699_v13, %v2537_v46  ;;  %v16610_v63 = vsub.f32 %v698_v58, %v2539_v53 }
 0x1a2   :  { %24061 = vst [vmem:[#allocation68_spill] sm:$0xff] %v16563_v61  ;;  %24062 = vst [vmem:[#allocation69_spill] sm:$0xff] %v16565_v30  ;;  %v709_v6 = vld [vmem:[%s22479_s4 + $0x1b8] sm:$0xff]  ;;  %v24063_v24 = vld [vmem:[#allocation36_spill] sm:$0xff]  ;;  %v16584_v30 = vpack.c.bf16 %v3392_v26, %v3388_v11  ;;  %v3394_v61 = vand.u32 4294901760, %v700_v23  ;;  %v3396_v15 = vand.u32 4294901760, %v705_v1  ;;  %v16612_v40 = vsub.f32 %v696_v10, %v3390_v62 }
 0x1a3   :  { %12532 = vmatprep.subr.bf16.mxu1 %v24063_v24  ;;  %v24064_v33 = vld [vmem:[#allocation54_spill] sm:$0xff]  ;;  %24065 = vst [vmem:[#allocation70_spill] sm:$0xff] %v16578_v49  ;;  %24066 = vst [vmem:[#allocation71_spill] sm:$0xff] %v16580_v52  ;;  %v2545_v49 = vand.u32 4294901760, %v707_v35  ;;  %v3400_v16 = vand.u32 4294901760, %v709_v6  ;;  %v704_v46 = vld [vmem:[%s22479_s4 + $0x190] sm:$0xff]  ;;  %v16606_v52 = vsub.f32 %v694_v31, %v2535_v12 }
 0x1a4   :  { %12724 = vmatprep.subr.bf16.mxu0 %v24064_v33  ;;  %24067 = vst [vmem:[#allocation73_spill] sm:$0xff] %v16582_v48  ;;  %24068 = vst [vmem:[#allocation75_spill] sm:$0xff] %v16584_v30  ;;  %v702_v29 = vld [vmem:[%s22479_s4 + $0x180] sm:$0xff]  ;;  %v2541_v33 = vand.u32 4294901760, %v703_v21  ;;  %v708_v13 = vld [vmem:[%s22479_s4 + $0x1b0] sm:$0xff]  ;;  %v16604_v48 = vpack.c.bf16 %v2539_v53, %v2535_v12  ;;  %v16620_v31 = vpack.c.bf16 %v3394_v61, %v3390_v62 }
 0x1a5   :  { %24069 = vst [vmem:[#allocation79_spill] sm:$0xff] %v16586_v47  ;;  %v706_v24 = vld [vmem:[%s22479_s4 + $0x1a0] sm:$0xff]  ;;  %v24071_v11 = vld [vmem:[#allocation55_spill] sm:$0xff]  ;;  %v16602_v47 = vsub.f32 %v701_v51, %v3392_v26  ;;  %v24073_v30 = vld [vmem:[#allocation56_spill] sm:$0xff]  ;;  %v2543_v28 = vand.u32 4294901760, %v702_v29  ;;  %v16622_v26 = vsub.f32 %v700_v23, %v3394_v61  ;;  %v16628_v12 = vsub.f32 %v707_v35, %v2545_v49 }
 0x1a6   :  { %v24070_v5 = vld [vmem:[#allocation42_spill] sm:$0xff]  ;;  %12726 = vmatpush1.bf16.msra.mxu0 %v24071_v11  ;;  %24072 = vst [vmem:[#allocation81_spill] sm:$0xff] %v16604_v48  ;;  %v24074_v55 = vld [vmem:[#allocation57_spill] sm:$0xff]  ;;  %24075 = vst [vmem:[#allocation82_spill] sm:$0xff] %v16610_v63  ;;  %v2547_v7 = vand.u32 4294901760, %v706_v24  ;;  %v16624_v58 = vpack.c.bf16 %v2545_v49, %v2541_v33  ;;  %v16626_v10 = vsub.f32 %v703_v21, %v2541_v33 }
 0x1a7   :  { %12534 = vmatpush1.bf16.msra.mxu1 %v24070_v5  ;;  %12728 = vmatprep.subr.bf16.mxu0 %v24074_v55  ;;  %24076 = vst [vmem:[#allocation83_spill] sm:$0xff] %v16612_v40  ;;  %v711_v5 = vld [vmem:[%s22479_s4 + $0x1c8] sm:$0xff]  ;;  %24077 = vst [vmem:[#allocation84_spill] sm:$0xff] %v16620_v31  ;;  %v3402_v55 = vand.u32 4294901760, %v708_v13  ;;  %v16630_v53 = vpack.c.bf16 %v3400_v16, %v3396_v15  ;;  %v24083_v11 = vld [vmem:[#allocation58_spill] sm:$0xff]  ;;  %v16634_v63 = vsub.f32 %v705_v1, %v3396_v15 }
 0x1a8   :  { %12536 = vmatprep.subr.bf16.mxu1 %v24073_v30  ;;  %v715_v51 = vld [vmem:[%s22479_s4 + $0x1e8] sm:$0xff]  ;;  %24078 = vst [vmem:[#allocation2_spill] sm:$0xff] %v16622_v26  ;;  %v3398_v30 = vand.u32 4294901760, %v704_v46  ;;  %24079 = vst [vmem:[#allocation46_spill] sm:$0xff] %v16624_v58  ;;  %v16636_v62 = vsub.f32 %v709_v6, %v3400_v16  ;;  %v2549_v23 = vand.u32 4294901760, %v711_v5  ;;  %v713_v26 = vld [vmem:[%s22479_s4 + $0x1d8] sm:$0xff]  ;;  %v16643_v49 = vpack.c.bf16 %v2547_v7, %v2543_v28 }
 0x1a9   :  { %24080 = vst [vmem:[#allocation4_spill] sm:$0xff] %v16626_v10  ;;  %24081 = vst [vmem:[#allocation5_spill] sm:$0xff] %v16628_v12  ;;  %v24084_v40 = vld [vmem:[#allocation59_spill] sm:$0xff]  ;;  %v2553_v61 = vand.u32 4294901760, %v715_v51  ;;  %v24087_v21 = vld [vmem:[#allocation60_spill] sm:$0xff]  ;;  %v16645_v33 = vsub.f32 %v702_v29, %v2543_v28  ;;  %v16664_v29 = vsub.f32 %v708_v13, %v3402_v55 }
 0x1aa   :  { %24082 = vst [vmem:[#allocation47_spill] sm:$0xff] %v16630_v53  ;;  %12730 = vmatpush1.bf16.msra.mxu0 %v24084_v40  ;;  %24085 = vst [vmem:[#allocation8_spill] sm:$0xff] %v16634_v63  ;;  %v24088_v35 = vld [vmem:[#allocation61_spill] sm:$0xff]  ;;  %v16652_v1 = vpack.c.bf16 %v3402_v55, %v3398_v30  ;;  %v16654_v6 = vsub.f32 %v704_v46, %v3398_v30  ;;  %v710_v15 = vld [vmem:[%s22479_s4 + $0x1c0] sm:$0xff] }
 0x1ab   :  { %12538 = vmatpush1.bf16.msra.mxu1 %v24083_v11  ;;  %24086 = vst [vmem:[#allocation48_spill] sm:$0xff] %v16636_v62  ;;  %12732 = vmatprep.subr.bf16.mxu0 %v24088_v35  ;;  %24089 = vst [vmem:[#allocation11_spill] sm:$0xff] %v16643_v49  ;;  %v16647_v11 = vsub.f32 %v706_v24, %v2547_v7  ;;  %v717_v40 = vld [vmem:[%s22479_s4 + $0x1f8] sm:$0xff]  ;;  %v714_v16 = vld [vmem:[%s22479_s4 + $0x1e0] sm:$0xff]  ;;  %v3404_v24 = vand.u32 4294901760, %v713_v26  ;;  %v16681_v30 = vsub.f32 %v715_v51, %v2553_v61 }
 0x1ac   :  { %12540 = vmatprep.subr.bf16.mxu1 %v24087_v21  ;;  %24090 = vst [vmem:[#allocation49_spill] sm:$0xff] %v16645_v33  ;;  %24092 = vst [vmem:[#allocation50_spill] sm:$0xff] %v16652_v1  ;;  %v712_v46 = vld [vmem:[%s22479_s4 + $0x1d0] sm:$0xff]  ;;  %v24095_v35 = vld [vmem:[#allocation62_spill] sm:$0xff]  ;;  %v3408_v28 = vand.u32 4294901760, %v717_v40  ;;  %v16679_v33 = vsub.f32 %v711_v5, %v2549_v23  ;;  %v2551_v21 = vand.u32 4294901760, %v710_v15 }
 0x1ad   :  { %24091 = vst [vmem:[#allocation16_spill] sm:$0xff] %v16647_v11  ;;  %24093 = vst [vmem:[#allocation22_spill] sm:$0xff] %v16654_v6  ;;  %v24096_v6 = vld [vmem:[#allocation63_spill] sm:$0xff]  ;;  %v16673_v11 = vpack.c.bf16 %v2553_v61, %v2549_v23  ;;  %v24098_v55 = vld [vmem:[#allocation64_spill] sm:$0xff]  ;;  %v2555_v62 = vand.u32 4294901760, %v714_v16  ;;  %v3406_v63 = vand.u32 4294901760, %v712_v46 }
 0x1ae   :  { %24094 = vst [vmem:[#allocation51_spill] sm:$0xff] %v16664_v29  ;;  %12734 = vmatpush1.bf16.msra.mxu0 %v24096_v6  ;;  %v24099_v29 = vld [vmem:[#allocation65_spill] sm:$0xff]  ;;  %24100 = vst [vmem:[#allocation52_spill] sm:$0xff] %v16681_v30  ;;  %v716_v6 = vld [vmem:[%s22479_s4 + $0x1f0] sm:$0xff]  ;;  %v24102_v7 = vand.u32 4294901760, %v16320_v36  ;;  %v24104_v51 = vand.u32 4294901760, %v16332_v20 }
 0x1af   :  { %12542 = vmatpush1.bf16.msra.mxu1 %v24095_v35  ;;  %24097 = vst [vmem:[#allocation26_spill] sm:$0xff] %v16673_v11  ;;  %12736 = vmatprep.subr.bf16.mxu0 %v24099_v29  ;;  %v16683_v35 = vsub.f32 %v713_v26, %v3404_v24  ;;  %v24105_v26 = vand.u32 4294901760, %v16334_v0  ;;  %v16721_v29 = vsub.f32 %v714_v16, %v2555_v62 }
 0x1b0   :  { %12544 = vmatprep.subr.bf16.mxu1 %v24098_v55  ;;  %v2604_v13 = vsub.f32 %v16320_v36, %v24102_v7  ;;  %v24103_v55 = vand.u32 4294901760, %v16330_v45  ;;  %v3459_v23 = vsub.f32 %v16332_v20, %v24104_v51  ;;  %v16704_v7 = vpack.c.bf16 %v3408_v28, %v3404_v24 }
 0x1b1   :  { %24101 = vst [vmem:[#allocation32_spill] sm:$0xff] %v16683_v35  ;;  %v3471_v61 = vsub.f32 %v16334_v0, %v24105_v26  ;;  %v24108_v51 = vand.u32 4294901760, %v16344_v8  ;;  %v16715_v35 = vsub.f32 %v717_v40, %v3408_v28  ;;  %v3410_v24 = vand.u32 4294901760, %v716_v6  ;;  %24111 = vst [vmem:[#allocation42_spill] sm:$0xff] %v16721_v29 }
 0x1b2   :  { %v2616_v5 = vsub.f32 %v16330_v45, %v24103_v55  ;;  %12738 = vmatpush1.bf16.msra.mxu0 %v23908_v27  ;;  %24106 = vst [vmem:[#allocation53_spill] sm:$0xff] %v16704_v7  ;;  %v24107_v55 = vand.u32 4294901760, %v16342_v54  ;;  %v16719_v27 = vsub.f32 %v710_v15, %v2551_v21  ;;  %v22799_v0 = vand.u32 4294901760, %v16368_v44 }
 0x1b3   :  { %12546 = vmatpush1.bf16.msra.mxu1 %v23907_v32  ;;  %v2622_v20 = vsub.f32 %v16344_v8, %v24108_v51  ;;  %12932 = vmatprep.subr.bf16.mxu0 %v16312_v41  ;;  %v16717_v32 = vpack.c.bf16 %v2555_v62, %v2551_v21  ;;  %v3460_v51 = vand.u32 4294901760, %v3459_v23  ;;  %v3472_v26 = vand.u32 4294901760, %v3471_v61  ;;  %v24155_v8 = vld [vmem:[#allocation15_spill] sm:$0xff] }
 0x1b4   :  { %v2610_v45 = vsub.f32 %v16342_v54, %v24107_v55  ;;  %12740 = vmatprep.subr.bf16.mxu1 %v16310_v56  ;;  %24110 = vst [vmem:[#allocation54_spill] sm:$0xff] %v16719_v27  ;;  %v2605_v55 = vand.u32 4294901760, %v2604_v13  ;;  %v2617_v54 = vand.u32 4294901760, %v2616_v5  ;;  %v24112_v40 = vand.u32 4294901760, %v16348_v17  ;;  %v24133_v56 = vld [vmem:[#allocation10_spill] sm:$0xff] }
 0x1b5   :  { %24109 = vst [vmem:[#allocation36_spill] sm:$0xff] %v16717_v32  ;;  %2487 = vmatmul.mubr.f32.vlgmr.msra.gmra.mrb[4].mxu0 %v24015_v9  ;;  %v24113_v15 = vand.u32 4294901760, %v16356_v14  ;;  %v2623_v16 = vand.u32 4294901760, %v2622_v20  ;;  %v24114_v13 = vand.u32 4294901760, %v16366_v4  ;;  %v16740_v23 = vpack.c.bf16 %v3410_v24, %v3406_v63 }
 0x1b6   :  { %1632 = vmatmul.mubr.f32.vlgmr.msra.gmra.mrb[4].mxu1 %v24015_v9  ;;  %v3465_v28 = vsub.f32 %v16348_v17, %v24112_v40  ;;  %12934 = vmatpush1.bf16.msra.mxu0 %v16346_v38  ;;  %v2611_v62 = vand.u32 4294901760, %v2610_v45  ;;  %v16742_v61 = vsub.f32 %v712_v46, %v3406_v63  ;;  %v16746_v45 = vsub.f32 %v716_v6, %v3410_v24  ;;  %v24126_v38 = vld [vmem:[#allocation102_spill] sm:$0xff] }
 0x1b7   :  { %v3477_v21 = vsub.f32 %v16356_v14, %v24113_v15  ;;  %12742 = vmatpush1.bf16.msra.mxu1 %v16322_v19  ;;  %v2628_v9 = vsub.f32 %v16366_v4, %v24114_v13  ;;  %12936 = vmatprep.subr.bf16.mxu0 %v16378_v22  ;;  %24115 = vst [vmem:[#allocation55_spill] sm:$0xff] %v16740_v23  ;;  %v24127_v19 = vld [vmem:[#allocation103_spill] sm:$0xff] }
 0x1b8   :  { %12744 = vmatprep.subr.bf16.mxu1 %v16358_v59  ;;  %2589 = vmatprep.mubr.f32.mxu1 %v23799_v42  ;;  %v24116_v20 = vsub.f32 %v16217_v60, %v16254_v37  ;;  %v16755_v5 = vpack.c.bf16 %v2617_v54, %v2605_v55  ;;  %v2640_v63 = vsub.f32 %v16368_v44, %v22799_v0  ;;  %v3466_v15 = vand.u32 4294901760, %v3465_v28  ;;  %v24122_v37 = vld [vmem:[#allocation97_spill] sm:$0xff]  ;;  %v24132_v0 = vld [vmem:[#allocation7_spill] sm:$0xff] }
 0x1b9   :  { %3444 = vmatprep.mubr.f32.mxu0 %v23799_v42  ;;  %v16760_v46 = vpack.c.bf16 %v3472_v26, %v3460_v51  ;;  %v3478_v6 = vand.u32 4294901760, %v3477_v21  ;;  %v16765_v40 = vpack.c.bf16 %v2623_v16, %v2611_v62  ;;  %v24117_v54 = vand.u32 4294901760, %v16370_v43  ;;  %v24120_v62 = vld [vmem:[#allocation43_spill] sm:$0xff]  ;;  %v24128_v16 = vld [vmem:[#allocation101_spill] sm:$0xff] }
 0x1ba   :  { %v16753_v13 = vand.u32 4294901760, %v24116_v20  ;;  %12938 = vmatpush1.bf16.msra.mxu0 %v16394_v25  ;;  %v2629_v20 = vand.u32 4294901760, %v2628_v9  ;;  %v24118_v26 = vand.u32 4294901760, %v16380_v2  ;;  %v24119_v28 = vand.u32 4294901760, %v16384_v34  ;;  %v24121_v9 = vld [vmem:[#allocation95_spill] sm:$0xff] }
 0x1bb   :  { %12746 = vmatpush1.bf16.msra.mxu1 %v16382_v18  ;;  %v16770_v55 = vsub.f32 %v16370_v43, %v24117_v54  ;;  %12940 = vmatprep.subr.bf16.mxu0 %v16428_v57  ;;  %v2641_v24 = vand.u32 4294901760, %v2640_v63  ;;  %v24123_v25 = vld [vmem:[#allocation99_spill] sm:$0xff]  ;;  %v24124_v18 = vld [vmem:[#allocation100_spill] sm:$0xff]  ;;  %v16788_v22 = vpack.c.bf16 %v3478_v6, %v3466_v15  ;;  %v24131_v15 = vld [vmem:[#allocation105_spill] sm:$0xff]  ;;  %v24137_v6 = vand.u32 4294901760, %v24122_v37 }
 0x1bc   :  { %12748 = vmatprep.subr.bf16.mxu1 %v16416_v39  ;;  %v3495_v51 = vsub.f32 %v16380_v2, %v24118_v26  ;;  %v16781_v21 = vsub.f32 %v16384_v34, %v24119_v28  ;;  %v24125_v26 = vand.u32 4294901760, %v16392_v50  ;;  %v24129_v54 = vld [vmem:[#allocation104_spill] sm:$0xff]  ;;  %v24130_v39 = vand.u32 4294901760, %v16404_v3  ;;  %v24149_v2 = vld [vmem:[#allocation77_spill] sm:$0xff]  ;;  %v24160_v14 = vld [vmem:[#allocation75_spill] sm:$0xff] }
 0x1bd   :  { %v3484_v63 = vand.u32 4294901760, %v16770_v55  ;;  %v24136_v55 = vand.u32 4294901760, %v24121_v9  ;;  %v2664_v41 = vsub.f32 %v24122_v37, %v24137_v6  ;;  %v24143_v6 = vld [vmem:[#allocation17_spill] sm:$0xff]  ;;  %v24144_v37 = vld [vmem:[#allocation27_spill] sm:$0xff] }
 0x1be   :  { %v2646_v59 = vsub.f32 %v16392_v50, %v24125_v26  ;;  %12942 = vmatpush1.bf16.msra.mxu0 %v24129_v54  ;;  %v3489_v57 = vsub.f32 %v16404_v3, %v24130_v39  ;;  %v24134_v26 = vld [vmem:[#allocation12_spill] sm:$0xff]  ;;  %v3496_v28 = vand.u32 4294901760, %v3495_v51  ;;  %v2635_v60 = vand.u32 4294901760, %v16781_v21 }
 0x1bf   :  { %12750 = vmatpush1.bf16.msra.mxu1 %v24128_v16  ;;  %12944 = vmatprep.subr.bf16.mxu0 %v24134_v26  ;;  %v24135_v16 = vand.u32 4294901760, %v24120_v62  ;;  %v2652_v50 = vsub.f32 %v24121_v9, %v24136_v55  ;;  %v16812_v39 = vpack.c.bf16 %v2641_v24, %v2629_v20  ;;  %v24139_v21 = vand.u32 4294901760, %v24124_v18  ;;  %v24142_v55 = vld [vmem:[#allocation9_spill] sm:$0xff] }
 0x1c0   :  { %12752 = vmatprep.subr.bf16.mxu1 %v24133_v56  ;;  %v24138_v56 = vand.u32 4294901760, %v24123_v25  ;;  %v2647_v3 = vand.u32 4294901760, %v2646_v59  ;;  %v24141_v24 = vand.u32 4294901760, %v24127_v19  ;;  %v24146_v59 = vand.u32 4294901760, %v24132_v0 }
 0x1c1   :  { %v3501_v54 = vsub.f32 %v24120_v62, %v24135_v16  ;;  %v3519_v26 = vsub.f32 %v24124_v18, %v24139_v21  ;;  %v24140_v16 = vand.u32 4294901760, %v24126_v38  ;;  %v24147_v18 = vld [vmem:[#allocation13_spill] sm:$0xff]  ;;  %v3490_v9 = vand.u32 4294901760, %v3489_v57  ;;  %v24156_v57 = vld [vmem:[#allocation68_spill] sm:$0xff] }
 0x1c2   :  { %v3507_v51 = vsub.f32 %v24123_v25, %v24138_v56  ;;  %v2670_v20 = vsub.f32 %v24127_v19, %v24141_v24  ;;  %12946 = vmatpush1.bf16.msra.mxu0 %v24144_v37  ;;  %v24145_v56 = vand.u32 4294901760, %v24131_v15  ;;  %v3525_v21 = vsub.f32 %v24132_v0, %v24146_v59  ;;  %v24150_v24 = vld [vmem:[#allocation66_spill] sm:$0xff]  ;;  %v24154_v0 = vld [vmem:[#allocation19_spill] sm:$0xff] }
 0x1c3   :  { %v2658_v62 = vsub.f32 %v24126_v38, %v24140_v16  ;;  %12754 = vmatpush1.bf16.msra.mxu1 %v24143_v6  ;;  %v24148_v38 = vld [vmem:[#allocation14_spill] sm:$0xff]  ;;  %12948 = vmatprep.subr.bf16.mxu0 %v24150_v24  ;;  %v3502_v6 = vand.u32 4294901760, %v3501_v54  ;;  %v2653_v19 = vand.u32 4294901760, %v2652_v50  ;;  %v2665_v44 = vand.u32 4294901760, %v2664_v41 }
 0x1c4   :  { %v3513_v25 = vsub.f32 %v24131_v15, %v24145_v56  ;;  %12756 = vmatprep.subr.bf16.mxu1 %v24149_v2  ;;  %v24151_v37 = vld [vmem:[#allocation18_spill] sm:$0xff]  ;;  %v3508_v4 = vand.u32 4294901760, %v3507_v51  ;;  %v3520_v56 = vand.u32 4294901760, %v3519_v26  ;;  %v24152_v15 = vld [vmem:[#allocation20_spill] sm:$0xff]  ;;  %v2671_v59 = vand.u32 4294901760, %v2670_v20 }
 0x1c5   :  { %v22854_v43 = vand.u32 4294901760, %v24151_v37  ;;  %v2659_v17 = vand.u32 4294901760, %v2658_v62  ;;  %v24153_v16 = vand.u32 4294901760, %v24142_v55  ;;  %v3526_v54 = vand.u32 4294901760, %v3525_v21  ;;  %v24159_v20 = vld [vmem:[#allocation70_spill] sm:$0xff] }
 0x1c6   :  { %12950 = vmatpush1.bf16.msra.mxu0 %v24156_v57  ;;  %v3514_v50 = vand.u32 4294901760, %v3513_v25  ;;  %v24157_v41 = vand.u32 4294901760, %v24147_v18  ;;  %v24158_v51 = vand.u32 4294901760, %v24148_v38  ;;  %v24161_v25 = vld [vmem:[#allocation72_spill] sm:$0xff]  ;;  %v24162_v57 = vld [vmem:[#allocation74_spill] sm:$0xff]  ;;  %v16865_v24 = vpack.c.bf16 %v2647_v3, %v2635_v60 }
 0x1c7   :  { %v2676_v34 = vsub.f32 %v24142_v55, %v24153_v16  ;;  %12758 = vmatpush1.bf16.msra.mxu1 %v24155_v8  ;;  %12952 = vmatprep.subr.bf16.mxu0 %v24160_v14  ;;  %v16858_v16 = vpack.c.bf16 %v3496_v28, %v3484_v63  ;;  %v3543_v2 = vsub.f32 %v24151_v37, %v22854_v43  ;;  %v22864_v8 = vand.u32 4294901760, %v24162_v57  ;;  %v24165_v3 = vld [vmem:[#allocation76_spill] sm:$0xff] }
 0x1c8   :  { %v2688_v26 = vsub.f32 %v24147_v18, %v24157_v41  ;;  %v3531_v62 = vsub.f32 %v24148_v38, %v24158_v51  ;;  %12760 = vmatprep.subr.bf16.mxu1 %v24159_v20  ;;  %v16867_v41 = vpack.c.bf16 %v3502_v6, %v3490_v9  ;;  %v16869_v18 = vpack.c.bf16 %v2665_v44, %v2653_v19  ;;  %v24167_v6 = vld [vmem:[#allocation78_spill] sm:$0xff] }
 0x1c9   :  { %v24163_v51 = vand.u32 4294901760, %v24152_v15  ;;  %v16874_v28 = vpack.c.bf16 %v3520_v56, %v3508_v4  ;;  %v16876_v63 = vpack.c.bf16 %v2671_v59, %v2659_v17  ;;  %v2677_v20 = vand.u32 4294901760, %v2676_v34 }
 0x1ca   :  { %v24164_v43 = vand.u32 4294901760, %v24154_v0  ;;  %12954 = vmatpush1.bf16.msra.mxu0 %v16620_v31  ;;  %v16883_v60 = vpack.c.bf16 %v3526_v54, %v3514_v50  ;;  %v2689_v19 = vand.u32 4294901760, %v2688_v26  ;;  %v3532_v44 = vand.u32 4294901760, %v3531_v62  ;;  %v24168_v50 = vld [vmem:[#allocation80_spill] sm:$0xff]  ;;  %v24169_v26 = vld [vmem:[#allocation67_spill] sm:$0xff]  ;;  %v24172_v31 = vld [vmem:[#allocation45_spill] sm:$0xff] }
 0x1cb   :  { %v2682_v14 = vsub.f32 %v24152_v15, %v24163_v51  ;;  %12762 = vmatpush1.bf16.msra.mxu1 %v16604_v48  ;;  %12956 = vmatprep.subr.bf16.mxu0 %v16630_v53  ;;  %v3544_v17 = vand.u32 4294901760, %v3543_v2  ;;  %v24166_v4 = vand.u32 4294901760, %v24161_v25  ;;  %v24170_v51 = vld [vmem:[#allocation3_spill] sm:$0xff]  ;;  %v24171_v53 = vld [vmem:[#allocation44_spill] sm:$0xff]  ;;  %v24176_v2 = vand.u32 4294901760, %v24167_v6 }
 0x1cc   :  { %v2694_v21 = vsub.f32 %v24154_v0, %v24164_v43  ;;  %12764 = vmatprep.subr.bf16.mxu1 %v16624_v58  ;;  %v3549_v43 = vsub.f32 %v24162_v57, %v22864_v8  ;;  %v24173_v0 = vld [vmem:[#allocation69_spill] sm:$0xff]  ;;  %v24174_v8 = vand.u32 4294901760, %v24165_v3  ;;  %v24175_v54 = vld [vmem:[#allocation71_spill] sm:$0xff]  ;;  %v24179_v62 = vand.u32 4294901760, %v24169_v26 }
 0x1cd   :  { %v3537_v34 = vsub.f32 %v24161_v25, %v24166_v4  ;;  %v2683_v59 = vand.u32 4294901760, %v2682_v14  ;;  %v2712_v9 = vsub.f32 %v24167_v6, %v24176_v2  ;;  %v16930_v2 = vpack.c.bf16 %v2689_v19, %v2677_v20 }
 0x1ce   :  { %v2695_v58 = vand.u32 4294901760, %v2694_v21  ;;  %12958 = vmatpush1.bf16.msra.mxu0 %v16652_v1  ;;  %v2700_v14 = vsub.f32 %v24165_v3, %v24174_v8  ;;  %v3550_v4 = vand.u32 4294901760, %v3549_v43  ;;  %v24177_v1 = vld [vmem:[#allocation73_spill] sm:$0xff]  ;;  %v24178_v8 = vand.u32 4294901760, %v24168_v50 }
 0x1cf   :  { %12766 = vmatpush1.bf16.msra.mxu1 %v16643_v49  ;;  %12960 = vmatprep.subr.bf16.mxu0 %v16704_v7  ;;  %v3538_v48 = vand.u32 4294901760, %v3537_v34  ;;  %v3567_v21 = vsub.f32 %v24169_v26, %v24179_v62  ;;  %v24181_v34 = vand.u32 4294901760, %v16742_v61  ;;  %v24182_v43 = vand.u32 4294901760, %v16746_v45 }
 0x1d0   :  { %12768 = vmatprep.subr.bf16.mxu1 %v16673_v11  ;;  %v3555_v56 = vsub.f32 %v24168_v50, %v24178_v8  ;;  %v24180_v11 = vand.u32 4294901760, %v24170_v51  ;;  %v24184_v49 = vand.u32 4294901760, %v24171_v53  ;;  %v24185_v50 = vand.u32 4294901760, %v24172_v31 }
 0x1d1   :  { %v16928_v3 = vpack.c.bf16 %v24182_v43, %v24181_v34  ;;  %v24186_v26 = vand.u32 4294901760, %v24173_v0  ;;  %v16943_v34 = vpack.c.bf16 %v3544_v17, %v3532_v44  ;;  %v16945_v20 = vpack.c.bf16 %v2695_v58, %v2683_v59  ;;  %v24195_v58 = vld [vmem:[#allocation48_spill] sm:$0xff] }
 0x1d2   :  { %v2706_v7 = vsub.f32 %v24170_v51, %v24180_v11  ;;  %v2718_v8 = vsub.f32 %v24171_v53, %v24184_v49  ;;  %v3561_v62 = vsub.f32 %v24172_v31, %v24185_v50  ;;  %12962 = vmatpush1.bf16.msra.mxu0 %v16740_v23  ;;  %v2701_v19 = vand.u32 4294901760, %v2700_v14  ;;  %v24189_v23 = vld [vmem:[#allocation79_spill] sm:$0xff] }
 0x1d3   :  { %24183 = vst [vmem:[#allocation56_spill] sm:$0xff] %v16928_v3  ;;  %v3573_v11 = vsub.f32 %v24173_v0, %v24186_v26  ;;  %12770 = vmatpush1.bf16.msra.mxu1 %v16717_v32  ;;  %v24187_v43 = vand.u32 4294901760, %v24175_v54  ;;  %12964 = vmatprep.subr.bf16.mxu0 %v16760_v46  ;;  %v16952_v50 = vpack.c.bf16 %v3550_v4, %v3538_v48  ;;  %v24188_v26 = vand.u32 4294901760, %v24177_v1 }
 0x1d4   :  { %12772 = vmatprep.subr.bf16.mxu1 %v16755_v5  ;;  %v22880_v44 = vand.u32 4294901760, %v24189_v23  ;;  %v2713_v17 = vand.u32 4294901760, %v2712_v9  ;;  %v3556_v59 = vand.u32 4294901760, %v3555_v56  ;;  %v3568_v14 = vand.u32 4294901760, %v3567_v21  ;;  %v24191_v9 = vld [vmem:[#allocation83_spill] sm:$0xff]  ;;  %v24192_v21 = vld [vmem:[#allocation2_spill] sm:$0xff] }
 0x1d5   :  { %v2724_v49 = vsub.f32 %v24175_v54, %v24187_v43  ;;  %v2736_v3 = vsub.f32 %v24177_v1, %v24188_v26  ;;  %v2707_v32 = vand.u32 4294901760, %v2706_v7  ;;  %3450 = vmatmul.mubr.f32.vlgmr.msra.gmra.mrb[4].mxu0 %v16753_v13  ;;  %v2719_v5 = vand.u32 4294901760, %v2718_v8  ;;  %v24190_v26 = vld [vmem:[#allocation82_spill] sm:$0xff]  ;;  %v24194_v56 = vld [vmem:[#allocation8_spill] sm:$0xff] }
 0x1d6   :  { %2595 = vmatmul.mubr.f32.vlgmr.msra.gmra.mrb[4].mxu1 %v16753_v13  ;;  %v3562_v46 = vand.u32 4294901760, %v3561_v62  ;;  %v3574_v48 = vand.u32 4294901760, %v3573_v11  ;;  %v22881_v4 = vand.u32 4294901760, %v16606_v52  ;;  %12966 = vmatpush1.bf16.msra.mxu0 %v16788_v22  ;;  %v3579_v8 = vsub.f32 %v24189_v23, %v22880_v44 }
 0x1d7   :  { %12774 = vmatpush1.bf16.msra.mxu1 %v16765_v40  ;;  %v2725_v43 = vand.u32 4294901760, %v2724_v49  ;;  %12968 = vmatprep.subr.bf16.mxu0 %v16858_v16  ;;  %v2737_v13 = vand.u32 4294901760, %v2736_v3  ;;  %v24193_v40 = vand.u32 4294901760, %v16602_v47  ;;  %v22882_v62 = vand.u32 4294901760, %v16626_v10 }
 0x1d8   :  { %12776 = vmatprep.subr.bf16.mxu1 %v16812_v39  ;;  %v12787_v11 = vpack.c.bf16 %v2713_v17, %v2701_v19  ;;  %v22885_v49 = vand.u32 4294901760, %v16628_v12  ;;  %2825 = vmatprep.mubr.f32.mxu1 %v23799_v42  ;;  %v12979_v16 = vpack.c.bf16 %v3568_v14, %v3556_v59  ;;  %v12789_v3 = vpack.c.bf16 %v2719_v5, %v2707_v32 }
 0x1d9   :  { %v3591_v22 = vsub.f32 %v16602_v47, %v24193_v40  ;;  %3680 = vmatprep.mubr.f32.mxu0 %v23799_v42  ;;  %v12981_v44 = vpack.c.bf16 %v3574_v48, %v3562_v46  ;;  %v2730_v40 = vsub.f32 %v16606_v52, %v22881_v4  ;;  %v24196_v19 = vand.u32 4294901760, %v24190_v26 }
 0x1da   :  { %12970 = vmatpush1.bf16.msra.mxu0 %v16867_v41  ;;  %v24197_v39 = vand.u32 4294901760, %v24191_v9  ;;  %v24198_v59 = vand.u32 4294901760, %v24192_v21  ;;  %v12791_v14 = vpack.c.bf16 %v2737_v13, %v2725_v43  ;;  %v2748_v41 = vsub.f32 %v16626_v10, %v22882_v62  ;;  %v24204_v62 = vld [vmem:[#allocation51_spill] sm:$0xff] }
 0x1db   :  { %12778 = vmatpush1.bf16.msra.mxu1 %v16865_v24  ;;  %v2742_v17 = vsub.f32 %v24190_v26, %v24196_v19  ;;  %12972 = vmatprep.subr.bf16.mxu0 %v16874_v28  ;;  %v3580_v24 = vand.u32 4294901760, %v3579_v8  ;;  %v3592_v5 = vand.u32 4294901760, %v3591_v22  ;;  %v2760_v46 = vsub.f32 %v16628_v12, %v22885_v49  ;;  %v24201_v28 = vld [vmem:[#allocation49_spill] sm:$0xff]  ;;  %v24202_v8 = vld [vmem:[#allocation16_spill] sm:$0xff] }
 0x1dc   :  { %v3585_v7 = vsub.f32 %v24191_v9, %v24197_v39  ;;  %v3597_v32 = vsub.f32 %v24192_v21, %v24198_v59  ;;  %12780 = vmatprep.subr.bf16.mxu1 %v16869_v18  ;;  %v24199_v48 = vand.u32 4294901760, %v24194_v56  ;;  %v24200_v19 = vand.u32 4294901760, %v24195_v58  ;;  %v24203_v59 = vld [vmem:[#allocation22_spill] sm:$0xff]  ;;  %v24205_v22 = vld [vmem:[#allocation32_spill] sm:$0xff] }
 0x1dd   :  { %v2731_v13 = vand.u32 4294901760, %v2730_v40  ;;  %v2743_v49 = vand.u32 4294901760, %v2742_v17  ;;  %v2749_v40 = vand.u32 4294901760, %v2748_v41  ;;  %v22894_v10 = vand.u32 4294901760, %v16715_v35 }
 0x1de   :  { %v3603_v39 = vsub.f32 %v24194_v56, %v24199_v48  ;;  %v3615_v18 = vsub.f32 %v24195_v58, %v24200_v19  ;;  %12974 = vmatpush1.bf16.msra.mxu0 %v16883_v60  ;;  %v3586_v12 = vand.u32 4294901760, %v3585_v7  ;;  %v3598_v48 = vand.u32 4294901760, %v3597_v32 }
 0x1df   :  { %12782 = vmatpush1.bf16.msra.mxu1 %v16876_v63  ;;  %v22890_v56 = vand.u32 4294901760, %v16679_v33  ;;  %12976 = vmatprep.subr.bf16.mxu0 %v16943_v34  ;;  %v22891_v19 = vand.u32 4294901760, %v16681_v30  ;;  %v2761_v43 = vand.u32 4294901760, %v2760_v46  ;;  %v24206_v60 = vand.u32 4294901760, %v24201_v28 }
 0x1e0   :  { %12784 = vmatprep.subr.bf16.mxu1 %v16930_v2  ;;  %v3604_v63 = vand.u32 4294901760, %v3603_v39  ;;  %v3616_v58 = vand.u32 4294901760, %v3615_v18  ;;  %v24207_v17 = vand.u32 4294901760, %v24202_v8  ;;  %v24208_v34 = vand.u32 4294901760, %v24203_v59 }
 0x1e1   :  { %v2754_v7 = vsub.f32 %v24201_v28, %v24206_v60  ;;  %v24209_v41 = vand.u32 4294901760, %v24204_v62  ;;  %v22893_v46 = vand.u32 4294901760, %v16719_v27  ;;  %v12983_v39 = vpack.c.bf16 %v3592_v5, %v3580_v24 }
 0x1e2   :  { %v2766_v2 = vsub.f32 %v24202_v8, %v24207_v17  ;;  %v3609_v32 = vsub.f32 %v24203_v59, %v24208_v34  ;;  %12978 = vmatpush1.bf16.msra.mxu0 %v16952_v50  ;;  %v12793_v18 = vpack.c.bf16 %v2743_v49, %v2731_v13  ;;  %v2772_v60 = vsub.f32 %v16679_v33, %v22890_v56 }
 0x1e3   :  { %v3621_v4 = vsub.f32 %v24204_v62, %v24209_v41  ;;  %12786 = vmatpush1.bf16.msra.mxu1 %v16945_v20  ;;  %12980 = vmatprep.subr.bf16.mxu0 %v12979_v16  ;;  %v2784_v34 = vsub.f32 %v16681_v30, %v22891_v19  ;;  %v24210_v41 = vand.u32 4294901760, %v24205_v22  ;;  %v3639_v50 = vsub.f32 %v16715_v35, %v22894_v10 }
 0x1e4   :  { %12788 = vmatprep.subr.bf16.mxu1 %v12787_v11  ;;  %v12985_v49 = vpack.c.bf16 %v3598_v48, %v3586_v12  ;;  %v12795_v24 = vpack.c.bf16 %v2761_v43, %v2749_v40  ;;  %v12987_v5 = vpack.c.bf16 %v3616_v58, %v3604_v63  ;;  %v2755_v13 = vand.u32 4294901760, %v2754_v7 }
 0x1e5   :  { %v3627_v20 = vsub.f32 %v24205_v22, %v24210_v41  ;;  %v2767_v56 = vand.u32 4294901760, %v2766_v2  ;;  %v3610_v17 = vand.u32 4294901760, %v3609_v32  ;;  %v3622_v11 = vand.u32 4294901760, %v3621_v4 }
 0x1e6   :  { %v2778_v16 = vsub.f32 %v16719_v27, %v22893_v46  ;;  %12982 = vmatpush1.bf16.msra.mxu0 %v12981_v44  ;;  %v24211_v19 = vand.u32 4294901760, %v16721_v29  ;;  %v24212_v22 = vand.u32 4294901760, %v16742_v61  ;;  %v24213_v58 = vand.u32 4294901760, %v16746_v45 }
 0x1e7   :  { %12790 = vmatpush1.bf16.msra.mxu1 %v12789_v3  ;;  %12984 = vmatprep.subr.bf16.mxu0 %v12983_v39  ;;  %v2773_v4 = vand.u32 4294901760, %v2772_v60  ;;  %v2785_v48 = vand.u32 4294901760, %v2784_v34  ;;  %v3628_v40 = vand.u32 4294901760, %v3627_v20  ;;  %v3640_v63 = vand.u32 4294901760, %v3639_v50  ;;  %v24214_v60 = vld [vmem:[#allocation34_spill] sm:$0xff]  ;;  %v24218_v50 = vld [vmem:[#allocation39_spill] sm:$0xff] }
 0x1e8   :  { %v2790_v41 = vsub.f32 %v16721_v29, %v24211_v19  ;;  %v3633_v12 = vsub.f32 %v16742_v61, %v24212_v22  ;;  %v3645_v43 = vsub.f32 %v16746_v45, %v24213_v58  ;;  %12792 = vmatprep.subr.bf16.mxu1 %v12791_v14  ;;  %v12797_v3 = vpack.c.bf16 %v2767_v56, %v2755_v13  ;;  %v24217_v20 = vld [vmem:[#allocation38_spill] sm:$0xff] }
 0x1e9   :  { %v12989_v44 = vpack.c.bf16 %v3622_v11, %v3610_v17  ;;  %v2779_v7 = vand.u32 4294901760, %v2778_v16  ;;  %v12799_v22 = vpack.c.bf16 %v2785_v48, %v2773_v4  ;;  %v12991_v46 = vpack.c.bf16 %v3640_v63, %v3628_v40  ;;  %v24215_v17 = vld [vmem:[#allocation35_spill] sm:$0xff]  ;;  %v24221_v11 = vld [vmem:[#allocation89_spill] sm:$0xff]  ;;  %v24222_v16 = vld [vmem:[#allocation90_spill] sm:$0xff] }
 0x1ea   :  { %12986 = vmatpush1.bf16.msra.mxu0 %v12985_v49  ;;  %v2791_v19 = vand.u32 4294901760, %v2790_v41  ;;  %v3634_v2 = vand.u32 4294901760, %v3633_v12  ;;  %v3646_v32 = vand.u32 4294901760, %v3645_v43  ;;  %v12803_v56 = vpack.c.bf16 %v24214_v60, %v16320_v36  ;;  %v24224_v12 = vld [vmem:[#allocation28_spill] sm:$0xff]  ;;  %v24225_v43 = vld [vmem:[#allocation23_spill] sm:$0xff]  ;;  %v24226_v4 = vld [vmem:[#allocation93_spill] sm:$0xff] }
 0x1eb   :  { %12794 = vmatpush1.bf16.msra.mxu1 %v12793_v18  ;;  %12988 = vmatprep.subr.bf16.mxu0 %v12987_v5  ;;  %v24216_v18 = vld [vmem:[#allocation37_spill] sm:$0xff]  ;;  %v12805_v49 = vpack.c.bf16 %v24218_v50, %v24217_v20  ;;  %v24220_v5 = vld [vmem:[#allocation87_spill] sm:$0xff]  ;;  %v12807_v41 = vpack.c.bf16 %v24222_v16, %v24221_v11  ;;  %v24227_v48 = vld [vmem:[#allocation94_spill] sm:$0xff] }
 0x1ec   :  { %12796 = vmatprep.subr.bf16.mxu1 %v12795_v24  ;;  %v12801_v14 = vpack.c.bf16 %v2791_v19, %v2779_v7  ;;  %v12993_v39 = vpack.c.bf16 %v3646_v32, %v3634_v2  ;;  %v12995_v34 = vpack.c.bf16 %v24216_v18, %v24215_v17  ;;  %v24219_v24 = vld [vmem:[#allocation86_spill] sm:$0xff]  ;;  %v12809_v40 = vpack.c.bf16 %v24227_v48, %v24226_v4  ;;  %v24228_v63 = vld [vmem:[#allocation41_spill] sm:$0xff]  ;;  %v24230_v7 = vld [vmem:[#allocation95_spill] sm:$0xff] }
 0x1ed   :  { %v12997_v13 = vpack.c.bf16 %v24220_v5, %v24219_v24  ;;  %v24231_v19 = vld [vmem:[#allocation97_spill] sm:$0xff]  ;;  %v24232_v32 = vld [vmem:[#allocation99_spill] sm:$0xff] }
 0x1ee   :  { %12990 = vmatpush1.bf16.msra.mxu0 %v12989_v44  ;;  %v12811_v2 = vpack.c.bf16 %v24231_v19, %v24230_v7 }
 0x1ef   :  { %12798 = vmatpush1.bf16.msra.mxu1 %v12797_v3  ;;  %12992 = vmatprep.subr.bf16.mxu0 %v12991_v46  ;;  %v24223_v46 = vld [vmem:[#allocation91_spill] sm:$0xff] }
 0x1f0   :  { %12800 = vmatprep.subr.bf16.mxu1 %v12799_v22  ;;  %v12999_v58 = vpack.c.bf16 %v24224_v12, %v24223_v46  ;;  %v24229_v3 = vld [vmem:[#allocation43_spill] sm:$0xff]  ;;  %v24233_v22 = vld [vmem:[#allocation100_spill] sm:$0xff] }
 0x1f1   :  { %v13001_v44 = vpack.c.bf16 %v24229_v3, %v24228_v63 }
 0x1f2   :  { %12994 = vmatpush1.bf16.msra.mxu0 %v12993_v39  ;;  %v24234_v39 = vld [vmem:[#allocation102_spill] sm:$0xff] }
 0x1f3   :  { %12802 = vmatpush1.bf16.msra.mxu1 %v12801_v14  ;;  %12996 = vmatprep.subr.bf16.mxu0 %v12995_v34  ;;  %v13003_v14 = vpack.c.bf16 %v24233_v22, %v24232_v32  ;;  %v24239_v22 = vld [vmem:[#allocation19_spill] sm:$0xff] }
 0x1f4   :  { %12804 = vmatprep.subr.bf16.mxu1 %v12803_v56  ;;  %v24235_v56 = vld [vmem:[#allocation103_spill] sm:$0xff] }
 0x1f5   :  { %3682 = vmatmul.mubr.f32.vlgmr.msra.gmra.mrb[4].mxu0 %v24225_v43  ;;  %v12813_v34 = vpack.c.bf16 %v24235_v56, %v24234_v39  ;;  %v24240_v56 = vld [vmem:[#allocation76_spill] sm:$0xff] }
 0x1f6   :  { %2827 = vmatmul.mubr.f32.vlgmr.msra.gmra.mrb[4].mxu1 %v24225_v43  ;;  %12998 = vmatpush1.bf16.msra.mxu0 %v12997_v13  ;;  %v24237_v13 = vld [vmem:[#allocation7_spill] sm:$0xff]  ;;  %v13007_v43 = vpack.c.bf16 %v24151_v37, %v24148_v38 }
 0x1f7   :  { %12806 = vmatpush1.bf16.msra.mxu1 %v12805_v49  ;;  %13000 = vmatprep.subr.bf16.mxu0 %v12999_v58  ;;  %v24236_v49 = vld [vmem:[#allocation105_spill] sm:$0xff] }
 0x1f8   :  { %12808 = vmatprep.subr.bf16.mxu1 %v12807_v41  ;;  %2961 = vmatprep.mubr.f32.mxu1 %v23799_v42  ;;  %v13005_v10 = vpack.c.bf16 %v24237_v13, %v24236_v49  ;;  %v24238_v41 = vld [vmem:[#allocation13_spill] sm:$0xff]  ;;  %v24242_v13 = vld [vmem:[#allocation67_spill] sm:$0xff] }
 0x1f9   :  { %3816 = vmatprep.mubr.f32.mxu0 %v23799_v42  ;;  %v12815_v58 = vpack.c.bf16 %v24238_v41, %v24142_v55 }
 0x1fa   :  { %13002 = vmatpush1.bf16.msra.mxu0 %v13001_v44  ;;  %v13009_v44 = vpack.c.bf16 %v24162_v57, %v24161_v25 }
 0x1fb   :  { %12810 = vmatpush1.bf16.msra.mxu1 %v12809_v40  ;;  %13004 = vmatprep.subr.bf16.mxu0 %v13003_v14  ;;  %v12817_v40 = vpack.c.bf16 %v24239_v22, %v24152_v15  ;;  %v24241_v14 = vld [vmem:[#allocation80_spill] sm:$0xff] }
 0x1fc   :  { %12812 = vmatprep.subr.bf16.mxu1 %v12811_v2  ;;  %v12819_v2 = vpack.c.bf16 %v24167_v6, %v24240_v56  ;;  %v13011_v49 = vpack.c.bf16 %v24242_v13, %v24241_v14 }
 0x1fe   :  { %13006 = vmatpush1.bf16.msra.mxu0 %v13005_v10  ;;  %v13013_v10 = vpack.c.bf16 %v24173_v0, %v24172_v31  ;;  %v24244_v0 = vld [vmem:[#allocation5_spill] sm:$0xff]  ;;  %v24246_v31 = vld [vmem:[#allocation48_spill] sm:$0xff] }
 0x1ff   :  { %12814 = vmatpush1.bf16.msra.mxu1 %v12813_v34  ;;  %13008 = vmatprep.subr.bf16.mxu0 %v13007_v43  ;;  %v12821_v34 = vpack.c.bf16 %v24171_v53, %v24170_v51  ;;  %v13015_v43 = vpack.c.bf16 %v16602_v47, %v24189_v23  ;;  %v24243_v53 = vld [vmem:[#allocation4_spill] sm:$0xff] }
 0x200   :  { %12816 = vmatprep.subr.bf16.mxu1 %v12815_v58  ;;  %v12823_v58 = vpack.c.bf16 %v24177_v1, %v24175_v54 }
 0x202   :  { %13010 = vmatpush1.bf16.msra.mxu0 %v13009_v44  ;;  %v13017_v44 = vpack.c.bf16 %v24192_v21, %v24191_v9 }
 0x203   :  { %12818 = vmatpush1.bf16.msra.mxu1 %v12817_v40  ;;  %13012 = vmatprep.subr.bf16.mxu0 %v13011_v49  ;;  %v12825_v40 = vpack.c.bf16 %v24190_v26, %v16606_v52  ;;  %v24245_v49 = vld [vmem:[#allocation8_spill] sm:$0xff] }
 0x204   :  { %12820 = vmatprep.subr.bf16.mxu1 %v12819_v2  ;;  %v12827_v2 = vpack.c.bf16 %v24244_v0, %v24243_v53  ;;  %v13019_v51 = vpack.c.bf16 %v24246_v31, %v24245_v49 }
 0x206   :  { %13014 = vmatpush1.bf16.msra.mxu0 %v13013_v10  ;;  %v13021_v10 = vpack.c.bf16 %v24204_v62, %v24203_v59 }
 0x207   :  { %12822 = vmatpush1.bf16.msra.mxu1 %v12821_v34  ;;  %13016 = vmatprep.subr.bf16.mxu0 %v13015_v43  ;;  %v12829_v34 = vpack.c.bf16 %v24202_v8, %v24201_v28  ;;  %v24247_v43 = vld [vmem:[#allocation32_spill] sm:$0xff] }
 0x208   :  { %12824 = vmatprep.subr.bf16.mxu1 %v12823_v58  ;;  %v12831_v58 = vpack.c.bf16 %v16681_v30, %v16679_v33  ;;  %v13023_v21 = vpack.c.bf16 %v16715_v35, %v24247_v43  ;;  %v24250_v30 = vld [vmem:[#allocation24_spill] sm:$0xff] }
 0x20a   :  { %13018 = vmatpush1.bf16.msra.mxu0 %v13017_v44  ;;  %v13025_v44 = vpack.c.bf16 %v16746_v45, %v16742_v61  ;;  %v24255_v61 = vld [vmem:[#allocation31_spill] sm:$0xff]  ;;  %v24256_v45 = vld [vmem:[#allocation40_spill] sm:$0xff] }
 0x20b   :  { %12826 = vmatpush1.bf16.msra.mxu1 %v12825_v40  ;;  %13020 = vmatprep.subr.bf16.mxu0 %v13019_v51  ;;  %v12833_v40 = vpack.c.bf16 %v16721_v29, %v16719_v27  ;;  %v24249_v51 = vld [vmem:[#allocation30_spill] sm:$0xff]  ;;  %v24253_v29 = vld [vmem:[#allocation88_spill] sm:$0xff] }
 0x20c   :  { %12828 = vmatprep.subr.bf16.mxu1 %v12827_v2  ;;  %v24248_v2 = vld [vmem:[#allocation29_spill] sm:$0xff]  ;;  %v24254_v27 = vld [vmem:[#allocation92_spill] sm:$0xff] }
 0x20e   :  { %13022 = vmatpush1.bf16.msra.mxu0 %v13021_v10  ;;  %v24252_v10 = vld [vmem:[#allocation85_spill] sm:$0xff] }
 0x20f   :  { %12830 = vmatpush1.bf16.msra.mxu1 %v12829_v34  ;;  %13024 = vmatprep.subr.bf16.mxu0 %v13023_v21  ;;  %v24251_v34 = vld [vmem:[#allocation33_spill] sm:$0xff]  ;;  %v24257_v21 = vld [vmem:[#allocation96_spill] sm:$0xff] }
 0x210   :  { %12832 = vmatprep.subr.bf16.mxu1 %v12831_v58  ;;  %v24258_v58 = vld [vmem:[#allocation98_spill] sm:$0xff] }
 0x212   :  { %13026 = vmatpush1.bf16.msra.mxu0 %v13025_v44  ;;  %v24261_v44 = vld [vmem:[#allocation10_spill] sm:$0xff] }
 0x213   :  { %12834 = vmatpush1.bf16.msra.mxu1 %v12833_v40  ;;  %13028 = vmatprep.subr.bf16.mxu0 %v24249_v51  ;;  %v24260_v40 = vld [vmem:[#allocation104_spill] sm:$0xff] }
 0x214   :  { %12836 = vmatprep.subr.bf16.mxu1 %v24248_v2  ;;  %v24283_v51 = vld [vmem:[#allocation36_spill] sm:$0xff] }
 0x215   :  { %3819 = vmatmul.mubr.f32.vlgmr.msra.gmra.mrb[4].mxu0 %v24250_v30 }
 0x216   :  { %2964 = vmatmul.mubr.f32.vlgmr.msra.gmra.mrb[4].mxu1 %v24250_v30  ;;  %13030 = vmatpush1.bf16.msra.mxu0 %v24252_v10  ;;  %v24259_v30 = vld [vmem:[#allocation101_spill] sm:$0xff]  ;;  %v24264_v10 = vld [vmem:[#allocation27_spill] sm:$0xff] }
 0x217   :  { %12838 = vmatpush1.bf16.msra.mxu1 %v24251_v34  ;;  %13032 = vmatprep.subr.bf16.mxu0 %v24254_v27  ;;  %v24263_v27 = vld [vmem:[#allocation17_spill] sm:$0xff] }
 0x218   :  { %12840 = vmatprep.subr.bf16.mxu1 %v24253_v29  ;;  %3066 = vmatprep.mubr.f32.mxu1 %v23799_v42  ;;  %v24262_v29 = vld [vmem:[#allocation12_spill] sm:$0xff]  ;;  %v24265_v34 = vld [vmem:[#allocation77_spill] sm:$0xff] }
 0x219   :  { %3921 = vmatprep.mubr.f32.mxu0 %v23799_v42 }
 0x21a   :  { %13034 = vmatpush1.bf16.msra.mxu0 %v24256_v45  ;;  %v24267_v45 = vld [vmem:[#allocation15_spill] sm:$0xff] }
 0x21b   :  { %12842 = vmatpush1.bf16.msra.mxu1 %v24255_v61  ;;  %13036 = vmatprep.subr.bf16.mxu0 %v24258_v58  ;;  %v24266_v61 = vld [vmem:[#allocation66_spill] sm:$0xff] }
 0x21c   :  { %12844 = vmatprep.subr.bf16.mxu1 %v24257_v21  ;;  %v24268_v21 = vld [vmem:[#allocation68_spill] sm:$0xff]  ;;  %v24269_v58 = vld [vmem:[#allocation70_spill] sm:$0xff] }
 0x21e   :  { %13038 = vmatpush1.bf16.msra.mxu0 %v24260_v40  ;;  %v24271_v40 = vld [vmem:[#allocation81_spill] sm:$0xff] }
 0x21f   :  { %12846 = vmatpush1.bf16.msra.mxu1 %v24259_v30  ;;  %13040 = vmatprep.subr.bf16.mxu0 %v24262_v29  ;;  %v24270_v30 = vld [vmem:[#allocation75_spill] sm:$0xff]  ;;  %v24273_v29 = vld [vmem:[#allocation46_spill] sm:$0xff] }
 0x220   :  { %12848 = vmatprep.subr.bf16.mxu1 %v24261_v44  ;;  %v24272_v44 = vld [vmem:[#allocation84_spill] sm:$0xff] }
 0x222   :  { %13042 = vmatpush1.bf16.msra.mxu0 %v24264_v10  ;;  %v24275_v10 = vld [vmem:[#allocation11_spill] sm:$0xff] }
 0x223   :  { %12850 = vmatpush1.bf16.msra.mxu1 %v24263_v27  ;;  %13044 = vmatprep.subr.bf16.mxu0 %v24266_v61  ;;  %v24274_v27 = vld [vmem:[#allocation47_spill] sm:$0xff]  ;;  %v24277_v61 = vld [vmem:[#allocation26_spill] sm:$0xff] }
 0x224   :  { %12852 = vmatprep.subr.bf16.mxu1 %v24265_v34  ;;  %v24276_v34 = vld [vmem:[#allocation50_spill] sm:$0xff] }
 0x226   :  { %13046 = vmatpush1.bf16.msra.mxu0 %v24268_v21 }
 0x227   :  { %12854 = vmatpush1.bf16.msra.mxu1 %v24267_v45  ;;  %13048 = vmatprep.subr.bf16.mxu0 %v24270_v30  ;;  %v24278_v45 = vld [vmem:[#allocation53_spill] sm:$0xff]  ;;  %v24280_v30 = vand.u32 4294901760, %v24214_v60 }
 0x228   :  { %12856 = vmatprep.subr.bf16.mxu1 %v24269_v58  ;;  %v24279_v58 = vand.u32 4294901760, %v16320_v36  ;;  %v24288_v36 = vand.u32 4294901760, %v24220_v5  ;;  %v24296_v5 = vand.u32 4294901760, %v24228_v63  ;;  %v24305_v63 = vand.u32 4294901760, %v24234_v39 }
 0x22a   :  { %13050 = vmatpush1.bf16.msra.mxu0 %v24272_v44  ;;  %v12867_v21 = vpack.c.bf16 %v24280_v30, %v24279_v58  ;;  %v24282_v44 = vand.u32 4294901760, %v24216_v18  ;;  %v24290_v18 = vand.u32 4294901760, %v24222_v16  ;;  %v24291_v30 = vand.u32 4294901760, %v24223_v46 }
 0x22b   :  { %12858 = vmatpush1.bf16.msra.mxu1 %v24271_v40  ;;  %13052 = vmatprep.subr.bf16.mxu0 %v24274_v27  ;;  %v24281_v40 = vand.u32 4294901760, %v24215_v17  ;;  %v24284_v27 = vld [vmem:[#allocation55_spill] sm:$0xff]  ;;  %v24289_v17 = vand.u32 4294901760, %v24221_v11  ;;  %v24297_v11 = vand.u32 4294901760, %v24229_v3  ;;  %v24298_v46 = vand.u32 4294901760, %v24230_v7 }
 0x22c   :  { %12860 = vmatprep.subr.bf16.mxu1 %v24273_v29  ;;  %v24306_v3 = vld [vmem:[#allocation103_spill] sm:$0xff] }
 0x22d   :  { %v13059_v29 = vpack.c.bf16 %v24282_v44, %v24281_v40  ;;  %v12871_v58 = vpack.c.bf16 %v24290_v18, %v24289_v17  ;;  %v24292_v40 = vand.u32 4294901760, %v24224_v12  ;;  %v24293_v44 = vld [vmem:[#allocation25_spill] sm:$0xff]  ;;  %v13065_v16 = vpack.c.bf16 %v24297_v11, %v24296_v5 }
 0x22e   :  { %13054 = vmatpush1.bf16.msra.mxu0 %v24276_v34  ;;  %v24285_v34 = vand.u32 4294901760, %v24217_v20  ;;  %v24299_v12 = vand.u32 4294901760, %v24231_v19  ;;  %v24307_v7 = vand.u32 4294901760, %v24306_v3  ;;  %v12107_v3 = vld [vmem:[%s22479_s4 + $0x438] sm:$0xff] }
 0x22f   :  { %12862 = vmatpush1.bf16.msra.mxu1 %v24275_v10  ;;  %13056 = vmatprep.subr.bf16.mxu0 %v24278_v45  ;;  %v24287_v45 = vand.u32 4294901760, %v24219_v24  ;;  %v13063_v20 = vpack.c.bf16 %v24292_v40, %v24291_v30  ;;  %v24313_v30 = vand.u32 4294901760, %v24238_v41  ;;  %v24320_v41 = vand.u32 4294901760, %v24162_v57  ;;  %v12101_v57 = vld [vmem:[%s22479_s4 + $0x408] sm:$0xff] }
 0x230   :  { %12864 = vmatprep.subr.bf16.mxu1 %v24277_v61  ;;  %v24286_v61 = vand.u32 4294901760, %v24218_v50  ;;  %v24294_v50 = vand.u32 4294901760, %v24226_v4  ;;  %v12877_v19 = vpack.c.bf16 %v24307_v7, %v24305_v63  ;;  %v12103_v63 = vld [vmem:[%s22479_s4 + $0x418] sm:$0xff]  ;;  %v24334_v7 = vand.u32 4294901760, %v24175_v54 }
 0x231   :  { %v13061_v60 = vpack.c.bf16 %v24288_v36, %v24287_v45  ;;  %v24308_v36 = vld [vmem:[#allocation105_spill] sm:$0xff]  ;;  %v4268_v54 = vand.u32 4294901760, %v12101_v57 }
 0x232   :  { %13058 = vmatpush1.bf16.msra.mxu0 %v24284_v27  ;;  %v12869_v10 = vpack.c.bf16 %v24286_v61, %v24285_v34  ;;  %v12875_v34 = vpack.c.bf16 %v24299_v12, %v24298_v46  ;;  %v24301_v61 = vld [vmem:[#allocation100_spill] sm:$0xff]  ;;  %v24323_v46 = vand.u32 4294901760, %v24241_v14  ;;  %v24324_v12 = vand.u32 4294901760, %v24242_v13  ;;  %v24332_v14 = vld [vmem:[#allocation69_spill] sm:$0xff] }
 0x233   :  { %12866 = vmatpush1.bf16.msra.mxu1 %v24283_v51  ;;  %13060 = vmatprep.subr.bf16.mxu0 %v13059_v29  ;;  %v24295_v29 = vand.u32 4294901760, %v24227_v48  ;;  %v24302_v45 = vand.u32 4294901760, %v24301_v61  ;;  %v24330_v61 = vld [vmem:[#allocation45_spill] sm:$0xff] }
 0x234   :  { %12868 = vmatprep.subr.bf16.mxu1 %v12867_v21  ;;  %v24303_v21 = vld [vmem:[#allocation21_spill] sm:$0xff] }
 0x235   :  { %3925 = vmatmul.mubr.f32.vlgmr.msra.gmra.mrb[4].mxu0 %v24293_v44  ;;  %v12873_v24 = vpack.c.bf16 %v24295_v29, %v24294_v50  ;;  %v17208_v48 = vand.u32 4294901760, %v24303_v21  ;;  %v24317_v29 = vand.u32 4294901760, %v24152_v15  ;;  %v13075_v15 = vpack.c.bf16 %v24324_v12, %v24323_v46 }
 0x236   :  { %3070 = vmatmul.mubr.f32.vlgmr.msra.gmra.mrb[4].mxu1 %v24293_v44  ;;  %13062 = vmatpush1.bf16.msra.mxu0 %v13061_v60  ;;  %v24309_v60 = vand.u32 4294901760, %v24308_v36  ;;  %v24315_v44 = vand.u32 4294901760, %v24151_v37  ;;  %v24321_v37 = vand.u32 4294901760, %v24240_v56  ;;  %v24328_v56 = vld [vmem:[#allocation44_spill] sm:$0xff]  ;;  %v24347_v12 = vand.u32 4294901760, %v24201_v28 }
 0x237   :  { %12870 = vmatpush1.bf16.msra.mxu1 %v12869_v10  ;;  %13064 = vmatprep.subr.bf16.mxu0 %v13063_v20  ;;  %v24300_v10 = vand.u32 4294901760, %v24232_v32  ;;  %24304 = vst [vmem:[#allocation57_spill] sm:$0xff] %v17208_v48  ;;  %v24310_v32 = vld [vmem:[#allocation7_spill] sm:$0xff]  ;;  %v24314_v20 = vand.u32 4294901760, %v24148_v38  ;;  %v17230_v50 = vsub.f32 %v24303_v21, %v17208_v48  ;;  %v24322_v38 = vand.u32 4294901760, %v24167_v6 }
 0x238   :  { %12872 = vmatprep.subr.bf16.mxu1 %v12871_v58  ;;  %3236 = vmatprep.mubr.f32.mxu1 %v23799_v42  ;;  %v24311_v17 = vand.u32 4294901760, %v24310_v32  ;;  %v24312_v58 = vand.u32 4294901760, %v24142_v55  ;;  %v24319_v55 = vand.u32 4294901760, %v24161_v25  ;;  %v24326_v25 = vld [vmem:[#allocation3_spill] sm:$0xff]  ;;  %v24337_v32 = vand.u32 4294901760, %v16602_v47 }
 0x239   :  { %v13067_v4 = vpack.c.bf16 %v24302_v45, %v24300_v10  ;;  %4091 = vmatprep.mubr.f32.mxu0 %v23799_v42  ;;  %v13071_v39 = vpack.c.bf16 %v24315_v44, %v24314_v20  ;;  %24316 = vst [vmem:[#allocation58_spill] sm:$0xff] %v17230_v50  ;;  %v24329_v10 = vand.u32 4294901760, %v24328_v56  ;;  %v24331_v45 = vand.u32 4294901760, %v24330_v61  ;;  %v12105_v21 = vld [vmem:[%s22479_s4 + $0x428] sm:$0xff] }
 0x23a   :  { %13066 = vmatpush1.bf16.msra.mxu0 %v13065_v16  ;;  %v13069_v18 = vpack.c.bf16 %v24311_v17, %v24309_v60  ;;  %v12879_v40 = vpack.c.bf16 %v24313_v30, %v24312_v58  ;;  %v13073_v11 = vpack.c.bf16 %v24320_v41, %v24319_v55  ;;  %v12883_v16 = vpack.c.bf16 %v24322_v38, %v24321_v37  ;;  %v12104_v58 = vld [vmem:[%s22479_s4 + $0x420] sm:$0xff]  ;;  %v12106_v37 = vld [vmem:[%s22479_s4 + $0x430] sm:$0xff] }
 0x23b   :  { %12874 = vmatpush1.bf16.msra.mxu1 %v12873_v24  ;;  %13068 = vmatprep.subr.bf16.mxu0 %v13067_v4  ;;  %v24318_v24 = vand.u32 4294901760, %v24239_v22  ;;  %v17249_v22 = vand.u32 4294901760, %v17230_v50  ;;  %v24333_v4 = vand.u32 4294901760, %v24332_v14  ;;  %v24336_v60 = vand.u32 4294901760, %v24189_v23  ;;  %v24356_v14 = vld [vmem:[#allocation54_spill] sm:$0xff]  ;;  %v24396_v30 = vld [vmem:[#allocation92_spill] sm:$0xff] }
 0x23c   :  { %12876 = vmatprep.subr.bf16.mxu1 %v12875_v34  ;;  %v24327_v34 = vand.u32 4294901760, %v24326_v25  ;;  %v5127_v20 = vand.u32 4294901760, %v12107_v3  ;;  %v24338_v47 = vand.u32 4294901760, %v16606_v52  ;;  %v24339_v23 = vand.u32 4294901760, %v24190_v26 }
 0x23d   :  { %v12881_v5 = vpack.c.bf16 %v24318_v24, %v24317_v29  ;;  %24325 = vst [vmem:[#allocation59_spill] sm:$0xff] %v17249_v22  ;;  %v13077_v13 = vpack.c.bf16 %v24333_v4, %v24331_v45  ;;  %v13079_v17 = vpack.c.bf16 %v24337_v32, %v24336_v60  ;;  %v24341_v29 = vld [vmem:[#allocation2_spill] sm:$0xff]  ;;  %v4274_v41 = vand.u32 4294901760, %v12104_v58 }
 0x23e   :  { %13070 = vmatpush1.bf16.msra.mxu0 %v13069_v18  ;;  %v12885_v6 = vpack.c.bf16 %v24329_v10, %v24327_v34  ;;  %v12100_v18 = vld [vmem:[%s22479_s4 + $0x400] sm:$0xff]  ;;  %v12889_v44 = vpack.c.bf16 %v24339_v23, %v24338_v47  ;;  %v24342_v24 = vand.u32 4294901760, %v24341_v29  ;;  %v24343_v52 = vand.u32 4294901760, %v24243_v53  ;;  %v12109_v34 = vld [vmem:[%s22479_s4 + $0x448] sm:$0xff]  ;;  %v24352_v10 = vld [vmem:[#allocation52_spill] sm:$0xff] }
 0x23f   :  { %12878 = vmatpush1.bf16.msra.mxu1 %v12877_v19  ;;  %13072 = vmatprep.subr.bf16.mxu0 %v13071_v39  ;;  %v24335_v19 = vand.u32 4294901760, %v24177_v1  ;;  %v5123_v1 = vand.u32 4294901760, %v12103_v63  ;;  %v24340_v39 = vand.u32 4294901760, %v24191_v9  ;;  %v4270_v55 = vand.u32 4294901760, %v12100_v18  ;;  %v12113_v53 = vld [vmem:[%s22479_s4 + $0x468] sm:$0xff]  ;;  %v12108_v23 = vld [vmem:[%s22479_s4 + $0x440] sm:$0xff] }
 0x240   :  { %12880 = vmatprep.subr.bf16.mxu1 %v12879_v40  ;;  %v4272_v40 = vand.u32 4294901760, %v12105_v21  ;;  %v24344_v26 = vand.u32 4294901760, %v24244_v0  ;;  %v24345_v38 = vand.u32 4294901760, %v24245_v49  ;;  %v24349_v0 = vand.u32 4294901760, %v24203_v59 }
 0x241   :  { %v12887_v36 = vpack.c.bf16 %v24335_v19, %v24334_v7  ;;  %v24350_v49 = vand.u32 4294901760, %v24204_v62  ;;  %v24353_v28 = vand.u32 4294901760, %v24352_v10  ;;  %v24355_v61 = vand.u32 4294901760, %v16715_v35  ;;  %v12115_v35 = vld [vmem:[%s22479_s4 + $0x478] sm:$0xff] }
 0x242   :  { %13074 = vmatpush1.bf16.msra.mxu0 %v13073_v11  ;;  %v12102_v11 = vld [vmem:[%s22479_s4 + $0x410] sm:$0xff]  ;;  %v12891_v9 = vpack.c.bf16 %v24344_v26, %v24343_v52  ;;  %v24357_v4 = vand.u32 4294901760, %v24356_v14  ;;  %v17337_v59 = vpack.c.bf16 %v5127_v20, %v5123_v1  ;;  %v5129_v60 = vand.u32 4294901760, %v12106_v37 }
 0x243   :  { %12882 = vmatpush1.bf16.msra.mxu1 %v12881_v5  ;;  %13076 = vmatprep.subr.bf16.mxu0 %v13075_v15  ;;  %v13081_v5 = vpack.c.bf16 %v24342_v24, %v24340_v39  ;;  %v24348_v15 = vand.u32 4294901760, %v24202_v8  ;;  %v13085_v56 = vpack.c.bf16 %v24350_v49, %v24349_v0  ;;  %v24354_v8 = vand.u32 4294901760, %v24247_v43  ;;  %v12112_v39 = vld [vmem:[%s22479_s4 + $0x460] sm:$0xff]  ;;  %v12114_v24 = vld [vmem:[%s22479_s4 + $0x470] sm:$0xff] }
 0x244   :  { %12884 = vmatprep.subr.bf16.mxu1 %v12883_v16  ;;  %v24346_v16 = vand.u32 4294901760, %v24246_v31  ;;  %v24351_v31 = vand.u32 4294901760, %v16679_v33  ;;  %24361 = vst [vmem:[#allocation61_spill] sm:$0xff] %v17337_v59  ;;  %v5125_v62 = vand.u32 4294901760, %v12102_v11  ;;  %v12111_v33 = vld [vmem:[%s22479_s4 + $0x458] sm:$0xff]  ;;  %v17345_v43 = vsub.f32 %v12101_v57, %v4268_v54 }
 0x245   :  { %v12893_v25 = vpack.c.bf16 %v24348_v15, %v24347_v12  ;;  %v13087_v45 = vpack.c.bf16 %v24355_v61, %v24354_v8  ;;  %v17347_v32 = vpack.c.bf16 %v4274_v41, %v4270_v55  ;;  %v4280_v47 = vand.u32 4294901760, %v12113_v53  ;;  %v12116_v12 = vld [vmem:[%s22479_s4 + $0x480] sm:$0xff]  ;;  %v24379_v8 = vld [vmem:[#allocation56_spill] sm:$0xff] }
 0x246   :  { %13078 = vmatpush1.bf16.msra.mxu0 %v13077_v13  ;;  %v13083_v46 = vpack.c.bf16 %v24346_v16, %v24345_v38  ;;  %v24358_v13 = vld [vmem:[#allocation42_spill] sm:$0xff]  ;;  %v17355_v29 = vsub.f32 %v12105_v21, %v4272_v40  ;;  %v17359_v57 = vsub.f32 %v12107_v3, %v5127_v20  ;;  %v17369_v52 = vsub.f32 %v12104_v58, %v4274_v41  ;;  %v12121_v20 = vld [vmem:[%s22479_s4 + $0x4a8] sm:$0xff]  ;;  %v12123_v38 = vld [vmem:[%s22479_s4 + $0x4b8] sm:$0xff] }
 0x247   :  { %12886 = vmatpush1.bf16.msra.mxu1 %v12885_v6  ;;  %13080 = vmatprep.subr.bf16.mxu0 %v13079_v17  ;;  %v12895_v6 = vpack.c.bf16 %v24353_v28, %v24351_v31  ;;  %v24359_v7 = vand.u32 4294901760, %v24358_v13  ;;  %24362 = vst [vmem:[#allocation62_spill] sm:$0xff] %v17347_v32  ;;  %v4276_v17 = vand.u32 4294901760, %v12109_v34  ;;  %v5131_v26 = vand.u32 4294901760, %v12111_v33  ;;  %v12120_v15 = vld [vmem:[%s22479_s4 + $0x4a0] sm:$0xff]  ;;  %v12118_v28 = vld [vmem:[%s22479_s4 + $0x490] sm:$0xff] }
 0x248   :  { %12888 = vmatprep.subr.bf16.mxu1 %v12887_v36  ;;  %v17335_v36 = vpack.c.bf16 %v4272_v40, %v4268_v54  ;;  %24363 = vst [vmem:[#allocation63_spill] sm:$0xff] %v17355_v29  ;;  %24365 = vst [vmem:[#allocation65_spill] sm:$0xff] %v17359_v57  ;;  %v12110_v54 = vld [vmem:[%s22479_s4 + $0x450] sm:$0xff]  ;;  %v17371_v21 = vpack.c.bf16 %v5129_v60, %v5125_v62  ;;  %v4278_v3 = vand.u32 4294901760, %v12108_v23  ;;  %v4282_v40 = vand.u32 4294901760, %v12112_v39  ;;  %v12125_v13 = vld [vmem:[%s22479_s4 + $0x4c8] sm:$0xff] }
 0x249   :  { %v12897_v19 = vpack.c.bf16 %v24359_v7, %v24357_v4  ;;  %24367 = vst [vmem:[#allocation14_spill] sm:$0xff] %v17369_v52  ;;  %v17383_v58 = vpack.c.bf16 %v4280_v47, %v4276_v17  ;;  %v5137_v41 = vand.u32 4294901760, %v12114_v24  ;;  %v17391_v16 = vsub.f32 %v12109_v34, %v4276_v17  ;;  %v12129_v7 = vld [vmem:[%s22479_s4 + $0x4e8] sm:$0xff]  ;;  %v12131_v17 = vld [vmem:[%s22479_s4 + $0x4f8] sm:$0xff] }
 0x24a   :  { %24360 = vst [vmem:[#allocation60_spill] sm:$0xff] %v17335_v36  ;;  %13082 = vmatpush1.bf16.msra.mxu0 %v13081_v5  ;;  %v17367_v5 = vsub.f32 %v12100_v18, %v4270_v55  ;;  %24368 = vst [vmem:[#allocation18_spill] sm:$0xff] %v17371_v21  ;;  %v17381_v18 = vsub.f32 %v12106_v37, %v5129_v60  ;;  %v5133_v55 = vand.u32 4294901760, %v12110_v54  ;;  %v5143_v10 = vand.u32 4294901760, %v12123_v38 }
 0x24b   :  { %12890 = vmatpush1.bf16.msra.mxu1 %v12889_v44  ;;  %13084 = vmatprep.subr.bf16.mxu0 %v13083_v46  ;;  %v17357_v44 = vsub.f32 %v12103_v63, %v5123_v1  ;;  %v17373_v63 = vsub.f32 %v12102_v11, %v5125_v62  ;;  %v12117_v1 = vld [vmem:[%s22479_s4 + $0x488] sm:$0xff]  ;;  %24371 = vst [vmem:[#allocation74_spill] sm:$0xff] %v17383_v58  ;;  %v12119_v11 = vld [vmem:[%s22479_s4 + $0x498] sm:$0xff]  ;;  %24372 = vst [vmem:[#allocation78_spill] sm:$0xff] %v17391_v16  ;;  %v4286_v14 = vand.u32 4294901760, %v12116_v12 }
 0x24c   :  { %12892 = vmatprep.subr.bf16.mxu1 %v12891_v9  ;;  %24366 = vst [vmem:[#allocation9_spill] sm:$0xff] %v17367_v5  ;;  %v5135_v9 = vand.u32 4294901760, %v12115_v35  ;;  %24370 = vst [vmem:[#allocation72_spill] sm:$0xff] %v17381_v18  ;;  %v17393_v46 = vsub.f32 %v12113_v53, %v4280_v47  ;;  %v17395_v37 = vsub.f32 %v12111_v33, %v5131_v26  ;;  %v4284_v49 = vand.u32 4294901760, %v12117_v1  ;;  %v24382_v62 = vld [vmem:[#allocation30_spill] sm:$0xff] }
 0x24d   :  { %24364 = vst [vmem:[#allocation64_spill] sm:$0xff] %v17357_v44  ;;  %24369 = vst [vmem:[#allocation20_spill] sm:$0xff] %v17373_v63  ;;  %v17407_v34 = vpack.c.bf16 %v4282_v40, %v4278_v3  ;;  %v17409_v53 = vsub.f32 %v12108_v23, %v4278_v3  ;;  %v5139_v31 = vand.u32 4294901760, %v12119_v11  ;;  %v17418_v61 = vsub.f32 %v12112_v39, %v4282_v40 }
 0x24e   :  { %13086 = vmatpush1.bf16.msra.mxu0 %v13085_v56  ;;  %24373 = vst [vmem:[#allocation71_spill] sm:$0xff] %v17393_v46  ;;  %24374 = vst [vmem:[#allocation73_spill] sm:$0xff] %v17395_v37  ;;  %v17405_v0 = vsub.f32 %v12115_v35, %v5135_v9  ;;  %v4288_v56 = vand.u32 4294901760, %v12121_v20  ;;  %v4290_v4 = vand.u32 4294901760, %v12120_v15  ;;  %v17432_v60 = vsub.f32 %v12114_v24, %v5137_v41  ;;  %v12127_v35 = vld [vmem:[%s22479_s4 + $0x4d8] sm:$0xff]  ;;  %v12128_v24 = vld [vmem:[%s22479_s4 + $0x4e0] sm:$0xff] }
 0x24f   :  { %12894 = vmatpush1.bf16.msra.mxu1 %v12893_v25  ;;  %13088 = vmatprep.subr.bf16.mxu0 %v13087_v45  ;;  %v17403_v25 = vpack.c.bf16 %v5135_v9, %v5131_v26  ;;  %24377 = vst [vmem:[#allocation83_spill] sm:$0xff] %v17407_v34  ;;  %24378 = vst [vmem:[#allocation49_spill] sm:$0xff] %v17409_v53  ;;  %v17420_v45 = vpack.c.bf16 %v5137_v41, %v5133_v55  ;;  %v24388_v26 = vld [vmem:[#allocation23_spill] sm:$0xff]  ;;  %v4292_v40 = vand.u32 4294901760, %v12125_v13  ;;  %v24391_v41 = vld [vmem:[#allocation33_spill] sm:$0xff] }
 0x250   :  { %12896 = vmatprep.subr.bf16.mxu1 %v12895_v6  ;;  %24376 = vst [vmem:[#allocation82_spill] sm:$0xff] %v17405_v0  ;;  %v12122_v6 = vld [vmem:[%s22479_s4 + $0x4b0] sm:$0xff]  ;;  %24380 = vst [vmem:[#allocation16_spill] sm:$0xff] %v17418_v61  ;;  %v17434_v33 = vsub.f32 %v12117_v1, %v4284_v49  ;;  %v17442_v47 = vpack.c.bf16 %v4288_v56, %v4284_v49  ;;  %v17444_v23 = vsub.f32 %v12121_v20, %v4288_v56  ;;  %v24392_v49 = vld [vmem:[#allocation85_spill] sm:$0xff] }
 0x251   :  { %24375 = vst [vmem:[#allocation79_spill] sm:$0xff] %v17403_v25  ;;  %24381 = vst [vmem:[#allocation22_spill] sm:$0xff] %v17420_v45  ;;  %v5145_v39 = vand.u32 4294901760, %v12122_v6  ;;  %v17454_v9 = vpack.c.bf16 %v5143_v10, %v5139_v31  ;;  %v17456_v3 = vsub.f32 %v12119_v11, %v5139_v31  ;;  %v4296_v1 = vand.u32 4294901760, %v12129_v7  ;;  %v12126_v20 = vld [vmem:[%s22479_s4 + $0x4d0] sm:$0xff] }
 0x252   :  { %13090 = vmatpush1.bf16.msra.mxu0 %v24379_v8  ;;  %24384 = vst [vmem:[#allocation34_spill] sm:$0xff] %v17432_v60  ;;  %24385 = vst [vmem:[#allocation35_spill] sm:$0xff] %v17434_v33  ;;  %v17466_v56 = vsub.f32 %v12123_v38, %v5143_v10  ;;  %v17468_v8 = vpack.c.bf16 %v4290_v4, %v4286_v14  ;;  %v5147_v11 = vand.u32 4294901760, %v12127_v35  ;;  %v5151_v31 = vand.u32 4294901760, %v12131_v17  ;;  %v12137_v38 = vld [vmem:[%s22479_s4 + $0x528] sm:$0xff] }
 0x253   :  { %12898 = vmatpush1.bf16.msra.mxu1 %v12897_v19  ;;  %13092 = vmatprep.subr.bf16.mxu0 %v24382_v62  ;;  %v17430_v19 = vsub.f32 %v12110_v54, %v5133_v55  ;;  %24386 = vst [vmem:[#allocation37_spill] sm:$0xff] %v17442_v47  ;;  %24387 = vst [vmem:[#allocation38_spill] sm:$0xff] %v17444_v23  ;;  %v12124_v54 = vld [vmem:[%s22479_s4 + $0x4c0] sm:$0xff]  ;;  %v12130_v55 = vld [vmem:[%s22479_s4 + $0x4f0] sm:$0xff]  ;;  %v17472_v48 = vsub.f32 %v12116_v12, %v4286_v14  ;;  %v4298_v33 = vand.u32 4294901760, %v12128_v24 }
 0x254   :  { %12900 = vmatprep.subr.bf16.mxu1 %v24248_v2  ;;  %v5141_v2 = vand.u32 4294901760, %v12118_v28  ;;  %24389 = vst [vmem:[#allocation39_spill] sm:$0xff] %v17454_v9  ;;  %24390 = vst [vmem:[#allocation86_spill] sm:$0xff] %v17456_v3  ;;  %v24395_v62 = vld [vmem:[#allocation88_spill] sm:$0xff]  ;;  %v17474_v3 = vsub.f32 %v12120_v15, %v4290_v4  ;;  %v4294_v23 = vand.u32 4294901760, %v12124_v54  ;;  %v5149_v12 = vand.u32 4294901760, %v12126_v20 }
 0x255   :  { %24383 = vst [vmem:[#allocation51_spill] sm:$0xff] %v17430_v19  ;;  %4093 = vmatmul.mubr.f32.vlgmr.msra.gmra.mrb[4].mxu0 %v24388_v26  ;;  %24393 = vst [vmem:[#allocation87_spill] sm:$0xff] %v17466_v56  ;;  %v5153_v15 = vand.u32 4294901760, %v12130_v55  ;;  %v17488_v14 = vsub.f32 %v12122_v6, %v5145_v39  ;;  %v17490_v4 = vpack.c.bf16 %v4296_v1, %v4292_v40 }
 0x256   :  { %3238 = vmatmul.mubr.f32.vlgmr.msra.gmra.mrb[4].mxu1 %v24388_v26  ;;  %13094 = vmatpush1.bf16.msra.mxu0 %v24392_v49  ;;  %24394 = vst [vmem:[#allocation89_spill] sm:$0xff] %v17468_v8  ;;  %24397 = vst [vmem:[#allocation90_spill] sm:$0xff] %v17472_v48  ;;  %v17484_v10 = vpack.c.bf16 %v5145_v39, %v5141_v2  ;;  %v17492_v49 = vsub.f32 %v12125_v13, %v4292_v40  ;;  %v12135_v8 = vld [vmem:[%s22479_s4 + $0x518] sm:$0xff]  ;;  %v4304_v40 = vand.u32 4294901760, %v12137_v38 }
 0x257   :  { %12902 = vmatpush1.bf16.msra.mxu1 %v24391_v41  ;;  %13096 = vmatprep.subr.bf16.mxu0 %v24396_v30  ;;  %24398 = vst [vmem:[#allocation91_spill] sm:$0xff] %v17474_v3  ;;  %v12133_v41 = vld [vmem:[%s22479_s4 + $0x508] sm:$0xff]  ;;  %v17486_v30 = vsub.f32 %v12118_v28, %v5141_v2  ;;  %24401 = vst [vmem:[#allocation94_spill] sm:$0xff] %v17488_v14  ;;  %v24406_v2 = vld [vmem:[#allocation40_spill] sm:$0xff]  ;;  %v17504_v6 = vpack.c.bf16 %v5151_v31, %v5147_v11 }
 0x258   :  { %12904 = vmatprep.subr.bf16.mxu1 %v24395_v62  ;;  %3340 = vmatprep.mubr.f32.mxu1 %v23799_v42  ;;  %24399 = vst [vmem:[#allocation28_spill] sm:$0xff] %v17484_v10  ;;  %24402 = vst [vmem:[#allocation41_spill] sm:$0xff] %v17490_v4  ;;  %v17494_v62 = vsub.f32 %v12129_v7, %v4296_v1  ;;  %v12139_v10 = vld [vmem:[%s22479_s4 + $0x538] sm:$0xff]  ;;  %v24405_v28 = vld [vmem:[#allocation31_spill] sm:$0xff]  ;;  %v17506_v39 = vsub.f32 %v12127_v35, %v5147_v11  ;;  %v4300_v13 = vand.u32 4294901760, %v12133_v41 }
 0x259   :  { %4195 = vmatprep.mubr.f32.mxu0 %v23799_v42  ;;  %24400 = vst [vmem:[#allocation93_spill] sm:$0xff] %v17486_v30  ;;  %24403 = vst [vmem:[#allocation43_spill] sm:$0xff] %v17492_v49  ;;  %v12132_v7 = vld [vmem:[%s22479_s4 + $0x500] sm:$0xff]  ;;  %v17520_v35 = vsub.f32 %v12124_v54, %v4294_v23  ;;  %v12134_v11 = vld [vmem:[%s22479_s4 + $0x510] sm:$0xff]  ;;  %v17530_v4 = vpack.c.bf16 %v5153_v15, %v5149_v12  ;;  %v17538_v54 = vsub.f32 %v12126_v20, %v5149_v12 }
 0x25a   :  { %24404 = vst [vmem:[#allocation95_spill] sm:$0xff] %v17494_v62  ;;  %13098 = vmatpush1.bf16.msra.mxu0 %v24406_v2  ;;  %24407 = vst [vmem:[#allocation97_spill] sm:$0xff] %v17504_v6  ;;  %v12136_v1 = vld [vmem:[%s22479_s4 + $0x520] sm:$0xff]  ;;  %v24409_v62 = vld [vmem:[#allocation96_spill] sm:$0xff]  ;;  %v17518_v2 = vpack.c.bf16 %v4298_v33, %v4294_v23  ;;  %v17528_v6 = vsub.f32 %v12128_v24, %v4298_v33  ;;  %v17552_v20 = vsub.f32 %v12133_v41, %v4300_v13 }
 0x25b   :  { %12906 = vmatpush1.bf16.msra.mxu1 %v24405_v28  ;;  %24408 = vst [vmem:[#allocation99_spill] sm:$0xff] %v17506_v39  ;;  %v24410_v49 = vld [vmem:[#allocation98_spill] sm:$0xff]  ;;  %v17516_v28 = vsub.f32 %v12131_v17, %v5151_v31  ;;  %24413 = vst [vmem:[#allocation19_spill] sm:$0xff] %v17520_v35  ;;  %v12138_v39 = vld [vmem:[%s22479_s4 + $0x530] sm:$0xff]  ;;  %v17540_v31 = vsub.f32 %v12130_v55, %v5153_v15  ;;  %v4302_v35 = vand.u32 4294901760, %v12132_v7  ;;  %v5157_v55 = vand.u32 4294901760, %v12134_v11 }
 0x25c   :  { %12908 = vmatprep.subr.bf16.mxu1 %v24409_v62  ;;  %13100 = vmatprep.subr.bf16.mxu0 %v24410_v49  ;;  %24412 = vst [vmem:[#allocation13_spill] sm:$0xff] %v17518_v2  ;;  %24414 = vst [vmem:[#allocation76_spill] sm:$0xff] %v17528_v6  ;;  %v5155_v62 = vand.u32 4294901760, %v12135_v8  ;;  %v5159_v49 = vand.u32 4294901760, %v12139_v10  ;;  %v12141_v17 = vld [vmem:[%s22479_s4 + $0x548] sm:$0xff]  ;;  %v12143_v33 = vld [vmem:[%s22479_s4 + $0x558] sm:$0xff]  ;;  %v17550_v2 = vpack.c.bf16 %v4304_v40, %v4300_v13 }
 0x25d   :  { %24411 = vst [vmem:[#allocation102_spill] sm:$0xff] %v17516_v28  ;;  %24415 = vst [vmem:[#allocation80_spill] sm:$0xff] %v17530_v4  ;;  %v12145_v23 = vld [vmem:[%s22479_s4 + $0x568] sm:$0xff]  ;;  %v4306_v28 = vand.u32 4294901760, %v12136_v1  ;;  %v12147_v24 = vld [vmem:[%s22479_s4 + $0x578] sm:$0xff]  ;;  %v5161_v12 = vand.u32 4294901760, %v12138_v39 }
 0x25e   :  { %24416 = vst [vmem:[#allocation67_spill] sm:$0xff] %v17538_v54  ;;  %24417 = vst [vmem:[#allocation4_spill] sm:$0xff] %v17540_v31  ;;  %v24418_v6 = vld [vmem:[#allocation101_spill] sm:$0xff]  ;;  %v24419_v4 = vld [vmem:[#allocation104_spill] sm:$0xff]  ;;  %v17556_v54 = vsub.f32 %v12137_v38, %v4304_v40  ;;  %v17558_v14 = vsub.f32 %v12135_v8, %v5155_v62  ;;  %v4308_v30 = vand.u32 4294901760, %v12141_v17  ;;  %v4312_v3 = vand.u32 4294901760, %v12145_v23 }
 0x25f   :  { %12910 = vmatpush1.bf16.msra.mxu1 %v24418_v6  ;;  %13102 = vmatpush1.bf16.msra.mxu0 %v24419_v4  ;;  %24420 = vst [vmem:[#allocation5_spill] sm:$0xff] %v17550_v2  ;;  %24421 = vst [vmem:[#allocation8_spill] sm:$0xff] %v17552_v20  ;;  %v24422_v15 = vld [vmem:[#allocation10_spill] sm:$0xff]  ;;  %v24423_v31 = vld [vmem:[#allocation12_spill] sm:$0xff]  ;;  %v17566_v6 = vpack.c.bf16 %v5159_v49, %v5155_v62  ;;  %v17568_v13 = vsub.f32 %v12139_v10, %v5159_v49 }
 0x260   :  { %12912 = vmatprep.subr.bf16.mxu1 %v24422_v15  ;;  %13104 = vmatprep.subr.bf16.mxu0 %v24423_v31  ;;  %24424 = vst [vmem:[#allocation48_spill] sm:$0xff] %v17556_v54  ;;  %24425 = vst [vmem:[#allocation32_spill] sm:$0xff] %v17558_v14  ;;  %v12140_v4 = vld [vmem:[%s22479_s4 + $0x540] sm:$0xff]  ;;  %v5163_v15 = vand.u32 4294901760, %v12143_v33  ;;  %v5167_v31 = vand.u32 4294901760, %v12147_v24  ;;  %v17570_v38 = vpack.c.bf16 %v4306_v28, %v4302_v35  ;;  %v12142_v54 = vld [vmem:[%s22479_s4 + $0x550] sm:$0xff] }
 0x261   :  { %v12144_v41 = vld [vmem:[%s22479_s4 + $0x560] sm:$0xff]  ;;  %24426 = vst [vmem:[#allocation29_spill] sm:$0xff] %v17566_v6  ;;  %24427 = vst [vmem:[#allocation24_spill] sm:$0xff] %v17568_v13  ;;  %v17572_v8 = vsub.f32 %v12132_v7, %v4302_v35  ;;  %v17574_v40 = vsub.f32 %v12136_v1, %v4306_v28  ;;  %v17576_v14 = vsub.f32 %v12134_v11, %v5157_v55  ;;  %v12146_v62 = vld [vmem:[%s22479_s4 + $0x570] sm:$0xff]  ;;  %v4310_v35 = vand.u32 4294901760, %v12140_v4 }
 0x262   :  { %24428 = vst [vmem:[#allocation36_spill] sm:$0xff] %v17570_v38  ;;  %v12149_v10 = vld [vmem:[%s22479_s4 + $0x588] sm:$0xff]  ;;  %v24432_v49 = vld [vmem:[#allocation17_spill] sm:$0xff]  ;;  %v17589_v1 = vpack.c.bf16 %v5161_v12, %v5157_v55  ;;  %v17591_v28 = vsub.f32 %v12138_v39, %v5161_v12  ;;  %v4314_v11 = vand.u32 4294901760, %v12144_v41  ;;  %v24437_v55 = vld [vmem:[#allocation66_spill] sm:$0xff]  ;;  %v17604_v39 = vpack.c.bf16 %v4312_v3, %v4308_v30 }
 0x263   :  { %24429 = vst [vmem:[#allocation55_spill] sm:$0xff] %v17572_v8  ;;  %24430 = vst [vmem:[#allocation25_spill] sm:$0xff] %v17574_v40  ;;  %12914 = vmatpush1.bf16.msra.mxu1 %v24432_v49  ;;  %v24433_v7 = vld [vmem:[#allocation27_spill] sm:$0xff]  ;;  %v12151_v40 = vld [vmem:[%s22479_s4 + $0x598] sm:$0xff]  ;;  %v17606_v12 = vsub.f32 %v12141_v17, %v4308_v30  ;;  %v17612_v13 = vsub.f32 %v12143_v33, %v5163_v15  ;;  %v5165_v20 = vand.u32 4294901760, %v12142_v54 }
 0x264   :  { %24431 = vst [vmem:[#allocation100_spill] sm:$0xff] %v17576_v14  ;;  %13106 = vmatpush1.bf16.msra.mxu0 %v24433_v7  ;;  %24434 = vst [vmem:[#allocation21_spill] sm:$0xff] %v17589_v1  ;;  %v12153_v14 = vld [vmem:[%s22479_s4 + $0x5a8] sm:$0xff]  ;;  %v12155_v49 = vld [vmem:[%s22479_s4 + $0x5b8] sm:$0xff]  ;;  %v17608_v7 = vsub.f32 %v12145_v23, %v4312_v3  ;;  %v5169_v1 = vand.u32 4294901760, %v12146_v62  ;;  %v5171_v30 = vand.u32 4294901760, %v12151_v40  ;;  %v17636_v2 = vsub.f32 %v12144_v41, %v4314_v11 }
 0x265   :  { %24435 = vst [vmem:[#allocation103_spill] sm:$0xff] %v17591_v28  ;;  %v24436_v8 = vld [vmem:[#allocation77_spill] sm:$0xff]  ;;  %13108 = vmatprep.subr.bf16.mxu0 %v24437_v55  ;;  %24438 = vst [vmem:[#allocation105_spill] sm:$0xff] %v17604_v39  ;;  %v17610_v28 = vpack.c.bf16 %v5167_v31, %v5163_v15  ;;  %v12148_v38 = vld [vmem:[%s22479_s4 + $0x580] sm:$0xff]  ;;  %v4316_v55 = vand.u32 4294901760, %v12149_v10  ;;  %v4320_v39 = vand.u32 4294901760, %v12153_v14  ;;  %v17638_v48 = vsub.f32 %v12142_v54, %v5165_v20 }
 0x266   :  { %12916 = vmatprep.subr.bf16.mxu1 %v24436_v8  ;;  %24439 = vst [vmem:[#allocation7_spill] sm:$0xff] %v17606_v12  ;;  %24440 = vst [vmem:[#allocation3_spill] sm:$0xff] %v17608_v7  ;;  %v12152_v8 = vld [vmem:[%s22479_s4 + $0x5a0] sm:$0xff]  ;;  %v5175_v17 = vand.u32 4294901760, %v12155_v49  ;;  %v12150_v3 = vld [vmem:[%s22479_s4 + $0x590] sm:$0xff]  ;;  %v17630_v7 = vpack.c.bf16 %v4314_v11, %v4310_v35  ;;  %v17632_v12 = vsub.f32 %v12140_v4, %v4310_v35  ;;  %v4318_v56 = vand.u32 4294901760, %v12148_v38 }
 0x267   :  { %24441 = vst [vmem:[#allocation44_spill] sm:$0xff] %v17610_v28  ;;  %24442 = vst [vmem:[#allocation45_spill] sm:$0xff] %v17612_v13  ;;  %v12154_v23 = vld [vmem:[%s22479_s4 + $0x5b0] sm:$0xff]  ;;  %v24443_v33 = vld [vmem:[#allocation15_spill] sm:$0xff]  ;;  %v17628_v13 = vsub.f32 %v12147_v24, %v5167_v31  ;;  %v4322_v60 = vand.u32 4294901760, %v12152_v8  ;;  %v17646_v4 = vpack.c.bf16 %v5169_v1, %v5165_v20  ;;  %v17648_v31 = vsub.f32 %v12146_v62, %v5169_v1 }
 0x268   :  { %12918 = vmatpush1.bf16.msra.mxu1 %v24443_v33  ;;  %v24444_v15 = vld [vmem:[#allocation68_spill] sm:$0xff]  ;;  %24445 = vst [vmem:[#allocation69_spill] sm:$0xff] %v17630_v7  ;;  %v24446_v28 = vld [vmem:[#allocation70_spill] sm:$0xff]  ;;  %v24447_v6 = vld [vmem:[#allocation75_spill] sm:$0xff]  ;;  %v17650_v41 = vpack.c.bf16 %v4320_v39, %v4316_v55  ;;  %v17652_v54 = vsub.f32 %v12149_v10, %v4316_v55  ;;  %v17654_v35 = vsub.f32 %v12153_v14, %v4320_v39 }
 0x269   :  { %13110 = vmatpush1.bf16.msra.mxu0 %v24444_v15  ;;  %12920 = vmatprep.subr.bf16.mxu1 %v24446_v28  ;;  %24448 = vst [vmem:[#allocation2_spill] sm:$0xff] %v17636_v2  ;;  %24449 = vst [vmem:[#allocation52_spill] sm:$0xff] %v17638_v48  ;;  %v12157_v33 = vld [vmem:[%s22479_s4 + $0x5c8] sm:$0xff]  ;;  %v5173_v28 = vand.u32 4294901760, %v12150_v3  ;;  %v17656_v11 = vpack.c.bf16 %v5175_v17, %v5171_v30  ;;  %v24456_v15 = vld [vmem:[#allocation81_spill] sm:$0xff]  ;;  %v17660_v2 = vsub.f32 %v12151_v40, %v5171_v30 }
 0x26a   :  { %13112 = vmatprep.subr.bf16.mxu0 %v24447_v6  ;;  %v12161_v24 = vld [vmem:[%s22479_s4 + $0x5e8] sm:$0xff]  ;;  %24450 = vst [vmem:[#allocation54_spill] sm:$0xff] %v17646_v4  ;;  %24451 = vst [vmem:[#allocation42_spill] sm:$0xff] %v17648_v31  ;;  %v5177_v6 = vand.u32 4294901760, %v12154_v23  ;;  %v24457_v48 = vld [vmem:[#allocation84_spill] sm:$0xff]  ;;  %v17662_v20 = vsub.f32 %v12155_v49, %v5175_v17  ;;  %v4324_v62 = vand.u32 4294901760, %v12157_v33  ;;  %v17669_v39 = vpack.c.bf16 %v4322_v60, %v4318_v56 }
 0x26b   :  { %24452 = vst [vmem:[#allocation56_spill] sm:$0xff] %v17650_v41  ;;  %24453 = vst [vmem:[#allocation30_spill] sm:$0xff] %v17652_v54  ;;  %v4328_v1 = vand.u32 4294901760, %v12161_v24  ;;  %v12159_v31 = vld [vmem:[%s22479_s4 + $0x5d8] sm:$0xff]  ;;  %v24460_v10 = vld [vmem:[#allocation46_spill] sm:$0xff]  ;;  %v17671_v55 = vsub.f32 %v12148_v38, %v4318_v56  ;;  %v17680_v49 = vsub.f32 %v12150_v3, %v5173_v28 }
 0x26c   :  { %24454 = vst [vmem:[#allocation23_spill] sm:$0xff] %v17654_v35  ;;  %24455 = vst [vmem:[#allocation33_spill] sm:$0xff] %v17656_v11  ;;  %12922 = vmatpush1.bf16.msra.mxu1 %v24456_v15  ;;  %v24461_v14 = vld [vmem:[#allocation47_spill] sm:$0xff]  ;;  %v17673_v15 = vsub.f32 %v12152_v8, %v4322_v60  ;;  %v17678_v40 = vpack.c.bf16 %v5177_v6, %v5173_v28  ;;  %v12156_v30 = vld [vmem:[%s22479_s4 + $0x5c0] sm:$0xff]  ;;  %v17690_v38 = vsub.f32 %v12154_v23, %v5177_v6 }
 0x26d   :  { %13114 = vmatpush1.bf16.msra.mxu0 %v24457_v48  ;;  %24458 = vst [vmem:[#allocation85_spill] sm:$0xff] %v17660_v2  ;;  %24459 = vst [vmem:[#allocation88_spill] sm:$0xff] %v17662_v20  ;;  %12924 = vmatprep.subr.bf16.mxu1 %v24460_v10  ;;  %v12163_v48 = vld [vmem:[%s22479_s4 + $0x5f8] sm:$0xff]  ;;  %v12160_v17 = vld [vmem:[%s22479_s4 + $0x5e0] sm:$0xff]  ;;  %v5179_v8 = vand.u32 4294901760, %v12159_v31  ;;  %v17707_v28 = vsub.f32 %v12161_v24, %v4328_v1  ;;  %v4326_v10 = vand.u32 4294901760, %v12156_v30 }
 0x26e   :  { %13116 = vmatprep.subr.bf16.mxu0 %v24461_v14  ;;  %24462 = vst [vmem:[#allocation92_spill] sm:$0xff] %v17669_v39  ;;  %24463 = vst [vmem:[#allocation31_spill] sm:$0xff] %v17671_v55  ;;  %v12158_v3 = vld [vmem:[%s22479_s4 + $0x5d0] sm:$0xff]  ;;  %v24468_v14 = vld [vmem:[#allocation11_spill] sm:$0xff]  ;;  %v5183_v56 = vand.u32 4294901760, %v12163_v48  ;;  %v17705_v55 = vsub.f32 %v12157_v33, %v4324_v62  ;;  %v4330_v20 = vand.u32 4294901760, %v12160_v17 }
 0x26f   :  { %24464 = vst [vmem:[#allocation40_spill] sm:$0xff] %v17673_v15  ;;  %24465 = vst [vmem:[#allocation96_spill] sm:$0xff] %v17678_v40  ;;  %v17699_v15 = vpack.c.bf16 %v4328_v1, %v4324_v62  ;;  %v24471_v6 = vld [vmem:[#allocation26_spill] sm:$0xff]  ;;  %v5181_v2 = vand.u32 4294901760, %v12158_v3  ;;  %v24475_v60 = vand.u32 4294901760, %v17345_v43  ;;  %v24477_v24 = vand.u32 4294901760, %v17357_v44 }
 0x270   :  { %24466 = vst [vmem:[#allocation98_spill] sm:$0xff] %v17680_v49  ;;  %24467 = vst [vmem:[#allocation101_spill] sm:$0xff] %v17690_v38  ;;  %12926 = vmatpush1.bf16.msra.mxu1 %v24468_v14  ;;  %v24469_v49 = vld [vmem:[#allocation50_spill] sm:$0xff]  ;;  %v24472_v38 = vld [vmem:[#allocation53_spill] sm:$0xff]  ;;  %v17709_v14 = vsub.f32 %v12159_v31, %v5179_v8  ;;  %v24478_v31 = vand.u32 4294901760, %v17359_v57 }
 0x271   :  { %13118 = vmatpush1.bf16.msra.mxu0 %v24469_v49  ;;  %24470 = vst [vmem:[#allocation104_spill] sm:$0xff] %v17699_v15  ;;  %12928 = vmatprep.subr.bf16.mxu1 %v24471_v6  ;;  %24473 = vst [vmem:[#allocation10_spill] sm:$0xff] %v17707_v28  ;;  %v12162_v49 = vld [vmem:[%s22479_s4 + $0x5f0] sm:$0xff]  ;;  %v4379_v23 = vsub.f32 %v17345_v43, %v24475_v60  ;;  %v24476_v6 = vand.u32 4294901760, %v17355_v29  ;;  %v5234_v62 = vsub.f32 %v17357_v44, %v24477_v24 }
 0x272   :  { %13120 = vmatprep.subr.bf16.mxu0 %v24472_v38  ;;  %24474 = vst [vmem:[#allocation12_spill] sm:$0xff] %v17709_v14  ;;  %v5246_v1 = vsub.f32 %v17359_v57, %v24478_v31  ;;  %v17730_v60 = vpack.c.bf16 %v5183_v56, %v5179_v8  ;;  %v24481_v24 = vand.u32 4294901760, %v17369_v52  ;;  %v17741_v14 = vsub.f32 %v12163_v48, %v5183_v56 }
 0x273   :  { %v4391_v33 = vsub.f32 %v17355_v29, %v24476_v6  ;;  %v24480_v6 = vand.u32 4294901760, %v17367_v5  ;;  %v5185_v8 = vand.u32 4294901760, %v12162_v49  ;;  %v17747_v38 = vsub.f32 %v12160_v17, %v4330_v20 }
 0x274   :  { %12930 = vmatpush1.bf16.msra.mxu1 %v24283_v51  ;;  %24479 = vst [vmem:[#allocation17_spill] sm:$0xff] %v17730_v60  ;;  %v4397_v44 = vsub.f32 %v17369_v52, %v24481_v24  ;;  %v17743_v51 = vpack.c.bf16 %v4330_v20, %v4326_v10  ;;  %v22964_v57 = vand.u32 4294901760, %v17393_v46  ;;  %v5235_v24 = vand.u32 4294901760, %v5234_v62  ;;  %v24528_v52 = vld [vmem:[#allocation36_spill] sm:$0xff] }
 0x275   :  { %13122 = vmatpush1.bf16.msra.mxu0 %v24284_v27  ;;  %v4385_v29 = vsub.f32 %v17367_v5, %v24480_v6  ;;  %13124 = vmatprep.subr.bf16.mxu1 %v17335_v36  ;;  %v17745_v27 = vsub.f32 %v12156_v30, %v4326_v10  ;;  %24484 = vst [vmem:[#allocation66_spill] sm:$0xff] %v17747_v38  ;;  %v4380_v6 = vand.u32 4294901760, %v4379_v23  ;;  %v4392_v5 = vand.u32 4294901760, %v4391_v33  ;;  %v24506_v36 = vld [vmem:[#allocation41_spill] sm:$0xff] }
 0x276   :  { %13316 = vmatprep.subr.bf16.mxu0 %v17337_v59  ;;  %24482 = vst [vmem:[#allocation27_spill] sm:$0xff] %v17743_v51  ;;  %v5247_v31 = vand.u32 4294901760, %v5246_v1  ;;  %v24485_v48 = vand.u32 4294901760, %v17373_v63  ;;  %v24486_v30 = vand.u32 4294901760, %v17381_v18  ;;  %v4398_v17 = vand.u32 4294901760, %v4397_v44 }
 0x277   :  { %24483 = vst [vmem:[#allocation77_spill] sm:$0xff] %v17745_v27  ;;  %3342 = vmatmul.mubr.f32.vlgmr.msra.gmra.mrb[4].mxu1 %v24388_v26  ;;  %v4386_v20 = vand.u32 4294901760, %v4385_v29  ;;  %v24487_v23 = vand.u32 4294901760, %v17391_v16  ;;  %v17766_v62 = vpack.c.bf16 %v5185_v8, %v5181_v2  ;;  %v17768_v1 = vsub.f32 %v12158_v3, %v5181_v2 }
 0x278   :  { %4197 = vmatmul.mubr.f32.vlgmr.msra.gmra.mrb[4].mxu0 %v24388_v26  ;;  %v5240_v56 = vsub.f32 %v17373_v63, %v24485_v48  ;;  %v5252_v10 = vsub.f32 %v17381_v18, %v24486_v30  ;;  %13126 = vmatpush1.bf16.msra.mxu1 %v17347_v32  ;;  %v17772_v29 = vsub.f32 %v12162_v49, %v5185_v8  ;;  %v24500_v32 = vld [vmem:[#allocation91_spill] sm:$0xff]  ;;  %v24533_v18 = vld [vmem:[#allocation44_spill] sm:$0xff] }
 0x279   :  { %13318 = vmatpush1.bf16.msra.mxu0 %v17371_v21  ;;  %v4403_v26 = vsub.f32 %v17391_v16, %v24487_v23  ;;  %13128 = vmatprep.subr.bf16.mxu1 %v17383_v58  ;;  %24488 = vst [vmem:[#allocation15_spill] sm:$0xff] %v17766_v62  ;;  %v24489_v44 = vsub.f32 %v17230_v50, %v17249_v22  ;;  %v24495_v22 = vld [vmem:[#allocation38_spill] sm:$0xff] }
 0x27a   :  { %13320 = vmatprep.subr.bf16.mxu0 %v17403_v25  ;;  %4364 = vmatprep.mubr.f32.mxu1 %v23799_v42  ;;  %v17781_v33 = vpack.c.bf16 %v4392_v5, %v4380_v6  ;;  %v4415_v2 = vsub.f32 %v17393_v46, %v22964_v57  ;;  %v17786_v3 = vpack.c.bf16 %v5247_v31, %v5235_v24  ;;  %v5241_v30 = vand.u32 4294901760, %v5240_v56  ;;  %v24499_v21 = vld [vmem:[#allocation90_spill] sm:$0xff] }
 0x27b   :  { %5219 = vmatprep.mubr.f32.mxu0 %v23799_v42  ;;  %v17779_v23 = vand.u32 4294901760, %v24489_v44  ;;  %v5253_v49 = vand.u32 4294901760, %v5252_v10  ;;  %v17791_v48 = vpack.c.bf16 %v4398_v17, %v4386_v20  ;;  %v4404_v44 = vand.u32 4294901760, %v4403_v26  ;;  %v24493_v20 = vld [vmem:[#allocation34_spill] sm:$0xff]  ;;  %v24494_v26 = vld [vmem:[#allocation35_spill] sm:$0xff]  ;;  %v24501_v17 = vld [vmem:[#allocation89_spill] sm:$0xff] }
 0x27c   :  { %13130 = vmatpush1.bf16.msra.mxu1 %v17407_v34  ;;  %v24490_v5 = vand.u32 4294901760, %v17395_v37  ;;  %v24491_v31 = vand.u32 4294901760, %v17405_v0  ;;  %v24492_v56 = vand.u32 4294901760, %v17409_v53  ;;  %v4416_v8 = vand.u32 4294901760, %v4415_v2  ;;  %v24497_v34 = vld [vmem:[#allocation87_spill] sm:$0xff]  ;;  %v24505_v57 = vld [vmem:[#allocation94_spill] sm:$0xff] }
 0x27d   :  { %13322 = vmatpush1.bf16.msra.mxu0 %v17420_v45  ;;  %13132 = vmatprep.subr.bf16.mxu1 %v17442_v47  ;;  %v24496_v45 = vld [vmem:[#allocation86_spill] sm:$0xff]  ;;  %v17814_v25 = vpack.c.bf16 %v5253_v49, %v5241_v30  ;;  %v24503_v47 = vand.u32 4294901760, %v17430_v19  ;;  %v24504_v30 = vld [vmem:[#allocation93_spill] sm:$0xff]  ;;  %v24510_v49 = vand.u32 4294901760, %v24495_v22 }
 0x27e   :  { %v17796_v6 = vsub.f32 %v17395_v37, %v24490_v5  ;;  %13324 = vmatprep.subr.bf16.mxu0 %v17454_v9  ;;  %v5270_v24 = vsub.f32 %v17405_v0, %v24491_v31  ;;  %v17807_v10 = vsub.f32 %v17409_v53, %v24492_v56  ;;  %v24498_v31 = vand.u32 4294901760, %v17418_v61  ;;  %v24502_v5 = vld [vmem:[#allocation28_spill] sm:$0xff]  ;;  %v24522_v0 = vld [vmem:[#allocation5_spill] sm:$0xff] }
 0x27f   :  { %v5264_v9 = vsub.f32 %v17430_v19, %v24503_v47  ;;  %v17838_v47 = vpack.c.bf16 %v4416_v8, %v4404_v44  ;;  %v4439_v59 = vsub.f32 %v24495_v22, %v24510_v49  ;;  %v24514_v8 = vand.u32 4294901760, %v24500_v32  ;;  %v24516_v49 = vld [vmem:[#allocation13_spill] sm:$0xff]  ;;  %v24517_v22 = vld [vmem:[#allocation80_spill] sm:$0xff] }
 0x280   :  { %v4421_v58 = vsub.f32 %v17418_v61, %v24498_v31  ;;  %13134 = vmatpush1.bf16.msra.mxu1 %v24501_v17  ;;  %v5259_v2 = vand.u32 4294901760, %v17796_v6  ;;  %v24507_v31 = vld [vmem:[#allocation97_spill] sm:$0xff]  ;;  %v5271_v56 = vand.u32 4294901760, %v5270_v24  ;;  %v4410_v50 = vand.u32 4294901760, %v17807_v10 }
 0x281   :  { %13326 = vmatpush1.bf16.msra.mxu0 %v24502_v5  ;;  %13136 = vmatprep.subr.bf16.mxu1 %v24506_v36  ;;  %v24508_v17 = vand.u32 4294901760, %v24493_v20  ;;  %v24509_v6 = vand.u32 4294901760, %v24494_v26  ;;  %v24511_v36 = vand.u32 4294901760, %v24496_v45  ;;  %v24512_v10 = vand.u32 4294901760, %v24497_v34 }
 0x282   :  { %13328 = vmatprep.subr.bf16.mxu0 %v24507_v31  ;;  %v4422_v19 = vand.u32 4294901760, %v4421_v58  ;;  %v4445_v44 = vsub.f32 %v24500_v32, %v24514_v8  ;;  %v24519_v58 = vand.u32 4294901760, %v24505_v57  ;;  %v24523_v8 = vld [vmem:[#allocation29_spill] sm:$0xff]  ;;  %v4440_v46 = vand.u32 4294901760, %v4439_v59 }
 0x283   :  { %v5276_v5 = vsub.f32 %v24493_v20, %v24508_v17  ;;  %v4427_v61 = vsub.f32 %v24494_v26, %v24509_v6  ;;  %v5282_v24 = vsub.f32 %v24496_v45, %v24511_v36  ;;  %v5294_v31 = vsub.f32 %v24497_v34, %v24512_v10  ;;  %v24515_v6 = vld [vmem:[#allocation43_spill] sm:$0xff] }
 0x284   :  { %v24513_v17 = vand.u32 4294901760, %v24499_v21  ;;  %13138 = vmatpush1.bf16.msra.mxu1 %v24516_v49  ;;  %v24518_v36 = vand.u32 4294901760, %v24504_v30  ;;  %v5300_v10 = vsub.f32 %v24505_v57, %v24519_v58  ;;  %v24520_v34 = vld [vmem:[#allocation95_spill] sm:$0xff]  ;;  %v5265_v26 = vand.u32 4294901760, %v5264_v9  ;;  %v24527_v57 = vld [vmem:[#allocation76_spill] sm:$0xff]  ;;  %v24529_v9 = vld [vmem:[#allocation21_spill] sm:$0xff] }
 0x285   :  { %13330 = vmatpush1.bf16.msra.mxu0 %v24517_v22  ;;  %13140 = vmatprep.subr.bf16.mxu1 %v24522_v0  ;;  %v5277_v49 = vand.u32 4294901760, %v5276_v5  ;;  %v4428_v32 = vand.u32 4294901760, %v4427_v61  ;;  %v24524_v22 = vld [vmem:[#allocation102_spill] sm:$0xff]  ;;  %v5283_v16 = vand.u32 4294901760, %v5282_v24  ;;  %v4446_v58 = vand.u32 4294901760, %v4445_v44  ;;  %v24532_v44 = vld [vmem:[#allocation105_spill] sm:$0xff] }
 0x286   :  { %v4433_v20 = vsub.f32 %v24499_v21, %v24513_v17  ;;  %v5288_v45 = vsub.f32 %v24504_v30, %v24518_v36  ;;  %v24521_v21 = vld [vmem:[#allocation99_spill] sm:$0xff]  ;;  %13332 = vmatprep.subr.bf16.mxu0 %v24523_v8  ;;  %v23019_v37 = vand.u32 4294901760, %v24524_v22  ;;  %v5295_v36 = vand.u32 4294901760, %v5294_v31 }
 0x287   :  { %v24525_v30 = vld [vmem:[#allocation19_spill] sm:$0xff]  ;;  %v24526_v17 = vand.u32 4294901760, %v24515_v6  ;;  %v5301_v5 = vand.u32 4294901760, %v5300_v10  ;;  %v24530_v59 = vand.u32 4294901760, %v24520_v34  ;;  %v24531_v24 = vand.u32 4294901760, %v24521_v21 }
 0x288   :  { %v4434_v63 = vand.u32 4294901760, %v4433_v20  ;;  %13142 = vmatpush1.bf16.msra.mxu1 %v24528_v52  ;;  %v5289_v61 = vand.u32 4294901760, %v5288_v45  ;;  %v5318_v0 = vsub.f32 %v24524_v22, %v23019_v37  ;;  %v24534_v45 = vld [vmem:[#allocation67_spill] sm:$0xff]  ;;  %v17891_v8 = vpack.c.bf16 %v4422_v19, %v4410_v50  ;;  %v24538_v19 = vld [vmem:[#allocation8_spill] sm:$0xff] }
 0x289   :  { %v4451_v53 = vsub.f32 %v24515_v6, %v24526_v17  ;;  %13334 = vmatpush1.bf16.msra.mxu0 %v24529_v9  ;;  %v4463_v31 = vsub.f32 %v24520_v34, %v24530_v59  ;;  %v5306_v20 = vsub.f32 %v24521_v21, %v24531_v24  ;;  %13144 = vmatprep.subr.bf16.mxu1 %v24532_v44  ;;  %v24535_v9 = vld [vmem:[#allocation4_spill] sm:$0xff]  ;;  %v24536_v24 = vand.u32 4294901760, %v24525_v30 }
 0x28a   :  { %13336 = vmatprep.subr.bf16.mxu0 %v24533_v18  ;;  %v17884_v17 = vpack.c.bf16 %v5271_v56, %v5259_v2  ;;  %v23029_v52 = vand.u32 4294901760, %v24535_v9  ;;  %v17893_v59 = vpack.c.bf16 %v5277_v49, %v5265_v26  ;;  %v17895_v34 = vpack.c.bf16 %v4440_v46, %v4428_v32  ;;  %v24540_v49 = vld [vmem:[#allocation48_spill] sm:$0xff] }
 0x28b   :  { %v4457_v18 = vsub.f32 %v24525_v30, %v24536_v24  ;;  %v17900_v56 = vpack.c.bf16 %v5295_v36, %v5283_v16  ;;  %v17902_v2 = vpack.c.bf16 %v4446_v58, %v4434_v63  ;;  %v4452_v44 = vand.u32 4294901760, %v4451_v53  ;;  %v24543_v24 = vld [vmem:[#allocation55_spill] sm:$0xff] }
 0x28c   :  { %v24537_v37 = vand.u32 4294901760, %v24527_v57  ;;  %13146 = vmatpush1.bf16.msra.mxu1 %v17630_v7  ;;  %v17909_v50 = vpack.c.bf16 %v5301_v5, %v5289_v61  ;;  %v4464_v32 = vand.u32 4294901760, %v4463_v31  ;;  %v5307_v46 = vand.u32 4294901760, %v5306_v20  ;;  %v24541_v61 = vld [vmem:[#allocation32_spill] sm:$0xff]  ;;  %v24548_v5 = vld [vmem:[#allocation7_spill] sm:$0xff] }
 0x28d   :  { %13338 = vmatpush1.bf16.msra.mxu0 %v17646_v4  ;;  %13148 = vmatprep.subr.bf16.mxu1 %v17650_v41  ;;  %v5319_v63 = vand.u32 4294901760, %v5318_v0  ;;  %v24539_v16 = vand.u32 4294901760, %v24534_v45  ;;  %v4458_v58 = vand.u32 4294901760, %v4457_v18  ;;  %v24542_v31 = vld [vmem:[#allocation24_spill] sm:$0xff]  ;;  %v24549_v0 = vand.u32 4294901760, %v24540_v49 }
 0x28e   :  { %v4469_v10 = vsub.f32 %v24527_v57, %v24537_v37  ;;  %13340 = vmatprep.subr.bf16.mxu0 %v17656_v11  ;;  %v5324_v37 = vsub.f32 %v24535_v9, %v23029_v52  ;;  %v24544_v11 = vld [vmem:[#allocation25_spill] sm:$0xff]  ;;  %v24545_v4 = vld [vmem:[#allocation100_spill] sm:$0xff]  ;;  %v24546_v57 = vld [vmem:[#allocation103_spill] sm:$0xff]  ;;  %v24547_v52 = vand.u32 4294901760, %v24538_v19  ;;  %v24552_v20 = vand.u32 4294901760, %v24542_v31 }
 0x28f   :  { %v5312_v53 = vsub.f32 %v24534_v45, %v24539_v16  ;;  %v4487_v26 = vsub.f32 %v24540_v49, %v24549_v0  ;;  %v17956_v0 = vpack.c.bf16 %v4464_v32, %v4452_v44 }
 0x290   :  { %v4470_v41 = vand.u32 4294901760, %v4469_v10  ;;  %13150 = vmatpush1.bf16.msra.mxu1 %v17669_v39  ;;  %v4475_v18 = vsub.f32 %v24538_v19, %v24547_v52  ;;  %v5325_v16 = vand.u32 4294901760, %v5324_v37  ;;  %v24551_v52 = vand.u32 4294901760, %v24541_v61 }
 0x291   :  { %13342 = vmatpush1.bf16.msra.mxu0 %v17678_v40  ;;  %13152 = vmatprep.subr.bf16.mxu1 %v17699_v15  ;;  %v5313_v7 = vand.u32 4294901760, %v5312_v53  ;;  %v24550_v40 = vld [vmem:[#allocation3_spill] sm:$0xff]  ;;  %v5342_v10 = vsub.f32 %v24542_v31, %v24552_v20  ;;  %v24553_v15 = vand.u32 4294901760, %v24543_v24  ;;  %v24554_v53 = vand.u32 4294901760, %v17768_v1 }
 0x292   :  { %13344 = vmatprep.subr.bf16.mxu0 %v17730_v60  ;;  %v5330_v36 = vsub.f32 %v24541_v61, %v24551_v52  ;;  %v24555_v37 = vand.u32 4294901760, %v17772_v29  ;;  %v24557_v39 = vand.u32 4294901760, %v24544_v11  ;;  %v24558_v61 = vand.u32 4294901760, %v24545_v4 }
 0x293   :  { %v4481_v60 = vsub.f32 %v24543_v24, %v24553_v15  ;;  %v24559_v31 = vand.u32 4294901760, %v24546_v57  ;;  %v17971_v44 = vpack.c.bf16 %v4470_v41, %v4458_v58  ;;  %v4476_v32 = vand.u32 4294901760, %v4475_v18  ;;  %v24568_v41 = vld [vmem:[#allocation88_spill] sm:$0xff] }
 0x294   :  { %v17954_v19 = vpack.c.bf16 %v24555_v37, %v24554_v53  ;;  %v4493_v52 = vsub.f32 %v24544_v11, %v24557_v39  ;;  %v5336_v20 = vsub.f32 %v24545_v4, %v24558_v61  ;;  %13154 = vmatpush1.bf16.msra.mxu1 %v17743_v51  ;;  %v17969_v53 = vpack.c.bf16 %v5319_v63, %v5307_v46 }
 0x295   :  { %v5348_v15 = vsub.f32 %v24546_v57, %v24559_v31  ;;  %13346 = vmatpush1.bf16.msra.mxu0 %v17766_v62  ;;  %v24560_v37 = vand.u32 4294901760, %v24548_v5  ;;  %13156 = vmatprep.subr.bf16.mxu1 %v17781_v33  ;;  %v17978_v61 = vpack.c.bf16 %v5325_v16, %v5313_v7  ;;  %v24561_v31 = vand.u32 4294901760, %v24550_v40  ;;  %v24562_v62 = vld [vmem:[#allocation45_spill] sm:$0xff] }
 0x296   :  { %24556 = vst [vmem:[#allocation68_spill] sm:$0xff] %v17954_v19  ;;  %13348 = vmatprep.subr.bf16.mxu0 %v17786_v3  ;;  %v23045_v46 = vand.u32 4294901760, %v24562_v62  ;;  %v4488_v63 = vand.u32 4294901760, %v4487_v26  ;;  %v5331_v58 = vand.u32 4294901760, %v5330_v36  ;;  %v5343_v18 = vand.u32 4294901760, %v5342_v10  ;;  %v24564_v26 = vld [vmem:[#allocation52_spill] sm:$0xff] }
 0x297   :  { %v4499_v39 = vsub.f32 %v24548_v5, %v24560_v37  ;;  %v4511_v19 = vsub.f32 %v24550_v40, %v24561_v31  ;;  %v4482_v51 = vand.u32 4294901760, %v4481_v60  ;;  %4370 = vmatmul.mubr.f32.vlgmr.msra.gmra.mrb[4].mxu1 %v17779_v23  ;;  %v4494_v33 = vand.u32 4294901760, %v4493_v52  ;;  %v24563_v31 = vld [vmem:[#allocation2_spill] sm:$0xff]  ;;  %v24567_v36 = vld [vmem:[#allocation85_spill] sm:$0xff] }
 0x298   :  { %5225 = vmatmul.mubr.f32.vlgmr.msra.gmra.mrb[4].mxu0 %v17779_v23  ;;  %v5337_v3 = vand.u32 4294901760, %v5336_v20  ;;  %v5349_v7 = vand.u32 4294901760, %v5348_v15  ;;  %v23046_v16 = vand.u32 4294901760, %v17632_v12  ;;  %13158 = vmatpush1.bf16.msra.mxu1 %v17791_v48  ;;  %v24565_v10 = vld [vmem:[#allocation42_spill] sm:$0xff]  ;;  %v5354_v52 = vsub.f32 %v24562_v62, %v23045_v46 }
 0x299   :  { %13350 = vmatpush1.bf16.msra.mxu0 %v17814_v25  ;;  %v4500_v37 = vand.u32 4294901760, %v4499_v39  ;;  %13160 = vmatprep.subr.bf16.mxu1 %v17838_v47  ;;  %v4512_v23 = vand.u32 4294901760, %v4511_v19  ;;  %v24566_v48 = vand.u32 4294901760, %v17628_v13  ;;  %v23047_v20 = vand.u32 4294901760, %v17652_v54 }
 0x29a   :  { %13352 = vmatprep.subr.bf16.mxu0 %v17884_v17  ;;  %v13171_v15 = vpack.c.bf16 %v4488_v63, %v4476_v32  ;;  %v23050_v39 = vand.u32 4294901760, %v17654_v35  ;;  %4600 = vmatprep.mubr.f32.mxu1 %v23799_v42  ;;  %v13363_v17 = vpack.c.bf16 %v5343_v18, %v5331_v58  ;;  %v13173_v19 = vpack.c.bf16 %v4494_v33, %v4482_v51 }
 0x29b   :  { %v5366_v25 = vsub.f32 %v17628_v13, %v24566_v48  ;;  %5455 = vmatprep.mubr.f32.mxu0 %v23799_v42  ;;  %v13365_v46 = vpack.c.bf16 %v5349_v7, %v5337_v3  ;;  %v4505_v48 = vsub.f32 %v17632_v12, %v23046_v16  ;;  %v24569_v32 = vand.u32 4294901760, %v24563_v31 }
 0x29c   :  { %13162 = vmatpush1.bf16.msra.mxu1 %v17891_v8  ;;  %v24570_v47 = vand.u32 4294901760, %v24564_v26  ;;  %v24571_v58 = vand.u32 4294901760, %v24565_v10  ;;  %v13175_v18 = vpack.c.bf16 %v4512_v23, %v4500_v37  ;;  %v5355_v8 = vand.u32 4294901760, %v5354_v52  ;;  %v24575_v52 = vld [vmem:[#allocation40_spill] sm:$0xff] }
 0x29d   :  { %13354 = vmatpush1.bf16.msra.mxu0 %v17893_v59  ;;  %v4517_v63 = vsub.f32 %v24563_v31, %v24569_v32  ;;  %13164 = vmatprep.subr.bf16.mxu1 %v17895_v34  ;;  %v5367_v33 = vand.u32 4294901760, %v5366_v25  ;;  %v4523_v59 = vsub.f32 %v17652_v54, %v23047_v20  ;;  %v4535_v3 = vsub.f32 %v17654_v35, %v23050_v39  ;;  %v24577_v20 = vld [vmem:[#allocation101_spill] sm:$0xff]  ;;  %v24578_v25 = vld [vmem:[#allocation12_spill] sm:$0xff] }
 0x29e   :  { %v5360_v60 = vsub.f32 %v24564_v26, %v24570_v47  ;;  %v5372_v51 = vsub.f32 %v24565_v10, %v24571_v58  ;;  %13356 = vmatprep.subr.bf16.mxu0 %v17900_v56  ;;  %v24572_v7 = vand.u32 4294901760, %v24567_v36  ;;  %v24573_v32 = vand.u32 4294901760, %v24568_v41  ;;  %v24574_v56 = vld [vmem:[#allocation31_spill] sm:$0xff]  ;;  %v24576_v58 = vld [vmem:[#allocation98_spill] sm:$0xff] }
 0x29f   :  { %v4506_v23 = vand.u32 4294901760, %v4505_v48  ;;  %v4518_v39 = vand.u32 4294901760, %v4517_v63  ;;  %v4524_v48 = vand.u32 4294901760, %v4523_v59  ;;  %v23059_v54 = vand.u32 4294901760, %v17741_v14 }
 0x2a0   :  { %v5378_v47 = vsub.f32 %v24567_v36, %v24572_v7  ;;  %v5390_v34 = vsub.f32 %v24568_v41, %v24573_v32  ;;  %13166 = vmatpush1.bf16.msra.mxu1 %v17902_v2  ;;  %v5361_v35 = vand.u32 4294901760, %v5360_v60  ;;  %v5373_v7 = vand.u32 4294901760, %v5372_v51 }
 0x2a1   :  { %13358 = vmatpush1.bf16.msra.mxu0 %v17909_v50  ;;  %v23055_v36 = vand.u32 4294901760, %v17705_v55  ;;  %13168 = vmatprep.subr.bf16.mxu1 %v17956_v0  ;;  %v23056_v32 = vand.u32 4294901760, %v17707_v28  ;;  %v4536_v37 = vand.u32 4294901760, %v4535_v3  ;;  %v24579_v50 = vand.u32 4294901760, %v24574_v56 }
 0x2a2   :  { %13360 = vmatprep.subr.bf16.mxu0 %v17969_v53  ;;  %v5379_v2 = vand.u32 4294901760, %v5378_v47  ;;  %v5391_v41 = vand.u32 4294901760, %v5390_v34  ;;  %v24580_v63 = vand.u32 4294901760, %v24575_v52  ;;  %v24581_v53 = vand.u32 4294901760, %v24576_v58 }
 0x2a3   :  { %v4529_v60 = vsub.f32 %v24574_v56, %v24579_v50  ;;  %v24582_v59 = vand.u32 4294901760, %v24577_v20  ;;  %v23058_v3 = vand.u32 4294901760, %v17745_v27  ;;  %v13367_v47 = vpack.c.bf16 %v5367_v33, %v5355_v8 }
 0x2a4   :  { %v4541_v0 = vsub.f32 %v24575_v52, %v24580_v63  ;;  %v5384_v51 = vsub.f32 %v24576_v58, %v24581_v53  ;;  %13170 = vmatpush1.bf16.msra.mxu1 %v17971_v44  ;;  %v13177_v34 = vpack.c.bf16 %v4518_v39, %v4506_v23  ;;  %v4547_v50 = vsub.f32 %v17705_v55, %v23055_v36 }
 0x2a5   :  { %v5396_v16 = vsub.f32 %v24577_v20, %v24582_v59  ;;  %13362 = vmatpush1.bf16.msra.mxu0 %v17978_v61  ;;  %13172 = vmatprep.subr.bf16.mxu1 %v13171_v15  ;;  %v4559_v53 = vsub.f32 %v17707_v28, %v23056_v32  ;;  %v24583_v59 = vand.u32 4294901760, %v24578_v25  ;;  %v5414_v61 = vsub.f32 %v17741_v14, %v23059_v54 }
 0x2a6   :  { %13364 = vmatprep.subr.bf16.mxu0 %v13363_v17  ;;  %v13369_v39 = vpack.c.bf16 %v5373_v7, %v5361_v35  ;;  %v13179_v8 = vpack.c.bf16 %v4536_v37, %v4524_v48  ;;  %v13371_v33 = vpack.c.bf16 %v5391_v41, %v5379_v2  ;;  %v4530_v23 = vand.u32 4294901760, %v4529_v60 }
 0x2a7   :  { %v5402_v44 = vsub.f32 %v24578_v25, %v24583_v59  ;;  %v4542_v36 = vand.u32 4294901760, %v4541_v0  ;;  %v5385_v63 = vand.u32 4294901760, %v5384_v51  ;;  %v5397_v15 = vand.u32 4294901760, %v5396_v16 }
 0x2a8   :  { %v4553_v17 = vsub.f32 %v17745_v27, %v23058_v3  ;;  %13174 = vmatpush1.bf16.msra.mxu1 %v13173_v19  ;;  %v24584_v32 = vand.u32 4294901760, %v17747_v38  ;;  %v24585_v25 = vand.u32 4294901760, %v17768_v1  ;;  %v24586_v41 = vand.u32 4294901760, %v17772_v29 }
 0x2a9   :  { %13366 = vmatpush1.bf16.msra.mxu0 %v13365_v46  ;;  %13176 = vmatprep.subr.bf16.mxu1 %v13175_v18  ;;  %v4548_v16 = vand.u32 4294901760, %v4547_v50  ;;  %v4560_v7 = vand.u32 4294901760, %v4559_v53  ;;  %v5403_v48 = vand.u32 4294901760, %v5402_v44  ;;  %v5415_v2 = vand.u32 4294901760, %v5414_v61  ;;  %v24587_v50 = vld [vmem:[#allocation63_spill] sm:$0xff]  ;;  %v24590_v44 = vld [vmem:[#allocation9_spill] sm:$0xff] }
 0x2aa   :  { %v4565_v59 = vsub.f32 %v17747_v38, %v24584_v32  ;;  %v5408_v35 = vsub.f32 %v17768_v1, %v24585_v25  ;;  %v5420_v37 = vsub.f32 %v17772_v29, %v24586_v41  ;;  %13368 = vmatprep.subr.bf16.mxu0 %v13367_v47  ;;  %v13181_v19 = vpack.c.bf16 %v4542_v36, %v4530_v23  ;;  %v24591_v61 = vld [vmem:[#allocation14_spill] sm:$0xff] }
 0x2ab   :  { %v13373_v46 = vpack.c.bf16 %v5397_v15, %v5385_v63  ;;  %v4554_v60 = vand.u32 4294901760, %v4553_v17  ;;  %v13183_v25 = vpack.c.bf16 %v4560_v7, %v4548_v16  ;;  %v13375_v3 = vpack.c.bf16 %v5415_v2, %v5403_v48  ;;  %v24588_v63 = vld [vmem:[#allocation64_spill] sm:$0xff]  ;;  %v24594_v15 = vld [vmem:[#allocation78_spill] sm:$0xff]  ;;  %v24595_v17 = vld [vmem:[#allocation71_spill] sm:$0xff] }
 0x2ac   :  { %13178 = vmatpush1.bf16.msra.mxu1 %v13177_v34  ;;  %v4566_v32 = vand.u32 4294901760, %v4565_v59  ;;  %v5409_v0 = vand.u32 4294901760, %v5408_v35  ;;  %v5421_v51 = vand.u32 4294901760, %v5420_v37  ;;  %v13187_v36 = vpack.c.bf16 %v24587_v50, %v17345_v43  ;;  %v24589_v34 = vld [vmem:[#allocation65_spill] sm:$0xff]  ;;  %v24597_v35 = vld [vmem:[#allocation82_spill] sm:$0xff]  ;;  %v24600_v7 = vld [vmem:[#allocation16_spill] sm:$0xff] }
 0x2ad   :  { %13370 = vmatpush1.bf16.msra.mxu0 %v13369_v39  ;;  %13180 = vmatprep.subr.bf16.mxu1 %v13179_v8  ;;  %v13379_v53 = vpack.c.bf16 %v24589_v34, %v24588_v63  ;;  %v13189_v39 = vpack.c.bf16 %v24591_v61, %v24590_v44  ;;  %v24592_v8 = vld [vmem:[#allocation20_spill] sm:$0xff]  ;;  %v13191_v59 = vpack.c.bf16 %v24595_v17, %v24594_v15  ;;  %v24598_v37 = vld [vmem:[#allocation57_spill] sm:$0xff]  ;;  %v24601_v2 = vld [vmem:[#allocation51_spill] sm:$0xff] }
 0x2ae   :  { %13372 = vmatprep.subr.bf16.mxu0 %v13371_v33  ;;  %v13185_v18 = vpack.c.bf16 %v4566_v32, %v4554_v60  ;;  %v13377_v47 = vpack.c.bf16 %v5421_v51, %v5409_v0  ;;  %v24593_v33 = vld [vmem:[#allocation72_spill] sm:$0xff]  ;;  %v24599_v16 = vld [vmem:[#allocation49_spill] sm:$0xff]  ;;  %v24603_v60 = vld [vmem:[#allocation35_spill] sm:$0xff] }
 0x2af   :  { %v13381_v23 = vpack.c.bf16 %v24593_v33, %v24592_v8  ;;  %v13193_v48 = vpack.c.bf16 %v24600_v7, %v24599_v16  ;;  %v24604_v32 = vld [vmem:[#allocation38_spill] sm:$0xff] }
 0x2b0   :  { %13182 = vmatpush1.bf16.msra.mxu1 %v13181_v19  ;;  %v24602_v19 = vld [vmem:[#allocation34_spill] sm:$0xff]  ;;  %v13195_v0 = vpack.c.bf16 %v24604_v32, %v24603_v60 }
 0x2b1   :  { %13374 = vmatpush1.bf16.msra.mxu0 %v13373_v46  ;;  %13184 = vmatprep.subr.bf16.mxu1 %v13183_v25  ;;  %v13385_v46 = vpack.c.bf16 %v24602_v19, %v24601_v2  ;;  %v24605_v51 = vld [vmem:[#allocation86_spill] sm:$0xff]  ;;  %v24606_v25 = vld [vmem:[#allocation87_spill] sm:$0xff] }
 0x2b2   :  { %13376 = vmatprep.subr.bf16.mxu0 %v13375_v3  ;;  %v24596_v3 = vld [vmem:[#allocation73_spill] sm:$0xff] }
 0x2b3   :  { %v13383_v41 = vpack.c.bf16 %v24597_v35, %v24596_v3 }
 0x2b4   :  { %13186 = vmatpush1.bf16.msra.mxu1 %v13185_v18  ;;  %v13387_v18 = vpack.c.bf16 %v24606_v25, %v24605_v51  ;;  %v24612_v25 = vld [vmem:[#allocation76_spill] sm:$0xff] }
 0x2b5   :  { %13378 = vmatpush1.bf16.msra.mxu0 %v13377_v47  ;;  %13188 = vmatprep.subr.bf16.mxu1 %v13187_v36  ;;  %v24607_v47 = vld [vmem:[#allocation90_spill] sm:$0xff]  ;;  %v24608_v36 = vld [vmem:[#allocation91_spill] sm:$0xff] }
 0x2b6   :  { %13380 = vmatprep.subr.bf16.mxu0 %v13379_v53  ;;  %v13197_v53 = vpack.c.bf16 %v24608_v36, %v24607_v47  ;;  %v24613_v36 = vld [vmem:[#allocation8_spill] sm:$0xff] }
 0x2b7   :  { %4602 = vmatmul.mubr.f32.vlgmr.msra.gmra.mrb[4].mxu1 %v24598_v37 }
 0x2b8   :  { %5457 = vmatmul.mubr.f32.vlgmr.msra.gmra.mrb[4].mxu0 %v24598_v37  ;;  %13190 = vmatpush1.bf16.msra.mxu1 %v13189_v39  ;;  %v24609_v39 = vld [vmem:[#allocation93_spill] sm:$0xff]  ;;  %v13391_v37 = vpack.c.bf16 %v24524_v22, %v24521_v21 }
 0x2b9   :  { %13382 = vmatpush1.bf16.msra.mxu0 %v13381_v23  ;;  %13192 = vmatprep.subr.bf16.mxu1 %v13191_v59  ;;  %v24610_v23 = vld [vmem:[#allocation94_spill] sm:$0xff]  ;;  %v24611_v59 = vld [vmem:[#allocation95_spill] sm:$0xff] }
 0x2ba   :  { %13384 = vmatprep.subr.bf16.mxu0 %v13383_v41  ;;  %4736 = vmatprep.mubr.f32.mxu1 %v23799_v42  ;;  %v13389_v54 = vpack.c.bf16 %v24610_v23, %v24609_v39  ;;  %v13199_v41 = vpack.c.bf16 %v24611_v59, %v24515_v6  ;;  %v24615_v23 = vld [vmem:[#allocation24_spill] sm:$0xff] }
 0x2bb   :  { %5591 = vmatprep.mubr.f32.mxu0 %v23799_v42 }
 0x2bc   :  { %13194 = vmatpush1.bf16.msra.mxu1 %v13193_v48  ;;  %v13201_v48 = vpack.c.bf16 %v24612_v25, %v24525_v30 }
 0x2bd   :  { %13386 = vmatpush1.bf16.msra.mxu0 %v13385_v46  ;;  %13196 = vmatprep.subr.bf16.mxu1 %v13195_v0  ;;  %v13393_v46 = vpack.c.bf16 %v24535_v9, %v24534_v45  ;;  %v13203_v0 = vpack.c.bf16 %v24540_v49, %v24613_v36 }
 0x2be   :  { %13388 = vmatprep.subr.bf16.mxu0 %v13387_v18  ;;  %v24614_v18 = vld [vmem:[#allocation32_spill] sm:$0xff] }
 0x2bf   :  { %v13395_v39 = vpack.c.bf16 %v24615_v23, %v24614_v18 }
 0x2c0   :  { %13198 = vmatpush1.bf16.msra.mxu1 %v13197_v53  ;;  %v13205_v53 = vpack.c.bf16 %v24544_v11, %v24543_v24  ;;  %v24616_v11 = vld [vmem:[#allocation30_spill] sm:$0xff] }
 0x2c1   :  { %13390 = vmatpush1.bf16.msra.mxu0 %v13389_v54  ;;  %13200 = vmatprep.subr.bf16.mxu1 %v13199_v41  ;;  %v13397_v54 = vpack.c.bf16 %v24546_v57, %v24545_v4  ;;  %v13207_v41 = vpack.c.bf16 %v24550_v40, %v24548_v5  ;;  %v24617_v57 = vld [vmem:[#allocation23_spill] sm:$0xff]  ;;  %v24619_v4 = vld [vmem:[#allocation88_spill] sm:$0xff] }
 0x2c2   :  { %13392 = vmatprep.subr.bf16.mxu0 %v13391_v37  ;;  %v13399_v37 = vpack.c.bf16 %v17628_v13, %v24562_v62 }
 0x2c4   :  { %13202 = vmatpush1.bf16.msra.mxu1 %v13201_v48  ;;  %v13209_v48 = vpack.c.bf16 %v24563_v31, %v17632_v12 }
 0x2c5   :  { %13394 = vmatpush1.bf16.msra.mxu0 %v13393_v46  ;;  %13204 = vmatprep.subr.bf16.mxu1 %v13203_v0  ;;  %v13401_v46 = vpack.c.bf16 %v24565_v10, %v24564_v26  ;;  %v13211_v0 = vpack.c.bf16 %v24617_v57, %v24616_v11 }
 0x2c6   :  { %13396 = vmatprep.subr.bf16.mxu0 %v13395_v39  ;;  %v24618_v39 = vld [vmem:[#allocation85_spill] sm:$0xff] }
 0x2c7   :  { %v13403_v24 = vpack.c.bf16 %v24619_v4, %v24618_v39 }
 0x2c8   :  { %13206 = vmatpush1.bf16.msra.mxu1 %v13205_v53  ;;  %v13213_v53 = vpack.c.bf16 %v24575_v52, %v24574_v56 }
 0x2c9   :  { %13398 = vmatpush1.bf16.msra.mxu0 %v13397_v54  ;;  %13208 = vmatprep.subr.bf16.mxu1 %v13207_v41  ;;  %v13405_v54 = vpack.c.bf16 %v24577_v20, %v24576_v58  ;;  %v13215_v41 = vpack.c.bf16 %v17707_v28, %v17705_v55  ;;  %v24623_v28 = vld [vmem:[#allocation58_spill] sm:$0xff] }
 0x2ca   :  { %13400 = vmatprep.subr.bf16.mxu0 %v13399_v37  ;;  %v24620_v37 = vld [vmem:[#allocation12_spill] sm:$0xff] }
 0x2cb   :  { %v13407_v10 = vpack.c.bf16 %v17741_v14, %v24620_v37 }
 0x2cc   :  { %13210 = vmatpush1.bf16.msra.mxu1 %v13209_v48  ;;  %v13217_v48 = vpack.c.bf16 %v17747_v38, %v17745_v27  ;;  %v24626_v38 = vld [vmem:[#allocation74_spill] sm:$0xff]  ;;  %v24627_v27 = vld [vmem:[#allocation79_spill] sm:$0xff] }
 0x2cd   :  { %13402 = vmatpush1.bf16.msra.mxu0 %v13401_v46  ;;  %13212 = vmatprep.subr.bf16.mxu1 %v13211_v0  ;;  %v13409_v46 = vpack.c.bf16 %v17772_v29, %v17768_v1  ;;  %v24621_v0 = vld [vmem:[#allocation60_spill] sm:$0xff]  ;;  %v24628_v1 = vld [vmem:[#allocation83_spill] sm:$0xff]  ;;  %v24629_v29 = vld [vmem:[#allocation22_spill] sm:$0xff] }
 0x2ce   :  { %13404 = vmatprep.subr.bf16.mxu0 %v13403_v24  ;;  %v24622_v24 = vld [vmem:[#allocation61_spill] sm:$0xff] }
 0x2d0   :  { %13214 = vmatpush1.bf16.msra.mxu1 %v13213_v53  ;;  %v24624_v53 = vld [vmem:[#allocation62_spill] sm:$0xff] }
 0x2d1   :  { %13406 = vmatpush1.bf16.msra.mxu0 %v13405_v54  ;;  %13216 = vmatprep.subr.bf16.mxu1 %v13215_v41  ;;  %v24625_v54 = vld [vmem:[#allocation18_spill] sm:$0xff]  ;;  %v24631_v41 = vld [vmem:[#allocation39_spill] sm:$0xff] }
 0x2d2   :  { %13408 = vmatprep.subr.bf16.mxu0 %v13407_v10  ;;  %v24630_v10 = vld [vmem:[#allocation37_spill] sm:$0xff] }
 0x2d4   :  { %13218 = vmatpush1.bf16.msra.mxu1 %v13217_v48  ;;  %v24633_v48 = vld [vmem:[#allocation28_spill] sm:$0xff] }
 0x2d5   :  { %13410 = vmatpush1.bf16.msra.mxu0 %v13409_v46  ;;  %13220 = vmatprep.subr.bf16.mxu1 %v24621_v0  ;;  %v24634_v46 = vld [vmem:[#allocation41_spill] sm:$0xff] }
 0x2d6   :  { %13412 = vmatprep.subr.bf16.mxu0 %v24622_v24  ;;  %v24656_v24 = vld [vmem:[#allocation27_spill] sm:$0xff] }
 0x2d7   :  { %4739 = vmatmul.mubr.f32.vlgmr.msra.gmra.mrb[4].mxu1 %v24623_v28 }
 0x2d8   :  { %5594 = vmatmul.mubr.f32.vlgmr.msra.gmra.mrb[4].mxu0 %v24623_v28  ;;  %13222 = vmatpush1.bf16.msra.mxu1 %v24624_v53  ;;  %v24632_v28 = vld [vmem:[#allocation89_spill] sm:$0xff] }
 0x2d9   :  { %13414 = vmatpush1.bf16.msra.mxu0 %v24625_v54  ;;  %13224 = vmatprep.subr.bf16.mxu1 %v24626_v38  ;;  %v24635_v38 = vld [vmem:[#allocation97_spill] sm:$0xff]  ;;  %v24637_v54 = vld [vmem:[#allocation80_spill] sm:$0xff] }
 0x2da   :  { %13416 = vmatprep.subr.bf16.mxu0 %v24627_v27  ;;  %4841 = vmatprep.mubr.f32.mxu1 %v23799_v42  ;;  %v24636_v27 = vld [vmem:[#allocation13_spill] sm:$0xff] }
 0x2db   :  { %5696 = vmatprep.mubr.f32.mxu0 %v23799_v42  ;;  %v24638_v53 = vld [vmem:[#allocation5_spill] sm:$0xff] }
 0x2dc   :  { %13226 = vmatpush1.bf16.msra.mxu1 %v24628_v1  ;;  %v24639_v1 = vld [vmem:[#allocation29_spill] sm:$0xff] }
 0x2dd   :  { %13418 = vmatpush1.bf16.msra.mxu0 %v24629_v29  ;;  %13228 = vmatprep.subr.bf16.mxu1 %v24630_v10  ;;  %v24640_v29 = vld [vmem:[#allocation36_spill] sm:$0xff]  ;;  %v24641_v10 = vld [vmem:[#allocation21_spill] sm:$0xff] }
 0x2de   :  { %13420 = vmatprep.subr.bf16.mxu0 %v24631_v41  ;;  %v24642_v41 = vld [vmem:[#allocation105_spill] sm:$0xff] }
 0x2e0   :  { %13230 = vmatpush1.bf16.msra.mxu1 %v24632_v28  ;;  %v24643_v28 = vld [vmem:[#allocation44_spill] sm:$0xff] }
 0x2e1   :  { %13422 = vmatpush1.bf16.msra.mxu0 %v24633_v48  ;;  %13232 = vmatprep.subr.bf16.mxu1 %v24634_v46  ;;  %v24644_v48 = vld [vmem:[#allocation69_spill] sm:$0xff]  ;;  %v24645_v46 = vld [vmem:[#allocation54_spill] sm:$0xff] }
 0x2e2   :  { %13424 = vmatprep.subr.bf16.mxu0 %v24635_v38  ;;  %v24646_v38 = vld [vmem:[#allocation56_spill] sm:$0xff] }
 0x2e4   :  { %13234 = vmatpush1.bf16.msra.mxu1 %v24636_v27  ;;  %v24647_v27 = vld [vmem:[#allocation33_spill] sm:$0xff] }
 0x2e5   :  { %13426 = vmatpush1.bf16.msra.mxu0 %v24637_v54  ;;  %13236 = vmatprep.subr.bf16.mxu1 %v24638_v53  ;;  %v24648_v54 = vld [vmem:[#allocation92_spill] sm:$0xff] }
 0x2e6   :  { %13428 = vmatprep.subr.bf16.mxu0 %v24639_v1  ;;  %v24649_v53 = vld [vmem:[#allocation96_spill] sm:$0xff] }
 0x2e7   :  { %v24650_v1 = vld [vmem:[#allocation104_spill] sm:$0xff] }
 0x2e8   :  { %13238 = vmatpush1.bf16.msra.mxu1 %v24640_v29  ;;  %v24651_v29 = vld [vmem:[#allocation17_spill] sm:$0xff] }
 0x2e9   :  { %13430 = vmatpush1.bf16.msra.mxu0 %v24641_v10  ;;  %13240 = vmatprep.subr.bf16.mxu1 %v24642_v41  ;;  %v24652_v41 = vand.u32 4294901760, %v17345_v43  ;;  %v24661_v43 = vand.u32 4294901760, %v24593_v33  ;;  %v24669_v33 = vand.u32 4294901760, %v24601_v2 }
 0x2ea   :  { %13432 = vmatprep.subr.bf16.mxu0 %v24643_v28  ;;  %v24653_v28 = vand.u32 4294901760, %v24587_v50 }
 0x2ec   :  { %13242 = vmatpush1.bf16.msra.mxu1 %v24644_v48  ;;  %v13251_v10 = vpack.c.bf16 %v24653_v28, %v24652_v41  ;;  %v24654_v48 = vand.u32 4294901760, %v24588_v63  ;;  %v24662_v63 = vand.u32 4294901760, %v24594_v15  ;;  %v24664_v28 = vand.u32 4294901760, %v24596_v3 }
 0x2ed   :  { %13434 = vmatpush1.bf16.msra.mxu0 %v24645_v46  ;;  %13244 = vmatprep.subr.bf16.mxu1 %v24646_v38  ;;  %v24655_v46 = vand.u32 4294901760, %v24589_v34  ;;  %v24663_v34 = vand.u32 4294901760, %v24595_v17  ;;  %v24670_v15 = vand.u32 4294901760, %v24602_v19  ;;  %v24671_v3 = vand.u32 4294901760, %v24603_v60  ;;  %v24679_v60 = vld [vmem:[#allocation91_spill] sm:$0xff] }
 0x2ee   :  { %13436 = vmatprep.subr.bf16.mxu0 %v24647_v27  ;;  %v24657_v27 = vld [vmem:[#allocation15_spill] sm:$0xff]  ;;  %v24678_v19 = vand.u32 4294901760, %v24607_v47 }
 0x2ef   :  { %v13443_v38 = vpack.c.bf16 %v24655_v46, %v24654_v48  ;;  %v13255_v41 = vpack.c.bf16 %v24663_v34, %v24662_v63  ;;  %v24665_v48 = vand.u32 4294901760, %v24597_v35  ;;  %v24666_v46 = vld [vmem:[#allocation59_spill] sm:$0xff]  ;;  %v13449_v17 = vpack.c.bf16 %v24670_v15, %v24669_v33 }
 0x2f0   :  { %13246 = vmatpush1.bf16.msra.mxu1 %v24648_v54  ;;  %v24672_v35 = vand.u32 4294901760, %v24604_v32 }
 0x2f1   :  { %13438 = vmatpush1.bf16.msra.mxu0 %v24649_v53  ;;  %13248 = vmatprep.subr.bf16.mxu1 %v24650_v1  ;;  %v24658_v53 = vand.u32 4294901760, %v24590_v44  ;;  %v24659_v1 = vand.u32 4294901760, %v24591_v61  ;;  %v13447_v44 = vpack.c.bf16 %v24665_v48, %v24664_v28  ;;  %v24667_v61 = vand.u32 4294901760, %v24599_v16 }
 0x2f2   :  { %13440 = vmatprep.subr.bf16.mxu0 %v24651_v29  ;;  %v24660_v29 = vand.u32 4294901760, %v24592_v8  ;;  %v24686_v28 = vand.u32 4294901760, %v24611_v59  ;;  %v24693_v59 = vand.u32 4294901760, %v24535_v9  ;;  %v12169_v9 = vld [vmem:[%s22479_s4 + $0x628] sm:$0xff] }
 0x2f3   :  { %v13253_v54 = vpack.c.bf16 %v24659_v1, %v24658_v53  ;;  %v13259_v53 = vpack.c.bf16 %v24672_v35, %v24671_v3  ;;  %v24674_v1 = vld [vmem:[#allocation87_spill] sm:$0xff]  ;;  %v24696_v3 = vand.u32 4294901760, %v24614_v18  ;;  %v24697_v35 = vand.u32 4294901760, %v24615_v23  ;;  %v12164_v23 = vld [vmem:[%s22479_s4 + $0x600] sm:$0xff] }
 0x2f4   :  { %13250 = vmatpush1.bf16.msra.mxu1 %v24656_v24  ;;  %v13445_v50 = vpack.c.bf16 %v24661_v43, %v24660_v29  ;;  %v24675_v29 = vand.u32 4294901760, %v24674_v1  ;;  %v24681_v43 = vld [vmem:[#allocation93_spill] sm:$0xff]  ;;  %v12168_v18 = vld [vmem:[%s22479_s4 + $0x620] sm:$0xff] }
 0x2f5   :  { %13442 = vmatpush1.bf16.msra.mxu0 %v24657_v27  ;;  %13252 = vmatprep.subr.bf16.mxu1 %v13251_v10  ;;  %v24680_v10 = vand.u32 4294901760, %v24679_v60  ;;  %v24701_v1 = vld [vmem:[#allocation25_spill] sm:$0xff]  ;;  %v24705_v60 = vld [vmem:[#allocation103_spill] sm:$0xff] }
 0x2f6   :  { %13444 = vmatprep.subr.bf16.mxu0 %v13443_v38  ;;  %v24668_v38 = vand.u32 4294901760, %v24600_v7  ;;  %v24676_v7 = vld [vmem:[#allocation6_spill] sm:$0xff] }
 0x2f7   :  { %4845 = vmatmul.mubr.f32.vlgmr.msra.gmra.mrb[4].mxu1 %v24666_v46  ;;  %v18236_v2 = vand.u32 4294901760, %v24676_v7  ;;  %v13261_v32 = vpack.c.bf16 %v24680_v10, %v24678_v19  ;;  %v24706_v10 = vand.u32 4294901760, %v24705_v60  ;;  %v12175_v60 = vld [vmem:[%s22479_s4 + $0x658] sm:$0xff] }
 0x2f8   :  { %5700 = vmatmul.mubr.f32.vlgmr.msra.gmra.mrb[4].mxu0 %v24666_v46  ;;  %13254 = vmatpush1.bf16.msra.mxu1 %v13253_v54  ;;  %v13257_v8 = vpack.c.bf16 %v24668_v38, %v24667_v61  ;;  %v24673_v54 = vand.u32 4294901760, %v24605_v51  ;;  %v24683_v51 = vld [vmem:[#allocation94_spill] sm:$0xff]  ;;  %v24688_v46 = vand.u32 4294901760, %v24524_v22  ;;  %v24690_v38 = vand.u32 4294901760, %v24525_v30 }
 0x2f9   :  { %13446 = vmatpush1.bf16.msra.mxu0 %v13445_v50  ;;  %13256 = vmatprep.subr.bf16.mxu1 %v13255_v41  ;;  %24677 = vst [vmem:[#allocation70_spill] sm:$0xff] %v18236_v2  ;;  %v24682_v50 = vand.u32 4294901760, %v24681_v43  ;;  %v24684_v63 = vand.u32 4294901760, %v24683_v51  ;;  %v24685_v41 = vand.u32 4294901760, %v24515_v6  ;;  %v18256_v61 = vsub.f32 %v24676_v7, %v18236_v2  ;;  %v24703_v7 = vld [vmem:[#allocation100_spill] sm:$0xff] }
 0x2fa   :  { %13448 = vmatprep.subr.bf16.mxu0 %v13447_v44  ;;  %v13451_v16 = vpack.c.bf16 %v24675_v29, %v24673_v54  ;;  %5011 = vmatprep.mubr.f32.mxu1 %v23799_v42  ;;  %v24687_v44 = vand.u32 4294901760, %v24521_v21  ;;  %v24692_v6 = vand.u32 4294901760, %v24534_v45  ;;  %v24694_v22 = vand.u32 4294901760, %v24613_v36  ;;  %v12167_v45 = vld [vmem:[%s22479_s4 + $0x618] sm:$0xff] }
 0x2fb   :  { %5866 = vmatprep.mubr.f32.mxu0 %v23799_v42  ;;  %v13453_v34 = vpack.c.bf16 %v24684_v63, %v24682_v50  ;;  %v13263_v48 = vpack.c.bf16 %v24686_v28, %v24685_v41  ;;  %24689 = vst [vmem:[#allocation75_spill] sm:$0xff] %v18256_v61  ;;  %v24695_v21 = vand.u32 4294901760, %v24540_v49  ;;  %v13459_v30 = vpack.c.bf16 %v24697_v35, %v24696_v3  ;;  %v12171_v36 = vld [vmem:[%s22479_s4 + $0x638] sm:$0xff] }
 0x2fc   :  { %13258 = vmatpush1.bf16.msra.mxu1 %v13257_v8  ;;  %v13455_v47 = vpack.c.bf16 %v24688_v46, %v24687_v44  ;;  %v24691_v8 = vand.u32 4294901760, %v24612_v25  ;;  %v13457_v15 = vpack.c.bf16 %v24693_v59, %v24692_v6  ;;  %v12165_v25 = vld [vmem:[%s22479_s4 + $0x608] sm:$0xff]  ;;  %v18284_v49 = vand.u32 4294901760, %v18256_v61  ;;  %v24714_v6 = vld [vmem:[#allocation42_spill] sm:$0xff] }
 0x2fd   :  { %13450 = vmatpush1.bf16.msra.mxu0 %v13449_v17  ;;  %13260 = vmatprep.subr.bf16.mxu1 %v13259_v53  ;;  %v13267_v17 = vpack.c.bf16 %v24695_v21, %v24694_v22  ;;  %v24699_v53 = vld [vmem:[#allocation55_spill] sm:$0xff]  ;;  %v24702_v29 = vand.u32 4294901760, %v24701_v1  ;;  %v24704_v19 = vand.u32 4294901760, %v24703_v7  ;;  %v24707_v43 = vand.u32 4294901760, %v24548_v5 }
 0x2fe   :  { %13452 = vmatprep.subr.bf16.mxu0 %v13451_v16  ;;  %v13265_v33 = vpack.c.bf16 %v24691_v8, %v24690_v38  ;;  %24698 = vst [vmem:[#allocation81_spill] sm:$0xff] %v18284_v49  ;;  %v24700_v54 = vand.u32 4294901760, %v24699_v53  ;;  %v24708_v50 = vand.u32 4294901760, %v24550_v40  ;;  %v24709_v63 = vand.u32 4294901760, %v24562_v62  ;;  %v12166_v8 = vld [vmem:[%s22479_s4 + $0x610] sm:$0xff]  ;;  %v12173_v1 = vld [vmem:[%s22479_s4 + $0x648] sm:$0xff] }
 0x2ff   :  { %v6047_v28 = vand.u32 4294901760, %v12165_v25  ;;  %v6902_v44 = vand.u32 4294901760, %v12167_v45  ;;  %v6906_v46 = vand.u32 4294901760, %v12171_v36  ;;  %v6053_v38 = vand.u32 4294901760, %v12168_v18  ;;  %v12170_v40 = vld [vmem:[%s22479_s4 + $0x630] sm:$0xff] }
 0x300   :  { %13262 = vmatpush1.bf16.msra.mxu1 %v13261_v32  ;;  %v13269_v16 = vpack.c.bf16 %v24702_v29, %v24700_v54  ;;  %v13461_v32 = vpack.c.bf16 %v24706_v10, %v24704_v19  ;;  %v13271_v51 = vpack.c.bf16 %v24708_v50, %v24707_v43  ;;  %v24711_v5 = vand.u32 4294901760, %v17632_v12  ;;  %v12179_v10 = vld [vmem:[%s22479_s4 + $0x678] sm:$0xff]  ;;  %v24731_v43 = vld [vmem:[#allocation66_spill] sm:$0xff] }
 0x301   :  { %13454 = vmatpush1.bf16.msra.mxu0 %v13453_v34  ;;  %13264 = vmatprep.subr.bf16.mxu1 %v13263_v48  ;;  %v24710_v34 = vand.u32 4294901760, %v17628_v13  ;;  %v6051_v48 = vand.u32 4294901760, %v12169_v9  ;;  %v24712_v62 = vand.u32 4294901760, %v24563_v31  ;;  %v24715_v59 = vand.u32 4294901760, %v24714_v6  ;;  %v12176_v6 = vld [vmem:[%s22479_s4 + $0x660] sm:$0xff] }
 0x302   :  { %13456 = vmatprep.subr.bf16.mxu0 %v13455_v47  ;;  %v6049_v47 = vand.u32 4294901760, %v12164_v23  ;;  %v24716_v22 = vand.u32 4294901760, %v24616_v11  ;;  %v24717_v21 = vand.u32 4294901760, %v24617_v57  ;;  %v24718_v12 = vand.u32 4294901760, %v24618_v39  ;;  %v12177_v39 = vld [vmem:[%s22479_s4 + $0x668] sm:$0xff] }
 0x303   :  { %v13463_v41 = vpack.c.bf16 %v24710_v34, %v24709_v63  ;;  %v13273_v13 = vpack.c.bf16 %v24712_v62, %v24711_v5  ;;  %v24719_v31 = vand.u32 4294901760, %v24619_v4  ;;  %v24722_v11 = vand.u32 4294901760, %v24576_v58 }
 0x304   :  { %13266 = vmatpush1.bf16.msra.mxu1 %v13265_v33  ;;  %v24713_v33 = vand.u32 4294901760, %v24564_v26  ;;  %v24720_v26 = vand.u32 4294901760, %v24574_v56  ;;  %v24723_v57 = vand.u32 4294901760, %v24577_v20  ;;  %v24724_v4 = vand.u32 4294901760, %v17705_v55  ;;  %v24725_v56 = vld [vmem:[#allocation10_spill] sm:$0xff] }
 0x305   :  { %13458 = vmatpush1.bf16.msra.mxu0 %v13457_v15  ;;  %13268 = vmatprep.subr.bf16.mxu1 %v13267_v17  ;;  %v13275_v17 = vpack.c.bf16 %v24717_v21, %v24716_v22  ;;  %v13467_v35 = vpack.c.bf16 %v24719_v31, %v24718_v12  ;;  %v24727_v58 = vand.u32 4294901760, %v24620_v37  ;;  %v24728_v20 = vand.u32 4294901760, %v17741_v14 }
 0x306   :  { %13460 = vmatprep.subr.bf16.mxu0 %v13459_v30  ;;  %v13465_v15 = vpack.c.bf16 %v24715_v59, %v24713_v33  ;;  %v24721_v30 = vand.u32 4294901760, %v24575_v52  ;;  %v13469_v54 = vpack.c.bf16 %v24723_v57, %v24722_v11  ;;  %v24726_v52 = vand.u32 4294901760, %v24725_v56  ;;  %v12172_v33 = vld [vmem:[%s22479_s4 + $0x640] sm:$0xff] }
 0x307   :  { %v6904_v7 = vand.u32 4294901760, %v12166_v8  ;;  %v6908_v19 = vand.u32 4294901760, %v12170_v40  ;;  %v24732_v50 = vand.u32 4294901760, %v24731_v43  ;;  %v18367_v63 = vpack.c.bf16 %v6051_v48, %v6047_v28  ;;  %v12184_v11 = vld [vmem:[%s22479_s4 + $0x6a0] sm:$0xff] }
 0x308   :  { %13270 = vmatpush1.bf16.msra.mxu1 %v13269_v16  ;;  %v13277_v53 = vpack.c.bf16 %v24721_v30, %v24720_v26  ;;  %v13279_v29 = vpack.c.bf16 %v24726_v52, %v24724_v4  ;;  %v13471_v16 = vpack.c.bf16 %v24728_v20, %v24727_v58  ;;  %v18369_v37 = vpack.c.bf16 %v6906_v46, %v6902_v44  ;;  %v12180_v30 = vld [vmem:[%s22479_s4 + $0x680] sm:$0xff]  ;;  %v12186_v4 = vld [vmem:[%s22479_s4 + $0x6b0] sm:$0xff] }
 0x309   :  { %13462 = vmatpush1.bf16.msra.mxu0 %v13461_v32  ;;  %13272 = vmatprep.subr.bf16.mxu1 %v13271_v51  ;;  %v24729_v32 = vld [vmem:[#allocation77_spill] sm:$0xff]  ;;  %24733 = vst [vmem:[#allocation84_spill] sm:$0xff] %v18367_v63  ;;  %v18371_v14 = vpack.c.bf16 %v6053_v38, %v6049_v47  ;;  %v18373_v34 = vsub.f32 %v12165_v25, %v6047_v28  ;;  %v6055_v5 = vand.u32 4294901760, %v12173_v1  ;;  %v6059_v62 = vand.u32 4294901760, %v12177_v39 }
 0x30a   :  { %13464 = vmatprep.subr.bf16.mxu0 %v13463_v41  ;;  %v24730_v55 = vand.u32 4294901760, %v24729_v32  ;;  %24734 = vst [vmem:[#allocation46_spill] sm:$0xff] %v18369_v37  ;;  %v18375_v41 = vsub.f32 %v12169_v9, %v6051_v48  ;;  %v18383_v59 = vsub.f32 %v12167_v45, %v6902_v44  ;;  %v18385_v22 = vsub.f32 %v12171_v36, %v6906_v46  ;;  %v12174_v9 = vld [vmem:[%s22479_s4 + $0x650] sm:$0xff]  ;;  %v12181_v36 = vld [vmem:[%s22479_s4 + $0x688] sm:$0xff] }
 0x30b   :  { %24735 = vst [vmem:[#allocation47_spill] sm:$0xff] %v18371_v14  ;;  %24736 = vst [vmem:[#allocation11_spill] sm:$0xff] %v18373_v34  ;;  %v6910_v25 = vand.u32 4294901760, %v12175_v60  ;;  %v6914_v28 = vand.u32 4294901760, %v12179_v10  ;;  %v12178_v48 = vld [vmem:[%s22479_s4 + $0x670] sm:$0xff]  ;;  %v18393_v21 = vsub.f32 %v12164_v23, %v6049_v47  ;;  %v18397_v45 = vpack.c.bf16 %v6908_v19, %v6904_v7  ;;  %v12183_v23 = vld [vmem:[%s22479_s4 + $0x698] sm:$0xff] }
 0x30c   :  { %v13281_v51 = vpack.c.bf16 %v24732_v50, %v24730_v55  ;;  %24737 = vst [vmem:[#allocation50_spill] sm:$0xff] %v18375_v41  ;;  %13274 = vmatpush1.bf16.msra.mxu1 %v13273_v13  ;;  %24738 = vst [vmem:[#allocation26_spill] sm:$0xff] %v18383_v59  ;;  %v18395_v13 = vsub.f32 %v12168_v18, %v6053_v38  ;;  %v18402_v44 = vsub.f32 %v12166_v8, %v6904_v7  ;;  %v12187_v18 = vld [vmem:[%s22479_s4 + $0x6b8] sm:$0xff]  ;;  %v24756_v32 = vld [vmem:[#allocation68_spill] sm:$0xff] }
 0x30d   :  { %13466 = vmatpush1.bf16.msra.mxu0 %v13465_v15  ;;  %24739 = vst [vmem:[#allocation53_spill] sm:$0xff] %v18385_v22  ;;  %13276 = vmatprep.subr.bf16.mxu1 %v13275_v17  ;;  %24740 = vst [vmem:[#allocation43_spill] sm:$0xff] %v18393_v21  ;;  %v18404_v46 = vsub.f32 %v12170_v40, %v6908_v19  ;;  %v6057_v15 = vand.u32 4294901760, %v12172_v33  ;;  %v6061_v12 = vand.u32 4294901760, %v12176_v6  ;;  %v12185_v17 = vld [vmem:[%s22479_s4 + $0x6a8] sm:$0xff]  ;;  %v6912_v8 = vand.u32 4294901760, %v12174_v9 }
 0x30e   :  { %13468 = vmatprep.subr.bf16.mxu0 %v13467_v35  ;;  %24741 = vst [vmem:[#allocation99_spill] sm:$0xff] %v18395_v13  ;;  %24742 = vst [vmem:[#allocation102_spill] sm:$0xff] %v18397_v45  ;;  %v18415_v47 = vpack.c.bf16 %v6059_v62, %v6055_v5  ;;  %v18417_v38 = vsub.f32 %v12173_v1, %v6055_v5  ;;  %v6916_v40 = vand.u32 4294901760, %v12178_v48  ;;  %v6063_v57 = vand.u32 4294901760, %v12181_v36 }
 0x30f   :  { %24743 = vst [vmem:[#allocation19_spill] sm:$0xff] %v18402_v44  ;;  %24744 = vst [vmem:[#allocation67_spill] sm:$0xff] %v18404_v46  ;;  %v18419_v31 = vsub.f32 %v12177_v39, %v6059_v62  ;;  %v18421_v35 = vpack.c.bf16 %v6914_v28, %v6910_v25  ;;  %v18423_v26 = vsub.f32 %v12175_v60, %v6910_v25  ;;  %v6067_v1 = vand.u32 4294901760, %v12185_v17  ;;  %v12182_v39 = vld [vmem:[%s22479_s4 + $0x690] sm:$0xff]  ;;  %v12189_v60 = vld [vmem:[%s22479_s4 + $0x6c8] sm:$0xff] }
 0x310   :  { %24745 = vst [vmem:[#allocation4_spill] sm:$0xff] %v18415_v47  ;;  %24746 = vst [vmem:[#allocation48_spill] sm:$0xff] %v18417_v38  ;;  %13278 = vmatpush1.bf16.msra.mxu1 %v13277_v53  ;;  %v6918_v53 = vand.u32 4294901760, %v12183_v23  ;;  %v18437_v56 = vsub.f32 %v12179_v10, %v6914_v28  ;;  %v18439_v52 = vpack.c.bf16 %v6061_v12, %v6057_v15  ;;  %v6065_v7 = vand.u32 4294901760, %v12180_v30  ;;  %v12193_v10 = vld [vmem:[%s22479_s4 + $0x6e8] sm:$0xff]  ;;  %v12191_v62 = vld [vmem:[%s22479_s4 + $0x6d8] sm:$0xff] }
 0x311   :  { %13470 = vmatpush1.bf16.msra.mxu0 %v13469_v54  ;;  %24747 = vst [vmem:[#allocation7_spill] sm:$0xff] %v18419_v31  ;;  %24748 = vst [vmem:[#allocation3_spill] sm:$0xff] %v18421_v35  ;;  %13280 = vmatprep.subr.bf16.mxu1 %v13279_v29  ;;  %v6922_v54 = vand.u32 4294901760, %v12187_v18  ;;  %v18441_v58 = vsub.f32 %v12172_v33, %v6057_v15  ;;  %v18443_v29 = vsub.f32 %v12176_v6, %v6061_v12  ;;  %v12195_v33 = vld [vmem:[%s22479_s4 + $0x6f8] sm:$0xff] }
 0x312   :  { %24749 = vst [vmem:[#allocation45_spill] sm:$0xff] %v18423_v26  ;;  %13472 = vmatprep.subr.bf16.mxu0 %v13471_v16  ;;  %24750 = vst [vmem:[#allocation2_spill] sm:$0xff] %v18437_v56  ;;  %v18445_v20 = vpack.c.bf16 %v6916_v40, %v6912_v8  ;;  %v18447_v16 = vsub.f32 %v12174_v9, %v6912_v8  ;;  %v6069_v19 = vand.u32 4294901760, %v12184_v11  ;;  %v6920_v50 = vand.u32 4294901760, %v12182_v39  ;;  %v24759_v6 = vld [vmem:[#allocation61_spill] sm:$0xff]  ;;  %v12188_v9 = vld [vmem:[%s22479_s4 + $0x6c0] sm:$0xff] }
 0x313   :  { %24751 = vst [vmem:[#allocation52_spill] sm:$0xff] %v18439_v52  ;;  %24752 = vst [vmem:[#allocation31_spill] sm:$0xff] %v18441_v58  ;;  %v18456_v55 = vsub.f32 %v12178_v48, %v6916_v40  ;;  %v18458_v43 = vsub.f32 %v12181_v36, %v6063_v57  ;;  %v6924_v5 = vand.u32 4294901760, %v12186_v4  ;;  %v18470_v25 = vsub.f32 %v12185_v17, %v6067_v1  ;;  %v12192_v48 = vld [vmem:[%s22479_s4 + $0x6e0] sm:$0xff]  ;;  %v12190_v17 = vld [vmem:[%s22479_s4 + $0x6d0] sm:$0xff] }
 0x314   :  { %24753 = vst [vmem:[#allocation40_spill] sm:$0xff] %v18443_v29  ;;  %24754 = vst [vmem:[#allocation98_spill] sm:$0xff] %v18445_v20  ;;  %13282 = vmatpush1.bf16.msra.mxu1 %v13281_v51  ;;  %v18468_v51 = vpack.c.bf16 %v6067_v1, %v6063_v57  ;;  %v18472_v28 = vpack.c.bf16 %v6922_v54, %v6918_v53  ;;  %v18480_v36 = vsub.f32 %v12183_v23, %v6918_v53  ;;  %v12194_v8 = vld [vmem:[%s22479_s4 + $0x6f0] sm:$0xff]  ;;  %v24765_v40 = vld [vmem:[#allocation57_spill] sm:$0xff] }
 0x315   :  { %24755 = vst [vmem:[#allocation101_spill] sm:$0xff] %v18447_v16  ;;  %13474 = vmatpush1.bf16.msra.mxu0 %v24756_v32  ;;  %24757 = vst [vmem:[#allocation63_spill] sm:$0xff] %v18456_v55  ;;  %13284 = vmatprep.subr.bf16.mxu1 %v24621_v0  ;;  %v18482_v15 = vsub.f32 %v12187_v18, %v6922_v54  ;;  %v6071_v0 = vand.u32 4294901760, %v12189_v60  ;;  %v6075_v12 = vand.u32 4294901760, %v12193_v10  ;;  %v6926_v18 = vand.u32 4294901760, %v12191_v62  ;;  %v24768_v53 = vld [vmem:[#allocation62_spill] sm:$0xff] }
 0x316   :  { %24758 = vst [vmem:[#allocation64_spill] sm:$0xff] %v18458_v43  ;;  %13476 = vmatprep.subr.bf16.mxu0 %v24759_v6  ;;  %24760 = vst [vmem:[#allocation65_spill] sm:$0xff] %v18468_v51  ;;  %v18492_v57 = vpack.c.bf16 %v6069_v19, %v6065_v7  ;;  %v18494_v23 = vsub.f32 %v12180_v30, %v6065_v7  ;;  %v6930_v1 = vand.u32 4294901760, %v12195_v33  ;;  %v24769_v54 = vld [vmem:[#allocation18_spill] sm:$0xff]  ;;  %v6073_v3 = vand.u32 4294901760, %v12188_v9  ;;  %v12201_v30 = vld [vmem:[%s22479_s4 + $0x728] sm:$0xff] }
 0x317   :  { %24761 = vst [vmem:[#allocation9_spill] sm:$0xff] %v18470_v25  ;;  %24762 = vst [vmem:[#allocation14_spill] sm:$0xff] %v18472_v28  ;;  %5013 = vmatmul.mubr.f32.vlgmr.msra.gmra.mrb[4].mxu1 %v24765_v40  ;;  %v18498_v32 = vsub.f32 %v12184_v11, %v6069_v19  ;;  %v18500_v6 = vpack.c.bf16 %v6924_v5, %v6920_v50  ;;  %v6077_v2 = vand.u32 4294901760, %v12192_v48  ;;  %v24772_v7 = vld [vmem:[#allocation74_spill] sm:$0xff]  ;;  %v6928_v19 = vand.u32 4294901760, %v12190_v17  ;;  %v24823_v51 = vld [vmem:[#allocation105_spill] sm:$0xff] }
 0x318   :  { %24763 = vst [vmem:[#allocation20_spill] sm:$0xff] %v18480_v36  ;;  %24764 = vst [vmem:[#allocation72_spill] sm:$0xff] %v18482_v15  ;;  %5868 = vmatmul.mubr.f32.vlgmr.msra.gmra.mrb[4].mxu0 %v24765_v40  ;;  %13286 = vmatpush1.bf16.msra.mxu1 %v24768_v53  ;;  %v12197_v15 = vld [vmem:[%s22479_s4 + $0x708] sm:$0xff]  ;;  %v18510_v53 = vsub.f32 %v12182_v39, %v6920_v50  ;;  %v18512_v11 = vsub.f32 %v12186_v4, %v6924_v5  ;;  %v12203_v39 = vld [vmem:[%s22479_s4 + $0x738] sm:$0xff] }
 0x319   :  { %24766 = vst [vmem:[#allocation78_spill] sm:$0xff] %v18492_v57  ;;  %24767 = vst [vmem:[#allocation71_spill] sm:$0xff] %v18494_v23  ;;  %13478 = vmatpush1.bf16.msra.mxu0 %v24769_v54  ;;  %13288 = vmatprep.subr.bf16.mxu1 %v24772_v7  ;;  %v24773_v57 = vld [vmem:[#allocation79_spill] sm:$0xff]  ;;  %v6932_v54 = vand.u32 4294901760, %v12194_v8  ;;  %v18520_v23 = vsub.f32 %v12193_v10, %v6075_v12  ;;  %v18528_v4 = vpack.c.bf16 %v6930_v1, %v6926_v18  ;;  %v12200_v10 = vld [vmem:[%s22479_s4 + $0x720] sm:$0xff] }
 0x31a   :  { %24770 = vst [vmem:[#allocation73_spill] sm:$0xff] %v18498_v32  ;;  %24771 = vst [vmem:[#allocation82_spill] sm:$0xff] %v18500_v6  ;;  %13480 = vmatprep.subr.bf16.mxu0 %v24773_v57  ;;  %5115 = vmatprep.mubr.f32.mxu1 %v23799_v42  ;;  %v18516_v6 = vpack.c.bf16 %v6075_v12, %v6071_v0  ;;  %v18518_v32 = vsub.f32 %v12189_v60, %v6071_v0  ;;  %v12199_v57 = vld [vmem:[%s22479_s4 + $0x718] sm:$0xff]  ;;  %v6079_v5 = vand.u32 4294901760, %v12197_v15  ;;  %v12196_v60 = vld [vmem:[%s22479_s4 + $0x700] sm:$0xff] }
 0x31b   :  { %24774 = vst [vmem:[#allocation49_spill] sm:$0xff] %v18510_v53  ;;  %24775 = vst [vmem:[#allocation16_spill] sm:$0xff] %v18512_v11  ;;  %5970 = vmatprep.mubr.f32.mxu0 %v23799_v42  ;;  %v18530_v50 = vsub.f32 %v12191_v62, %v6926_v18  ;;  %v6083_v7 = vand.u32 4294901760, %v12201_v30  ;;  %v24781_v0 = vld [vmem:[#allocation83_spill] sm:$0xff]  ;;  %v24782_v12 = vld [vmem:[#allocation22_spill] sm:$0xff]  ;;  %v18544_v62 = vsub.f32 %v12188_v9, %v6073_v3 }
 0x31c   :  { %24776 = vst [vmem:[#allocation51_spill] sm:$0xff] %v18516_v6  ;;  %24777 = vst [vmem:[#allocation34_spill] sm:$0xff] %v18518_v32  ;;  %13290 = vmatpush1.bf16.msra.mxu1 %v24781_v0  ;;  %v18540_v6 = vsub.f32 %v12195_v33, %v6930_v1  ;;  %v12198_v18 = vld [vmem:[%s22479_s4 + $0x710] sm:$0xff]  ;;  %v24787_v32 = vld [vmem:[#allocation39_spill] sm:$0xff]  ;;  %v18554_v0 = vsub.f32 %v12192_v48, %v6077_v2  ;;  %v18556_v33 = vpack.c.bf16 %v6932_v54, %v6928_v19 }
 0x31d   :  { %24778 = vst [vmem:[#allocation35_spill] sm:$0xff] %v18520_v23  ;;  %24779 = vst [vmem:[#allocation38_spill] sm:$0xff] %v18528_v4  ;;  %13482 = vmatpush1.bf16.msra.mxu0 %v24782_v12  ;;  %v18542_v23 = vpack.c.bf16 %v6077_v2, %v6073_v3  ;;  %v24786_v4 = vld [vmem:[#allocation37_spill] sm:$0xff]  ;;  %v6934_v1 = vand.u32 4294901760, %v12199_v57  ;;  %v6938_v12 = vand.u32 4294901760, %v12203_v39  ;;  %v12205_v3 = vld [vmem:[%s22479_s4 + $0x748] sm:$0xff] }
 0x31e   :  { %24780 = vst [vmem:[#allocation86_spill] sm:$0xff] %v18530_v50  ;;  %24783 = vst [vmem:[#allocation90_spill] sm:$0xff] %v18540_v6  ;;  %v12202_v50 = vld [vmem:[%s22479_s4 + $0x730] sm:$0xff]  ;;  %13292 = vmatprep.subr.bf16.mxu1 %v24786_v4  ;;  %13484 = vmatprep.subr.bf16.mxu0 %v24787_v32  ;;  %v12209_v9 = vld [vmem:[%s22479_s4 + $0x768] sm:$0xff]  ;;  %v6081_v4 = vand.u32 4294901760, %v12196_v60  ;;  %v6085_v32 = vand.u32 4294901760, %v12200_v10 }
 0x31f   :  { %24784 = vst [vmem:[#allocation95_spill] sm:$0xff] %v18542_v23  ;;  %24785 = vst [vmem:[#allocation76_spill] sm:$0xff] %v18544_v62  ;;  %v18564_v62 = vsub.f32 %v12190_v17, %v6928_v19  ;;  %v18566_v23 = vsub.f32 %v12194_v8, %v6932_v54  ;;  %v12207_v2 = vld [vmem:[%s22479_s4 + $0x758] sm:$0xff]  ;;  %v6936_v6 = vand.u32 4294901760, %v12198_v18  ;;  %v6940_v11 = vand.u32 4294901760, %v12202_v50  ;;  %v24795_v8 = vld [vmem:[#allocation28_spill] sm:$0xff] }
 0x320   :  { %24788 = vst [vmem:[#allocation8_spill] sm:$0xff] %v18554_v0  ;;  %24789 = vst [vmem:[#allocation32_spill] sm:$0xff] %v18556_v33  ;;  %v12211_v48 = vld [vmem:[%s22479_s4 + $0x778] sm:$0xff]  ;;  %v18574_v0 = vpack.c.bf16 %v6083_v7, %v6079_v5  ;;  %v18576_v33 = vsub.f32 %v12197_v15, %v6079_v5  ;;  %v18580_v19 = vsub.f32 %v12201_v30, %v6083_v7  ;;  %v12204_v53 = vld [vmem:[%s22479_s4 + $0x740] sm:$0xff] }
 0x321   :  { %24790 = vst [vmem:[#allocation24_spill] sm:$0xff] %v18564_v62  ;;  %24791 = vst [vmem:[#allocation30_spill] sm:$0xff] %v18566_v23  ;;  %v24794_v17 = vld [vmem:[#allocation89_spill] sm:$0xff]  ;;  %13486 = vmatpush1.bf16.msra.mxu0 %v24795_v8  ;;  %v18582_v54 = vsub.f32 %v12199_v57, %v6934_v1  ;;  %v6087_v23 = vand.u32 4294901760, %v12205_v3  ;;  %v6091_v62 = vand.u32 4294901760, %v12209_v9  ;;  %v12208_v15 = vld [vmem:[%s22479_s4 + $0x760] sm:$0xff]  ;;  %v18594_v30 = vsub.f32 %v12203_v39, %v6938_v12 }
 0x322   :  { %24792 = vst [vmem:[#allocation23_spill] sm:$0xff] %v18574_v0  ;;  %24793 = vst [vmem:[#allocation85_spill] sm:$0xff] %v18576_v33  ;;  %13294 = vmatpush1.bf16.msra.mxu1 %v24794_v17  ;;  %v24798_v5 = vld [vmem:[#allocation41_spill] sm:$0xff]  ;;  %v18592_v17 = vpack.c.bf16 %v6938_v12, %v6934_v1  ;;  %v6942_v57 = vand.u32 4294901760, %v12207_v2  ;;  %v6946_v7 = vand.u32 4294901760, %v12211_v48  ;;  %v18596_v8 = vpack.c.bf16 %v6085_v32, %v6081_v4  ;;  %v12213_v39 = vld [vmem:[%s22479_s4 + $0x788] sm:$0xff] }
 0x323   :  { %24796 = vst [vmem:[#allocation88_spill] sm:$0xff] %v18580_v19  ;;  %24797 = vst [vmem:[#allocation12_spill] sm:$0xff] %v18582_v54  ;;  %13296 = vmatprep.subr.bf16.mxu1 %v24798_v5  ;;  %v24799_v33 = vld [vmem:[#allocation97_spill] sm:$0xff]  ;;  %v18598_v54 = vsub.f32 %v12196_v60, %v6081_v4  ;;  %v18600_v19 = vsub.f32 %v12200_v10, %v6085_v32  ;;  %v18602_v0 = vsub.f32 %v12198_v18, %v6936_v6  ;;  %v12206_v5 = vld [vmem:[%s22479_s4 + $0x750] sm:$0xff] }
 0x324   :  { %13488 = vmatprep.subr.bf16.mxu0 %v24799_v33  ;;  %24800 = vst [vmem:[#allocation60_spill] sm:$0xff] %v18592_v17  ;;  %24801 = vst [vmem:[#allocation58_spill] sm:$0xff] %v18594_v30  ;;  %v12210_v33 = vld [vmem:[%s22479_s4 + $0x770] sm:$0xff]  ;;  %v18613_v1 = vpack.c.bf16 %v6940_v11, %v6936_v6  ;;  %v18615_v60 = vsub.f32 %v12202_v50, %v6940_v11  ;;  %v6089_v10 = vand.u32 4294901760, %v12204_v53  ;;  %v6093_v12 = vand.u32 4294901760, %v12208_v15  ;;  %v12217_v18 = vld [vmem:[%s22479_s4 + $0x7a8] sm:$0xff] }
 0x325   :  { %24802 = vst [vmem:[#allocation27_spill] sm:$0xff] %v18596_v8  ;;  %24803 = vst [vmem:[#allocation15_spill] sm:$0xff] %v18598_v54  ;;  %v12215_v4 = vld [vmem:[%s22479_s4 + $0x798] sm:$0xff]  ;;  %v24809_v6 = vld [vmem:[#allocation80_spill] sm:$0xff]  ;;  %v18628_v11 = vpack.c.bf16 %v6091_v62, %v6087_v23  ;;  %v18630_v50 = vsub.f32 %v12205_v3, %v6087_v23  ;;  %v6944_v23 = vand.u32 4294901760, %v12206_v5  ;;  %v6948_v3 = vand.u32 4294901760, %v12210_v33 }
 0x326   :  { %24804 = vst [vmem:[#allocation59_spill] sm:$0xff] %v18600_v19  ;;  %24805 = vst [vmem:[#allocation87_spill] sm:$0xff] %v18602_v0  ;;  %v12219_v32 = vld [vmem:[%s22479_s4 + $0x7b8] sm:$0xff]  ;;  %13490 = vmatpush1.bf16.msra.mxu0 %v24809_v6  ;;  %v12212_v19 = vld [vmem:[%s22479_s4 + $0x780] sm:$0xff]  ;;  %v18644_v6 = vsub.f32 %v12207_v2, %v6942_v57  ;;  %v18652_v8 = vsub.f32 %v12211_v48, %v6946_v7  ;;  %v18658_v17 = vsub.f32 %v12204_v53, %v6089_v10 }
 0x327   :  { %24806 = vst [vmem:[#allocation6_spill] sm:$0xff] %v18613_v1  ;;  %24807 = vst [vmem:[#allocation91_spill] sm:$0xff] %v18615_v60  ;;  %v24808_v0 = vld [vmem:[#allocation13_spill] sm:$0xff]  ;;  %v18632_v60 = vsub.f32 %v12209_v9, %v6091_v62  ;;  %v12216_v54 = vld [vmem:[%s22479_s4 + $0x7a0] sm:$0xff]  ;;  %v6097_v2 = vand.u32 4294901760, %v12212_v19  ;;  %v18660_v36 = vsub.f32 %v12208_v15, %v6093_v12  ;;  %v18664_v48 = vpack.c.bf16 %v6948_v3, %v6944_v23 }
 0x328   :  { %13298 = vmatpush1.bf16.msra.mxu1 %v24808_v0  ;;  %24810 = vst [vmem:[#allocation93_spill] sm:$0xff] %v18628_v11  ;;  %24811 = vst [vmem:[#allocation94_spill] sm:$0xff] %v18630_v50  ;;  %v24813_v30 = vld [vmem:[#allocation5_spill] sm:$0xff]  ;;  %v18642_v0 = vpack.c.bf16 %v6946_v7, %v6942_v57  ;;  %v12214_v62 = vld [vmem:[%s22479_s4 + $0x790] sm:$0xff]  ;;  %v6099_v50 = vand.u32 4294901760, %v12217_v18  ;;  %v6950_v11 = vand.u32 4294901760, %v12215_v4  ;;  %v18666_v7 = vsub.f32 %v12206_v5, %v6944_v23 }
 0x329   :  { %24812 = vst [vmem:[#allocation55_spill] sm:$0xff] %v18632_v60  ;;  %13300 = vmatprep.subr.bf16.mxu1 %v24813_v30  ;;  %v24814_v1 = vld [vmem:[#allocation29_spill] sm:$0xff]  ;;  %24816 = vst [vmem:[#allocation100_spill] sm:$0xff] %v18644_v6  ;;  %v12218_v9 = vld [vmem:[%s22479_s4 + $0x7b0] sm:$0xff]  ;;  %v6095_v60 = vand.u32 4294901760, %v12213_v39  ;;  %v6954_v30 = vand.u32 4294901760, %v12219_v32  ;;  %v18693_v23 = vsub.f32 %v12212_v19, %v6097_v2 }
 0x32a   :  { %13492 = vmatprep.subr.bf16.mxu0 %v24814_v1  ;;  %24815 = vst [vmem:[#allocation25_spill] sm:$0xff] %v18642_v0  ;;  %24817 = vst [vmem:[#allocation103_spill] sm:$0xff] %v18652_v8  ;;  %v18654_v1 = vpack.c.bf16 %v6093_v12, %v6089_v10  ;;  %v6101_v57 = vand.u32 4294901760, %v12216_v54  ;;  %v24819_v6 = vld [vmem:[#allocation36_spill] sm:$0xff]  ;;  %v24820_v0 = vld [vmem:[#allocation21_spill] sm:$0xff]  ;;  %v6952_v25 = vand.u32 4294901760, %v12214_v62  ;;  %v18668_v8 = vsub.f32 %v12210_v33, %v6948_v3 }
 0x32b   :  { %13494 = vmatpush1.bf16.msra.mxu0 %v24820_v0  ;;  %24821 = vst [vmem:[#allocation10_spill] sm:$0xff] %v18658_v17  ;;  %24822 = vst [vmem:[#allocation77_spill] sm:$0xff] %v18660_v36  ;;  %v6956_v28 = vand.u32 4294901760, %v12218_v9  ;;  %v24824_v43 = vld [vmem:[#allocation44_spill] sm:$0xff]  ;;  %v12221_v0 = vld [vmem:[%s22479_s4 + $0x7c8] sm:$0xff]  ;;  %v18676_v15 = vpack.c.bf16 %v6099_v50, %v6095_v60  ;;  %v18678_v10 = vsub.f32 %v12213_v39, %v6095_v60 }
 0x32c   :  { %24818 = vst [vmem:[#allocation42_spill] sm:$0xff] %v18654_v1  ;;  %13302 = vmatpush1.bf16.msra.mxu1 %v24819_v6  ;;  %13496 = vmatprep.subr.bf16.mxu0 %v24824_v43  ;;  %24825 = vst [vmem:[#allocation66_spill] sm:$0xff] %v18664_v48  ;;  %v12225_v53 = vld [vmem:[%s22479_s4 + $0x7e8] sm:$0xff]  ;;  %v18682_v43 = vpack.c.bf16 %v6954_v30, %v6950_v11  ;;  %v12223_v5 = vld [vmem:[%s22479_s4 + $0x7d8] sm:$0xff]  ;;  %v18687_v33 = vsub.f32 %v12215_v4, %v6950_v11 }
 0x32d   :  { %13304 = vmatprep.subr.bf16.mxu1 %v24823_v51  ;;  %24826 = vst [vmem:[#allocation68_spill] sm:$0xff] %v18668_v8  ;;  %24827 = vst [vmem:[#allocation61_spill] sm:$0xff] %v18676_v15  ;;  %v18680_v51 = vsub.f32 %v12217_v18, %v6099_v50  ;;  %v18689_v12 = vsub.f32 %v12219_v32, %v6954_v30  ;;  %v18691_v6 = vpack.c.bf16 %v6101_v57, %v6097_v2  ;;  %v24834_v3 = vld [vmem:[#allocation69_spill] sm:$0xff]  ;;  %v24835_v39 = vld [vmem:[#allocation54_spill] sm:$0xff] }
 0x32e   :  { %24829 = vst [vmem:[#allocation62_spill] sm:$0xff] %v18682_v43  ;;  %24830 = vst [vmem:[#allocation18_spill] sm:$0xff] %v18687_v33  ;;  %v18697_v60 = vsub.f32 %v12216_v54, %v6101_v57  ;;  %v18699_v18 = vpack.c.bf16 %v6956_v28, %v6952_v25  ;;  %v6103_v50 = vand.u32 4294901760, %v12221_v0  ;;  %v12227_v4 = vld [vmem:[%s22479_s4 + $0x7f8] sm:$0xff]  ;;  %v24838_v32 = vld [vmem:[#allocation56_spill] sm:$0xff]  ;;  %v18706_v19 = vsub.f32 %v12214_v62, %v6952_v25 }
 0x32f   :  { %24828 = vst [vmem:[#allocation57_spill] sm:$0xff] %v18680_v51  ;;  %24831 = vst [vmem:[#allocation74_spill] sm:$0xff] %v18689_v12  ;;  %13498 = vmatpush1.bf16.msra.mxu0 %v24835_v39  ;;  %v6107_v51 = vand.u32 4294901760, %v12225_v53  ;;  %v24839_v11 = vld [vmem:[#allocation33_spill] sm:$0xff]  ;;  %v18708_v30 = vsub.f32 %v12218_v9, %v6956_v28  ;;  %v6958_v2 = vand.u32 4294901760, %v12223_v5  ;;  %v12220_v54 = vld [vmem:[%s22479_s4 + $0x7c0] sm:$0xff] }
 0x330   :  { %24832 = vst [vmem:[#allocation79_spill] sm:$0xff] %v18691_v6  ;;  %24833 = vst [vmem:[#allocation83_spill] sm:$0xff] %v18693_v23  ;;  %13306 = vmatpush1.bf16.msra.mxu1 %v24834_v3  ;;  %13500 = vmatprep.subr.bf16.mxu0 %v24839_v11  ;;  %v12224_v57 = vld [vmem:[%s22479_s4 + $0x7e0] sm:$0xff]  ;;  %v18720_v39 = vld [vmem:[%s22479_s4 + $0x7d0] sm:$0xff]  ;;  %v18733_v25 = vsub.f32 %v12221_v0, %v6103_v50  ;;  %v6105_v28 = vand.u32 4294901760, %v12220_v54  ;;  %v24849_v3 = vand.u32 4294901760, %v18373_v34 }
 0x331   :  { %24836 = vst [vmem:[#allocation22_spill] sm:$0xff] %v18697_v60  ;;  %24837 = vst [vmem:[#allocation37_spill] sm:$0xff] %v18699_v18  ;;  %13308 = vmatprep.subr.bf16.mxu1 %v24838_v32  ;;  %v6962_v32 = vand.u32 4294901760, %v12227_v4  ;;  %v24843_v60 = vld [vmem:[#allocation96_spill] sm:$0xff]  ;;  %v18731_v23 = vpack.c.bf16 %v6107_v51, %v6103_v50  ;;  %v6109_v12 = vand.u32 4294901760, %v12224_v57  ;;  %v24846_v9 = vld [vmem:[#allocation17_spill] sm:$0xff]  ;;  %v18737_v33 = vsub.f32 %v12225_v53, %v6107_v51 }
 0x332   :  { %24840 = vst [vmem:[#allocation39_spill] sm:$0xff] %v18706_v19  ;;  %24841 = vst [vmem:[#allocation89_spill] sm:$0xff] %v18708_v30  ;;  %v24842_v19 = vld [vmem:[#allocation92_spill] sm:$0xff]  ;;  %v18739_v11 = vsub.f32 %v12223_v5, %v6958_v2  ;;  %v6158_v0 = vsub.f32 %v18373_v34, %v24849_v3  ;;  %v24850_v50 = vand.u32 4294901760, %v18375_v41  ;;  %v24852_v51 = vand.u32 4294901760, %v18385_v22 }
 0x333   :  { %13502 = vmatpush1.bf16.msra.mxu0 %v24843_v60  ;;  %24844 = vst [vmem:[#allocation28_spill] sm:$0xff] %v18731_v23  ;;  %v24845_v62 = vld [vmem:[#allocation104_spill] sm:$0xff]  ;;  %24847 = vst [vmem:[#allocation41_spill] sm:$0xff] %v18737_v33  ;;  %v6960_v60 = vand.u32 4294901760, %v18720_v39  ;;  %v24853_v30 = vand.u32 4294901760, %v18393_v21  ;;  %v18760_v33 = vpack.c.bf16 %v6962_v32, %v6958_v2  ;;  %v24855_v3 = vand.u32 4294901760, %v18395_v13 }
 0x334   :  { %13310 = vmatpush1.bf16.msra.mxu1 %v24842_v19  ;;  %13504 = vmatprep.subr.bf16.mxu0 %v24846_v9  ;;  %24848 = vst [vmem:[#allocation97_spill] sm:$0xff] %v18739_v11  ;;  %v12226_v19 = vld [vmem:[%s22479_s4 + $0x7f0] sm:$0xff]  ;;  %v24851_v9 = vand.u32 4294901760, %v18383_v59  ;;  %v7025_v5 = vsub.f32 %v18385_v22, %v24852_v51  ;;  %v18773_v51 = vsub.f32 %v12227_v4, %v6962_v32 }
 0x335   :  { %13312 = vmatprep.subr.bf16.mxu1 %v24845_v62  ;;  %v6170_v62 = vsub.f32 %v18375_v41, %v24850_v50  ;;  %v6164_v11 = vsub.f32 %v18393_v21, %v24853_v30  ;;  %24854 = vst [vmem:[#allocation13_spill] sm:$0xff] %v18760_v33  ;;  %v6176_v34 = vsub.f32 %v18395_v13, %v24855_v3  ;;  %v24856_v50 = vand.u32 4294901760, %v18402_v44  ;;  %v24902_v22 = vld [vmem:[#allocation24_spill] sm:$0xff] }
 0x336   :  { %v7013_v53 = vsub.f32 %v18383_v59, %v24851_v9  ;;  %v24857_v9 = vand.u32 4294901760, %v18404_v46  ;;  %24858 = vst [vmem:[#allocation80_spill] sm:$0xff] %v18773_v51  ;;  %v18775_v30 = vpack.c.bf16 %v6109_v12, %v6105_v28  ;;  %v6964_v2 = vand.u32 4294901760, %v12226_v19 }
 0x337   :  { %v7019_v41 = vsub.f32 %v18402_v44, %v24856_v50  ;;  %13506 = vmatpush1.bf16.msra.mxu0 %v24657_v27  ;;  %v18780_v3 = vsub.f32 %v12220_v54, %v6105_v28  ;;  %v6159_v50 = vand.u32 4294901760, %v6158_v0  ;;  %v7026_v4 = vand.u32 4294901760, %v7025_v5 }
 0x338   :  { %v7031_v59 = vsub.f32 %v18404_v46, %v24857_v9  ;;  %13314 = vmatpush1.bf16.msra.mxu1 %v24656_v24  ;;  %24859 = vst [vmem:[#allocation5_spill] sm:$0xff] %v18775_v30  ;;  %13700 = vmatprep.subr.bf16.mxu0 %v18369_v37  ;;  %v23139_v9 = vand.u32 4294901760, %v18419_v31  ;;  %v23138_v24 = vand.u32 4294901760, %v18423_v26  ;;  %v6171_v46 = vand.u32 4294901760, %v6170_v62 }
 0x339   :  { %13508 = vmatprep.subr.bf16.mxu1 %v18367_v63  ;;  %24860 = vst [vmem:[#allocation29_spill] sm:$0xff] %v18780_v3  ;;  %v7014_v27 = vand.u32 4294901760, %v7013_v53  ;;  %v6165_v32 = vand.u32 4294901760, %v6164_v11  ;;  %v6177_v21 = vand.u32 4294901760, %v6176_v34  ;;  %v7020_v44 = vand.u32 4294901760, %v7019_v41 }
 0x33a   :  { %5972 = vmatmul.mubr.f32.vlgmr.msra.gmra.mrb[4].mxu0 %v24765_v40  ;;  %v7032_v63 = vand.u32 4294901760, %v7031_v59  ;;  %v23141_v37 = vand.u32 4294901760, %v18437_v56  ;;  %v18789_v54 = vsub.f32 %v12224_v57, %v6109_v12  ;;  %v18792_v28 = vsub.f32 %v18720_v39, %v6960_v60 }
 0x33b   :  { %5117 = vmatmul.mubr.f32.vlgmr.msra.gmra.mrb[4].mxu1 %v24765_v40  ;;  %13702 = vmatpush1.bf16.msra.mxu0 %v18397_v45  ;;  %v24862_v11 = vand.u32 4294901760, %v18417_v38  ;;  %v23140_v34 = vand.u32 4294901760, %v18441_v58  ;;  %v18805_v41 = vsub.f32 %v18419_v31, %v23139_v9  ;;  %v18810_v59 = vsub.f32 %v18423_v26, %v23138_v24  ;;  %v24875_v45 = vld [vmem:[#allocation78_spill] sm:$0xff] }
 0x33c   :  { %13510 = vmatpush1.bf16.msra.mxu1 %v18371_v14  ;;  %24861 = vst [vmem:[#allocation36_spill] sm:$0xff] %v18789_v54  ;;  %13704 = vmatprep.subr.bf16.mxu0 %v18421_v35  ;;  %v23148_v40 = vand.u32 4294901760, %v18443_v29  ;;  %v23155_v12 = vand.u32 4294901760, %v18447_v16  ;;  %v18814_v57 = vpack.c.bf16 %v6964_v2, %v6960_v60  ;;  %v18816_v39 = vsub.f32 %v12226_v19, %v6964_v2  ;;  %v24866_v2 = vld [vmem:[#allocation65_spill] sm:$0xff]  ;;  %v24869_v60 = vld [vmem:[#allocation20_spill] sm:$0xff]  ;;  %v24878_v14 = vld [vmem:[#allocation34_spill] sm:$0xff] }
 0x33d   :  { %v18797_v0 = vsub.f32 %v18417_v38, %v24862_v11  ;;  %13512 = vmatprep.subr.bf16.mxu1 %v18415_v47  ;;  %6143 = vmatprep.mubr.f32.mxu1 %v23799_v42  ;;  %v24864_v62 = vsub.f32 %v18256_v61, %v18284_v49  ;;  %v18825_v5 = vpack.c.bf16 %v6171_v46, %v6159_v50  ;;  %v24867_v50 = vld [vmem:[#allocation14_spill] sm:$0xff]  ;;  %v24874_v35 = vld [vmem:[#allocation16_spill] sm:$0xff]  ;;  %v24879_v61 = vld [vmem:[#allocation35_spill] sm:$0xff] }
 0x33e   :  { %24863 = vst [vmem:[#allocation21_spill] sm:$0xff] %v18814_v57  ;;  %6998 = vmatprep.mubr.f32.mxu0 %v23799_v42  ;;  %v18827_v11 = vpack.c.bf16 %v7026_v4, %v7014_v27  ;;  %v18829_v24 = vpack.c.bf16 %v6177_v21, %v6165_v32  ;;  %v18831_v9 = vpack.c.bf16 %v7032_v63, %v7020_v44  ;;  %v24865_v63 = vld [vmem:[#allocation64_spill] sm:$0xff]  ;;  %v6195_v27 = vand.u32 4294901760, %v18805_v41  ;;  %v24904_v54 = vld [vmem:[#allocation6_spill] sm:$0xff] }
 0x33f   :  { %v18823_v53 = vand.u32 4294901760, %v24864_v62  ;;  %v18836_v19 = vsub.f32 %v18437_v56, %v23141_v37  ;;  %13706 = vmatpush1.bf16.msra.mxu0 %v18445_v20  ;;  %v18844_v46 = vsub.f32 %v18441_v58, %v23140_v34  ;;  %v18855_v32 = vsub.f32 %v18443_v29, %v23148_v40  ;;  %v24868_v34 = vld [vmem:[#allocation9_spill] sm:$0xff]  ;;  %v24870_v21 = vld [vmem:[#allocation72_spill] sm:$0xff]  ;;  %v24881_v20 = vld [vmem:[#allocation38_spill] sm:$0xff] }
 0x340   :  { %13514 = vmatpush1.bf16.msra.mxu1 %v18439_v52  ;;  %13708 = vmatprep.subr.bf16.mxu0 %v24867_v50  ;;  %v18860_v62 = vsub.f32 %v18447_v16, %v23155_v12  ;;  %v24871_v50 = vld [vmem:[#allocation71_spill] sm:$0xff]  ;;  %v24873_v52 = vld [vmem:[#allocation49_spill] sm:$0xff]  ;;  %v24876_v12 = vld [vmem:[#allocation82_spill] sm:$0xff]  ;;  %v24877_v44 = vand.u32 4294901760, %v18456_v55  ;;  %v24882_v40 = vand.u32 4294901760, %v24865_v63 }
 0x341   :  { %13516 = vmatprep.subr.bf16.mxu1 %v24866_v2  ;;  %v7050_v4 = vand.u32 4294901760, %v18836_v19  ;;  %v24872_v2 = vld [vmem:[#allocation73_spill] sm:$0xff]  ;;  %v6189_v37 = vand.u32 4294901760, %v18844_v46  ;;  %v24880_v16 = vld [vmem:[#allocation51_spill] sm:$0xff]  ;;  %v6201_v47 = vand.u32 4294901760, %v18855_v32  ;;  %v24884_v29 = vld [vmem:[#allocation90_spill] sm:$0xff] }
 0x342   :  { %v7055_v49 = vsub.f32 %v18456_v55, %v24877_v44  ;;  %v24885_v44 = vand.u32 4294901760, %v24868_v34  ;;  %v24886_v19 = vand.u32 4294901760, %v24869_v60  ;;  %v24888_v55 = vand.u32 4294901760, %v24871_v50  ;;  %v24892_v56 = vld [vmem:[#allocation95_spill] sm:$0xff] }
 0x343   :  { %13710 = vmatpush1.bf16.msra.mxu0 %v24876_v12  ;;  %v6206_v12 = vsub.f32 %v24865_v63, %v24882_v40  ;;  %v7044_v46 = vand.u32 4294901760, %v18860_v62  ;;  %v24889_v58 = vand.u32 4294901760, %v24872_v2 }
 0x344   :  { %13518 = vmatpush1.bf16.msra.mxu1 %v24875_v45  ;;  %13712 = vmatprep.subr.bf16.mxu0 %v24881_v20  ;;  %v24883_v45 = vld [vmem:[#allocation86_spill] sm:$0xff]  ;;  %v6218_v41 = vsub.f32 %v24868_v34, %v24885_v44  ;;  %v24887_v20 = vand.u32 4294901760, %v24870_v21  ;;  %v6212_v40 = vsub.f32 %v24871_v50, %v24888_v55  ;;  %v24890_v44 = vand.u32 4294901760, %v24873_v52 }
 0x345   :  { %13520 = vmatprep.subr.bf16.mxu1 %v24880_v16  ;;  %v7061_v16 = vsub.f32 %v24869_v60, %v24886_v19  ;;  %v6224_v63 = vsub.f32 %v24872_v2, %v24889_v58  ;;  %v24891_v19 = vand.u32 4294901760, %v24874_v35  ;;  %v24894_v55 = vand.u32 4294901760, %v24878_v14  ;;  %v24896_v2 = vld [vmem:[#allocation76_spill] sm:$0xff] }
 0x346   :  { %v7073_v32 = vsub.f32 %v24870_v21, %v24887_v20  ;;  %v7067_v34 = vsub.f32 %v24873_v52, %v24890_v44  ;;  %v24893_v20 = vld [vmem:[#allocation32_spill] sm:$0xff]  ;;  %v7056_v21 = vand.u32 4294901760, %v7055_v49  ;;  %v24895_v50 = vand.u32 4294901760, %v24879_v61  ;;  %v24897_v44 = vld [vmem:[#allocation23_spill] sm:$0xff] }
 0x347   :  { %v7079_v60 = vsub.f32 %v24874_v35, %v24891_v19  ;;  %13714 = vmatpush1.bf16.msra.mxu0 %v24893_v20  ;;  %v6230_v62 = vsub.f32 %v24878_v14, %v24894_v55  ;;  %v24898_v52 = vld [vmem:[#allocation60_spill] sm:$0xff]  ;;  %v6207_v19 = vand.u32 4294901760, %v6206_v12  ;;  %v24900_v49 = vand.u32 4294901760, %v24884_v29  ;;  %v24903_v12 = vld [vmem:[#allocation27_spill] sm:$0xff] }
 0x348   :  { %13522 = vmatpush1.bf16.msra.mxu1 %v24892_v56  ;;  %v6242_v58 = vsub.f32 %v24879_v61, %v24895_v50  ;;  %13716 = vmatprep.subr.bf16.mxu0 %v24898_v52  ;;  %v24899_v56 = vand.u32 4294901760, %v24883_v45  ;;  %v24901_v55 = vld [vmem:[#allocation8_spill] sm:$0xff]  ;;  %v6219_v31 = vand.u32 4294901760, %v6218_v41  ;;  %v7062_v38 = vand.u32 4294901760, %v7061_v16  ;;  %v24906_v41 = vld [vmem:[#allocation30_spill] sm:$0xff] }
 0x349   :  { %13524 = vmatprep.subr.bf16.mxu1 %v24897_v44  ;;  %v7097_v35 = vsub.f32 %v24884_v29, %v24900_v49  ;;  %v23193_v14 = vand.u32 4294901760, %v24901_v55  ;;  %v7074_v50 = vand.u32 4294901760, %v7073_v32  ;;  %v6213_v61 = vand.u32 4294901760, %v6212_v40  ;;  %v24907_v32 = vld [vmem:[#allocation93_spill] sm:$0xff] }
 0x34a   :  { %v7085_v20 = vsub.f32 %v24883_v45, %v24899_v56  ;;  %v6225_v26 = vand.u32 4294901760, %v6224_v63  ;;  %v7068_v13 = vand.u32 4294901760, %v7067_v34  ;;  %v7080_v44 = vand.u32 4294901760, %v7079_v60  ;;  %v24908_v63 = vld [vmem:[#allocation25_spill] sm:$0xff] }
 0x34b   :  { %13718 = vmatpush1.bf16.msra.mxu0 %v24904_v54  ;;  %v6231_v56 = vand.u32 4294901760, %v6230_v62  ;;  %v6243_v45 = vand.u32 4294901760, %v6242_v58  ;;  %v24905_v3 = vand.u32 4294901760, %v24896_v2  ;;  %v24909_v34 = vand.u32 4294901760, %v18797_v0 }
 0x34c   :  { %13526 = vmatpush1.bf16.msra.mxu1 %v24903_v12  ;;  %13720 = vmatprep.subr.bf16.mxu0 %v24908_v63  ;;  %v7086_v40 = vand.u32 4294901760, %v7085_v20  ;;  %v7098_v52 = vand.u32 4294901760, %v7097_v35  ;;  %v18944_v62 = vsub.f32 %v24901_v55, %v23193_v14  ;;  %v18950_v16 = vpack.c.bf16 %v6201_v47, %v6189_v37  ;;  %v24911_v63 = vld [vmem:[#allocation85_spill] sm:$0xff]  ;;  %v24920_v14 = vld [vmem:[#allocation91_spill] sm:$0xff] }
 0x34d   :  { %v18932_v49 = vsub.f32 %v24896_v2, %v24905_v3  ;;  %13528 = vmatprep.subr.bf16.mxu1 %v24907_v32  ;;  %v18939_v60 = vpack.c.bf16 %v6195_v27, %v24909_v34  ;;  %v24910_v3 = vand.u32 4294901760, %v18810_v59  ;;  %v18952_v32 = vpack.c.bf16 %v7056_v21, %v7044_v46  ;;  %v24914_v21 = vld [vmem:[#allocation88_spill] sm:$0xff] }
 0x34e   :  { %v23194_v54 = vand.u32 4294901760, %v24911_v63  ;;  %v18955_v0 = vpack.c.bf16 %v6219_v31, %v6207_v19  ;;  %v18957_v27 = vpack.c.bf16 %v7074_v50, %v7062_v38  ;;  %v18959_v35 = vpack.c.bf16 %v6225_v26, %v6213_v61  ;;  %v24917_v50 = vld [vmem:[#allocation15_spill] sm:$0xff]  ;;  %v24921_v31 = vld [vmem:[#allocation94_spill] sm:$0xff] }
 0x34f   :  { %v18948_v58 = vpack.c.bf16 %v7050_v4, %v24910_v3  ;;  %v24912_v20 = vand.u32 4294901760, %v24902_v22  ;;  %13722 = vmatpush1.bf16.msra.mxu0 %v18664_v48  ;;  %v18968_v37 = vpack.c.bf16 %v7080_v44, %v7068_v13  ;;  %v18970_v47 = vpack.c.bf16 %v6243_v45, %v6231_v56  ;;  %v24915_v4 = vld [vmem:[#allocation12_spill] sm:$0xff]  ;;  %v24916_v44 = vld [vmem:[#allocation58_spill] sm:$0xff]  ;;  %v24918_v3 = vld [vmem:[#allocation59_spill] sm:$0xff] }
 0x350   :  { %13530 = vmatpush1.bf16.msra.mxu1 %v18654_v1  ;;  %v24913_v38 = vand.u32 4294901760, %v24906_v41  ;;  %13724 = vmatprep.subr.bf16.mxu0 %v18682_v43  ;;  %v18980_v26 = vpack.c.bf16 %v7098_v52, %v7086_v40  ;;  %v18988_v46 = vsub.f32 %v24911_v63, %v23194_v54  ;;  %v24919_v40 = vld [vmem:[#allocation87_spill] sm:$0xff]  ;;  %v24923_v52 = vand.u32 4294901760, %v24914_v21 }
 0x351   :  { %v18964_v34 = vsub.f32 %v24902_v22, %v24912_v20  ;;  %13532 = vmatprep.subr.bf16.mxu1 %v18676_v15  ;;  %v24922_v45 = vld [vmem:[#allocation55_spill] sm:$0xff]  ;;  %v24924_v59 = vand.u32 4294901760, %v24915_v4  ;;  %v24927_v56 = vand.u32 4294901760, %v24916_v44  ;;  %v24929_v43 = vand.u32 4294901760, %v24918_v3 }
 0x352   :  { %v18976_v61 = vsub.f32 %v24906_v41, %v24913_v38  ;;  %v6266_v13 = vsub.f32 %v24914_v21, %v24923_v52  ;;  %v24930_v15 = vand.u32 4294901760, %v18792_v28  ;;  %v6255_v19 = vand.u32 4294901760, %v18988_v46 }
 0x353   :  { %13726 = vmatpush1.bf16.msra.mxu0 %v18699_v18  ;;  %v7109_v38 = vsub.f32 %v24915_v4, %v24924_v59  ;;  %v24925_v18 = vld [vmem:[#allocation100_spill] sm:$0xff]  ;;  %v7121_v20 = vsub.f32 %v24916_v44, %v24927_v56  ;;  %v6272_v52 = vsub.f32 %v24918_v3, %v24929_v43  ;;  %v24931_v59 = vand.u32 4294901760, %v18816_v39 }
 0x354   :  { %13534 = vmatpush1.bf16.msra.mxu1 %v18691_v6  ;;  %v7104_v54 = vand.u32 4294901760, %v18976_v61  ;;  %13728 = vmatprep.subr.bf16.mxu0 %v18760_v33  ;;  %v24926_v6 = vld [vmem:[#allocation103_spill] sm:$0xff]  ;;  %v24933_v61 = vand.u32 4294901760, %v24919_v40  ;;  %v24934_v1 = vand.u32 4294901760, %v24920_v14  ;;  %v24935_v12 = vand.u32 4294901760, %v24921_v31 }
 0x355   :  { %13536 = vmatprep.subr.bf16.mxu1 %v18731_v23  ;;  %v24928_v23 = vand.u32 4294901760, %v24917_v50  ;;  %v19026_v48 = vpack.c.bf16 %v24931_v59, %v24930_v15  ;;  %v24936_v15 = vand.u32 4294901760, %v24922_v45 }
 0x356   :  { %v7115_v56 = vsub.f32 %v24919_v40, %v24933_v61  ;;  %v6278_v43 = vsub.f32 %v24921_v31, %v24935_v12  ;;  %v23222_v31 = vand.u32 4294901760, %v18666_v7  ;;  %v14699_v61 = vmov 0  }
 0x357   :  { %v6260_v33 = vsub.f32 %v24917_v50, %v24928_v23  ;;  %24932 = vst [vmem:[#allocation105_spill] sm:$0xff] %v19026_v48  ;;  %v7127_v23 = vsub.f32 %v24920_v14, %v24934_v1  ;;  %13730 = vmatpush1.bf16.msra.mxu0 %v18814_v57  ;;  %v6290_v46 = vsub.f32 %v24922_v45, %v24936_v15  ;;  %v6267_v1 = vand.u32 4294901760, %v6266_v13 }
 0x358   :  { %13538 = vmatpush1.bf16.msra.mxu1 %v18775_v30  ;;  %13732 = vmatprep.subr.bf16.mxu0 %v18827_v11  ;;  %v24937_v48 = vand.u32 4294901760, %v24925_v18  ;;  %v24938_v30 = vand.u32 4294901760, %v24926_v6  ;;  %v7110_v15 = vand.u32 4294901760, %v7109_v38  ;;  %v7122_v45 = vand.u32 4294901760, %v7121_v20 }
 0x359   :  { %13540 = vmatprep.subr.bf16.mxu1 %v18825_v5  ;;  %v6261_v59 = vand.u32 4294901760, %v6260_v33  ;;  %v6273_v14 = vand.u32 4294901760, %v6272_v52  ;;  %14692 = vset.pattern.permute.xlu0 %v14699_v61  ;;  %v7116_v5 = vand.u32 4294901760, %v7115_v56  ;;  %v7128_v11 = vand.u32 4294901760, %v7127_v23  ;;  %v7761_v56 = vld [vmem:[%s22480_s3] sm:$0xff] }
 0x35a   :  { %v7133_v12 = vsub.f32 %v24925_v18, %v24937_v48  ;;  %v7145_v57 = vsub.f32 %v24926_v6, %v24938_v30  ;;  %14693 = vset.pattern.permute.xlu1 %v14699_v61  ;;  %7004 = vmatmul.mubr.f32.vlgmr.msra.gmra.mrb[4].mxu0 %v18823_v53  ;;  %v6279_v48 = vand.u32 4294901760, %v6278_v43  ;;  %v6291_v30 = vand.u32 4294901760, %v6290_v46  ;;  %v24941_v43 = vld [vmem:[#allocation57_spill] sm:$0xff] }
 0x35b   :  { %6149 = vmatmul.mubr.f32.vlgmr.msra.gmra.mrb[4].mxu1 %v18823_v53  ;;  %13734 = vmatpush1.bf16.msra.mxu0 %v18831_v9  ;;  %v24939_v33 = vand.u32 4294901760, %v18658_v17  ;;  %v24940_v38 = vand.u32 4294901760, %v18660_v36  ;;  %v7139_v23 = vsub.f32 %v18666_v7, %v23222_v31  ;;  %v23225_v46 = vand.u32 4294901760, %v24941_v43 }
 0x35c   :  { %13542 = vmatpush1.bf16.msra.mxu1 %v18829_v24  ;;  %13736 = vmatprep.subr.bf16.mxu0 %v18948_v58  ;;  %v7134_v9 = vand.u32 4294901760, %v7133_v12  ;;  %v7146_v24 = vand.u32 4294901760, %v7145_v57  ;;  %v24942_v61 = vand.u32 4294901760, %v18932_v49  ;;  %v24944_v53 = vand.u32 4294901760, %v18964_v34 }
 0x35d   :  { %v6284_v20 = vsub.f32 %v18658_v17, %v24939_v33  ;;  %v6296_v52 = vsub.f32 %v18660_v36, %v24940_v38  ;;  %13544 = vmatprep.subr.bf16.mxu1 %v18939_v60  ;;  %v24943_v33 = vand.u32 4294901760, %v18944_v62  ;;  %v24945_v36 = vld [vmem:[#allocation18_spill] sm:$0xff]  ;;  %6379 = vmatprep.mubr.f32.mxu1 %v23799_v42  ;;  %v13555_v57 = vpack.c.bf16 %v6267_v1, %v6255_v19 }
 0x35e   :  { %v13745_v13 = vpack.c.bf16 %v7104_v54, %v24944_v53  ;;  %v23224_v60 = vand.u32 4294901760, %v24945_v36  ;;  %v24946_v17 = vld [vmem:[#allocation74_spill] sm:$0xff]  ;;  %7234 = vmatprep.mubr.f32.mxu0 %v23799_v42  ;;  %v13747_v12 = vpack.c.bf16 %v7122_v45, %v7110_v15  ;;  %v19085_v31 = vpack.c.bf16 %v6273_v14, %v6261_v59  ;;  %7764 = vperm.xlu0 %14692, %v7761_v56  }
 0x35f   :  { %v13553_v38 = vpack.c.bf16 %v24943_v33, %v24942_v61  ;;  %v23223_v58 = vand.u32 4294901760, %v24946_v17  ;;  %v24947_v49 = vand.u32 4294901760, %v18668_v8  ;;  %13738 = vmatpush1.bf16.msra.mxu0 %v18952_v32  ;;  %v19092_v54 = vpack.c.bf16 %v7128_v11, %v7116_v5  ;;  %v24953_v33 = vld [vmem:[#allocation41_spill] sm:$0xff] }
 0x360   :  { %13546 = vmatpush1.bf16.msra.mxu1 %v18950_v16  ;;  %v6285_v34 = vand.u32 4294901760, %v6284_v20  ;;  %v6297_v53 = vand.u32 4294901760, %v6296_v52  ;;  %v24948_v61 = vand.u32 4294901760, %v18678_v10  ;;  %13740 = vmatprep.subr.bf16.mxu0 %v18957_v27  ;;  %v19099_v14 = vpack.c.bf16 %v6291_v30, %v6279_v48  ;;  %v24950_v27 = vld [vmem:[#allocation22_spill] sm:$0xff]  ;;  %v24951_v48 = vld [vmem:[#allocation39_spill] sm:$0xff]  ;;  %v24952_v20 = vld [vmem:[#allocation89_spill] sm:$0xff] }
 0x361   :  { %v7151_v62 = vsub.f32 %v18668_v8, %v24947_v49  ;;  %13548 = vmatprep.subr.bf16.mxu1 %v18955_v0  ;;  %v19101_v45 = vpack.c.bf16 %v7146_v24, %v7134_v9  ;;  %v7140_v59 = vand.u32 4294901760, %v7139_v23  ;;  %v6314_v16 = vsub.f32 %v24941_v43, %v23225_v46  ;;  %v24949_v0 = vld [vmem:[#allocation83_spill] sm:$0xff] }
 0x362   :  { %v6302_v19 = vsub.f32 %v18678_v10, %v24948_v61  ;;  %v7157_v32 = vsub.f32 %v24945_v36, %v23224_v60  ;;  %v7169_v1 = vsub.f32 %v24946_v17, %v23223_v58  ;;  %v23229_v15 = vand.u32 4294901760, %v24949_v0  ;;  %v24954_v61 = vld [vmem:[#allocation97_spill] sm:$0xff] }
 0x363   :  { %v23228_v5 = vand.u32 4294901760, %v24950_v27  ;;  %v7152_v11 = vand.u32 4294901760, %v7151_v62  ;;  %v23226_v30 = vand.u32 4294901760, %v24951_v48  ;;  %v23227_v52 = vand.u32 4294901760, %v24952_v20  ;;  %13742 = vmatpush1.bf16.msra.mxu0 %v18968_v37 }
 0x364   :  { %v7822_v56 = vlaneseq  ;;  %13550 = vmatpush1.bf16.msra.mxu1 %v18959_v35  ;;  %v19118_v9 = vpack.c.bf16 %v6297_v53, %v6285_v34  ;;  %v6303_v24 = vand.u32 4294901760, %v6302_v19  ;;  %v23231_v23 = vand.u32 4294901760, %v18733_v25  ;;  %13744 = vmatprep.subr.bf16.mxu0 %v18980_v26 }
 0x365   :  { %v23230_v49 = vand.u32 4294901760, %v24953_v33  ;;  %13552 = vmatprep.subr.bf16.mxu1 %v18970_v47  ;;  %v6315_v62 = vand.u32 4294901760, %v6314_v16  ;;  %v23232_v58 = vand.u32 4294901760, %v24954_v61  ;;  %v23235_v60 = vand.u32 4294901760, %v18773_v51  ;;  %v19137_v47 = vld [vmem:[%s22481_s1 + $0x8] sm:$0xff]  ;;  %v24956_v16 = vld [vmem:[#allocation29_spill] sm:$0xff] }
 0x366   :  { %v19126_v46 = vshrl.u32 %v7822_v56, 7  ;;  %v7158_v35 = vand.u32 4294901760, %v7157_v32  ;;  %v7170_v37 = vand.u32 4294901760, %v7169_v1  ;;  %v6308_v34 = vsub.f32 %v24949_v0, %v23229_v15  ;;  %24955 = vst [vmem:[#allocation44_spill] sm:$0xff] %v19137_v47  ;;  %7793 = vrot.lane.b32.xlu1 %v19137_v47, %s14700_s17  ;;  %v19161_v32 = vld [vmem:[%s22482_s5 + $0x4] sm:$0xf] }
 0x367   :  { %v6320_v53 = vsub.f32 %v24950_v27, %v23228_v5  ;;  %v7163_v26 = vsub.f32 %v24951_v48, %v23226_v30  ;;  %v7175_v19 = vsub.f32 %v24952_v20, %v23227_v52  ;;  %13746 = vmatpush1.bf16.msra.mxu0 %v13745_v13  ;;  %v13753_v56 = vpack.c.bf16 %v7152_v11, %v7140_v59  ;;  %v24958_v5 = vld [vmem:[#allocation36_spill] sm:$0xff]  ;;  %v19174_v11 = vld [vmem:[%s22481_s1] sm:$0xff] }
 0x368   :  { %v19149_v1 = vsub.s32 0, %v19126_v46  ;;  %13554 = vmatpush1.bf16.msra.mxu1 %v13553_v38  ;;  %v6326_v30 = vsub.f32 %v18733_v25, %v23231_v23  ;;  %v6338_v52 = vsub.f32 %v24953_v33, %v23230_v49  ;;  %13748 = vmatprep.subr.bf16.mxu0 %v13747_v12  ;;  %v7181_v13 = vsub.f32 %v24954_v61, %v23232_v58 }
 0x369   :  { %13556 = vmatprep.subr.bf16.mxu1 %v13555_v57  ;;  %v7193_v38 = vsub.f32 %v18773_v51, %v23235_v60  ;;  %24959 = vst [vmem:[#allocation54_spill] sm:$0xff] %v19174_v11  ;;  %v13563_v49 = vpack.c.bf16 %v6315_v62, %v6303_v24  ;;  %v13755_v23 = vpack.c.bf16 %v7170_v37, %v7158_v35  ;;  %v6309_v57 = vand.u32 4294901760, %v6308_v34 }
 0x36a   :  { %24957 = vst [vmem:[#allocation69_spill] sm:$0xff] %v19149_v1  ;;  %v7856_v59 = vrot.slane %v19161_v32, %v19149_v1  ;;  %v6321_v12 = vand.u32 4294901760, %v6320_v53  ;;  %7791 = vrot.lane.b32.xlu0 %v19174_v11, %s14700_s17  ;;  %v7164_v58 = vand.u32 4294901760, %v7163_v26  ;;  %v7176_v15 = vand.u32 4294901760, %v7175_v19  ;;  %v19203_v19 = vld [vmem:[%s22481_s1 + $0x10] sm:$0xff] }
 0x36b   :  { %v24960_v47 = vand.u32 4294901760, %v24956_v16  ;;  %v19183_v51 = vsub.s32 2, %v19126_v46  ;;  %13750 = vmatpush1.bf16.msra.mxu0 %v19092_v54  ;;  %v6327_v24 = vand.u32 4294901760, %v6326_v30  ;;  %v24962_v62 = vand.u32 4294901760, %v24958_v5  ;;  %24965 = vst [vmem:[#allocation33_spill] sm:$0xff] %v19203_v19  ;;  %v24986_v11 = vld [vmem:[#allocation64_spill] sm:$0xff] }
 0x36c   :  { %7869 = vrot.lane.b32.xlu1 %v7856_v59, %s14701_s22  ;;  %13558 = vmatpush1.bf16.msra.mxu1 %v19085_v31  ;;  %v24963_v37 = vand.u32 4294901760, %v18792_v28  ;;  %v24964_v53 = vand.u32 4294901760, %v18816_v39  ;;  %v6339_v31 = vand.u32 4294901760, %v6338_v52  ;;  %v7182_v26 = vand.u32 4294901760, %v7181_v13 }
 0x36d   :  { %v6332_v60 = vsub.f32 %v24956_v16, %v24960_v47  ;;  %24961 = vst [vmem:[#allocation56_spill] sm:$0xff] %v19183_v51  ;;  %v6344_v35 = vsub.f32 %v24958_v5, %v24962_v62  ;;  %13560 = vmatprep.subr.bf16.mxu1 %v19099_v14  ;;  %13752 = vmatprep.subr.bf16.mxu0 %v19101_v45  ;;  %v7194_v54 = vand.u32 4294901760, %v7193_v38  ;;  %v19209_v14 = vsub.s32 1, %v19126_v46 }
 0x36e   :  { %v7187_v34 = vsub.f32 %v18792_v28, %v24963_v37  ;;  %v7199_v47 = vsub.f32 %v18816_v39, %v24964_v53  ;;  %v7864_v30 = vrot.slane %v19161_v32, %v19183_v51  ;;  %7795 = vrot.lane.b32.xlu0 %v19203_v19, %s14700_s17  ;;  %v13565_v59 = vpack.c.bf16 %v6321_v12, %v6309_v57  ;;  %v12229_v12 = vld [vmem:[%s22482_s5 + $0x8] sm:$0xf]  ;;  %v12230_v19 = vld [vmem:[%s22482_s5 + $0xc] sm:$0xf] }
 0x36f   :  { %v13757_v62 = vpack.c.bf16 %v7176_v15, %v7164_v58  ;;  %24966 = vst [vmem:[#allocation92_spill] sm:$0xff] %v19209_v14  ;;  %13754 = vmatpush1.bf16.msra.mxu0 %v13753_v56  ;;  %v6333_v45 = vand.u32 4294901760, %v6332_v60  ;;  %v6345_v52 = vand.u32 4294901760, %v6344_v35  ;;  %v13567_v37 = vpack.c.bf16 %v6339_v31, %v6327_v24  ;;  %v19215_v58 = vld [vmem:[%s22481_s1 + $0x18] sm:$0xff]  ;;  %v24970_v56 = vld [vmem:[#allocation50_spill] sm:$0xff]  ;;  %v24973_v31 = vld [vmem:[#allocation43_spill] sm:$0xff] }
 0x370   :  { %7873 = vrot.lane.b32.xlu1 %v7864_v30, %s14701_s22  ;;  %13562 = vmatpush1.bf16.msra.mxu1 %v19118_v9  ;;  %v7188_v13 = vand.u32 4294901760, %v7187_v34  ;;  %v7200_v38 = vand.u32 4294901760, %v7199_v47  ;;  %v13759_v53 = vpack.c.bf16 %v7194_v54, %v7182_v26  ;;  %24967 = vst [vmem:[#allocation96_spill] sm:$0xff] %v19215_v58  ;;  %v7860_v15 = vrot.slane %v19161_v32, %v19209_v14  ;;  %v24971_v24 = vld [vmem:[#allocation26_spill] sm:$0xff]  ;;  %v24972_v35 = vld [vmem:[#allocation53_spill] sm:$0xff]  ;;  %v24974_v26 = vld [vmem:[#allocation99_spill] sm:$0xff] }
 0x371   :  { %13564 = vmatprep.subr.bf16.mxu1 %v13563_v49  ;;  %13756 = vmatprep.subr.bf16.mxu0 %v13755_v23  ;;  %v19223_v60 = vsub.s32 3, %v19126_v46  ;;  %v13569_v9 = vpack.c.bf16 %v6345_v52, %v6333_v45  ;;  %v24969_v49 = vld [vmem:[#allocation11_spill] sm:$0xff]  ;;  %v13763_v34 = vpack.c.bf16 %v24972_v35, %v24971_v24  ;;  %v7902_v47 = vrot.slane %v12229_v12, %v19149_v1  ;;  %v24977_v45 = vld [vmem:[#allocation48_spill] sm:$0xff]  ;;  %s14710_s1 = smov 112  }
 0x372   :  { %7871 = vrot.lane.b32.xlu0 %v7860_v15, %s14701_s22  ;;  %v13761_v23 = vpack.c.bf16 %v7200_v38, %v7188_v13  ;;  %v13571_v57 = vpack.c.bf16 %v24970_v56, %v24969_v49  ;;  %v13573_v54 = vpack.c.bf16 %v24974_v26, %v24973_v31  ;;  %v24975_v30 = vld [vmem:[#allocation19_spill] sm:$0xff]  ;;  %v24979_v38 = vld [vmem:[#allocation45_spill] sm:$0xff]  ;;  %v7910_v15 = vrot.slane %v12229_v12, %v19183_v51 }
 0x373   :  { %24968 = vst [vmem:[#allocation104_spill] sm:$0xff] %v19223_v60  ;;  %13758 = vmatpush1.bf16.msra.mxu0 %v13757_v62  ;;  %v7868_v46 = vrot.slane %v19161_v32, %v19223_v60  ;;  %v24978_v52 = vld [vmem:[#allocation7_spill] sm:$0xff]  ;;  %v24980_v32 = vld [vmem:[#allocation2_spill] sm:$0xff] }
 0x374   :  { %7797 = vrot.lane.b32.xlu1 %v19215_v58, %s14700_s17  ;;  %13566 = vmatpush1.bf16.msra.mxu1 %v13565_v59  ;;  %v24976_v59 = vld [vmem:[#allocation67_spill] sm:$0xff]  ;;  %v13575_v13 = vpack.c.bf16 %v24978_v52, %v24977_v45  ;;  %v24989_v52 = vld [vmem:[#allocation72_spill] sm:$0xff] }
 0x375   :  { %13568 = vmatprep.subr.bf16.mxu1 %v13567_v37  ;;  %13760 = vmatprep.subr.bf16.mxu0 %v13759_v53  ;;  %v13765_v62 = vpack.c.bf16 %v24976_v59, %v24975_v30  ;;  %v13767_v37 = vpack.c.bf16 %v24980_v32, %v24979_v38  ;;  %v24981_v53 = vld [vmem:[#allocation70_spill] sm:$0xff]  ;;  %v24988_v38 = vld [vmem:[#allocation20_spill] sm:$0xff] }
 0x376   :  { %7875 = vrot.lane.b32.xlu0 %v7868_v46, %s14701_s22  ;;  %v24985_v46 = vld [vmem:[#allocation63_spill] sm:$0xff]  ;;  %v13771_v45 = vpack.c.bf16 %v24989_v52, %v24988_v38  ;;  %v24994_v38 = vld [vmem:[#allocation34_spill] sm:$0xff] }
 0x377   :  { %13762 = vmatpush1.bf16.msra.mxu0 %v13761_v23  ;;  %v24982_v23 = vld [vmem:[#allocation31_spill] sm:$0xff] }
 0x378   :  { %7915 = vrot.lane.b32.xlu1 %v7902_v47, %s14702_s26  ;;  %13570 = vmatpush1.bf16.msra.mxu1 %v13569_v9  ;;  %v7906_v9 = vrot.slane %v12229_v12, %v19209_v14  ;;  %v24983_v47 = vld [vmem:[#allocation40_spill] sm:$0xff] }
 0x379   :  { %13572 = vmatprep.subr.bf16.mxu1 %v13571_v57  ;;  %13764 = vmatprep.subr.bf16.mxu0 %v13763_v34  ;;  %v13577_v57 = vpack.c.bf16 %v24983_v47, %v24982_v23  ;;  %v24984_v34 = vld [vmem:[#allocation101_spill] sm:$0xff] }
 0x37a   :  { %7236 = vmatmul.mubr.f32.vlgmr.msra.gmra.mrb[4].mxu0 %v24981_v53  ;;  %v13769_v58 = vpack.c.bf16 %v24985_v46, %v24984_v34  ;;  %7917 = vrot.lane.b32.xlu0 %v7906_v9, %s14702_s26  ;;  %v24993_v46 = vld [vmem:[#allocation16_spill] sm:$0xff]  ;;  %v24995_v34 = vld [vmem:[#allocation35_spill] sm:$0xff] }
 0x37b   :  { %6381 = vmatmul.mubr.f32.vlgmr.msra.gmra.mrb[4].mxu1 %v24981_v53  ;;  %13766 = vmatpush1.bf16.msra.mxu0 %v13765_v62  ;;  %v24987_v53 = vld [vmem:[#allocation9_spill] sm:$0xff]  ;;  %v7914_v62 = vrot.slane %v12229_v12, %v19223_v60  ;;  %v13583_v47 = vpack.c.bf16 %v24995_v34, %v24994_v38  ;;  %v7952_v12 = vrot.slane %v12230_v19, %v19209_v14 }
 0x37c   :  { %13574 = vmatpush1.bf16.msra.mxu1 %v13573_v54  ;;  %13768 = vmatprep.subr.bf16.mxu0 %v13767_v37  ;;  %v13579_v32 = vpack.c.bf16 %v24987_v53, %v24986_v11  ;;  %v7948_v54 = vrot.slane %v12230_v19, %v19149_v1  ;;  %v24991_v37 = vld [vmem:[#allocation73_spill] sm:$0xff] }
 0x37d   :  { %13576 = vmatprep.subr.bf16.mxu1 %v13575_v13  ;;  %6515 = vmatprep.mubr.f32.mxu1 %v23799_v42  ;;  %v24990_v13 = vld [vmem:[#allocation71_spill] sm:$0xff]  ;;  %v24992_v11 = vld [vmem:[#allocation49_spill] sm:$0xff] }
 0x37e   :  { %7370 = vmatprep.mubr.f32.mxu0 %v23799_v42  ;;  %7919 = vrot.lane.b32.xlu1 %v7910_v15, %s14702_s26  ;;  %v13581_v53 = vpack.c.bf16 %v24991_v37, %v24990_v13  ;;  %v13773_v52 = vpack.c.bf16 %v24993_v46, %v24992_v11  ;;  %v24996_v15 = vld [vmem:[#allocation86_spill] sm:$0xff] }
 0x37f   :  { %13770 = vmatpush1.bf16.msra.mxu0 %v13769_v58  ;;  %v13775_v9 = vpack.c.bf16 %v24884_v29, %v24996_v15  ;;  %7921 = vrot.lane.b32.xlu0 %v7914_v62, %s14702_s26  ;;  %v7956_v58 = vrot.slane %v12230_v19, %v19183_v51  ;;  %v13779_v62 = vpack.c.bf16 %v24916_v44, %v24915_v4  ;;  %s14712_s26 = smov 96  }
 0x380   :  { %13578 = vmatpush1.bf16.msra.mxu1 %v13577_v57  ;;  %13772 = vmatprep.subr.bf16.mxu0 %v13771_v45  ;;  %v13777_v45 = vpack.c.bf16 %v24906_v41, %v24902_v22  ;;  %v12231_v57 = vld [vmem:[%s22482_s5 + $0x14] sm:$0xf]  ;;  %v13589_v41 = vpack.c.bf16 %v24918_v3, %v24917_v50 }
 0x381   :  { %13580 = vmatprep.subr.bf16.mxu1 %v13579_v32  ;;  %v13585_v32 = vpack.c.bf16 %v24901_v55, %v24896_v2 }
 0x382   :  { %7961 = vrot.lane.b32.xlu1 %v7948_v54, %s14703_s29  ;;  %v13587_v54 = vpack.c.bf16 %v24914_v21, %v24911_v63  ;;  %v24998_v21 = vld [vmem:[#allocation94_spill] sm:$0xff]  ;;  %v24999_v63 = vld [vmem:[#allocation55_spill] sm:$0xff] }
 0x383   :  { %13774 = vmatpush1.bf16.msra.mxu0 %v13773_v52  ;;  %7963 = vrot.lane.b32.xlu0 %v7952_v12, %s14703_s29  ;;  %v7993_v52 = vrot.slane %v12231_v57, %v19149_v1  ;;  %v13591_v22 = vpack.c.bf16 %v24999_v63, %v24998_v21  ;;  %v7997_v12 = vrot.slane %v12231_v57, %v19209_v14 }
 0x384   :  { %13582 = vmatpush1.bf16.msra.mxu1 %v13581_v53  ;;  %13776 = vmatprep.subr.bf16.mxu0 %v13775_v9  ;;  %v7960_v53 = vrot.slane %v12230_v19, %v19223_v60  ;;  %v8001_v19 = vrot.slane %v12231_v57, %v19183_v51 }
 0x385   :  { %13584 = vmatprep.subr.bf16.mxu1 %v13583_v47  ;;  %v24997_v47 = vld [vmem:[#allocation91_spill] sm:$0xff] }
 0x386   :  { %7965 = vrot.lane.b32.xlu1 %v7956_v58, %s14703_s29  ;;  %v13781_v9 = vpack.c.bf16 %v24997_v47, %v24919_v40  ;;  %v13783_v58 = vpack.c.bf16 %v24926_v6, %v24925_v18 }
 0x387   :  { %13778 = vmatpush1.bf16.msra.mxu0 %v13777_v45  ;;  %7967 = vrot.lane.b32.xlu0 %v7960_v53, %s14703_s29  ;;  %v25001_v45 = vld [vmem:[#allocation77_spill] sm:$0xff]  ;;  %v13787_v53 = vpack.c.bf16 %v24946_v17, %v24945_v36 }
 0x388   :  { %13586 = vmatpush1.bf16.msra.mxu1 %v13585_v32  ;;  %13780 = vmatprep.subr.bf16.mxu0 %v13779_v62  ;;  %v25000_v32 = vld [vmem:[#allocation10_spill] sm:$0xff]  ;;  %v12232_v62 = vld [vmem:[%s22482_s5 + $0x18] sm:$0xf] }
 0x389   :  { %13588 = vmatprep.subr.bf16.mxu1 %v13587_v54  ;;  %v13593_v47 = vpack.c.bf16 %v25001_v45, %v25000_v32  ;;  %v13785_v54 = vpack.c.bf16 %v18668_v8, %v18666_v7  ;;  %v13597_v8 = vpack.c.bf16 %v24950_v27, %v24949_v0 }
 0x38a   :  { %8006 = vrot.lane.b32.xlu1 %v7993_v52, %s14704_s15  ;;  %v13595_v52 = vpack.c.bf16 %v24941_v43, %v18678_v10 }
 0x38b   :  { %13782 = vmatpush1.bf16.msra.mxu0 %v13781_v9  ;;  %8008 = vrot.lane.b32.xlu0 %v7997_v12, %s14704_s15  ;;  %v8005_v9 = vrot.slane %v12231_v57, %v19223_v60  ;;  %v8047_v57 = vrot.slane %v12232_v62, %v19183_v51 }
 0x38c   :  { %13590 = vmatpush1.bf16.msra.mxu1 %v13589_v41  ;;  %13784 = vmatprep.subr.bf16.mxu0 %v13783_v58  ;;  %v8039_v41 = vrot.slane %v12232_v62, %v19149_v1  ;;  %v13599_v58 = vpack.c.bf16 %v24953_v33, %v18733_v25 }
 0x38d   :  { %13592 = vmatprep.subr.bf16.mxu1 %v13591_v22  ;;  %v13789_v22 = vpack.c.bf16 %v24952_v20, %v24951_v48 }
 0x38e   :  { %8010 = vrot.lane.b32.xlu1 %v8001_v19, %s14704_s15  ;;  %v25002_v19 = vld [vmem:[#allocation80_spill] sm:$0xff] }
 0x38f   :  { %13786 = vmatpush1.bf16.msra.mxu0 %v13785_v54  ;;  %v13791_v12 = vpack.c.bf16 %v25002_v19, %v24954_v61  ;;  %8012 = vrot.lane.b32.xlu0 %v8005_v9, %s14704_s15  ;;  %v13601_v54 = vpack.c.bf16 %v24958_v5, %v24956_v16  ;;  %v25005_v9 = vld [vmem:[#allocation75_spill] sm:$0xff] }
 0x390   :  { %13594 = vmatpush1.bf16.msra.mxu1 %v13593_v47  ;;  %13788 = vmatprep.subr.bf16.mxu0 %v13787_v53  ;;  %v8043_v47 = vrot.slane %v12232_v62, %v19209_v14  ;;  %v12233_v53 = vld [vmem:[%s22482_s5 + $0x1c] sm:$0xf] }
 0x391   :  { %13596 = vmatprep.subr.bf16.mxu1 %v13595_v52  ;;  %v13793_v52 = vpack.c.bf16 %v18816_v39, %v18792_v28  ;;  %v8085_v28 = vrot.slane %v12233_v53, %v19149_v1  ;;  %v8051_v39 = vrot.slane %v12232_v62, %v19223_v60  ;;  %v8089_v62 = vrot.slane %v12233_v53, %v19209_v14 }
 0x392   :  { %8052 = vrot.lane.b32.xlu1 %v8039_v41, %s14705_s18  ;;  %v25004_v41 = vld [vmem:[#allocation46_spill] sm:$0xff] }
 0x393   :  { %13790 = vmatpush1.bf16.msra.mxu0 %v13789_v22  ;;  %8054 = vrot.lane.b32.xlu0 %v8043_v47, %s14705_s18  ;;  %v25006_v22 = vld [vmem:[#allocation47_spill] sm:$0xff]  ;;  %v8093_v47 = vrot.slane %v12233_v53, %v19183_v51 }
 0x394   :  { %13598 = vmatpush1.bf16.msra.mxu1 %v13597_v8  ;;  %13792 = vmatprep.subr.bf16.mxu0 %v13791_v12  ;;  %v25003_v8 = vld [vmem:[#allocation84_spill] sm:$0xff] }
 0x395   :  { %13600 = vmatprep.subr.bf16.mxu1 %v13599_v58  ;;  %v25007_v58 = vld [vmem:[#allocation102_spill] sm:$0xff]  ;;  %v25008_v12 = vld [vmem:[#allocation4_spill] sm:$0xff] }
 0x396   :  { %8056 = vrot.lane.b32.xlu1 %v8047_v57, %s14705_s18  ;;  %v25009_v57 = vld [vmem:[#allocation3_spill] sm:$0xff] }
 0x397   :  { %13794 = vmatpush1.bf16.msra.mxu0 %v13793_v52  ;;  %8058 = vrot.lane.b32.xlu0 %v8051_v39, %s14705_s18  ;;  %v25011_v52 = vld [vmem:[#allocation98_spill] sm:$0xff]  ;;  %v8097_v39 = vrot.slane %v12233_v53, %v19223_v60  ;;  %v25020_v53 = vld [vmem:[#allocation23_spill] sm:$0xff] }
 0x398   :  { %13602 = vmatpush1.bf16.msra.mxu1 %v13601_v54  ;;  %13796 = vmatprep.subr.bf16.mxu0 %v25004_v41  ;;  %v25010_v54 = vld [vmem:[#allocation52_spill] sm:$0xff] }
 0x399   :  { %13604 = vmatprep.subr.bf16.mxu1 %v25003_v8 }
 0x39a   :  { %7373 = vmatmul.mubr.f32.vlgmr.msra.gmra.mrb[4].mxu0 %v25005_v9  ;;  %8098 = vrot.lane.b32.xlu1 %v8085_v28, %s14706_s21 }
 0x39b   :  { %6518 = vmatmul.mubr.f32.vlgmr.msra.gmra.mrb[4].mxu1 %v25005_v9  ;;  %13798 = vmatpush1.bf16.msra.mxu0 %v25007_v58  ;;  %v12234_v9 = vld [vmem:[%s22482_s5 + $0x20] sm:$0xf] }
 0x39c   :  { %13606 = vmatpush1.bf16.msra.mxu1 %v25006_v22  ;;  %13800 = vmatprep.subr.bf16.mxu0 %v25009_v57  ;;  %v25012_v57 = vld [vmem:[#allocation65_spill] sm:$0xff]  ;;  %v8131_v28 = vrot.slane %v12234_v9, %v19149_v1  ;;  %v25014_v58 = vld [vmem:[#allocation78_spill] sm:$0xff]  ;;  %v25019_v1 = vld [vmem:[#allocation32_spill] sm:$0xff] }
 0x39d   :  { %13608 = vmatprep.subr.bf16.mxu1 %v25008_v12  ;;  %6620 = vmatprep.mubr.f32.mxu1 %v23799_v42  ;;  %v25013_v12 = vld [vmem:[#allocation14_spill] sm:$0xff] }
 0x39e   :  { %7475 = vmatprep.mubr.f32.mxu0 %v23799_v42  ;;  %8102 = vrot.lane.b32.xlu1 %v8093_v47, %s14706_s21  ;;  %v25015_v22 = vld [vmem:[#allocation82_spill] sm:$0xff]  ;;  %v8135_v47 = vrot.slane %v12234_v9, %v19209_v14 }
 0x39f   :  { %13802 = vmatpush1.bf16.msra.mxu0 %v25011_v52  ;;  %8100 = vrot.lane.b32.xlu0 %v8089_v62, %s14706_s21  ;;  %v25017_v52 = vld [vmem:[#allocation38_spill] sm:$0xff]  ;;  %v25018_v62 = vld [vmem:[#allocation95_spill] sm:$0xff] }
 0x3a0   :  { %13610 = vmatpush1.bf16.msra.mxu1 %v25010_v54  ;;  %13804 = vmatprep.subr.bf16.mxu0 %v25013_v12  ;;  %v25016_v54 = vld [vmem:[#allocation51_spill] sm:$0xff]  ;;  %v25026_v14 = vld [vmem:[#allocation42_spill] sm:$0xff] }
 0x3a1   :  { %13612 = vmatprep.subr.bf16.mxu1 %v25012_v57  ;;  %v8139_v57 = vrot.slane %v12234_v9, %v19183_v51  ;;  %v25025_v51 = vld [vmem:[#allocation25_spill] sm:$0xff] }
 0x3a2   :  { %8144 = vrot.lane.b32.xlu1 %v8131_v28, %s14707_s24  ;;  %v25023_v28 = vld [vmem:[#allocation6_spill] sm:$0xff] }
 0x3a3   :  { %13806 = vmatpush1.bf16.msra.mxu0 %v25015_v22  ;;  %8104 = vrot.lane.b32.xlu0 %v8097_v39, %s14706_s21  ;;  %v25024_v39 = vld [vmem:[#allocation93_spill] sm:$0xff] }
 0x3a4   :  { %13614 = vmatpush1.bf16.msra.mxu1 %v25014_v58  ;;  %13808 = vmatprep.subr.bf16.mxu0 %v25017_v52  ;;  %v25021_v58 = vld [vmem:[#allocation60_spill] sm:$0xff]  ;;  %v25022_v52 = vld [vmem:[#allocation27_spill] sm:$0xff] }
 0x3a5   :  { %13616 = vmatprep.subr.bf16.mxu1 %v25016_v54  ;;  %v8143_v54 = vrot.slane %v12234_v9, %v19223_v60  ;;  %v25031_v9 = vld [vmem:[#allocation37_spill] sm:$0xff] }
 0x3a6   :  { %8148 = vrot.lane.b32.xlu1 %v8139_v57, %s14707_s24  ;;  %v25030_v57 = vld [vmem:[#allocation79_spill] sm:$0xff]  ;;  %v25033_v60 = vld [vmem:[#allocation13_spill] sm:$0xff] }
 0x3a7   :  { %13810 = vmatpush1.bf16.msra.mxu0 %v25019_v1  ;;  %8146 = vrot.lane.b32.xlu0 %v8135_v47, %s14707_s24  ;;  %v25027_v1 = vld [vmem:[#allocation66_spill] sm:$0xff]  ;;  %v25032_v47 = vld [vmem:[#allocation28_spill] sm:$0xff] }
 0x3a8   :  { %13618 = vmatpush1.bf16.msra.mxu1 %v25018_v62  ;;  %13812 = vmatprep.subr.bf16.mxu0 %v25021_v58  ;;  %v25029_v58 = vld [vmem:[#allocation62_spill] sm:$0xff]  ;;  %v25052_v62 = vld [vmem:[#allocation81_spill] sm:$0xff] }
 0x3a9   :  { %13620 = vmatprep.subr.bf16.mxu1 %v25020_v53  ;;  %v25028_v53 = vld [vmem:[#allocation61_spill] sm:$0xff] }
 0x3ab   :  { %13814 = vmatpush1.bf16.msra.mxu0 %v25023_v28  ;;  %8150 = vrot.lane.b32.xlu0 %v8143_v54, %s14707_s24  ;;  %v25035_v54 = vand.u32 4294901760, %v24970_v56  ;;  %v25038_v28 = vld [vmem:[#allocation5_spill] sm:$0xff] }
 0x3ac   :  { %13622 = vmatpush1.bf16.msra.mxu1 %v25022_v52  ;;  %13816 = vmatprep.subr.bf16.mxu0 %v25025_v51 }
 0x3ad   :  { %13624 = vmatprep.subr.bf16.mxu1 %v25024_v39  ;;  %v25034_v39 = vand.u32 4294901760, %v24969_v49  ;;  %v25043_v49 = vand.u32 4294901760, %v24976_v59  ;;  %v25056_v59 = vld [vmem:[#allocation101_spill] sm:$0xff] }
 0x3af   :  { %13818 = vmatpush1.bf16.msra.mxu0 %v25027_v1  ;;  %v13635_v51 = vpack.c.bf16 %v25035_v54, %v25034_v39  ;;  %v25037_v1 = vand.u32 4294901760, %v24972_v35  ;;  %v25046_v35 = vld [vmem:[#allocation7_spill] sm:$0xff]  ;;  %v25048_v54 = vld [vmem:[#allocation45_spill] sm:$0xff] }
 0x3b0   :  { %13626 = vmatpush1.bf16.msra.mxu1 %v25026_v14  ;;  %13820 = vmatprep.subr.bf16.mxu0 %v25029_v58  ;;  %v25036_v14 = vand.u32 4294901760, %v24971_v24  ;;  %v25039_v58 = vld [vmem:[#allocation21_spill] sm:$0xff]  ;;  %v25044_v24 = vld [vmem:[#allocation48_spill] sm:$0xff] }
 0x3b1   :  { %13628 = vmatprep.subr.bf16.mxu1 %v25028_v53  ;;  %v25045_v39 = vand.u32 4294901760, %v25044_v24 }
 0x3b2   :  { %v13827_v53 = vpack.c.bf16 %v25037_v1, %v25036_v14  ;;  %v25047_v1 = vand.u32 4294901760, %v25046_v35 }
 0x3b3   :  { %13822 = vmatpush1.bf16.msra.mxu0 %v25031_v9  ;;  %v25040_v9 = vand.u32 4294901760, %v24973_v31 }
 0x3b4   :  { %13630 = vmatpush1.bf16.msra.mxu1 %v25030_v57  ;;  %13824 = vmatprep.subr.bf16.mxu0 %v25033_v60  ;;  %v25042_v60 = vand.u32 4294901760, %v24975_v30  ;;  %v13639_v14 = vpack.c.bf16 %v25047_v1, %v25045_v39  ;;  %v25068_v1 = vand.u32 4294901760, %v24990_v13 }
 0x3b5   :  { %13632 = vmatprep.subr.bf16.mxu1 %v25032_v47  ;;  %v25041_v47 = vand.u32 4294901760, %v24974_v26 }
 0x3b6   :  { %v13829_v56 = vpack.c.bf16 %v25043_v49, %v25042_v60  ;;  %v25053_v60 = vand.u32 4294901760, %v24982_v23 }
 0x3b7   :  { %13826 = vmatpush1.bf16.msra.mxu0 %v25039_v58  ;;  %v13637_v57 = vpack.c.bf16 %v25041_v47, %v25040_v9  ;;  %v25050_v58 = vld [vmem:[#allocation2_spill] sm:$0xff]  ;;  %v25058_v9 = vld [vmem:[#allocation63_spill] sm:$0xff] }
 0x3b8   :  { %13634 = vmatpush1.bf16.msra.mxu1 %v25038_v28  ;;  %13828 = vmatprep.subr.bf16.mxu0 %v13827_v53  ;;  %v25049_v28 = vand.u32 4294901760, %v25048_v54  ;;  %v25051_v52 = vand.u32 4294901760, %v25050_v58  ;;  %v25057_v53 = vand.u32 4294901760, %v25056_v59  ;;  %v25059_v47 = vand.u32 4294901760, %v25058_v9  ;;  %v25060_v58 = vld [vmem:[#allocation64_spill] sm:$0xff] }
 0x3b9   :  { %13636 = vmatprep.subr.bf16.mxu1 %v13635_v51  ;;  %v25054_v51 = vld [vmem:[#allocation40_spill] sm:$0xff]  ;;  %v25073_v59 = vand.u32 4294901760, %v24995_v34  ;;  %v25075_v9 = vand.u32 4294901760, %v24884_v29  ;;  %v25082_v34 = vld [vmem:[#allocation85_spill] sm:$0xff] }
 0x3ba   :  { %v13831_v31 = vpack.c.bf16 %v25051_v52, %v25049_v28  ;;  %7479 = vmatmul.mubr.f32.vlgmr.msra.gmra.mrb[4].mxu0 %v25052_v62  ;;  %v25055_v26 = vand.u32 4294901760, %v25054_v51  ;;  %v13833_v49 = vpack.c.bf16 %v25059_v47, %v25057_v53  ;;  %v25061_v52 = vand.u32 4294901760, %v25060_v58  ;;  %v25062_v28 = vld [vmem:[#allocation9_spill] sm:$0xff]  ;;  %v25078_v47 = vld [vmem:[#allocation24_spill] sm:$0xff]  ;;  %v25080_v58 = vld [vmem:[#allocation30_spill] sm:$0xff] }
 0x3bb   :  { %6624 = vmatmul.mubr.f32.vlgmr.msra.gmra.mrb[4].mxu1 %v25052_v62  ;;  %13830 = vmatpush1.bf16.msra.mxu0 %v13829_v56  ;;  %v25063_v24 = vand.u32 4294901760, %v25062_v28  ;;  %v25064_v62 = vld [vmem:[#allocation20_spill] sm:$0xff]  ;;  %v25083_v28 = vand.u32 4294901760, %v25082_v34 }
 0x3bc   :  { %13638 = vmatpush1.bf16.msra.mxu1 %v13637_v57  ;;  %v13641_v30 = vpack.c.bf16 %v25055_v26, %v25053_v60  ;;  %13832 = vmatprep.subr.bf16.mxu0 %v13831_v31  ;;  %v25065_v57 = vand.u32 4294901760, %v25064_v62  ;;  %v25066_v56 = vld [vmem:[#allocation72_spill] sm:$0xff]  ;;  %v25070_v31 = vand.u32 4294901760, %v24992_v11  ;;  %v25071_v60 = vand.u32 4294901760, %v24993_v46 }
 0x3bd   :  { %13640 = vmatprep.subr.bf16.mxu1 %v13639_v14  ;;  %v13643_v39 = vpack.c.bf16 %v25063_v24, %v25061_v52  ;;  %v25067_v35 = vand.u32 4294901760, %v25066_v56  ;;  %6790 = vmatprep.mubr.f32.mxu1 %v23799_v42  ;;  %v25069_v14 = vand.u32 4294901760, %v24991_v37  ;;  %v25072_v26 = vand.u32 4294901760, %v24994_v38 }
 0x3be   :  { %7645 = vmatprep.mubr.f32.mxu0 %v23799_v42  ;;  %v13837_v51 = vpack.c.bf16 %v25071_v60, %v25070_v31  ;;  %v25076_v37 = vand.u32 4294901760, %v24896_v2  ;;  %v25077_v11 = vand.u32 4294901760, %v24901_v55  ;;  %v25081_v52 = vand.u32 4294901760, %v25080_v58 }
 0x3bf   :  { %v13835_v23 = vpack.c.bf16 %v25067_v35, %v25065_v57  ;;  %13834 = vmatpush1.bf16.msra.mxu0 %v13833_v49  ;;  %v13645_v54 = vpack.c.bf16 %v25069_v14, %v25068_v1  ;;  %v13647_v53 = vpack.c.bf16 %v25073_v59, %v25072_v26  ;;  %v25079_v49 = vand.u32 4294901760, %v25078_v47  ;;  %v25100_v59 = vld [vmem:[#allocation68_spill] sm:$0xff] }
 0x3c0   :  { %13642 = vmatpush1.bf16.msra.mxu1 %v13641_v30  ;;  %v25074_v30 = vand.u32 4294901760, %v24996_v15  ;;  %v13649_v46 = vpack.c.bf16 %v25077_v11, %v25076_v37  ;;  %v25084_v15 = vld [vmem:[#allocation88_spill] sm:$0xff]  ;;  %v25087_v62 = vand.u32 4294901760, %v24916_v44  ;;  %v25088_v55 = vand.u32 4294901760, %v24917_v50 }
 0x3c1   :  { %13644 = vmatprep.subr.bf16.mxu1 %v13643_v39  ;;  %13836 = vmatprep.subr.bf16.mxu0 %v13835_v23  ;;  %v13841_v38 = vpack.c.bf16 %v25081_v52, %v25079_v49  ;;  %v25085_v24 = vand.u32 4294901760, %v25084_v15  ;;  %v25086_v39 = vand.u32 4294901760, %v24915_v4  ;;  %v25089_v57 = vand.u32 4294901760, %v24918_v3  ;;  %v25091_v23 = vld [vmem:[#allocation91_spill] sm:$0xff]  ;;  %v25116_v49 = vld [vmem:[#allocation105_spill] sm:$0xff]  ;;  %v25124_v52 = vld [vmem:[#allocation98_spill] sm:$0xff] }
 0x3c2   :  { %v13839_v13 = vpack.c.bf16 %v25075_v9, %v25074_v30  ;;  %v25090_v35 = vand.u32 4294901760, %v24919_v40  ;;  %v25092_v1 = vand.u32 4294901760, %v25091_v23  ;;  %v25094_v4 = vand.u32 4294901760, %v24999_v63 }
 0x3c3   :  { %13838 = vmatpush1.bf16.msra.mxu0 %v13837_v51  ;;  %v13651_v29 = vpack.c.bf16 %v25085_v24, %v25083_v28  ;;  %v13843_v2 = vpack.c.bf16 %v25087_v62, %v25086_v39  ;;  %v13653_v56 = vpack.c.bf16 %v25089_v57, %v25088_v55  ;;  %v25095_v31 = vand.u32 4294901760, %v24925_v18  ;;  %v25126_v24 = vld [vmem:[#allocation78_spill] sm:$0xff]  ;;  %v25127_v39 = vld [vmem:[#allocation51_spill] sm:$0xff]  ;;  %v25130_v57 = vld [vmem:[#allocation32_spill] sm:$0xff] }
 0x3c4   :  { %13646 = vmatpush1.bf16.msra.mxu1 %v13645_v54  ;;  %13840 = vmatprep.subr.bf16.mxu0 %v13839_v13  ;;  %v13845_v14 = vpack.c.bf16 %v25092_v1, %v25090_v35  ;;  %v25093_v54 = vand.u32 4294901760, %v24998_v21  ;;  %v25096_v60 = vand.u32 4294901760, %v24926_v6  ;;  %v25097_v3 = vand.u32 4294901760, %v25000_v32  ;;  %v25128_v62 = vld [vmem:[#allocation38_spill] sm:$0xff] }
 0x3c5   :  { %13648 = vmatprep.subr.bf16.mxu1 %v13647_v53  ;;  %v25098_v40 = vand.u32 4294901760, %v25001_v45  ;;  %v25099_v26 = vand.u32 4294901760, %v18666_v7  ;;  %v25101_v53 = vand.u32 4294901760, %v25100_v59  ;;  %v25102_v63 = vand.u32 4294901760, %v18678_v10  ;;  %v25141_v59 = vld [vmem:[#allocation42_spill] sm:$0xff] }
 0x3c6   :  { %v13655_v44 = vpack.c.bf16 %v25094_v4, %v25093_v54  ;;  %v13847_v50 = vpack.c.bf16 %v25096_v60, %v25095_v31  ;;  %v25103_v18 = vand.u32 4294901760, %v24941_v43  ;;  %v25104_v30 = vand.u32 4294901760, %v24945_v36  ;;  %v25135_v54 = vld [vmem:[#allocation27_spill] sm:$0xff]  ;;  %v25136_v4 = vld [vmem:[#allocation6_spill] sm:$0xff]  ;;  %v25137_v60 = vld [vmem:[#allocation93_spill] sm:$0xff] }
 0x3c7   :  { %13842 = vmatpush1.bf16.msra.mxu0 %v13841_v38  ;;  %v13657_v51 = vpack.c.bf16 %v25098_v40, %v25097_v3  ;;  %v13849_v21 = vpack.c.bf16 %v25101_v53, %v25099_v26  ;;  %v25105_v9 = vand.u32 4294901760, %v24946_v17  ;;  %v25106_v45 = vand.u32 4294901760, %v24949_v0  ;;  %v25125_v38 = vld [vmem:[#allocation65_spill] sm:$0xff]  ;;  %v25142_v53 = vld [vmem:[#allocation66_spill] sm:$0xff] }
 0x3c8   :  { %13650 = vmatpush1.bf16.msra.mxu1 %v13649_v46  ;;  %13844 = vmatprep.subr.bf16.mxu0 %v13843_v2  ;;  %v13659_v6 = vpack.c.bf16 %v25103_v18, %v25102_v63  ;;  %v25107_v7 = vand.u32 4294901760, %v24950_v27  ;;  %v25108_v37 = vand.u32 4294901760, %v24951_v48  ;;  %v25109_v11 = vand.u32 4294901760, %v24952_v20  ;;  %v25143_v63 = vld [vmem:[#allocation61_spill] sm:$0xff]  ;;  %v25144_v18 = vld [vmem:[#allocation62_spill] sm:$0xff] }
 0x3c9   :  { %13652 = vmatprep.subr.bf16.mxu1 %v13651_v29  ;;  %v13851_v32 = vpack.c.bf16 %v25105_v9, %v25104_v30  ;;  %v25110_v43 = vand.u32 4294901760, %v18733_v25  ;;  %v25111_v36 = vand.u32 4294901760, %v24953_v33  ;;  %v25112_v46 = vand.u32 4294901760, %v24954_v61  ;;  %v25117_v33 = vld [vmem:[#allocation70_spill] sm:$0xff]  ;;  %v25118_v61 = vld [vmem:[#allocation47_spill] sm:$0xff] }
 0x3ca   :  { %v13661_v13 = vpack.c.bf16 %v25107_v7, %v25106_v45  ;;  %v13853_v10 = vpack.c.bf16 %v25109_v11, %v25108_v37  ;;  %v25113_v47 = vand.u32 4294901760, %v25002_v19  ;;  %v25114_v27 = vand.u32 4294901760, %v24956_v16  ;;  %v25119_v16 = vld [vmem:[#allocation102_spill] sm:$0xff]  ;;  %v25121_v19 = vld [vmem:[#allocation3_spill] sm:$0xff]  ;;  %v25147_v7 = vld [vmem:[#allocation37_spill] sm:$0xff] }
 0x3cb   :  { %13846 = vmatpush1.bf16.msra.mxu0 %v13845_v14  ;;  %v13663_v17 = vpack.c.bf16 %v25111_v36, %v25110_v43  ;;  %v25115_v48 = vand.u32 4294901760, %v24958_v5  ;;  %v25120_v5 = vld [vmem:[#allocation4_spill] sm:$0xff]  ;;  %v25146_v45 = vld [vmem:[#allocation79_spill] sm:$0xff]  ;;  %v25149_v11 = vld [vmem:[#allocation13_spill] sm:$0xff] }
 0x3cc   :  { %13654 = vmatpush1.bf16.msra.mxu1 %v13653_v56  ;;  %13848 = vmatprep.subr.bf16.mxu0 %v13847_v50  ;;  %v13855_v0 = vpack.c.bf16 %v25113_v47, %v25112_v46  ;;  %v25131_v56 = vld [vmem:[#allocation23_spill] sm:$0xff]  ;;  %v25138_v50 = vld [vmem:[#allocation25_spill] sm:$0xff]  ;;  %v25148_v37 = vld [vmem:[#allocation28_spill] sm:$0xff] }
 0x3cd   :  { %13656 = vmatprep.subr.bf16.mxu1 %v13655_v44  ;;  %v13665_v20 = vpack.c.bf16 %v25115_v48, %v25114_v27  ;;  %v25153_v46 = vld [vmem:[#allocation5_spill] sm:$0xff] }
 0x3ce   :  { %v25154_v47 = vld [vmem:[#allocation21_spill] sm:$0xff] }
 0x3cf   :  { %13850 = vmatpush1.bf16.msra.mxu0 %v13849_v21 }
 0x3d0   :  { %13658 = vmatpush1.bf16.msra.mxu1 %v13657_v51  ;;  %13852 = vmatprep.subr.bf16.mxu0 %v13851_v32 }
 0x3d1   :  { %13660 = vmatprep.subr.bf16.mxu1 %v13659_v6 }
 0x3d3   :  { %13854 = vmatpush1.bf16.msra.mxu0 %v13853_v10 }
 0x3d4   :  { %13662 = vmatpush1.bf16.msra.mxu1 %v13661_v13  ;;  %13856 = vmatprep.subr.bf16.mxu0 %v13855_v0 }
 0x3d5   :  { %13664 = vmatprep.subr.bf16.mxu1 %v13663_v17 }
 0x3d7   :  { %13858 = vmatpush1.bf16.msra.mxu0 %v25116_v49 }
 0x3d8   :  { %13666 = vmatpush1.bf16.msra.mxu1 %v13665_v20  ;;  %13860 = vmatprep.subr.bf16.mxu0 %v25004_v41  ;;  %v19513_v25 = vpop.permute.xlu1 %7793  ;;  %v25123_v41 = vld [vmem:[#allocation52_spill] sm:$0xff] }
 0x3d9   :  { %13668 = vmatprep.subr.bf16.mxu1 %v25003_v8 }
 0x3da   :  { %7647 = vmatmul.mubr.f32.vlgmr.msra.gmra.mrb[4].mxu0 %v25117_v33 }
 0x3db   :  { %6792 = vmatmul.mubr.f32.vlgmr.msra.gmra.mrb[4].mxu1 %v25117_v33  ;;  %13862 = vmatpush1.bf16.msra.mxu0 %v25119_v16 }
 0x3dc   :  { %13670 = vmatpush1.bf16.msra.mxu1 %v25118_v61  ;;  %13864 = vmatprep.subr.bf16.mxu0 %v25121_v19 }
 0x3dd   :  { %13672 = vmatprep.subr.bf16.mxu1 %v25120_v5  ;;  %6894 = vmatprep.mubr.f32.mxu1 %v23799_v42  ;;  %v19525_v8 = vpop.permute.xlu0 %7764 }
 0x3de   :  { %v19521_v58 = vpop.permute.xlu1 %7869  ;;  %7749 = vmatprep.mubr.f32.mxu0 %v23799_v42 }
 0x3df   :  { %25122 = vst [vmem:[#allocation17_spill] sm:$0xff] %v19521_v58  ;;  %13866 = vmatpush1.bf16.msra.mxu0 %v25124_v52 }
 0x3e0   :  { %13674 = vmatpush1.bf16.msra.mxu1 %v25123_v41  ;;  %13868 = vmatprep.subr.bf16.mxu0 %v25013_v12  ;;  %v25129_v12 = vld [vmem:[#allocation95_spill] sm:$0xff] }
 0x3e1   :  { %13676 = vmatprep.subr.bf16.mxu1 %v25125_v38  ;;  %v7792_v28 = vpop.permute.xlu0 %7791 }
 0x3e2   :  { %v19531_v34 = vpop.permute.xlu1 %7873  ;;  %v19534_v15 = vsel %vm7799_vm1, 0.0, %v7792_v28  ;;  %v19551_v35 = vsel %vm7799_vm1, %v7792_v28, %v19513_v25 }
 0x3e3   :  { %13870 = vmatpush1.bf16.msra.mxu0 %v25015_v22  ;;  %v7891_v29 = vmul.f32 %v19521_v58, %v19534_v15  ;;  %v25132_v22 = vld [vmem:[#allocation60_spill] sm:$0xff] }
 0x3e4   :  { %13678 = vmatpush1.bf16.msra.mxu1 %v25126_v24  ;;  %13872 = vmatprep.subr.bf16.mxu0 %v25128_v62 }
 0x3e5   :  { %13680 = vmatprep.subr.bf16.mxu1 %v25127_v39  ;;  %v19542_v55 = vpop.permute.xlu0 %7795  ;;  %8191 = vrot.lane.b32.xlu0 %v7891_v29, %s14708_s0 }
 0x3e6   :  { %v7798_v2 = vpop.permute.xlu1 %7797  ;;  %v19664_v62 = vsel %vm7799_vm1, %v19513_v25, %v19542_v55 }
 0x3e7   :  { %13874 = vmatpush1.bf16.msra.mxu0 %v25130_v57  ;;  %v19565_v44 = vsel %vm7799_vm1, %v7798_v2, 0.0  ;;  %v19573_v3 = vsel %vm7799_vm1, %v19542_v55, %v7798_v2 }
 0x3e8   :  { %13682 = vmatpush1.bf16.msra.mxu1 %v25129_v12  ;;  %13876 = vmatprep.subr.bf16.mxu0 %v25132_v22 }
 0x3e9   :  { %13684 = vmatprep.subr.bf16.mxu1 %v25131_v56  ;;  %v19553_v23 = vpop.permute.xlu0 %7871 }
 0x3ea   :  { %v19558_v1 = vsel %vm7877_vm2, %v19521_v58, %v19553_v23  ;;  %v19560_v14 = vpop.permute.xlu1 %7915  ;;  %v19669_v2 = vsel %vm7877_vm2, %v19553_v23, %v19531_v34 }
 0x3eb   :  { %25133 = vst [vmem:[#allocation90_spill] sm:$0xff] %v19558_v1  ;;  %25134 = vst [vmem:[#allocation76_spill] sm:$0xff] %v19560_v14  ;;  %13878 = vmatpush1.bf16.msra.mxu0 %v25136_v4  ;;  %v7892_v31 = vmul.f32 %v19558_v1, %v19551_v35  ;;  %v7937_v9 = vmul.f32 %v19560_v14, %v19534_v15 }
 0x3ec   :  { %13686 = vmatpush1.bf16.msra.mxu1 %v25135_v54  ;;  %13880 = vmatprep.subr.bf16.mxu0 %v25138_v50  ;;  %25161 = vst [vmem:[#allocation22_spill] sm:$0xff] %v19669_v2 }
 0x3ed   :  { %13688 = vmatprep.subr.bf16.mxu1 %v25137_v60  ;;  %v19575_v40 = vpop.permute.xlu0 %7875  ;;  %8193 = vrot.lane.b32.xlu1 %v7892_v31, %s14708_s0 }
 0x3ee   :  { %25139 = vst [vmem:[#allocation8_spill] sm:$0xff] %v19575_v40  ;;  %v7895_v51 = vmul.f32 %v19575_v40, %v19565_v44  ;;  %v19583_v26 = vsel %vm7877_vm2, %v19531_v34, %v19575_v40  ;;  %v7893_v34 = vmul.f32 %v19669_v2, %v19664_v62 }
 0x3ef   :  { %25140 = vst [vmem:[#allocation12_spill] sm:$0xff] %v19583_v26  ;;  %13882 = vmatpush1.bf16.msra.mxu0 %v25142_v53  ;;  %v7894_v21 = vmul.f32 %v19583_v26, %v19573_v3 }
 0x3f0   :  { %13690 = vmatpush1.bf16.msra.mxu1 %v25141_v59  ;;  %13884 = vmatprep.subr.bf16.mxu0 %v25144_v18  ;;  %v7920_v6 = vpop.permute.xlu1 %7919  ;;  %v25168_v59 = vld [vmem:[#allocation54_spill] sm:$0xff] }
 0x3f1   :  { %13692 = vmatprep.subr.bf16.mxu1 %v25143_v63  ;;  %8199 = vrot.lane.b32.xlu0 %v7895_v51, %s14708_s0  ;;  %v7918_v30 = vpop.permute.xlu0 %7917  ;;  %v8549_v53 = vand.u32 4294901760, %v25168_v59 }
 0x3f2   :  { %8197 = vrot.lane.b32.xlu1 %v7894_v21, %s14708_s0  ;;  %v19597_v32 = vsel %vm7923_vm3, %v19560_v14, %v7918_v30  ;;  %v19686_v55 = vsel %vm7923_vm3, %v7918_v30, %v7920_v6  ;;  %v25169_v21 = vld [vmem:[#allocation33_spill] sm:$0xff]  ;;  %v25172_v30 = vld [vmem:[#allocation44_spill] sm:$0xff] }
 0x3f3   :  { %25145 = vst [vmem:[#allocation58_spill] sm:$0xff] %v19597_v32  ;;  %13886 = vmatpush1.bf16.msra.mxu0 %v25147_v7  ;;  %v7938_v13 = vmul.f32 %v19597_v32, %v19551_v35  ;;  %25164 = vst [vmem:[#allocation41_spill] sm:$0xff] %v19686_v55  ;;  %v7939_v4 = vmul.f32 %v19686_v55, %v19664_v62  ;;  %v9469_v63 = vand.u32 4294901760, %v25169_v21 }
 0x3f4   :  { %13694 = vmatpush1.bf16.msra.mxu1 %v25146_v45  ;;  %13888 = vmatprep.subr.bf16.mxu0 %v25149_v11  ;;  %v19605_v10 = vpop.permute.xlu1 %7961  ;;  %v19714_v18 = vsub.f32 %v25168_v59, %v8549_v53  ;;  %v25173_v45 = vld [vmem:[#allocation96_spill] sm:$0xff] }
 0x3f5   :  { %13696 = vmatprep.subr.bf16.mxu1 %v25148_v37  ;;  %25150 = vst [vmem:[#allocation15_spill] sm:$0xff] %v19605_v10  ;;  %8238 = vrot.lane.b32.xlu0 %v7937_v9, %s14709_s25  ;;  %v19608_v43 = vpop.permute.xlu0 %7921  ;;  %v7982_v20 = vmul.f32 %v19605_v10, %v19534_v15  ;;  %v8547_v9 = vand.u32 4294901760, %v25172_v30  ;;  %v9467_v7 = vand.u32 4294901760, %v25173_v45 }
 0x3f6   :  { %25151 = vst [vmem:[#allocation59_spill] sm:$0xff] %v19608_v43  ;;  %8240 = vrot.lane.b32.xlu1 %v7938_v13, %s14709_s25  ;;  %v7941_v36 = vmul.f32 %v19608_v43, %v19565_v44  ;;  %v19615_v17 = vsel %vm7923_vm3, %v7920_v6, %v19608_v43  ;;  %25170 = vst [vmem:[#allocation11_spill] sm:$0xff] %v19714_v18  ;;  %v19717_v6 = vsub.f32 %v25169_v21, %v9469_v63 }
 0x3f7   :  { %25152 = vst [vmem:[#allocation87_spill] sm:$0xff] %v19615_v17  ;;  %13890 = vmatpush1.bf16.msra.mxu0 %v25154_v47  ;;  %v7940_v0 = vmul.f32 %v19615_v17, %v19573_v3  ;;  %v23255_v13 = vand.u32 4294901760, %v19714_v18  ;;  %v19724_v11 = vsub.f32 %v25172_v30, %v8547_v9 }
 0x3f8   :  { %13698 = vmatpush1.bf16.msra.mxu1 %v25153_v46  ;;  %v7966_v27 = vpop.permute.xlu1 %7965  ;;  %25171 = vst [vmem:[#allocation50_spill] sm:$0xff] %v19717_v6  ;;  %v23254_v37 = vand.u32 4294901760, %v19717_v6 }
 0x3f9   :  { %8246 = vrot.lane.b32.xlu0 %v7941_v36, %s14709_s25  ;;  %v7964_v48 = vpop.permute.xlu0 %7963  ;;  %25174 = vst [vmem:[#allocation26_spill] sm:$0xff] %v19724_v11  ;;  %v19727_v36 = vsub.f32 %v25173_v45, %v9467_v7 }
 0x3fa   :  { %8244 = vrot.lane.b32.xlu1 %v7940_v0, %s14709_s25  ;;  %7751 = vmatmul.mubr.f32.vlgmr.msra.gmra.mrb[4].mxu0 %v25117_v33  ;;  %v19629_v49 = vsel %vm53_vm0, %v19605_v10, %v7964_v48  ;;  %v19699_v31 = vsel %vm53_vm0, %v7964_v48, %v7966_v27  ;;  %v19734_v0 = vsub.f32 %v19714_v18, %v23255_v13 }
 0x3fb   :  { %6896 = vmatmul.mubr.f32.vlgmr.msra.gmra.mrb[4].mxu1 %v25117_v33  ;;  %25155 = vst [vmem:[#allocation100_spill] sm:$0xff] %v19629_v49  ;;  %v7983_v61 = vmul.f32 %v19629_v49, %v19551_v35  ;;  %25166 = vst [vmem:[#allocation29_spill] sm:$0xff] %v19699_v31  ;;  %v7984_v60 = vmul.f32 %v19699_v31, %v19664_v62 }
 0x3fc   :  { %v19633_v16 = vpop.permute.xlu1 %8006  ;;  %25175 = vst [vmem:[#allocation53_spill] sm:$0xff] %v19727_v36 }
 0x3fd   :  { %25156 = vst [vmem:[#allocation103_spill] sm:$0xff] %v19633_v16  ;;  %8285 = vrot.lane.b32.xlu0 %v7982_v20, %s14710_s1  ;;  %v19636_v5 = vpop.permute.xlu0 %7967  ;;  %v8028_v38 = vmul.f32 %v19633_v16, %v19534_v15 }
 0x3fe   :  { %25157 = vst [vmem:[#allocation57_spill] sm:$0xff] %v19636_v5  ;;  %8287 = vrot.lane.b32.xlu1 %v7983_v61, %s14710_s1  ;;  %v7986_v19 = vmul.f32 %v19636_v5, %v19565_v44  ;;  %v19643_v33 = vsel %vm53_vm0, %v7966_v27, %v19636_v5  ;;  %v19739_v27 = vsub.f32 %v19717_v6, %v23254_v37  ;;  %v23256_v61 = vand.u32 4294901760, %v19724_v11 }
 0x3ff   :  { %25158 = vst [vmem:[#allocation18_spill] sm:$0xff] %v19643_v33  ;;  %v7985_v41 = vmul.f32 %v19643_v33, %v19573_v3 }
 0x400   :  { %v8011_v24 = vpop.permute.xlu1 %8010 }
 0x401   :  { %8293 = vrot.lane.b32.xlu0 %v7986_v19, %s14710_s1  ;;  %v8009_v52 = vpop.permute.xlu0 %8008  ;;  %v23257_v19 = vand.u32 4294901760, %v19727_v36 }
 0x402   :  { %8291 = vrot.lane.b32.xlu1 %v7985_v41, %s14710_s1  ;;  %v19653_v28 = vsel %vm8014_vm4, %v19633_v16, %v8009_v52  ;;  %v19705_v50 = vsel %vm8014_vm4, %v8009_v52, %v8011_v24  ;;  %v8746_v41 = vand.u32 4294901760, %v19734_v0 }
 0x403   :  { %25159 = vst [vmem:[#allocation74_spill] sm:$0xff] %v19653_v28  ;;  %v8029_v29 = vmul.f32 %v19653_v28, %v19551_v35  ;;  %25167 = vst [vmem:[#allocation36_spill] sm:$0xff] %v19705_v50  ;;  %v8030_v51 = vmul.f32 %v19705_v50, %v19664_v62  ;;  %v9659_v0 = vsub.f32 %v19727_v36, %v23257_v19 }
 0x404   :  { %v19679_v22 = vpop.permute.xlu1 %8052 }
 0x405   :  { %8332 = vrot.lane.b32.xlu0 %v8028_v38, %s14711_s2  ;;  %v19658_v39 = vpop.permute.xlu0 %8012  ;;  %25163 = vst [vmem:[#allocation89_spill] sm:$0xff] %v19679_v22  ;;  %v8074_v6 = vmul.f32 %v19679_v22, %v19534_v15 }
 0x406   :  { %25160 = vst [vmem:[#allocation83_spill] sm:$0xff] %v19658_v39  ;;  %8334 = vrot.lane.b32.xlu1 %v8029_v29, %s14711_s2  ;;  %v8032_v12 = vmul.f32 %v19658_v39, %v19565_v44  ;;  %v19675_v57 = vsel %vm8014_vm4, %v8011_v24, %v19658_v39 }
 0x407   :  { %25162 = vst [vmem:[#allocation39_spill] sm:$0xff] %v19675_v57  ;;  %v8031_v56 = vmul.f32 %v19675_v57, %v19573_v3 }
 0x408   :  { %v8057_v46 = vpop.permute.xlu1 %8056 }
 0x409   :  { %8340 = vrot.lane.b32.xlu0 %v8032_v12, %s14711_s2  ;;  %v8055_v25 = vpop.permute.xlu0 %8054  ;;  %v9666_v12 = vand.u32 4294901760, %v19739_v27 }
 0x40a   :  { %8338 = vrot.lane.b32.xlu1 %v8031_v56, %s14711_s2  ;;  %v19690_v23 = vsel %vm8060_vm5, %v19679_v22, %v8055_v25  ;;  %v19748_v56 = vsel %vm8060_vm5, %v8055_v25, %v8057_v46 }
 0x40b   :  { %25165 = vst [vmem:[#allocation97_spill] sm:$0xff] %v19690_v23  ;;  %v8075_v54 = vmul.f32 %v19690_v23, %v19551_v35  ;;  %25177 = vst [vmem:[#allocation99_spill] sm:$0xff] %v19748_v56 }
 0x40d   :  { %8195 = vrot.lane.b32.xlu0 %v7893_v34, %s14708_s0  ;;  %v19729_v47 = vpop.permute.xlu0 %8058  ;;  %v19750_v34 = vpop.permute.xlu1 %8098 }
 0x40e   :  { %8381 = vrot.lane.b32.xlu1 %v8075_v54, %s14712_s26  ;;  %25176 = vst [vmem:[#allocation43_spill] sm:$0xff] %v19729_v47  ;;  %25178 = vst [vmem:[#allocation19_spill] sm:$0xff] %v19750_v34  ;;  %v19765_v25 = vsel %vm8060_vm5, %v8057_v46, %v19729_v47 }
 0x40f   :  { %25180 = vst [vmem:[#allocation31_spill] sm:$0xff] %v19765_v25 }
 0x411   :  { %8242 = vrot.lane.b32.xlu0 %v7939_v4, %s14709_s25  ;;  %v19752_v54 = vpop.permute.xlu0 %8100 }
 0x415   :  { %8289 = vrot.lane.b32.xlu0 %v7984_v60, %s14710_s1 }
 0x419   :  { %8336 = vrot.lane.b32.xlu0 %v8030_v51, %s14711_s2  ;;  %v19759_v51 = vsel %vm8106_vm6, %v19750_v34, %v19752_v54 }
 0x41a   :  { %25179 = vst [vmem:[#allocation67_spill] sm:$0xff] %v19759_v51 }
 0x4cd   :  { %v7752_v20 = vpop.f32.mrb[4].mxu0 }
 0x4ce   :  { %v6897_v48 = vpop.f32.mrb[4].mxu1  ;;  %v7769_v38 = vadd.f32 %v19525_v8, %v7752_v20  ;;  %v7754_v29 = vpop.f32.mrb[5].mxu0 }
 0x4cf   :  { %v7767_v52 = vadd.f32 %v19525_v8, %v6897_v48  ;;  %v6899_v24 = vpop.f32.mrb[5].mxu1  ;;  %v7770_v60 = vadd.f32 %v19525_v8, %v7754_v29 }
 0x4d0   :  { %v7768_v4 = vadd.f32 %v19525_v8, %v6899_v24  ;;  %v9465_v21 = vand.u32 4294901760, %v7769_v38  ;;  %7787 = vrot.lane.b32.xlu1 %v7769_v38, %s14700_s17  ;;  %v8739_v8 = vsub.f32 %v19724_v11, %v23256_v61 }
 0x4d1   :  { %v8545_v59 = vand.u32 4294901760, %v7767_v52  ;;  %7783 = vrot.lane.b32.xlu0 %v7767_v52, %s14700_s17  ;;  %v9463_v45 = vand.u32 4294901760, %v7770_v60 }
 0x4d2   :  { %v8543_v30 = vand.u32 4294901760, %v7768_v4  ;;  %v19777_v20 = vpack.c.bf16 %v9469_v63, %v9465_v21  ;;  %v19779_v24 = vsub.f32 %v7769_v38, %v9465_v21  ;;  %v8076_v21 = vmul.f32 %v19748_v56, %v19664_v62 }
 0x4d3   :  { %v19773_v27 = vpack.c.bf16 %v8549_v53, %v8545_v59  ;;  %v19775_v48 = vsub.f32 %v7767_v52, %v8545_v59  ;;  %v19783_v29 = vsub.f32 %v7770_v60, %v9463_v45  ;;  %v19787_v13 = vpack.c.bf16 %v9467_v7, %v9463_v45  ;;  %v19803_v59 = vpop.permute.xlu0 %8104  ;;  %v8103_v53 = vpop.permute.xlu1 %8102 }
 0x4d4   :  { %25183 = vst [vmem:[#allocation49_spill] sm:$0xff] %v19777_v20  ;;  %25184 = vst [vmem:[#allocation16_spill] sm:$0xff] %v19779_v24  ;;  %v19781_v46 = vsub.f32 %v7768_v4, %v8543_v30  ;;  %v19785_v37 = vpack.c.bf16 %v8547_v9, %v8543_v30  ;;  %v23259_v19 = vand.u32 4294901760, %v19779_v24  ;;  %7785 = vrot.lane.b32.xlu1 %v7768_v4, %s14700_s17  ;;  %v8740_v63 = vand.u32 4294901760, %v8739_v8 }
 0x4d5   :  { %25181 = vst [vmem:[#allocation71_spill] sm:$0xff] %v19773_v27  ;;  %25182 = vst [vmem:[#allocation73_spill] sm:$0xff] %v19775_v48  ;;  %v23258_v61 = vand.u32 4294901760, %v19775_v48  ;;  %7789 = vrot.lane.b32.xlu0 %v7770_v60, %s14700_s17  ;;  %v23268_v9 = vand.u32 4294901760, %v19783_v29  ;;  %v8077_v30 = vmul.f32 %v19765_v25, %v19573_v3  ;;  %v8121_v8 = vmul.f32 %v19759_v51, %v19551_v35  ;;  %v25221_v27 = vld [vmem:[#allocation92_spill] sm:$0xff] }
 0x4d6   :  { %25185 = vst [vmem:[#allocation34_spill] sm:$0xff] %v19781_v46  ;;  %25186 = vst [vmem:[#allocation35_spill] sm:$0xff] %v19783_v29  ;;  %v23265_v52 = vand.u32 4294901760, %v19781_v46  ;;  %v9653_v60 = vsub.f32 %v19779_v24, %v23259_v19 }
 0x4d7   :  { %25187 = vst [vmem:[#allocation86_spill] sm:$0xff] %v19785_v37  ;;  %25188 = vst [vmem:[#allocation94_spill] sm:$0xff] %v19787_v13  ;;  %v8733_v4 = vsub.f32 %v19775_v48, %v23258_v61  ;;  %v9647_v38 = vsub.f32 %v19783_v29, %v23268_v9  ;;  %v9660_v61 = vand.u32 4294901760, %v9659_v0  ;;  %v19833_v0 = vsel %vm8106_vm6, %v8103_v53, %v19803_v59 }
 0x4d8   :  { %25189 = vst [vmem:[#allocation55_spill] sm:$0xff] %v19803_v59  ;;  %v8727_v45 = vsub.f32 %v19781_v46, %v23265_v52  ;;  %8385 = vrot.lane.b32.xlu1 %v8077_v30, %s14712_s26  ;;  %v9654_v7 = vand.u32 4294901760, %v9653_v60  ;;  %25192 = vst [vmem:[#allocation80_spill] sm:$0xff] %v19833_v0  ;;  %v19841_v60 = vpop.permute.xlu1 %8144 }
 0x4d9   :  { %8383 = vrot.lane.b32.xlu0 %v8076_v21, %s14712_s26  ;;  %v8734_v19 = vand.u32 4294901760, %v8733_v4  ;;  %v9648_v24 = vand.u32 4294901760, %v9647_v38  ;;  %v8147_v38 = vpop.permute.xlu0 %8146  ;;  %25195 = vst [vmem:[#allocation75_spill] sm:$0xff] %v19841_v60  ;;  %v8166_v30 = vmul.f32 %v19841_v60, %v19534_v15 }
 0x4da   :  { %v8728_v42 = vand.u32 4294901760, %v8727_v45  ;;  %v19829_v36 = vpack.c.bf16 %v9666_v12, %v9654_v7 }
 0x4db   :  { %v19827_v52 = vpack.c.bf16 %v8746_v41, %v8734_v19  ;;  %v19837_v4 = vpack.c.bf16 %v9660_v61, %v9648_v24  ;;  %v8078_v19 = vmul.f32 %v19729_v47, %v19565_v44  ;;  %v8123_v41 = vmul.f32 %v19833_v0, %v19573_v3 }
 0x4dc   :  { %25191 = vst [vmem:[#allocation77_spill] sm:$0xff] %v19829_v36  ;;  %v19835_v21 = vpack.c.bf16 %v8740_v63, %v8728_v42  ;;  %8428 = vrot.lane.b32.xlu1 %v8121_v8, %s14713_s27  ;;  %v19849_v42 = vsel %vm8106_vm6, %v19752_v54, %v8103_v53  ;;  %v19853_v61 = vsel %vm8152_vm7, %v19841_v60, %v8147_v38  ;;  %v19865_v24 = vpop.permute.xlu1 %8148 }
 0x4dd   :  { %25190 = vst [vmem:[#allocation10_spill] sm:$0xff] %v19827_v52  ;;  %25194 = vst [vmem:[#allocation46_spill] sm:$0xff] %v19837_v4  ;;  %8379 = vrot.lane.b32.xlu0 %v8074_v6, %s14712_s26  ;;  %v8122_v6 = vmul.f32 %v19849_v42, %v19664_v62  ;;  %v8167_v12 = vmul.f32 %v19853_v61, %v19551_v35  ;;  %v8120_v54 = vmul.f32 %v19750_v34, %v19534_v15  ;;  %v19881_v45 = vpop.permute.xlu0 %8150 }
 0x4de   :  { %25193 = vst [vmem:[#allocation84_spill] sm:$0xff] %v19835_v21  ;;  %25196 = vst [vmem:[#allocation14_spill] sm:$0xff] %v19849_v42  ;;  %v8124_v53 = vmul.f32 %v19803_v59, %v19565_v44  ;;  %v19872_v63 = vsel %vm8152_vm7, %v8147_v38, %v19865_v24  ;;  %v7820_v21 = vld [vmem:[%s22482_s5] sm:$0xf] }
 0x4df   :  { %25197 = vst [vmem:[#allocation82_spill] sm:$0xff] %v19853_v61  ;;  %25198 = vst [vmem:[#allocation48_spill] sm:$0xff] %v19872_v63  ;;  %v8168_v7 = vmul.f32 %v19872_v63, %v19664_v62  ;;  %v19929_v37 = vrot.slane %v7820_v21, %v25221_v27 }
 0x4e0   :  { %8432 = vrot.lane.b32.xlu1 %v8123_v41, %s14713_s27  ;;  %25199 = vst [vmem:[#allocation7_spill] sm:$0xff] %v19881_v45 }
 0x4e1   :  { %8387 = vrot.lane.b32.xlu0 %v8078_v19, %s14712_s26  ;;  %v19883_v8 = vpop.permute.xlu0 %8191  ;;  %25222 = vst [vmem:[#allocation3_spill] sm:$0xff] %v19929_v37 }
 0x4e2   :  { %25200 = vst [vmem:[#allocation45_spill] sm:$0xff] %v19883_v8 }
 0x4e4   :  { %8475 = vrot.lane.b32.xlu1 %v8167_v12, %s14714_s28 }
 0x4e5   :  { %8430 = vrot.lane.b32.xlu0 %v8122_v6, %s14713_s27  ;;  %v19885_v19 = vpop.permute.xlu0 %8199  ;;  %v19891_v6 = vpop.permute.xlu1 %8193 }
 0x4e6   :  { %25201 = vst [vmem:[#allocation2_spill] sm:$0xff] %v19885_v19  ;;  %25204 = vst [vmem:[#allocation101_spill] sm:$0xff] %v19891_v6 }
 0x4e9   :  { %8426 = vrot.lane.b32.xlu0 %v8120_v54, %s14713_s27  ;;  %v19887_v38 = vpop.permute.xlu0 %8238  ;;  %v19895_v54 = vpop.permute.xlu1 %8197 }
 0x4ea   :  { %25202 = vst [vmem:[#allocation81_spill] sm:$0xff] %v19887_v38  ;;  %25206 = vst [vmem:[#allocation64_spill] sm:$0xff] %v19895_v54 }
 0x4ed   :  { %8434 = vrot.lane.b32.xlu0 %v8124_v53, %s14713_s27  ;;  %v19889_v41 = vpop.permute.xlu0 %8246 }
 0x4ee   :  { %25203 = vst [vmem:[#allocation40_spill] sm:$0xff] %v19889_v41 }
 0x4f1   :  { %8477 = vrot.lane.b32.xlu0 %v8168_v7, %s14714_s28  ;;  %v19893_v12 = vpop.permute.xlu0 %8285  ;;  %v19899_v7 = vpop.permute.xlu1 %8240 }
 0x4f2   :  { %25205 = vst [vmem:[#allocation63_spill] sm:$0xff] %v19893_v12  ;;  %25208 = vst [vmem:[#allocation20_spill] sm:$0xff] %v19899_v7 }
 0x4f5   :  { %8473 = vrot.lane.b32.xlu0 %v8166_v30, %s14714_s28  ;;  %v19897_v53 = vpop.permute.xlu0 %8293  ;;  %v19903_v9 = vpop.permute.xlu1 %8244 }
 0x4f6   :  { %25207 = vst [vmem:[#allocation9_spill] sm:$0xff] %v19897_v53  ;;  %25210 = vst [vmem:[#allocation24_spill] sm:$0xff] %v19903_v9  ;;  %v25223_v53 = vld [vmem:[#allocation104_spill] sm:$0xff] }
 0x4f9   :  { %v19901_v30 = vpop.permute.xlu0 %8332  ;;  %v19907_v48 = vpop.permute.xlu1 %8287 }
 0x4fa   :  { %25209 = vst [vmem:[#allocation72_spill] sm:$0xff] %v19901_v30  ;;  %25212 = vst [vmem:[#allocation85_spill] sm:$0xff] %v19907_v48  ;;  %v19932_v30 = vrot.slane %v7820_v21, %v25223_v53 }
 0x4fc   :  { %25224 = vst [vmem:[#allocation52_spill] sm:$0xff] %v19932_v30 }
 0x4fd   :  { %v19905_v29 = vpop.permute.xlu0 %8340  ;;  %v19911_v46 = vpop.permute.xlu1 %8291 }
 0x4fe   :  { %25211 = vst [vmem:[#allocation30_spill] sm:$0xff] %v19905_v29  ;;  %25214 = vst [vmem:[#allocation91_spill] sm:$0xff] %v19911_v46 }
 0x501   :  { %v19909_v18 = vpop.permute.xlu0 %8195  ;;  %v19915_v36 = vpop.permute.xlu1 %8334 }
 0x502   :  { %25213 = vst [vmem:[#allocation88_spill] sm:$0xff] %v19909_v18  ;;  %25216 = vst [vmem:[#allocation105_spill] sm:$0xff] %v19915_v36  ;;  %v25225_v36 = vld [vmem:[#allocation69_spill] sm:$0xff] }
 0x505   :  { %v19913_v11 = vpop.permute.xlu0 %8242  ;;  %v19919_v52 = vpop.permute.xlu1 %8338 }
 0x506   :  { %25215 = vst [vmem:[#allocation68_spill] sm:$0xff] %v19913_v11  ;;  %25218 = vst [vmem:[#allocation47_spill] sm:$0xff] %v19919_v52  ;;  %v25227_v52 = vld [vmem:[#allocation56_spill] sm:$0xff] }
 0x507   :  { %v19938_v11 = vrot.slane %v7820_v21, %v25227_v52  ;;  %v7849_v52 = vmul.f32 %v19932_v30, %v19573_v3 }
 0x509   :  { %v19917_v4 = vpop.permute.xlu0 %8289  ;;  %v19926_v13 = vpop.permute.xlu1 %8381  ;;  %25228 = vst [vmem:[#allocation65_spill] sm:$0xff] %v19938_v11 }
 0x50a   :  { %25217 = vst [vmem:[#allocation70_spill] sm:$0xff] %v19917_v4  ;;  %25220 = vst [vmem:[#allocation4_spill] sm:$0xff] %v19926_v13  ;;  %v19935_v4 = vrot.slane %v7820_v21, %v25225_v36  ;;  %v7847_v13 = vmul.f32 %v19929_v37, %v19551_v35  ;;  %v7848_v35 = vmul.f32 %v19938_v11, %v19664_v62 }
 0x50c   :  { %25226 = vst [vmem:[#allocation98_spill] sm:$0xff] %v19935_v4  ;;  %v7846_v21 = vmul.f32 %v19935_v4, %v19534_v15 }
 0x50d   :  { %v19924_v20 = vpop.permute.xlu0 %8336 }
 0x50e   :  { %25219 = vst [vmem:[#allocation102_spill] sm:$0xff] %v19924_v20 }
 0x542   :  { %v7788_v29 = vpop.permute.xlu1 %7787 }
 0x543   :  { %v7784_v46 = vpop.permute.xlu0 %7783 }
 0x544   :  { %v19941_v18 = vsel %vm7799_vm1, 0.0, %v7784_v46 }
 0x545   :  { %v7886_v27 = vmul.f32 %v19521_v58, %v19941_v18  ;;  %v7842_v20 = vmul.f32 %v19935_v4, %v19941_v18  ;;  %v7932_v48 = vmul.f32 %v19560_v14, %v19941_v18 }
 0x546   :  { %v7786_v36 = vpop.permute.xlu1 %7785 }
 0x547   :  { %v7790_v53 = vpop.permute.xlu0 %7789  ;;  %8181 = vrot.lane.b32.xlu1 %v7886_v27, %s14708_s0  ;;  %v8513_v9 = vand.u32 4294901760, %v7842_v20  ;;  %v19960_v58 = vsel %vm7799_vm1, %v7784_v46, %v7786_v36  ;;  %v19963_v12 = vsel %vm7799_vm1, %v7786_v36, %v7788_v29  ;;  %v8515_v27 = vand.u32 4294901760, %v7847_v13 }
 0x548   :  { %v19957_v41 = vsel %vm7799_vm1, %v7788_v29, %v7790_v53  ;;  %v7888_v15 = vmul.f32 %v19669_v2, %v19963_v12  ;;  %v7843_v62 = vmul.f32 %v19929_v37, %v19960_v58  ;;  %v19974_v54 = vsel %vm7799_vm1, %v7790_v53, 0.0 }
 0x549   :  { %v7845_v4 = vmul.f32 %v19932_v30, %v19957_v41  ;;  %v19976_v46 = vsub.f32 %v7842_v20, %v8513_v9  ;;  %v7844_v29 = vmul.f32 %v19938_v11, %v19963_v12  ;;  %v9435_v2 = vand.u32 4294901760, %v7849_v52 }
 0x54a   :  { %8185 = vrot.lane.b32.xlu0 %v7888_v15, %s14708_s0  ;;  %v19984_v14 = vpop.permute.xlu1 %8385  ;;  %v8511_v19 = vand.u32 4294901760, %v7843_v62  ;;  %v19986_v37 = vsub.f32 %v7847_v13, %v8515_v27  ;;  %v8517_v53 = vand.u32 4294901760, %v7846_v21  ;;  %v9437_v20 = vand.u32 4294901760, %v7848_v35 }
 0x54b   :  { %25229 = vst [vmem:[#allocation78_spill] sm:$0xff] %v19976_v46  ;;  %v19980_v36 = vpop.permute.xlu0 %8383  ;;  %8228 = vrot.lane.b32.xlu1 %v7932_v48, %s14709_s25  ;;  %25231 = vst [vmem:[#allocation38_spill] sm:$0xff] %v19984_v14  ;;  %v9431_v30 = vand.u32 4294901760, %v7845_v4  ;;  %v9433_v38 = vand.u32 4294901760, %v7844_v29  ;;  %v7977_v11 = vmul.f32 %v19605_v10, %v19941_v18  ;;  %v7890_v48 = vmul.f32 %v19575_v40, %v19974_v54 }
 0x54c   :  { %25230 = vst [vmem:[#allocation51_spill] sm:$0xff] %v19980_v36  ;;  %25232 = vst [vmem:[#allocation95_spill] sm:$0xff] %v19986_v37  ;;  %v19996_v15 = vpack.c.bf16 %v8515_v27, %v8511_v19  ;;  %v19998_v14 = vsub.f32 %v7843_v62, %v8511_v19  ;;  %v20014_v19 = vsub.f32 %v7849_v52, %v9435_v2  ;;  %v25246_v10 = vand.u32 4294901760, %v19976_v46 }
 0x54d   :  { %v19988_v7 = vpack.c.bf16 %v9435_v2, %v9431_v30  ;;  %v19990_v8 = vsub.f32 %v7845_v4, %v9431_v30  ;;  %v20000_v36 = vpack.c.bf16 %v9437_v20, %v9433_v38  ;;  %v20002_v13 = vsub.f32 %v7844_v29, %v9433_v38 }
 0x54e   :  { %25235 = vst [vmem:[#allocation60_spill] sm:$0xff] %v19996_v15  ;;  %25236 = vst [vmem:[#allocation27_spill] sm:$0xff] %v19998_v14  ;;  %v20008_v4 = vpack.c.bf16 %v8517_v53, %v8513_v9  ;;  %8189 = vrot.lane.b32.xlu0 %v7890_v48, %s14708_s0  ;;  %13892 = vmatprep.subr.bf16.mxu1 %v19996_v15  ;;  %v20012_v30 = vsub.f32 %v7846_v21, %v8517_v53  ;;  %v20016_v27 = vpop.permute.xlu1 %8428 }
 0x54f   :  { %25233 = vst [vmem:[#allocation32_spill] sm:$0xff] %v19988_v7  ;;  %25234 = vst [vmem:[#allocation23_spill] sm:$0xff] %v19990_v8  ;;  %14108 = vmatprep.subr.bf16.mxu0 %v19988_v7  ;;  %v20005_v6 = vpop.permute.xlu0 %8379  ;;  %8275 = vrot.lane.b32.xlu1 %v7977_v11, %s14710_s1  ;;  %v8023_v38 = vmul.f32 %v19633_v16, %v19941_v18  ;;  %v23305_v11 = vand.u32 4294901760, %v19986_v37  ;;  %v7934_v9 = vmul.f32 %v19686_v55, %v19963_v12 }
 0x550   :  { %25237 = vst [vmem:[#allocation6_spill] sm:$0xff] %v20000_v36  ;;  %25238 = vst [vmem:[#allocation93_spill] sm:$0xff] %v20002_v13  ;;  %13894 = vmatpush1.bf16.msra.mxu1 %v20008_v4  ;;  %14110 = vmatpush1.bf16.msra.mxu0 %v20000_v36  ;;  %v20025_v62 = vsub.f32 %v7848_v35, %v9437_v20  ;;  %v8069_v29 = vmul.f32 %v19679_v22, %v19941_v18  ;;  %v25244_v48 = vand.u32 4294901760, %v20012_v30 }
 0x551   :  { %25239 = vst [vmem:[#allocation25_spill] sm:$0xff] %v20008_v4  ;;  %25240 = vst [vmem:[#allocation42_spill] sm:$0xff] %v20012_v30  ;;  %v8643_v53 = vsub.f32 %v19986_v37, %v23305_v11  ;;  %v7936_v20 = vmul.f32 %v19608_v43, %v19974_v54  ;;  %v25243_v11 = vand.u32 4294901760, %v19998_v14  ;;  %v7979_v52 = vmul.f32 %v19699_v31, %v19963_v12 }
 0x552   :  { %25241 = vst [vmem:[#allocation66_spill] sm:$0xff] %v20014_v19  ;;  %25242 = vst [vmem:[#allocation61_spill] sm:$0xff] %v20025_v62  ;;  %8232 = vrot.lane.b32.xlu0 %v7934_v9, %s14709_s25  ;;  %v8649_v43 = vsub.f32 %v20012_v30, %v25244_v48  ;;  %v25245_v22 = vand.u32 4294901760, %v20014_v19  ;;  %v23319_v55 = vand.u32 4294901760, %v19990_v8  ;;  %v23318_v48 = vand.u32 4294901760, %v20002_v13 }
 0x553   :  { %v20027_v21 = vpop.permute.xlu0 %8387  ;;  %8322 = vrot.lane.b32.xlu1 %v8023_v38, %s14711_s2  ;;  %v20042_v38 = vpop.permute.xlu1 %8432  ;;  %v8631_v35 = vsub.f32 %v19998_v14, %v25243_v11  ;;  %v8644_v40 = vand.u32 4294901760, %v8643_v53  ;;  %v8637_v11 = vsub.f32 %v19976_v46, %v25246_v10  ;;  %v8161_v36 = vmul.f32 %v19841_v60, %v19941_v18 }
 0x554   :  { %v9563_v16 = vsub.f32 %v20014_v19, %v25245_v22  ;;  %v9551_v10 = vsub.f32 %v19990_v8, %v23319_v55  ;;  %v25283_v8 = vld [vmem:[#allocation102_spill] sm:$0xff] }
 0x555   :  { %v8638_v22 = vand.u32 4294901760, %v8637_v11  ;;  %v25291_v19 = vld [vmem:[#allocation30_spill] sm:$0xff] }
 0x556   :  { %8236 = vrot.lane.b32.xlu0 %v7936_v20, %s14709_s25  ;;  %v8632_v20 = vand.u32 4294901760, %v8631_v35  ;;  %v8650_v35 = vand.u32 4294901760, %v8649_v43 }
 0x557   :  { %v20044_v9 = vpop.permute.xlu0 %8430  ;;  %8369 = vrot.lane.b32.xlu1 %v8069_v29, %s14712_s26  ;;  %v8115_v29 = vmul.f32 %v19750_v34, %v19941_v18  ;;  %v25247_v34 = vand.u32 4294901760, %v20025_v62 }
 0x558   :  { %v20051_v2 = vsel %vm8436_vm8, %v20044_v9, %v20042_v38  ;;  %v20077_v53 = vpack.c.bf16 %v8644_v40, %v8632_v20  ;;  %v20089_v7 = vpack.c.bf16 %v8650_v35, %v8638_v22  ;;  %v9552_v40 = vand.u32 4294901760, %v9551_v10 }
 0x559   :  { %v9569_v31 = vsub.f32 %v20025_v62, %v25247_v34  ;;  %v7981_v34 = vmul.f32 %v19636_v5, %v19974_v54  ;;  %v8025_v22 = vmul.f32 %v19705_v50, %v19963_v12  ;;  %v7889_v35 = vmul.f32 %v19583_v26, %v19957_v41  ;;  %v25266_v26 = vld [vmem:[#allocation40_spill] sm:$0xff] }
 0x55a   :  { %8279 = vrot.lane.b32.xlu0 %v7979_v52, %s14710_s1  ;;  %25248 = vst [vmem:[#allocation62_spill] sm:$0xff] %v20077_v53  ;;  %25249 = vst [vmem:[#allocation79_spill] sm:$0xff] %v20089_v7  ;;  %v9564_v52 = vand.u32 4294901760, %v9563_v16  ;;  %v8027_v10 = vmul.f32 %v19658_v39, %v19974_v54  ;;  %v25259_v16 = vld [vmem:[#allocation81_spill] sm:$0xff]  ;;  %v25275_v50 = vld [vmem:[#allocation72_spill] sm:$0xff] }
 0x55b   :  { %8416 = vrot.lane.b32.xlu1 %v8115_v29, %s14713_s27  ;;  %v9557_v29 = vsub.f32 %v20002_v13, %v23318_v48  ;;  %v9570_v20 = vand.u32 4294901760, %v9569_v31  ;;  %v7887_v48 = vmul.f32 %v19558_v1, %v19960_v58  ;;  %v25258_v31 = vld [vmem:[#allocation20_spill] sm:$0xff]  ;;  %v25263_v39 = vld [vmem:[#allocation85_spill] sm:$0xff]  ;;  %v25278_v1 = vld [vmem:[#allocation91_spill] sm:$0xff] }
 0x55c   :  { %v20093_v11 = vpack.c.bf16 %v9564_v52, %v9552_v40  ;;  %v8073_v40 = vmul.f32 %v19729_v47, %v19974_v54  ;;  %v7978_v52 = vmul.f32 %v19629_v49, %v19960_v58  ;;  %v20223_v18 = vsel %vm8248_vm10, %v25259_v16, %v25258_v31  ;;  %v25262_v47 = vld [vmem:[#allocation64_spill] sm:$0xff]  ;;  %v25264_v16 = vld [vmem:[#allocation63_spill] sm:$0xff] }
 0x55d   :  { %v9558_v43 = vand.u32 4294901760, %v9557_v29  ;;  %v7933_v29 = vmul.f32 %v19597_v32, %v19960_v58  ;;  %v25277_v32 = vld [vmem:[#allocation9_spill] sm:$0xff] }
 0x55e   :  { %8283 = vrot.lane.b32.xlu0 %v7981_v34, %s14710_s1  ;;  %25250 = vst [vmem:[#allocation37_spill] sm:$0xff] %v20093_v11  ;;  %v8071_v34 = vmul.f32 %v19748_v56, %v19963_v12  ;;  %v25268_v56 = vld [vmem:[#allocation88_spill] sm:$0xff] }
 0x55f   :  { %8463 = vrot.lane.b32.xlu1 %v8161_v36, %s14714_s28  ;;  %v20099_v55 = vpack.c.bf16 %v9570_v20, %v9558_v43  ;;  %v8117_v43 = vmul.f32 %v19849_v42, %v19963_v12  ;;  %v7980_v20 = vmul.f32 %v19643_v33, %v19957_v41  ;;  %v20243_v33 = vsel %vm8295_vm11, %v25264_v16, %v25263_v39 }
 0x561   :  { %25251 = vst [vmem:[#allocation28_spill] sm:$0xff] %v20099_v55 }
 0x562   :  { %8326 = vrot.lane.b32.xlu0 %v8025_v22, %s14711_s2  ;;  %v8119_v22 = vmul.f32 %v19803_v59, %v19974_v54 }
 0x563   :  { %8183 = vrot.lane.b32.xlu1 %v7887_v48, %s14708_s0  ;;  %v7935_v48 = vmul.f32 %v19615_v17, %v19957_v41 }
 0x566   :  { %8330 = vrot.lane.b32.xlu0 %v8027_v10, %s14711_s2  ;;  %v8163_v10 = vmul.f32 %v19872_v63, %v19963_v12  ;;  %v8170_v12 = vmul.f32 %v19881_v45, %v19565_v44  ;;  %v8162_v44 = vmul.f32 %v19853_v61, %v19960_v58  ;;  %v25267_v63 = vld [vmem:[#allocation24_spill] sm:$0xff] }
 0x567   :  { %8187 = vrot.lane.b32.xlu1 %v7889_v35, %s14708_s0  ;;  %v8024_v35 = vmul.f32 %v19653_v28, %v19960_v58  ;;  %v20256_v60 = vsel %vm8248_vm10, %v25267_v63, %v25266_v26 }
 0x568   :  { %v25281_v13 = vand.u32 4294901760, %v20256_v60 }
 0x56a   :  { %8373 = vrot.lane.b32.xlu0 %v8071_v34, %s14712_s26  ;;  %v8165_v34 = vmul.f32 %v19881_v45, %v19974_v54  ;;  %v8116_v54 = vmul.f32 %v19759_v51, %v19960_v58 }
 0x56b   :  { %8230 = vrot.lane.b32.xlu1 %v7933_v29, %s14709_s25  ;;  %v8026_v29 = vmul.f32 %v19675_v57, %v19957_v41 }
 0x56e   :  { %8377 = vrot.lane.b32.xlu0 %v8073_v40, %s14712_s26  ;;  %v8072_v40 = vmul.f32 %v19765_v25, %v19957_v41  ;;  %v25261_v25 = vld [vmem:[#allocation2_spill] sm:$0xff] }
 0x56f   :  { %8234 = vrot.lane.b32.xlu1 %v7935_v48, %s14709_s25  ;;  %v8070_v48 = vmul.f32 %v19690_v23, %v19960_v58  ;;  %v20238_v57 = vsel %vm8201_vm9, %v25262_v47, %v25261_v25 }
 0x570   :  { %v23343_v25 = vand.u32 4294901760, %v20238_v57 }
 0x572   :  { %8420 = vrot.lane.b32.xlu0 %v8117_v43, %s14713_s27  ;;  %v8501_v43 = vld [vmem:[%s22483_s6 + $0x8] sm:$0xff]  ;;  %v20280_v42 = vsub.f32 %v20238_v57, %v23343_v25 }
 0x573   :  { %8277 = vrot.lane.b32.xlu1 %v7978_v52, %s14710_s1  ;;  %v8118_v52 = vmul.f32 %v19833_v0, %v19957_v41  ;;  %v23336_v0 = vand.u32 4294901760, %v20223_v18 }
 0x574   :  { %25270 = vst [vmem:[#allocation96_spill] sm:$0xff] %v20280_v42 }
 0x575   :  { %v20248_v5 = vsub.f32 %v20223_v18, %v23336_v0  ;;  %v25271_v0 = vand.u32 4294901760, %v20243_v33 }
 0x576   :  { %8424 = vrot.lane.b32.xlu0 %v8119_v22, %s14713_s27  ;;  %v20178_v22 = vsel %vm8152_vm7, %v19865_v24, %v19881_v45 }
 0x577   :  { %8281 = vrot.lane.b32.xlu1 %v7980_v20, %s14710_s1  ;;  %v8509_v20 = vsel %vm53_vm0, %v8501_v43, 0  ;;  %25252 = vst [vmem:[#allocation13_spill] sm:$0xff] %v20178_v22  ;;  %25265 = vst [vmem:[#allocation44_spill] sm:$0xff] %v20248_v5  ;;  %v20285_v23 = vsub.f32 %v20243_v33, %v25271_v0  ;;  %v20305_v0 = vsel %vm8295_vm11, %v25278_v1, %v25277_v32  ;;  %v25280_v4 = vand.u32 4294901760, %v20248_v5 }
 0x578   :  { %v20325_v32 = vsub.f32 %v20256_v60, %v25281_v13 }
 0x579   :  { %25272 = vst [vmem:[#allocation92_spill] sm:$0xff] %v20285_v23  ;;  %v20320_v15 = vsub.f32 %v20248_v5, %v25280_v4  ;;  %v25284_v5 = vld [vmem:[#allocation47_spill] sm:$0xff] }
 0x57a   :  { %8467 = vrot.lane.b32.xlu0 %v8163_v10, %s14714_s28  ;;  %v8164_v10 = vmul.f32 %v20178_v22, %v19957_v41  ;;  %v20196_v41 = vpop.permute.xlu0 %8426  ;;  %25282 = vst [vmem:[#allocation69_spill] sm:$0xff] %v20325_v32  ;;  %v20342_v13 = vsel %vm8342_vm12, %v25283_v8, %v25284_v5 }
 0x57b   :  { %8324 = vrot.lane.b32.xlu1 %v8024_v35, %s14711_s2  ;;  %v20180_v35 = vand.u32 4294901760, %v8509_v20 }
 0x57d   :  { %25253 = vst [vmem:[#allocation5_spill] sm:$0xff] %v20180_v35  ;;  %v20185_v58 = vsub.f32 %v8509_v20, %v20180_v35  ;;  %v25256_v20 = vld [vmem:[#allocation101_spill] sm:$0xff] }
 0x57e   :  { %8471 = vrot.lane.b32.xlu0 %v8165_v34, %s14714_s28  ;;  %v8169_v34 = vmul.f32 %v20178_v22, %v19573_v3  ;;  %v8207_v61 = vsel %vm8201_vm9, %v25256_v20, %v25268_v56 }
 0x57f   :  { %8328 = vrot.lane.b32.xlu1 %v8026_v29, %s14711_s2  ;;  %25254 = vst [vmem:[#allocation21_spill] sm:$0xff] %v20185_v58  ;;  %v20189_v29 = vand.u32 4294901760, %v20185_v58  ;;  %v8523_v62 = vand.u32 4294901760, %v8207_v61 }
 0x581   :  { %25255 = vst [vmem:[#allocation54_spill] sm:$0xff] %v20189_v29  ;;  %v8614_v24 = vsub.f32 %v20185_v58, %v20189_v29  ;;  %v25279_v29 = vld [vmem:[#allocation70_spill] sm:$0xff]  ;;  %v20365_v46 = vsub.f32 %v8207_v61, %v8523_v62  ;;  %v20380_v58 = vsel %vm8342_vm12, %v25284_v5, %v25291_v19  ;;  %v25300_v5 = vand.u32 4294901760, %v20285_v23 }
 0x582   :  { %8481 = vrot.lane.b32.xlu0 %v8170_v12, %s14714_s28  ;;  %v20198_v12 = vpop.permute.xlu0 %8434 }
 0x583   :  { %8371 = vrot.lane.b32.xlu1 %v8070_v48, %s14712_s26  ;;  %v8615_v48 = vand.u32 4294901760, %v8614_v24  ;;  %25286 = vst [vmem:[#allocation101_spill] sm:$0xff] %v20365_v46  ;;  %v20403_v19 = vsub.f32 %v20285_v23, %v25300_v5  ;;  %v25306_v5 = vand.u32 4294901760, %v20342_v13 }
 0x585   :  { %8616 = vmatprep.mubr.f32.mxu1 %v8615_v48  ;;  %9536 = vmatprep.mubr.f32.mxu0 %v8615_v48  ;;  %25301 = vst [vmem:[#allocation63_spill] sm:$0xff] %v20403_v19 }
 0x587   :  { %8375 = vrot.lane.b32.xlu1 %v8072_v40, %s14712_s26  ;;  %v20200_v40 = vpop.permute.xlu0 %8477 }
 0x58b   :  { %8418 = vrot.lane.b32.xlu1 %v8116_v54, %s14713_s27  ;;  %v20202_v54 = vpop.permute.xlu1 %8475 }
 0x58f   :  { %8422 = vrot.lane.b32.xlu1 %v8118_v52, %s14713_s27  ;;  %v20204_v52 = vpop.permute.xlu0 %8473 }
 0x593   :  { %8465 = vrot.lane.b32.xlu1 %v8162_v44, %s14714_s28 }
 0x597   :  { %8469 = vrot.lane.b32.xlu1 %v8164_v10, %s14714_s28  ;;  %v25257_v10 = vld [vmem:[#allocation45_spill] sm:$0xff] }
 0x59b   :  { %8479 = vrot.lane.b32.xlu1 %v8169_v34, %s14714_s28  ;;  %v20213_v34 = vsel %vm8201_vm9, %v25257_v10, %v25256_v20 }
 0x59c   :  { %v8525_v36 = vand.u32 4294901760, %v20213_v34 }
 0x59e   :  { %v20231_v10 = vsub.f32 %v20213_v34, %v8525_v36  ;;  %v20267_v34 = vsel %vm8201_vm9, %v25268_v56, %v25262_v47  ;;  %v25273_v47 = vld [vmem:[#allocation68_spill] sm:$0xff] }
 0x59f   :  { %v20290_v28 = vsel %vm8248_vm10, %v25258_v31, %v25273_v47  ;;  %v9445_v25 = vand.u32 4294901760, %v20267_v34  ;;  %v20310_v31 = vsel %vm8248_vm10, %v25273_v47, %v25267_v63  ;;  %v20330_v63 = vsel %vm8295_vm11, %v25263_v39, %v25279_v29 }
 0x5a0   :  { %25260 = vst [vmem:[#allocation33_spill] sm:$0xff] %v20231_v10  ;;  %v25269_v51 = vand.u32 4294901760, %v20231_v10 }
 0x5a2   :  { %v20272_v26 = vsub.f32 %v20231_v10, %v25269_v51  ;;  %v25274_v51 = vld [vmem:[#allocation105_spill] sm:$0xff] }
 0x5a3   :  { %v20295_v49 = vsel %vm8342_vm12, %v25275_v50, %v25274_v51  ;;  %v20315_v50 = vsel %vm8295_vm11, %v25279_v29, %v25278_v1  ;;  %v20337_v4 = vsel %vm8342_vm12, %v25274_v51, %v25283_v8  ;;  %v20349_v1 = vsub.f32 %v20267_v34, %v9445_v25 }
 0x5a4   :  { %v25287_v51 = vand.u32 4294901760, %v20290_v28  ;;  %v25292_v29 = vand.u32 4294901760, %v20310_v31  ;;  %v25294_v34 = vand.u32 4294901760, %v20315_v50 }
 0x5a5   :  { %25285 = vst [vmem:[#allocation56_spill] sm:$0xff] %v20349_v1 }
 0x5a6   :  { %v20385_v61 = vsub.f32 %v20310_v31, %v25292_v29  ;;  %v25302_v29 = vand.u32 4294901760, %v20330_v63 }
 0x5a8   :  { %25293 = vst [vmem:[#allocation81_spill] sm:$0xff] %v20385_v61  ;;  %v20408_v35 = vsub.f32 %v20330_v63, %v25302_v29  ;;  %v20427_v29 = vsub.f32 %v20342_v13, %v25306_v5 }
 0x5aa   :  { %25303 = vst [vmem:[#allocation40_spill] sm:$0xff] %v20408_v35  ;;  %25307 = vst [vmem:[#allocation88_spill] sm:$0xff] %v20427_v29 }
 0x5b9   :  { %v8182_v44 = vpop.permute.xlu1 %8181 }
 0x5bc   :  { %v20206_v3 = vpop.permute.xlu0 %8185 }
 0x5bd   :  { %v20208_v43 = vpop.permute.xlu1 %8228 }
 0x5c0   :  { %v20217_v48 = vpop.permute.xlu0 %8189 }
 0x5c1   :  { %v20215_v24 = vpop.permute.xlu1 %8275 }
 0x5c4   :  { %v20227_v45 = vpop.permute.xlu0 %8232 }
 0x5c5   :  { %v20225_v22 = vpop.permute.xlu1 %8322 }
 0x5c8   :  { %v20250_v17 = vpop.permute.xlu0 %8236 }
 0x5c9   :  { %v20233_v59 = vpop.permute.xlu1 %8369 }
 0x5cc   :  { %v20297_v56 = vpop.permute.xlu0 %8279 }
 0x5cd   :  { %v20260_v16 = vpop.permute.xlu1 %8416 }
 0x5d0   :  { %v20361_v39 = vpop.permute.xlu0 %8283 }
 0x5d1   :  { %v20299_v20 = vpop.permute.xlu1 %8463 }
 0x5d2   :  { %25276 = vst [vmem:[#allocation104_spill] sm:$0xff] %v20299_v20 }
 0x5d4   :  { %v20438_v5 = vpop.permute.xlu0 %8326 }
 0x5d5   :  { %v8184_v47 = vpop.permute.xlu1 %8183 }
 0x5d6   :  { %v20353_v10 = vsel %vm8201_vm9, %v8182_v44, %v8184_v47  ;;  %v20357_v8 = vsel %vm8201_vm9, %v8184_v47, %v20206_v3  ;;  %v20370_v44 = vsub.f32 %v20290_v28, %v25287_v51  ;;  %v25289_v47 = vand.u32 4294901760, %v20295_v49 }
 0x5d7   :  { %v20390_v51 = vsub.f32 %v20315_v50, %v25294_v34  ;;  %v25296_v14 = vand.u32 4294901760, %v20353_v10  ;;  %v25298_v55 = vand.u32 4294901760, %v20357_v8 }
 0x5d8   :  { %25288 = vst [vmem:[#allocation45_spill] sm:$0xff] %v20370_v44  ;;  %v20375_v30 = vsub.f32 %v20295_v49, %v25289_v47 }
 0x5d9   :  { %25295 = vst [vmem:[#allocation2_spill] sm:$0xff] %v20390_v51  ;;  %v20394_v37 = vpack.c.bf16 %v8525_v36, %v25296_v14  ;;  %v8188_v47 = vpop.permute.xlu1 %8187  ;;  %v20398_v11 = vpack.c.bf16 %v8523_v62, %v25298_v55  ;;  %v25304_v62 = vand.u32 4294901760, %v20337_v4 }
 0x5da   :  { %25290 = vst [vmem:[#allocation20_spill] sm:$0xff] %v20375_v30  ;;  %v20412_v34 = vsel %vm8201_vm9, %v20206_v3, %v8188_v47  ;;  %v20416_v14 = vsel %vm8201_vm9, %v8188_v47, %v20217_v48 }
 0x5db   :  { %25297 = vst [vmem:[#allocation64_spill] sm:$0xff] %v20394_v37  ;;  %25299 = vst [vmem:[#allocation85_spill] sm:$0xff] %v20398_v11  ;;  %v20422_v36 = vsub.f32 %v20337_v4, %v25304_v62  ;;  %v23382_v23 = vand.u32 4294901760, %v20416_v14  ;;  %13896 = vmatprep.subr.bf16.mxu1 %v20398_v11  ;;  %v23383_v47 = vand.u32 4294901760, %v20412_v34  ;;  %v25308_v11 = vand.u32 4294901760, %v20238_v57 }
 0x5dc   :  { %13898 = vmatpush1.bf16.msra.mxu1 %v20394_v37  ;;  %v25315_v57 = vand.u32 4294901760, %v20375_v30 }
 0x5dd   :  { %25305 = vst [vmem:[#allocation24_spill] sm:$0xff] %v20422_v36  ;;  %v8231_v53 = vpop.permute.xlu1 %8230  ;;  %v20444_v3 = vpack.c.bf16 %v25308_v11, %v23382_v23  ;;  %v20449_v37 = vpack.c.bf16 %v9445_v25, %v23383_v47  ;;  %v25312_v47 = vand.u32 4294901760, %v20349_v1  ;;  %v25316_v11 = vand.u32 4294901760, %v20365_v46 }
 0x5de   :  { %v20453_v55 = vsel %vm8248_vm10, %v20208_v43, %v8231_v53  ;;  %v20457_v7 = vsel %vm8248_vm10, %v8231_v53, %v20227_v45  ;;  %v25313_v53 = vand.u32 4294901760, %v20305_v0  ;;  %v20478_v62 = vsub.f32 %v20375_v30, %v25315_v57 }
 0x5df   :  { %25309 = vst [vmem:[#allocation68_spill] sm:$0xff] %v20444_v3  ;;  %25310 = vst [vmem:[#allocation105_spill] sm:$0xff] %v20449_v37  ;;  %14112 = vmatprep.subr.bf16.mxu0 %v20444_v3  ;;  %v20468_v43 = vsub.f32 %v20349_v1, %v25312_v47  ;;  %v20484_v25 = vsub.f32 %v20365_v46, %v25316_v11  ;;  %v25317_v47 = vand.u32 4294901760, %v20380_v58  ;;  %v25320_v3 = vand.u32 4294901760, %v20223_v18 }
 0x5e0   :  { %25311 = vst [vmem:[#allocation72_spill] sm:$0xff] %v20453_v55  ;;  %v20473_v48 = vsub.f32 %v20305_v0, %v25313_v53  ;;  %14114 = vmatpush1.bf16.msra.mxu0 %v20449_v37  ;;  %v25319_v53 = vand.u32 4294901760, %v20453_v55  ;;  %v25322_v30 = vand.u32 4294901760, %v20457_v7  ;;  %v25323_v37 = vand.u32 4294901760, %v20290_v28 }
 0x5e1   :  { %v20489_v23 = vsub.f32 %v20380_v58, %v25317_v47  ;;  %v8235_v57 = vpop.permute.xlu1 %8234  ;;  %v25325_v11 = vand.u32 4294901760, %v20370_v44  ;;  %v25326_v47 = vand.u32 4294901760, %v20385_v61  ;;  %v25327_v28 = vand.u32 4294901760, %v20408_v35 }
 0x5e2   :  { %25314 = vst [vmem:[#allocation9_spill] sm:$0xff] %v20473_v48  ;;  %v20495_v1 = vpack.c.bf16 %v25320_v3, %v25319_v53  ;;  %v20501_v20 = vpack.c.bf16 %v25323_v37, %v25322_v30  ;;  %v20515_v18 = vsel %vm8248_vm10, %v20227_v45, %v8235_v57  ;;  %v20519_v3 = vsel %vm8248_vm10, %v8235_v57, %v20250_v17  ;;  %v20536_v45 = vpop.permute.xlu0 %8330 }
 0x5e3   :  { %25318 = vst [vmem:[#allocation91_spill] sm:$0xff] %v20489_v23  ;;  %v20506_v46 = vsub.f32 %v20370_v44, %v25325_v11  ;;  %v20511_v55 = vsub.f32 %v20385_v61, %v25326_v47  ;;  %v20524_v37 = vsub.f32 %v20408_v35, %v25327_v28  ;;  %v25328_v30 = vand.u32 4294901760, %v20390_v51 }
 0x5e4   :  { %25321 = vst [vmem:[#allocation70_spill] sm:$0xff] %v20495_v1  ;;  %25324 = vst [vmem:[#allocation102_spill] sm:$0xff] %v20501_v20  ;;  %v25329_v11 = vand.u32 4294901760, %v20427_v29  ;;  %13900 = vmatprep.subr.bf16.mxu1 %v20501_v20  ;;  %v25331_v57 = vand.u32 4294901760, %v20422_v36  ;;  %v25333_v61 = vand.u32 4294901760, %v20519_v3 }
 0x5e5   :  { %v20529_v53 = vsub.f32 %v20390_v51, %v25328_v30  ;;  %13902 = vmatpush1.bf16.msra.mxu1 %v20495_v1  ;;  %v8278_v20 = vpop.permute.xlu1 %8277  ;;  %v25336_v51 = vand.u32 4294901760, %v20515_v18  ;;  %v25345_v1 = vld [vmem:[#allocation38_spill] sm:$0xff] }
 0x5e6   :  { %v20534_v47 = vsub.f32 %v20427_v29, %v25329_v11  ;;  %v20543_v28 = vsub.f32 %v20422_v36, %v25331_v57  ;;  %v25332_v29 = vld [vmem:[#allocation4_spill] sm:$0xff]  ;;  %v25334_v57 = vand.u32 4294901760, %v20256_v60  ;;  %v25337_v11 = vand.u32 4294901760, %v20310_v31  ;;  %v20591_v30 = vpop.permute.xlu0 %8373 }
 0x5e7   :  { %v20552_v17 = vsel %vm8389_vm13, %v20005_v6, %v25332_v29  ;;  %v20570_v6 = vsel %vm8295_vm11, %v20215_v24, %v8278_v20  ;;  %v20574_v44 = vsel %vm8295_vm11, %v8278_v20, %v20297_v56  ;;  %v25340_v31 = vand.u32 4294901760, %v20243_v33 }
 0x5e8   :  { %25330 = vst [vmem:[#allocation47_spill] sm:$0xff] %v20534_v47  ;;  %v20558_v36 = vpack.c.bf16 %v25334_v57, %v25333_v61  ;;  %v20566_v35 = vpack.c.bf16 %v25337_v11, %v25336_v51  ;;  %v23417_v57 = vand.u32 4294901760, %v20570_v6  ;;  %v25339_v11 = vld [vmem:[#allocation51_spill] sm:$0xff]  ;;  %v20610_v19 = vsel %vm8389_vm13, %v25345_v1, %v20027_v21 }
 0x5e9   :  { %v20585_v24 = vsel %vm8389_vm13, %v25332_v29, %v25339_v11  ;;  %v8282_v61 = vpop.permute.xlu1 %8281  ;;  %v25342_v29 = vand.u32 4294901760, %v20574_v44  ;;  %v25382_v47 = vand.u32 4294901760, %v20342_v13 }
 0x5ea   :  { %25335 = vst [vmem:[#allocation30_spill] sm:$0xff] %v20558_v36  ;;  %25338 = vst [vmem:[#allocation4_spill] sm:$0xff] %v20566_v35  ;;  %14116 = vmatprep.subr.bf16.mxu0 %v20558_v36  ;;  %v20597_v51 = vpack.c.bf16 %v25340_v31, %v23417_v57  ;;  %v25343_v36 = vand.u32 4294901760, %v20330_v63  ;;  %v20614_v33 = vsel %vm8295_vm11, %v20297_v56, %v8282_v61  ;;  %v25347_v57 = vand.u32 4294901760, %v20552_v17 }
 0x5eb   :  { %14118 = vmatpush1.bf16.msra.mxu0 %v20566_v35  ;;  %v20618_v31 = vsel %vm8295_vm11, %v8282_v61, %v20361_v39  ;;  %v25346_v35 = vand.u32 4294901760, %v20280_v42  ;;  %v25349_v63 = vand.u32 4294901760, %v20325_v32  ;;  %v25356_v56 = vand.u32 4294901760, %v20315_v50 }
 0x5ec   :  { %25341 = vst [vmem:[#allocation51_spill] sm:$0xff] %v20597_v51  ;;  %v20603_v20 = vpack.c.bf16 %v25343_v36, %v25342_v29  ;;  %v20633_v39 = vsub.f32 %v20552_v17, %v25347_v57  ;;  %v25350_v29 = vld [vmem:[#allocation86_spill] sm:$0xff]  ;;  %v25351_v61 = vand.u32 4294901760, %v20618_v31 }
 0x5ed   :  { %v20627_v21 = vsub.f32 %v20280_v42, %v25346_v35  ;;  %v20640_v36 = vsub.f32 %v20325_v32, %v25349_v63  ;;  %v20646_v35 = vsel %vm8389_vm13, %v25339_v11, %v25345_v1  ;;  %v8325_v57 = vpop.permute.xlu1 %8324  ;;  %v25354_v63 = vand.u32 4294901760, %v20473_v48  ;;  %v25362_v32 = vld [vmem:[#allocation71_spill] sm:$0xff] }
 0x5ee   :  { %25344 = vst [vmem:[#allocation106_spill] sm:$0xff] %v20603_v20  ;;  %13904 = vmatprep.subr.bf16.mxu1 %v20603_v20  ;;  %25348 = vst [vmem:[#allocation38_spill] sm:$0xff] %v20633_v39  ;;  %v20664_v1 = vsel %vm8436_vm8, %v20016_v27, %v20044_v9  ;;  %v25355_v11 = vand.u32 4294901760, %v20614_v33  ;;  %v8378_v9 = vpop.permute.xlu0 %8377  ;;  %v25364_v42 = vand.u32 4294901760, %v20295_v49 }
 0x5ef   :  { %13906 = vmatpush1.bf16.msra.mxu1 %v20597_v51  ;;  %v25352_v51 = vand.u32 4294901760, %v20305_v0  ;;  %v20659_v60 = vsub.f32 %v20473_v48, %v25354_v63  ;;  %v20674_v0 = vsel %vm8342_vm12, %v20225_v22, %v8325_v57  ;;  %v25370_v48 = vand.u32 4294901760, %v20610_v19 }
 0x5f0   :  { %13908 = vmatprep.subr.bf16.mxu1 %v25350_v29  ;;  %v20670_v29 = vpack.c.bf16 %v25356_v56, %v25355_v11  ;;  %v25360_v56 = vand.u32 4294901760, %v20489_v23 }
 0x5f1   :  { %v20654_v20 = vpack.c.bf16 %v25352_v51, %v25351_v61  ;;  %v20678_v51 = vsel %vm8342_vm12, %v8325_v57, %v20438_v5  ;;  %v25358_v61 = vand.u32 4294901760, %v20585_v24  ;;  %v8329_v57 = vpop.permute.xlu1 %8328  ;;  %v20717_v50 = vsub.f32 %v20610_v19, %v25370_v48  ;;  %v8500_v48 = vld [vmem:[%s22483_s6] sm:$0xff] }
 0x5f2   :  { %25357 = vst [vmem:[#allocation108_spill] sm:$0xff] %v20670_v29  ;;  %v20691_v22 = vsub.f32 %v20489_v23, %v25360_v56  ;;  %v25366_v23 = vld [vmem:[#allocation94_spill] sm:$0xff]  ;;  %v25367_v11 = vand.u32 4294901760, %v20678_v51  ;;  %v20721_v49 = vsel %vm8342_vm12, %v20438_v5, %v8329_v57 }
 0x5f3   :  { %25353 = vst [vmem:[#allocation107_spill] sm:$0xff] %v20654_v20  ;;  %v20683_v63 = vsub.f32 %v20585_v24, %v25358_v61  ;;  %14120 = vmatprep.subr.bf16.mxu0 %v20654_v20  ;;  %13910 = vmatpush1.bf16.msra.mxu1 %v25362_v32  ;;  %v25363_v20 = vand.u32 4294901760, %v20674_v0  ;;  %v25368_v32 = vand.u32 4294901760, %v20337_v4  ;;  %25371 = vst [vmem:[#allocation113_spill] sm:$0xff] %v20717_v50  ;;  %v25372_v61 = vand.u32 4294901760, %v20646_v35 }
 0x5f4   :  { %25361 = vst [vmem:[#allocation110_spill] sm:$0xff] %v20691_v22  ;;  %14122 = vmatpush1.bf16.msra.mxu0 %v20670_v29 }
 0x5f5   :  { %25359 = vst [vmem:[#allocation109_spill] sm:$0xff] %v20683_v63  ;;  %v20704_v56 = vpack.c.bf16 %v25364_v42, %v25363_v20  ;;  %14124 = vmatprep.subr.bf16.mxu0 %v25366_v23  ;;  %v20711_v29 = vpack.c.bf16 %v25368_v32, %v25367_v11  ;;  %v20725_v42 = vsel %vm8342_vm12, %v8329_v57, %v20536_v45  ;;  %v25374_v45 = vand.u32 4294901760, %v20633_v39  ;;  %v25375_v32 = vld [vmem:[#allocation49_spill] sm:$0xff]  ;;  %v20758_v20 = vpop.permute.xlu0 %8420  ;;  %v8372_v23 = vpop.permute.xlu1 %8371 }
 0x5f6   :  { %v20736_v5 = vsub.f32 %v20646_v35, %v25372_v61  ;;  %v25376_v11 = vand.u32 4294901760, %v20664_v1  ;;  %v25385_v13 = vand.u32 4294901760, %v20683_v63 }
 0x5f7   :  { %25365 = vst [vmem:[#allocation111_spill] sm:$0xff] %v20704_v56  ;;  %25369 = vst [vmem:[#allocation112_spill] sm:$0xff] %v20711_v29  ;;  %13912 = vmatprep.subr.bf16.mxu1 %v20711_v29  ;;  %v20741_v57 = vsub.f32 %v20633_v39, %v25374_v45  ;;  %v8441_v45 = vsel %vm8436_vm8, %v20196_v41, %v20016_v27  ;;  %v20775_v27 = vsel %vm8389_vm13, %v20233_v59, %v8372_v23 }
 0x5f8   :  { %25373 = vst [vmem:[#allocation114_spill] sm:$0xff] %v20736_v5  ;;  %13914 = vmatpush1.bf16.msra.mxu1 %v20704_v56  ;;  %14126 = vmatpush1.bf16.msra.mxu0 %v25375_v32  ;;  %v20752_v61 = vsub.f32 %v20664_v1, %v25376_v11  ;;  %v25378_v32 = vand.u32 4294901760, %v20725_v42  ;;  %v25379_v56 = vand.u32 4294901760, %v20380_v58  ;;  %v25381_v11 = vand.u32 4294901760, %v20721_v49 }
 0x5f9   :  { %v20779_v41 = vsel %vm8389_vm13, %v8372_v23, %v20591_v30  ;;  %v8573_v39 = vand.u32 4294901760, %v8441_v45  ;;  %v25386_v23 = vand.u32 4294901760, %v20357_v8  ;;  %v25391_v59 = vand.u32 4294901760, %v20552_v17 }
 0x5fa   :  { %25377 = vst [vmem:[#allocation115_spill] sm:$0xff] %v20752_v61  ;;  %v20764_v29 = vpack.c.bf16 %v25379_v56, %v25378_v32  ;;  %v20771_v4 = vpack.c.bf16 %v25382_v47, %v25381_v11  ;;  %v20784_v32 = vand.u32 4294901760, %v8500_v48  ;;  %v20789_v47 = vsub.f32 %v20683_v63, %v25385_v13  ;;  %v8376_v63 = vpop.permute.xlu1 %8375 }
 0x5fb   :  { %v20796_v58 = vsub.f32 %v20357_v8, %v25386_v23  ;;  %v25390_v13 = vand.u32 4294901760, %v20775_v27  ;;  %v25393_v5 = vand.u32 4294901760, %v20779_v41  ;;  %v25394_v8 = vand.u32 4294901760, %v20585_v24 }
 0x5fc   :  { %25380 = vst [vmem:[#allocation116_spill] sm:$0xff] %v20764_v29  ;;  %25383 = vst [vmem:[#allocation117_spill] sm:$0xff] %v20771_v4  ;;  %14128 = vmatprep.subr.bf16.mxu0 %v20764_v29  ;;  %v25388_v29 = vand.u32 4294901760, %v20051_v2  ;;  %v8444_v56 = vsel %vm8436_vm8, %v20042_v38, %v20198_v12  ;;  %v25396_v17 = vand.u32 4294901760, %v20717_v50  ;;  %v20835_v24 = vsel %vm8483_vm14, %v20202_v54, %v20200_v40 }
 0x5fd   :  { %25384 = vst [vmem:[#allocation118_spill] sm:$0xff] %v20784_v32  ;;  %25387 = vst [vmem:[#allocation119_spill] sm:$0xff] %v20796_v58  ;;  %14130 = vmatpush1.bf16.msra.mxu0 %v20771_v4  ;;  %v20809_v11 = vpack.c.bf16 %v25391_v59, %v25390_v13  ;;  %v20815_v23 = vpack.c.bf16 %v25394_v8, %v25393_v5  ;;  %v20825_v4 = vsel %vm8389_vm13, %v8376_v63, %v8378_v9  ;;  %v8425_v5 = vpop.permute.xlu0 %8424 }
 0x5fe   :  { %v20803_v22 = vsub.f32 %v20051_v2, %v25388_v29  ;;  %v20822_v29 = vsel %vm8389_vm13, %v20591_v30, %v8376_v63  ;;  %v20830_v59 = vsub.f32 %v20717_v50, %v25396_v17  ;;  %v20840_v12 = vsub.f32 %v8500_v48, %v20784_v32  ;;  %v8419_v30 = vpop.permute.xlu1 %8418 }
 0x5ff   :  { %25392 = vst [vmem:[#allocation121_spill] sm:$0xff] %v20809_v11  ;;  %25395 = vst [vmem:[#allocation122_spill] sm:$0xff] %v20815_v23  ;;  %13916 = vmatprep.subr.bf16.mxu1 %v20815_v23  ;;  %v20843_v63 = vsub.f32 %v8441_v45, %v8573_v39  ;;  %v25399_v13 = vand.u32 4294901760, %v20353_v10  ;;  %v9491_v38 = vand.u32 4294901760, %v8444_v56  ;;  %v25401_v23 = vand.u32 4294901760, %v20412_v34 }
 0x600   :  { %25389 = vst [vmem:[#allocation120_spill] sm:$0xff] %v20803_v22  ;;  %25397 = vst [vmem:[#allocation123_spill] sm:$0xff] %v20830_v59  ;;  %13918 = vmatpush1.bf16.msra.mxu1 %v20809_v11  ;;  %v25403_v45 = vand.u32 4294901760, %v20825_v4  ;;  %v25404_v9 = vand.u32 4294901760, %v20610_v19  ;;  %v8579_v17 = vand.u32 4294901760, %v20835_v24  ;;  %v25407_v11 = vand.u32 4294901760, %v20822_v29 }
 0x601   :  { %25398 = vst [vmem:[#allocation124_spill] sm:$0xff] %v20840_v12  ;;  %v20849_v8 = vsub.f32 %v20353_v10, %v25399_v13  ;;  %v20856_v48 = vsub.f32 %v20412_v34, %v25401_v23  ;;  %v25406_v10 = vand.u32 4294901760, %v20752_v61  ;;  %v25408_v32 = vand.u32 4294901760, %v20646_v35 }
 0x602   :  { %v20862_v50 = vpack.c.bf16 %v25404_v9, %v25403_v45  ;;  %v20878_v23 = vsel %vm8436_vm8, %v20260_v16, %v8419_v30  ;;  %v20882_v19 = vsel %vm8436_vm8, %v8419_v30, %v20758_v20  ;;  %v8488_v9 = vsel %vm8483_vm14, %v20204_v52, %v20202_v54  ;;  %v25413_v30 = vld [vmem:[#allocation72_spill] sm:$0xff] }
 0x603   :  { %25400 = vst [vmem:[#allocation125_spill] sm:$0xff] %v20849_v8  ;;  %25402 = vst [vmem:[#allocation126_spill] sm:$0xff] %v20856_v48  ;;  %v20867_v13 = vsub.f32 %v20752_v61, %v25406_v10  ;;  %v20874_v34 = vpack.c.bf16 %v25408_v32, %v25407_v11  ;;  %v20891_v35 = vand.u32 4294901760, %v20840_v12  ;;  %v25411_v32 = vand.u32 4294901760, %v20416_v14 }
 0x604   :  { %25405 = vst [vmem:[#allocation127_spill] sm:$0xff] %v20862_v50  ;;  %14132 = vmatprep.subr.bf16.mxu0 %v20862_v50  ;;  %v25414_v61 = vand.u32 4294901760, %v25413_v30  ;;  %v25416_v52 = vand.u32 4294901760, %v20796_v58  ;;  %v25417_v16 = vand.u32 4294901760, %v20457_v7  ;;  %v20925_v10 = vsub.f32 %v8444_v56, %v9491_v38 }
 0x605   :  { %25409 = vst [vmem:[#allocation128_spill] sm:$0xff] %v20874_v34  ;;  %25410 = vst [vmem:[#allocation129_spill] sm:$0xff] %v20891_v35  ;;  %v20897_v11 = vsub.f32 %v20416_v14, %v25411_v32  ;;  %14134 = vmatpush1.bf16.msra.mxu0 %v20874_v34  ;;  %v8468_v14 = vpop.permute.xlu0 %8467  ;;  %v25419_v32 = vand.u32 4294901760, %v20878_v23  ;;  %v25422_v34 = vand.u32 4294901760, %v20664_v1  ;;  %v8620_v1 = vsub.f32 %v20840_v12, %v20891_v35 }
 0x606   :  { %v20902_v54 = vsub.f32 %v25413_v30, %v25414_v61  ;;  %v8655_v45 = vsub.f32 %v20796_v58, %v25416_v52  ;;  %v20912_v50 = vsub.f32 %v20457_v7, %v25417_v16  ;;  %v8423_v61 = vpop.permute.xlu1 %8422  ;;  %v25421_v30 = vand.u32 4294901760, %v20882_v19 }
 0x607   :  { %25412 = vst [vmem:[#allocation130_spill] sm:$0xff] %v20897_v11  ;;  %v20916_v59 = vpack.c.bf16 %v8573_v39, %v25419_v32  ;;  %v20929_v7 = vsel %vm8436_vm8, %v20758_v20, %v8423_v61  ;;  %v20932_v16 = vsel %vm8436_vm8, %v8423_v61, %v8425_v5  ;;  %v20935_v39 = vsub.f32 %v20835_v24, %v8579_v17 }
 0x608   :  { %25415 = vst [vmem:[#allocation72_spill] sm:$0xff] %v20902_v54  ;;  %25418 = vst [vmem:[#allocation131_spill] sm:$0xff] %v20912_v50  ;;  %v20922_v22 = vpack.c.bf16 %v25422_v34, %v25421_v30  ;;  %v8581_v32 = vand.u32 4294901760, %v8488_v9  ;;  %v25425_v56 = vand.u32 4294901760, %v20849_v8  ;;  %v23477_v24 = vand.u32 4294901760, %v20929_v7 }
 0x609   :  { %25420 = vst [vmem:[#allocation132_spill] sm:$0xff] %v20916_v59  ;;  %25424 = vst [vmem:[#allocation134_spill] sm:$0xff] %v20935_v39  ;;  %v25426_v61 = vand.u32 4294901760, %v20856_v48  ;;  %v25427_v35 = vand.u32 4294901760, %v20932_v16  ;;  %v25429_v20 = vand.u32 4294901760, %v20574_v44 }
 0x60a   :  { %25423 = vst [vmem:[#allocation133_spill] sm:$0xff] %v20922_v22  ;;  %13920 = vmatprep.subr.bf16.mxu1 %v20922_v22  ;;  %v20944_v34 = vsub.f32 %v20849_v8, %v25425_v56  ;;  %v8466_v58 = vpop.permute.xlu1 %8465  ;;  %v8656_v22 = vand.u32 4294901760, %v8655_v45 }
 0x60b   :  { %13922 = vmatpush1.bf16.msra.mxu1 %v20916_v59  ;;  %v20953_v30 = vsub.f32 %v20856_v48, %v25426_v61  ;;  %v20958_v56 = vpack.c.bf16 %v9491_v38, %v25427_v35  ;;  %v20963_v5 = vsub.f32 %v20574_v44, %v25429_v20  ;;  %v25431_v59 = vand.u32 4294901760, %v20051_v2  ;;  %v25433_v61 = vld [vmem:[#allocation104_spill] sm:$0xff]  ;;  %v8472_v2 = vpop.permute.xlu0 %8471 }
 0x60c   :  { %v20973_v52 = vsel %vm8483_vm14, %v25433_v61, %v8466_v58  ;;  %v20976_v48 = vsel %vm8483_vm14, %v8466_v58, %v8468_v14  ;;  %v25434_v38 = vand.u32 4294901760, %v20515_v18  ;;  %v25436_v44 = vand.u32 4294901760, %v20570_v6 }
 0x60d   :  { %25428 = vst [vmem:[#allocation135_spill] sm:$0xff] %v20958_v56  ;;  %25430 = vst [vmem:[#allocation136_spill] sm:$0xff] %v20963_v5  ;;  %v20969_v12 = vpack.c.bf16 %v25431_v59, %v23477_v24  ;;  %v23484_v20 = vand.u32 4294901760, %v20973_v52  ;;  %14136 = vmatprep.subr.bf16.mxu0 %v20958_v56  ;;  %v20992_v61 = vsub.f32 %v8488_v9, %v8581_v32  ;;  %v25438_v24 = vand.u32 4294901760, %v20902_v54 }
 0x60e   :  { %v20981_v45 = vsub.f32 %v20515_v18, %v25434_v38  ;;  %v20986_v35 = vsub.f32 %v20570_v6, %v25436_v44  ;;  %v21000_v6 = vand.u32 4294901760, %v8620_v1  ;;  %v25439_v38 = vand.u32 4294901760, %v20519_v3  ;;  %v8470_v9 = vpop.permute.xlu1 %8469 }
 0x60f   :  { %25432 = vst [vmem:[#allocation137_spill] sm:$0xff] %v20969_v12  ;;  %v20997_v18 = vsub.f32 %v20902_v54, %v25438_v24  ;;  %14138 = vmatpush1.bf16.msra.mxu0 %v20969_v12  ;;  %v21009_v59 = vpack.c.bf16 %v8581_v32, %v23484_v20  ;;  %v25441_v58 = vand.u32 4294901760, %v20976_v48  ;;  %v25443_v24 = vand.u32 4294901760, %v20912_v50 }
 0x610   :  { %25435 = vst [vmem:[#allocation104_spill] sm:$0xff] %v20981_v45  ;;  %25437 = vst [vmem:[#allocation138_spill] sm:$0xff] %v20986_v35  ;;  %v21005_v44 = vsub.f32 %v20519_v3, %v25439_v38  ;;  %v8662_v1 = vand.u32 4294901760, %v20944_v34  ;;  %v25444_v3 = vand.u32 4294901760, %v20614_v33  ;;  %v25446_v32 = vand.u32 4294901760, %v20484_v25 }
 0x611   :  { %25440 = vst [vmem:[#allocation139_spill] sm:$0xff] %v21009_v59  ;;  %v21013_v56 = vpack.c.bf16 %v8579_v17, %v25441_v58  ;;  %v8679_v12 = vsub.f32 %v20912_v50, %v25443_v24  ;;  %v25447_v34 = vand.u32 4294901760, %v20897_v11  ;;  %v25448_v54 = vand.u32 4294901760, %v20678_v51  ;;  %v8482_v58 = vpop.permute.xlu0 %8481 }
 0x612   :  { %v21023_v38 = vsub.f32 %v20614_v33, %v25444_v3  ;;  %v13931_v20 = vpack.c.bf16 %v25446_v32, %v8656_v22  ;;  %v25449_v25 = vand.u32 4294901760, %v20674_v0  ;;  %v21045_v3 = vsel %vm8483_vm14, %v8468_v14, %v8470_v9 }
 0x613   :  { %25442 = vst [vmem:[#allocation140_spill] sm:$0xff] %v21013_v56  ;;  %13924 = vmatprep.subr.bf16.mxu1 %v21013_v56  ;;  %v9575_v24 = vsub.f32 %v20897_v11, %v25447_v34  ;;  %v21037_v33 = vsub.f32 %v20678_v51, %v25448_v54  ;;  %v21048_v32 = vsel %vm8483_vm14, %v8470_v9, %v8472_v2  ;;  %v8686_v34 = vand.u32 4294901760, %v20997_v18 }
 0x614   :  { %25445 = vst [vmem:[#allocation141_spill] sm:$0xff] %v21023_v38  ;;  %v21042_v22 = vsub.f32 %v20674_v0, %v25449_v25  ;;  %13926 = vmatpush1.bf16.msra.mxu1 %v21009_v59  ;;  %v25451_v51 = vand.u32 4294901760, %v20618_v31  ;;  %v8480_v0 = vpop.permute.xlu1 %8479  ;;  %v25453_v25 = vld [vmem:[#allocation62_spill] sm:$0xff]  ;;  %v8680_v14 = vand.u32 4294901760, %v8679_v12  ;;  %v25454_v9 = vand.u32 4294901760, %v20963_v5  ;;  %v25457_v59 = vld [vmem:[#allocation79_spill] sm:$0xff] }
 0x615   :  { %13928 = vmatprep.subr.bf16.mxu1 %v25453_v25  ;;  %v21062_v2 = vsel %vm8483_vm14, %v20200_v40, %v8480_v0  ;;  %v21065_v18 = vsel %vm8483_vm14, %v8480_v0, %v8482_v58  ;;  %v25455_v40 = vand.u32 4294901760, %v20981_v45  ;;  %v25456_v58 = vand.u32 4294901760, %v20986_v35 }
 0x616   :  { %25450 = vst [vmem:[#allocation142_spill] sm:$0xff] %v21042_v22  ;;  %v21056_v54 = vsub.f32 %v20618_v31, %v25451_v51  ;;  %v8703_v8 = vsub.f32 %v20963_v5, %v25454_v9  ;;  %v9499_v25 = vand.u32 4294901760, %v21065_v18  ;;  %v9501_v12 = vand.u32 4294901760, %v21062_v2  ;;  %v25458_v51 = vld [vmem:[#allocation5_spill] sm:$0xff] }
 0x617   :  { %8622 = vmatmul.mubr.f32.vlgmr.msra.gmra.mrb[6].mxu1 %v21000_v6  ;;  %v9605_v17 = vsub.f32 %v20981_v45, %v25455_v40  ;;  %v8709_v0 = vsub.f32 %v20986_v35, %v25456_v58  ;;  %v25459_v56 = vand.u32 4294901760, %v20721_v49  ;;  %v25460_v5 = vand.u32 4294901760, %v21045_v3 }
 0x618   :  { %25452 = vst [vmem:[#allocation143_spill] sm:$0xff] %v21056_v54  ;;  %13930 = vmatpush1.bf16.msra.mxu1 %v25457_v59  ;;  %8873 = vmatprep.mubr.f32.mxu1 %v25458_v51  ;;  %v25461_v58 = vand.u32 4294901760, %v21048_v32  ;;  %v9576_v9 = vand.u32 4294901760, %v9575_v24  ;;  %v25463_v31 = vand.u32 4294901760, %v20779_v41  ;;  %v25464_v35 = vand.u32 4294901760, %v20775_v27 }
 0x619   :  { %v21088_v11 = vsub.f32 %v20721_v49, %v25459_v56  ;;  %v21092_v40 = vpack.c.bf16 %v9501_v12, %v25460_v5  ;;  %13932 = vmatprep.subr.bf16.mxu1 %v13931_v20  ;;  %v25465_v56 = vand.u32 4294901760, %v20272_v26  ;;  %v25466_v20 = vand.u32 4294901760, %v21005_v44 }
 0x61a   :  { %v21096_v45 = vpack.c.bf16 %v9499_v25, %v25461_v58  ;;  %v21101_v59 = vsub.f32 %v20779_v41, %v25463_v31  ;;  %v21106_v49 = vsub.f32 %v20775_v27, %v25464_v35  ;;  %v25467_v24 = vand.u32 4294901760, %v21023_v38 }
 0x61b   :  { %v13933_v5 = vpack.c.bf16 %v25465_v56, %v8662_v1  ;;  %v9599_v50 = vsub.f32 %v21005_v44, %v25466_v20  ;;  %v25468_v41 = vand.u32 4294901760, %v20506_v46  ;;  %v8704_v35 = vand.u32 4294901760, %v8703_v8  ;;  %v25473_v8 = vld [vmem:[#allocation37_spill] sm:$0xff] }
 0x61c   :  { %25462 = vst [vmem:[#allocation62_spill] sm:$0xff] %v21096_v45  ;;  %v21117_v39 = vsub.f32 %v21023_v38, %v25467_v24  ;;  %14140 = vmatprep.subr.bf16.mxu0 %v21096_v45  ;;  %v9606_v31 = vand.u32 4294901760, %v9605_v17  ;;  %v8710_v26 = vand.u32 4294901760, %v8709_v0  ;;  %v25469_v1 = vand.u32 4294901760, %v21042_v22 }
 0x61d   :  { %v13935_v27 = vpack.c.bf16 %v25468_v41, %v8680_v14  ;;  %13934 = vmatpush1.bf16.msra.mxu1 %v13933_v5  ;;  %14142 = vmatpush1.bf16.msra.mxu0 %v21092_v40  ;;  %v25470_v20 = vand.u32 4294901760, %v21037_v33  ;;  %v25471_v58 = vand.u32 4294901760, %v20725_v42  ;;  %v23507_v46 = vand.u32 4294901760, %v21088_v11 }
 0x61e   :  { %v8757_v56 = vsub.f32 %v21042_v22, %v25469_v1  ;;  %14144 = vmatprep.subr.bf16.mxu0 %v25473_v8  ;;  %v25474_v17 = vand.u32 4294901760, %v20320_v15  ;;  %v25475_v0 = vand.u32 4294901760, %v20627_v21  ;;  %v23518_v1 = vand.u32 4294901760, %v21106_v49 }
 0x61f   :  { %v8751_v24 = vsub.f32 %v21037_v33, %v25470_v20  ;;  %v21132_v45 = vsub.f32 %v20725_v42, %v25471_v58  ;;  %13936 = vmatprep.subr.bf16.mxu1 %v13935_v27  ;;  %v25476_v20 = vand.u32 4294901760, %v20882_v19  ;;  %v9600_v58 = vand.u32 4294901760, %v9599_v50 }
 0x620   :  { %v13937_v14 = vpack.c.bf16 %v25474_v17, %v8686_v34  ;;  %v14147_v5 = vpack.c.bf16 %v25475_v0, %v9576_v9  ;;  %v9630_v27 = vand.u32 4294901760, %v21117_v39  ;;  %9542 = vmatmul.mubr.f32.vlgmr.msra.gmra.mrb[6].mxu0 %v21000_v6  ;;  %v25477_v15 = vand.u32 4294901760, %v20524_v37  ;;  %v25482_v39 = vld [vmem:[#allocation28_spill] sm:$0xff]  ;;  %v25483_v37 = vld [vmem:[#allocation63_spill] sm:$0xff] }
 0x621   :  { %25472 = vst [vmem:[#allocation79_spill] sm:$0xff] %v21132_v45  ;;  %v21145_v42 = vsub.f32 %v20882_v19, %v25476_v20  ;;  %v25478_v21 = vand.u32 4294901760, %v20953_v30  ;;  %v25479_v9 = vand.u32 4294901760, %v20468_v43  ;;  %v25480_v17 = vand.u32 4294901760, %v21056_v54  ;;  %14146 = vmatpush1.bf16.msra.mxu0 %v25482_v39  ;;  %9793 = vmatprep.mubr.f32.mxu0 %v25458_v51 }
 0x622   :  { %v13939_v34 = vpack.c.bf16 %v25477_v15, %v8704_v35  ;;  %v8758_v41 = vand.u32 4294901760, %v8757_v56  ;;  %v25481_v19 = vand.u32 4294901760, %v20878_v23  ;;  %13938 = vmatpush1.bf16.msra.mxu1 %v13937_v14  ;;  %v25484_v6 = vand.u32 4294901760, %v25483_v37  ;;  %14148 = vmatprep.subr.bf16.mxu0 %v14147_v5 }
 0x623   :  { %v14149_v8 = vpack.c.bf16 %v25479_v9, %v25478_v21  ;;  %v9623_v0 = vsub.f32 %v21056_v54, %v25480_v17  ;;  %v8752_v30 = vand.u32 4294901760, %v8751_v24  ;;  %v23510_v43 = vand.u32 4294901760, %v21132_v45 }
 0x624   :  { %v21161_v50 = vsub.f32 %v20878_v23, %v25481_v19  ;;  %v13941_v35 = vpack.c.bf16 %v25484_v6, %v8710_v26  ;;  %v21170_v20 = vsub.f32 %v21088_v11, %v23507_v46  ;;  %v25485_v56 = vand.u32 4294901760, %v20825_v4  ;;  %13940 = vmatprep.subr.bf16.mxu1 %v13939_v34  ;;  %v25511_v46 = vld [vmem:[#allocation110_spill] sm:$0xff] }
 0x625   :  { %v25486_v23 = vand.u32 4294901760, %v20511_v55  ;;  %v8781_v26 = vsub.f32 %v21106_v49, %v23518_v1  ;;  %v23511_v24 = vand.u32 4294901760, %v21145_v42  ;;  %v25487_v21 = vand.u32 4294901760, %v20640_v36  ;;  %14150 = vmatpush1.bf16.msra.mxu0 %v14149_v8  ;;  %v25550_v1 = vld [vmem:[#allocation69_spill] sm:$0xff] }
 0x626   :  { %v21175_v15 = vsub.f32 %v20825_v4, %v25485_v56  ;;  %v25488_v17 = vand.u32 4294901760, %v21101_v59  ;;  %v25489_v4 = vand.u32 4294901760, %v20976_v48  ;;  %v21198_v5 = vsub.f32 %v21062_v2, %v9501_v12  ;;  %13942 = vmatpush1.bf16.msra.mxu1 %v13941_v35  ;;  %v25496_v35 = vld [vmem:[#allocation84_spill] sm:$0xff] }
 0x627   :  { %v14153_v14 = vpack.c.bf16 %v25486_v23, %v9606_v31  ;;  %v14151_v9 = vpack.c.bf16 %v25487_v21, %v9600_v58  ;;  %v21195_v31 = vsub.f32 %v21065_v18, %v9499_v25  ;;  %v9624_v34 = vand.u32 4294901760, %v9623_v0  ;;  %13944 = vmatprep.subr.bf16.mxu1 %v25496_v35 }
 0x628   :  { %v8775_v19 = vsub.f32 %v21101_v59, %v25488_v17  ;;  %v21192_v55 = vsub.f32 %v20976_v48, %v25489_v4  ;;  %v25490_v36 = vand.u32 4294901760, %v20822_v29  ;;  %v23509_v39 = vand.u32 4294901760, %v21161_v50  ;;  %v25499_v4 = vld [vmem:[#allocation10_spill] sm:$0xff] }
 0x629   :  { %v25491_v37 = vand.u32 4294901760, %v20543_v28  ;;  %v25492_v6 = vand.u32 4294901760, %v20478_v62  ;;  %v23505_v25 = vand.u32 4294901760, %v21175_v15  ;;  %v25493_v2 = vand.u32 4294901760, %v20932_v16  ;;  %14152 = vmatprep.subr.bf16.mxu0 %v14151_v9 }
 0x62a   :  { %v21203_v58 = vsub.f32 %v20822_v29, %v25490_v36  ;;  %v25494_v29 = vand.u32 4294901760, %v21048_v32  ;;  %v25495_v8 = vand.u32 4294901760, %v21045_v3  ;;  %v25497_v62 = vand.u32 4294901760, %v20973_v52  ;;  %13946 = vmatpush1.bf16.msra.mxu1 %v25499_v4  ;;  %14154 = vmatpush1.bf16.msra.mxu0 %v14153_v14 }
 0x62b   :  { %v13947_v48 = vpack.c.bf16 %v25491_v37, %v8752_v30  ;;  %v13949_v18 = vpack.c.bf16 %v25492_v6, %v8758_v41  ;;  %v21214_v12 = vsub.f32 %v20932_v16, %v25493_v2  ;;  %v8776_v16 = vand.u32 4294901760, %v8775_v19 }
 0x62c   :  { %v21219_v0 = vsub.f32 %v21048_v32, %v25494_v29  ;;  %v21224_v28 = vsub.f32 %v21045_v3, %v25495_v8  ;;  %v21230_v41 = vsub.f32 %v20973_v52, %v25497_v62  ;;  %v8799_v30 = vsub.f32 %v21145_v42, %v23511_v24 }
 0x62d   :  { %v9671_v32 = vsub.f32 %v21132_v45, %v23510_v43  ;;  %v23506_v3 = vand.u32 4294901760, %v21192_v55  ;;  %v9754_v56 = vand.u32 4294901760, %v21195_v31  ;;  %v9760_v23 = vand.u32 4294901760, %v21198_v5  ;;  %13948 = vmatprep.subr.bf16.mxu1 %v13947_v48 }
 0x62e   :  { %v25498_v21 = vand.u32 4294901760, %v20659_v60  ;;  %v8782_v52 = vand.u32 4294901760, %v8781_v26  ;;  %v23508_v17 = vand.u32 4294901760, %v21203_v58  ;;  %v8805_v19 = vsub.f32 %v21161_v50, %v23509_v39  ;;  %13950 = vmatpush1.bf16.msra.mxu1 %v13949_v18 }
 0x62f   :  { %v25500_v36 = vand.u32 4294901760, %v20529_v53  ;;  %v23512_v6 = vand.u32 4294901760, %v21214_v12  ;;  %v25501_v2 = vand.u32 4294901760, %v20929_v7  ;;  %v9742_v26 = vand.u32 4294901760, %v21219_v0 }
 0x630   :  { %v14155_v9 = vpack.c.bf16 %v25498_v21, %v9624_v34  ;;  %v9748_v34 = vand.u32 4294901760, %v21224_v28  ;;  %v23514_v29 = vand.u32 4294901760, %v21230_v41  ;;  %v25503_v14 = vand.u32 4294901760, %v20789_v47 }
 0x631   :  { %v14157_v37 = vpack.c.bf16 %v25500_v36, %v9630_v27  ;;  %v21254_v60 = vsub.f32 %v20929_v7, %v25501_v2  ;;  %v8800_v53 = vand.u32 4294901760, %v8799_v30  ;;  %v9672_v27 = vand.u32 4294901760, %v9671_v32  ;;  %v25507_v36 = vld [vmem:[#allocation46_spill] sm:$0xff] }
 0x632   :  { %14156 = vmatprep.subr.bf16.mxu0 %v14155_v9  ;;  %v13951_v8 = vpack.c.bf16 %v25503_v14, %v8776_v16  ;;  %v8823_v35 = vsub.f32 %v21192_v55, %v23506_v3  ;;  %v9695_v7 = vsub.f32 %v21175_v15, %v23505_v25  ;;  %v21267_v62 = vpack.c.bf16 %v9754_v56, %v9742_v26 }
 0x633   :  { %25502 = vst [vmem:[#allocation5_spill] sm:$0xff] %v21254_v60  ;;  %v21273_v48 = vpack.c.bf16 %v9760_v23, %v9748_v34  ;;  %v25506_v47 = vand.u32 4294901760, %v20843_v63  ;;  %v23515_v30 = vand.u32 4294901760, %v20925_v10  ;;  %v23513_v32 = vand.u32 4294901760, %v20992_v61  ;;  %14158 = vmatpush1.bf16.msra.mxu0 %v14157_v37 }
 0x634   :  { %25504 = vst [vmem:[#allocation37_spill] sm:$0xff] %v21267_v62  ;;  %v8812_v21 = vand.u32 4294901760, %v20867_v13  ;;  %v9678_v9 = vand.u32 4294901760, %v21170_v20  ;;  %v9701_v4 = vsub.f32 %v21203_v58, %v23508_v17  ;;  %13952 = vmatprep.subr.bf16.mxu1 %v13951_v8  ;;  %14160 = vmatprep.subr.bf16.mxu0 %v25507_v36  ;;  %v25508_v2 = vand.u32 4294901760, %v20741_v57  ;;  %v25552_v62 = vld [vmem:[#allocation34_spill] sm:$0xff] }
 0x635   :  { %25505 = vst [vmem:[#allocation28_spill] sm:$0xff] %v21273_v48  ;;  %v8817_v16 = vsub.f32 %v20843_v63, %v25506_v47  ;;  %v25509_v47 = vld [vmem:[#allocation134_spill] sm:$0xff]  ;;  %v8806_v18 = vand.u32 4294901760, %v8805_v19  ;;  %v23517_v37 = vand.u32 4294901760, %v21254_v60  ;;  %v8829_v13 = vsub.f32 %v21230_v41, %v23514_v29  ;;  %v25515_v19 = vld [vmem:[#allocation120_spill] sm:$0xff] }
 0x636   :  { %v13953_v14 = vpack.c.bf16 %v25508_v2, %v8782_v52  ;;  %v25510_v25 = vand.u32 4294901760, %v25509_v47  ;;  %v13955_v20 = vpack.c.bf16 %v8812_v21, %v8800_v53  ;;  %v25512_v17 = vand.u32 4294901760, %v25511_v46  ;;  %v25513_v52 = vld [vmem:[#allocation114_spill] sm:$0xff]  ;;  %v25516_v46 = vld [vmem:[#allocation77_spill] sm:$0xff] }
 0x637   :  { %v8824_v39 = vand.u32 4294901760, %v8823_v35  ;;  %v9696_v36 = vand.u32 4294901760, %v9695_v7  ;;  %v9719_v57 = vsub.f32 %v21214_v12, %v23512_v6  ;;  %v25514_v2 = vand.u32 4294901760, %v25513_v52  ;;  %14162 = vmatpush1.bf16.msra.mxu0 %v25516_v46  ;;  %v25517_v35 = vld [vmem:[#allocation123_spill] sm:$0xff] }
 0x638   :  { %v8835_v3 = vsub.f32 %v25509_v47, %v25510_v25  ;;  %v14163_v8 = vpack.c.bf16 %v25512_v17, %v9672_v27  ;;  %v23516_v43 = vand.u32 4294901760, %v25515_v19  ;;  %v8818_v24 = vand.u32 4294901760, %v8817_v16  ;;  %13954 = vmatpush1.bf16.msra.mxu1 %v13953_v14 }
 0x639   :  { %v9713_v25 = vsub.f32 %v25513_v52, %v25514_v2  ;;  %v8841_v53 = vsub.f32 %v20992_v61, %v23513_v32  ;;  %v9702_v17 = vand.u32 4294901760, %v9701_v4  ;;  %13956 = vmatprep.subr.bf16.mxu1 %v13955_v20  ;;  %v9708_v7 = vand.u32 4294901760, %v25517_v35  ;;  %v25518_v32 = vld [vmem:[#allocation47_spill] sm:$0xff] }
 0x63a   :  { %14164 = vmatprep.subr.bf16.mxu0 %v14163_v8  ;;  %v8836_v27 = vand.u32 4294901760, %v8835_v3  ;;  %v9731_v21 = vsub.f32 %v20925_v10, %v23515_v30  ;;  %v9725_v16 = vsub.f32 %v21254_v60, %v23517_v37  ;;  %v8830_v2 = vand.u32 4294901760, %v8829_v13 }
 0x63b   :  { %v13957_v6 = vpack.c.bf16 %v8818_v24, %v8806_v18  ;;  %v25519_v14 = vand.u32 4294901760, %v25518_v32  ;;  %v14167_v4 = vpack.c.bf16 %v9708_v7, %v9696_v36  ;;  %v9720_v20 = vand.u32 4294901760, %v9719_v57 }
 0x63c   :  { %v13959_v46 = vpack.c.bf16 %v8836_v27, %v8824_v39  ;;  %v9755_v3 = vsub.f32 %v21195_v31, %v9754_v56  ;;  %v9737_v8 = vsub.f32 %v25515_v19, %v23516_v43  ;;  %v8842_v35 = vand.u32 4294901760, %v8841_v53  ;;  %v25549_v43 = vld [vmem:[#allocation92_spill] sm:$0xff] }
 0x63d   :  { %v14165_v29 = vpack.c.bf16 %v25519_v14, %v9678_v9  ;;  %13958 = vmatpush1.bf16.msra.mxu1 %v13957_v6  ;;  %v9714_v30 = vand.u32 4294901760, %v9713_v25  ;;  %v9732_v13 = vand.u32 4294901760, %v9731_v21  ;;  %v9743_v24 = vsub.f32 %v21219_v0, %v9742_v26  ;;  %v25521_v25 = vld [vmem:[#allocation27_spill] sm:$0xff]  ;;  %v25526_v14 = vld [vmem:[#allocation42_spill] sm:$0xff] }
 0x63e   :  { %13960 = vmatprep.subr.bf16.mxu1 %v13959_v46  ;;  %v9726_v32 = vand.u32 4294901760, %v9725_v16  ;;  %v9761_v39 = vsub.f32 %v21198_v5, %v9760_v23  ;;  %v13961_v9 = vpack.c.bf16 %v8842_v35, %v8830_v2  ;;  %v9756_v36 = vand.u32 4294901760, %v9755_v3  ;;  %v25523_v23 = vld [vmem:[#allocation118_spill] sm:$0xff]  ;;  %v25531_v35 = vld [vmem:[#allocation21_spill] sm:$0xff] }
 0x63f   :  { %14166 = vmatpush1.bf16.msra.mxu0 %v14165_v29  ;;  %v14169_v56 = vpack.c.bf16 %v9714_v30, %v9702_v17  ;;  %v14171_v18 = vpack.c.bf16 %v9732_v13, %v9720_v20  ;;  %v9738_v57 = vand.u32 4294901760, %v9737_v8  ;;  %v9749_v6 = vsub.f32 %v21224_v28, %v9748_v34  ;;  %v25520_v29 = vld [vmem:[#allocation95_spill] sm:$0xff]  ;;  %v25525_v17 = vld [vmem:[#allocation101_spill] sm:$0xff]  ;;  %v25527_v46 = vld [vmem:[#allocation78_spill] sm:$0xff] }
 0x640   :  { %14168 = vmatprep.subr.bf16.mxu0 %v14167_v4  ;;  %v25522_v53 = vpack.c.bf16 %v25520_v29, %v25521_v25  ;;  %v9744_v26 = vand.u32 4294901760, %v9743_v24  ;;  %v9762_v27 = vand.u32 4294901760, %v9761_v39  ;;  %v25524_v30 = vld [vmem:[#allocation119_spill] sm:$0xff]  ;;  %v25528_v34 = vpack.c.bf16 %v25526_v14, %v25527_v46  ;;  %v25529_v4 = vld [vmem:[#allocation125_spill] sm:$0xff]  ;;  %v25534_v39 = vld [vmem:[#allocation66_spill] sm:$0xff] }
 0x641   :  { %13962 = vmatpush1.bf16.msra.mxu1 %v13961_v9  ;;  %v14173_v7 = vpack.c.bf16 %v9738_v57, %v9726_v32  ;;  %v13967_v21 = vpack.c.bf16 %v25525_v17, %v25524_v30  ;;  %v9750_v2 = vand.u32 4294901760, %v9749_v6  ;;  %v25530_v20 = vld [vmem:[#allocation33_spill] sm:$0xff]  ;;  %v25532_v13 = vld [vmem:[#allocation131_spill] sm:$0xff]  ;;  %v25539_v6 = vld [vmem:[#allocation136_spill] sm:$0xff]  ;;  %v14187_v48 = vpack.c.bf16 %v25550_v1, %v21005_v44 }
 0x642   :  { %13964 = vmatprep.subr.bf16.mxu1 %v25522_v53  ;;  %v14175_v16 = vpack.c.bf16 %v9756_v36, %v9744_v26  ;;  %v13969_v3 = vpack.c.bf16 %v25530_v20, %v25529_v4  ;;  %v25533_v24 = vld [vmem:[#allocation45_spill] sm:$0xff]  ;;  %v25535_v9 = vld [vmem:[#allocation23_spill] sm:$0xff]  ;;  %v25538_v36 = vld [vmem:[#allocation44_spill] sm:$0xff] }
 0x643   :  { %14170 = vmatpush1.bf16.msra.mxu0 %v14169_v56  ;;  %v14177_v8 = vpack.c.bf16 %v9762_v27, %v9750_v2  ;;  %v13971_v32 = vpack.c.bf16 %v25533_v24, %v25532_v13  ;;  %v25536_v56 = vpack.c.bf16 %v25534_v39, %v25535_v9  ;;  %v25540_v53 = vld [vmem:[#allocation40_spill] sm:$0xff]  ;;  %v25541_v27 = vld [vmem:[#allocation130_spill] sm:$0xff]  ;;  %v25544_v2 = vld [vmem:[#allocation93_spill] sm:$0xff] }
 0x644   :  { %14172 = vmatprep.subr.bf16.mxu0 %v14171_v18  ;;  %8875 = vmatmul.mubr.f32.vlgmr.msra.gmra.mrb[6].mxu1 %v25523_v23  ;;  %v25537_v18 = vld [vmem:[#allocation72_spill] sm:$0xff]  ;;  %v13975_v26 = vpack.c.bf16 %v25540_v53, %v25539_v6 }
 0x645   :  { %13966 = vmatpush1.bf16.msra.mxu1 %v25528_v34  ;;  %9019 = vmatprep.mubr.f32.mxu1 %v25531_v35  ;;  %v13973_v57 = vpack.c.bf16 %v25538_v36, %v25537_v18 }
 0x646   :  { %13968 = vmatprep.subr.bf16.mxu1 %v13967_v21 }
 0x647   :  { %14174 = vmatpush1.bf16.msra.mxu0 %v14173_v7  ;;  %v25542_v7 = vld [vmem:[#allocation96_spill] sm:$0xff] }
 0x648   :  { %14176 = vmatprep.subr.bf16.mxu0 %v14175_v16  ;;  %v14183_v21 = vpack.c.bf16 %v25542_v7, %v25541_v27  ;;  %v25543_v16 = vld [vmem:[#allocation61_spill] sm:$0xff] }
 0x649   :  { %13970 = vmatpush1.bf16.msra.mxu1 %v13969_v3  ;;  %v25545_v34 = vpack.c.bf16 %v25543_v16, %v25544_v2  ;;  %v25546_v3 = vld [vmem:[#allocation126_spill] sm:$0xff]  ;;  %v25559_v7 = vld [vmem:[#allocation73_spill] sm:$0xff] }
 0x64a   :  { %13972 = vmatprep.subr.bf16.mxu1 %v13971_v32 }
 0x64b   :  { %14178 = vmatpush1.bf16.msra.mxu0 %v14177_v8  ;;  %v25547_v8 = vld [vmem:[#allocation56_spill] sm:$0xff] }
 0x64c   :  { %14180 = vmatprep.subr.bf16.mxu0 %v25536_v56  ;;  %v14185_v32 = vpack.c.bf16 %v25547_v8, %v25546_v3  ;;  %v25548_v56 = vld [vmem:[#allocation138_spill] sm:$0xff]  ;;  %v25556_v8 = vld [vmem:[#allocation24_spill] sm:$0xff] }
 0x64d   :  { %13974 = vmatpush1.bf16.msra.mxu1 %v13973_v57  ;;  %v13977_v37 = vpack.c.bf16 %v25549_v43, %v25548_v56  ;;  %v25551_v57 = vld [vmem:[#allocation26_spill] sm:$0xff]  ;;  %v13983_v3 = vpack.c.bf16 %v25556_v8, %v21037_v33  ;;  %v25557_v43 = vld [vmem:[#allocation9_spill] sm:$0xff] }
 0x64e   :  { %9795 = vmatmul.mubr.f32.vlgmr.msra.gmra.mrb[6].mxu0 %v25523_v23  ;;  %13976 = vmatprep.subr.bf16.mxu1 %v13975_v26  ;;  %v25553_v23 = vpack.c.bf16 %v25551_v57, %v25552_v62  ;;  %v25554_v26 = vld [vmem:[#allocation104_spill] sm:$0xff]  ;;  %v14191_v56 = vpack.c.bf16 %v25557_v43, %v21056_v54  ;;  %v25564_v43 = vld [vmem:[#allocation53_spill] sm:$0xff]  ;;  %v25565_v54 = vld [vmem:[#allocation35_spill] sm:$0xff] }
 0x64f   :  { %14182 = vmatpush1.bf16.msra.mxu0 %v25545_v34  ;;  %9939 = vmatprep.mubr.f32.mxu0 %v25531_v35  ;;  %v25558_v35 = vld [vmem:[#allocation11_spill] sm:$0xff]  ;;  %v25566_v8 = vpack.c.bf16 %v25564_v43, %v25565_v54 }
 0x650   :  { %14184 = vmatprep.subr.bf16.mxu0 %v14183_v21  ;;  %v25555_v21 = vld [vmem:[#allocation81_spill] sm:$0xff]  ;;  %v25560_v27 = vpack.c.bf16 %v25558_v35, %v25559_v7 }
 0x651   :  { %13978 = vmatpush1.bf16.msra.mxu1 %v13977_v37  ;;  %v14189_v34 = vpack.c.bf16 %v25555_v21, %v25554_v26  ;;  %v25561_v37 = vld [vmem:[#allocation2_spill] sm:$0xff]  ;;  %v25563_v21 = vld [vmem:[#allocation109_spill] sm:$0xff] }
 0x652   :  { %13980 = vmatprep.subr.bf16.mxu1 %v25553_v23  ;;  %v14193_v23 = vpack.c.bf16 %v25561_v37, %v21023_v38  ;;  %v13987_v26 = vpack.c.bf16 %v25563_v21, %v21101_v59  ;;  %v25569_v37 = vld [vmem:[#allocation91_spill] sm:$0xff] }
 0x653   :  { %14186 = vmatpush1.bf16.msra.mxu0 %v14185_v32  ;;  %v14199_v38 = vpack.c.bf16 %v25569_v37, %v21132_v45  ;;  %v25574_v37 = vld [vmem:[#allocation113_spill] sm:$0xff] }
 0x654   :  { %14188 = vmatprep.subr.bf16.mxu0 %v14187_v48  ;;  %v25562_v48 = vld [vmem:[#allocation20_spill] sm:$0xff]  ;;  %v14203_v45 = vpack.c.bf16 %v25574_v37, %v21175_v15 }
 0x655   :  { %13982 = vmatpush1.bf16.msra.mxu1 %v25560_v27  ;;  %v13985_v32 = vpack.c.bf16 %v25562_v48, %v21042_v22  ;;  %v25567_v27 = vld [vmem:[#allocation38_spill] sm:$0xff]  ;;  %v25571_v22 = vld [vmem:[#allocation16_spill] sm:$0xff] }
 0x656   :  { %13984 = vmatprep.subr.bf16.mxu1 %v13983_v3  ;;  %v13989_v3 = vpack.c.bf16 %v25567_v27, %v21106_v49  ;;  %v25570_v48 = vld [vmem:[#allocation50_spill] sm:$0xff] }
 0x657   :  { %14190 = vmatpush1.bf16.msra.mxu0 %v14189_v34  ;;  %v25572_v21 = vpack.c.bf16 %v25570_v48, %v25571_v22 }
 0x658   :  { %14192 = vmatprep.subr.bf16.mxu0 %v14191_v56  ;;  %v25568_v56 = vld [vmem:[#allocation115_spill] sm:$0xff] }
 0x659   :  { %13986 = vmatpush1.bf16.msra.mxu1 %v13985_v32  ;;  %v13991_v34 = vpack.c.bf16 %v25568_v56, %v21145_v42  ;;  %v13993_v32 = vpack.c.bf16 %v20843_v63, %v21161_v50 }
 0x65a   :  { %13988 = vmatprep.subr.bf16.mxu1 %v13987_v26  ;;  %v8502_v26 = vld [vmem:[%s22484_s7] sm:$0xff] }
 0x65b   :  { %14194 = vmatpush1.bf16.msra.mxu0 %v14193_v23  ;;  %8505 = vperm.xlu1 %14693, %v8502_v26   ;;  %v25575_v26 = vld [vmem:[#allocation60_spill] sm:$0xff] }
 0x65c   :  { %14196 = vmatprep.subr.bf16.mxu0 %v25566_v8  ;;  %v25573_v8 = vld [vmem:[#allocation88_spill] sm:$0xff] }
 0x65d   :  { %13990 = vmatpush1.bf16.msra.mxu1 %v13989_v3  ;;  %v14201_v23 = vpack.c.bf16 %v25573_v8, %v21088_v11  ;;  %v13995_v3 = vpack.c.bf16 %v25509_v47, %v21192_v55 }
 0x65e   :  { %13992 = vmatprep.subr.bf16.mxu1 %v13991_v34  ;;  %v14207_v34 = vpack.c.bf16 %v20925_v10, %v21214_v12 }
 0x65f   :  { %14198 = vmatpush1.bf16.msra.mxu0 %v25572_v21  ;;  %v13997_v21 = vpack.c.bf16 %v20992_v61, %v21230_v41 }
 0x660   :  { %14200 = vmatprep.subr.bf16.mxu0 %v14199_v38  ;;  %v14205_v38 = vpack.c.bf16 %v25513_v52, %v21203_v58  ;;  %v25578_v52 = vld [vmem:[#allocation85_spill] sm:$0xff] }
 0x661   :  { %13994 = vmatpush1.bf16.msra.mxu1 %v13993_v32  ;;  %v14209_v32 = vpack.c.bf16 %v25515_v19, %v21254_v60  ;;  %v25581_v19 = vld [vmem:[#allocation102_spill] sm:$0xff]  ;;  %v25582_v60 = vld [vmem:[#allocation32_spill] sm:$0xff] }
 0x662   :  { %13996 = vmatprep.subr.bf16.mxu1 %v13995_v3  ;;  %v25577_v3 = vld [vmem:[#allocation25_spill] sm:$0xff] }
 0x663   :  { %14202 = vmatpush1.bf16.msra.mxu0 %v14201_v23  ;;  %v25576_v23 = vld [vmem:[#allocation124_spill] sm:$0xff] }
 0x664   :  { %14204 = vmatprep.subr.bf16.mxu0 %v14203_v45  ;;  %v14211_v45 = vpack.c.bf16 %v21195_v31, %v21219_v0  ;;  %v25583_v31 = vld [vmem:[#allocation70_spill] sm:$0xff] }
 0x665   :  { %13998 = vmatpush1.bf16.msra.mxu1 %v13997_v21  ;;  %v25579_v21 = vld [vmem:[#allocation54_spill] sm:$0xff] }
 0x666   :  { %14000 = vmatprep.subr.bf16.mxu1 %v25575_v26  ;;  %v25584_v0 = vld [vmem:[#allocation6_spill] sm:$0xff] }
 0x667   :  { %14206 = vmatpush1.bf16.msra.mxu0 %v14205_v38  ;;  %v14213_v38 = vpack.c.bf16 %v21198_v5, %v21224_v28  ;;  %v25587_v5 = vld [vmem:[#allocation51_spill] sm:$0xff]  ;;  %v25588_v28 = vld [vmem:[#allocation105_spill] sm:$0xff] }
 0x668   :  { %14208 = vmatprep.subr.bf16.mxu0 %v14207_v34  ;;  %9022 = vmatmul.mubr.f32.vlgmr.msra.gmra.mrb[6].mxu1 %v25576_v23  ;;  %v25580_v34 = vld [vmem:[#allocation64_spill] sm:$0xff] }
 0x669   :  { %14002 = vmatpush1.bf16.msra.mxu1 %v25577_v3  ;;  %9131 = vmatprep.mubr.f32.mxu1 %v25579_v21 }
 0x66a   :  { %14004 = vmatprep.subr.bf16.mxu1 %v25578_v52 }
 0x66b   :  { %14210 = vmatpush1.bf16.msra.mxu0 %v14209_v32  ;;  %v25585_v32 = vld [vmem:[#allocation106_spill] sm:$0xff] }
 0x66c   :  { %14212 = vmatprep.subr.bf16.mxu0 %v14211_v45  ;;  %v25586_v45 = vld [vmem:[#allocation68_spill] sm:$0xff] }
 0x66d   :  { %14006 = vmatpush1.bf16.msra.mxu1 %v25580_v34 }
 0x66e   :  { %14008 = vmatprep.subr.bf16.mxu1 %v25581_v19  ;;  %v25590_v19 = vld [vmem:[#allocation30_spill] sm:$0xff] }
 0x66f   :  { %14214 = vmatpush1.bf16.msra.mxu0 %v14213_v38  ;;  %v25589_v38 = vld [vmem:[#allocation86_spill] sm:$0xff] }
 0x670   :  { %14216 = vmatprep.subr.bf16.mxu0 %v25582_v60  ;;  %v25591_v60 = vld [vmem:[#allocation71_spill] sm:$0xff] }
 0x671   :  { %14010 = vmatpush1.bf16.msra.mxu1 %v25583_v31  ;;  %v25593_v31 = vld [vmem:[#allocation112_spill] sm:$0xff] }
 0x672   :  { %9942 = vmatmul.mubr.f32.vlgmr.msra.gmra.mrb[6].mxu0 %v25576_v23  ;;  %14012 = vmatprep.subr.bf16.mxu1 %v25585_v32  ;;  %v25592_v23 = vld [vmem:[#allocation4_spill] sm:$0xff]  ;;  %v25595_v32 = vld [vmem:[#allocation111_spill] sm:$0xff] }
 0x673   :  { %14218 = vmatpush1.bf16.msra.mxu0 %v25584_v0  ;;  %10051 = vmatprep.mubr.f32.mxu0 %v25579_v21  ;;  %v25594_v0 = vld [vmem:[#allocation107_spill] sm:$0xff]  ;;  %v25597_v21 = vld [vmem:[#allocation122_spill] sm:$0xff] }
 0x674   :  { %14220 = vmatprep.subr.bf16.mxu0 %v25586_v45  ;;  %v25596_v45 = vld [vmem:[#allocation108_spill] sm:$0xff] }
 0x675   :  { %14014 = vmatpush1.bf16.msra.mxu1 %v25587_v5  ;;  %v25598_v5 = vld [vmem:[#allocation94_spill] sm:$0xff] }
 0x676   :  { %14016 = vmatprep.subr.bf16.mxu1 %v25589_v38  ;;  %v25600_v38 = vld [vmem:[#allocation49_spill] sm:$0xff] }
 0x677   :  { %14222 = vmatpush1.bf16.msra.mxu0 %v25588_v28  ;;  %v25599_v28 = vld [vmem:[#allocation121_spill] sm:$0xff] }
 0x678   :  { %14224 = vmatprep.subr.bf16.mxu0 %v25590_v19  ;;  %v25601_v19 = vld [vmem:[#allocation133_spill] sm:$0xff] }
 0x679   :  { %14018 = vmatpush1.bf16.msra.mxu1 %v25591_v60  ;;  %v25602_v60 = vld [vmem:[#allocation116_spill] sm:$0xff] }
 0x67a   :  { %14020 = vmatprep.subr.bf16.mxu1 %v25593_v31  ;;  %v25604_v31 = vld [vmem:[#allocation117_spill] sm:$0xff] }
 0x67b   :  { %14226 = vmatpush1.bf16.msra.mxu0 %v25592_v23  ;;  %v25603_v23 = vld [vmem:[#allocation132_spill] sm:$0xff] }
 0x67c   :  { %14228 = vmatprep.subr.bf16.mxu0 %v25594_v0  ;;  %v25605_v0 = vld [vmem:[#allocation140_spill] sm:$0xff] }
 0x67d   :  { %14022 = vmatpush1.bf16.msra.mxu1 %v25595_v32  ;;  %v25606_v32 = vld [vmem:[#allocation127_spill] sm:$0xff] }
 0x67e   :  { %14024 = vmatprep.subr.bf16.mxu1 %v25597_v21  ;;  %v25607_v21 = vand.u32 4294901760, %v25521_v25  ;;  %v25616_v25 = vand.u32 4294901760, %v25525_v17  ;;  %v25623_v17 = vand.u32 4294901760, %v25535_v9 }
 0x67f   :  { %14230 = vmatpush1.bf16.msra.mxu0 %v25596_v45 }
 0x680   :  { %14232 = vmatprep.subr.bf16.mxu0 %v25598_v5  ;;  %v25608_v5 = vand.u32 4294901760, %v25520_v29 }
 0x681   :  { %14026 = vmatpush1.bf16.msra.mxu1 %v25599_v28  ;;  %v25609_v28 = vld [vmem:[#allocation139_spill] sm:$0xff] }
 0x682   :  { %14028 = vmatprep.subr.bf16.mxu1 %v25601_v19  ;;  %v14035_v45 = vpack.c.bf16 %v25608_v5, %v25607_v21  ;;  %v25611_v19 = vld [vmem:[#allocation135_spill] sm:$0xff]  ;;  %v25617_v5 = vld [vmem:[#allocation137_spill] sm:$0xff]  ;;  %v25618_v21 = vld [vmem:[#allocation62_spill] sm:$0xff] }
 0x683   :  { %14234 = vmatpush1.bf16.msra.mxu0 %v25600_v38  ;;  %v25610_v38 = vld [vmem:[#allocation128_spill] sm:$0xff] }
 0x684   :  { %14236 = vmatprep.subr.bf16.mxu0 %v25602_v60 }
 0x685   :  { %14030 = vmatpush1.bf16.msra.mxu1 %v25603_v23  ;;  %v25612_v23 = vand.u32 4294901760, %v25527_v46  ;;  %v25620_v46 = vand.u32 4294901760, %v25530_v20  ;;  %v25626_v20 = vand.u32 4294901760, %v25538_v36  ;;  %v25635_v36 = vld [vmem:[#allocation138_spill] sm:$0xff] }
 0x686   :  { %14032 = vmatprep.subr.bf16.mxu1 %v25605_v0  ;;  %v25614_v0 = vld [vmem:[#allocation129_spill] sm:$0xff] }
 0x687   :  { %14238 = vmatpush1.bf16.msra.mxu0 %v25604_v31  ;;  %v25613_v31 = vand.u32 4294901760, %v25526_v14  ;;  %v25621_v14 = vand.u32 4294901760, %v25532_v13  ;;  %v25627_v13 = vand.u32 4294901760, %v25544_v2  ;;  %v25636_v2 = vand.u32 4294901760, %v25635_v36 }
 0x688   :  { %14240 = vmatprep.subr.bf16.mxu0 %v25606_v32  ;;  %v25615_v32 = vand.u32 4294901760, %v25524_v30  ;;  %v25622_v30 = vand.u32 4294901760, %v25533_v24  ;;  %v25628_v24 = vand.u32 4294901760, %v25543_v16  ;;  %v25637_v16 = vld [vmem:[#allocation92_spill] sm:$0xff] }
 0x689   :  { %14034 = vmatpush1.bf16.msra.mxu1 %v25609_v28  ;;  %v14037_v60 = vpack.c.bf16 %v25613_v31, %v25612_v23 }
 0x68a   :  { %14036 = vmatprep.subr.bf16.mxu1 %v14035_v45  ;;  %v14039_v29 = vpack.c.bf16 %v25616_v25, %v25615_v32  ;;  %v25619_v45 = vand.u32 4294901760, %v25529_v4  ;;  %v14043_v31 = vpack.c.bf16 %v25622_v30, %v25621_v14  ;;  %v25625_v4 = vand.u32 4294901760, %v25537_v18 }
 0x68b   :  { %14242 = vmatpush1.bf16.msra.mxu0 %v25610_v38  ;;  %v14253_v25 = vpack.c.bf16 %v25628_v24, %v25627_v13  ;;  %v25638_v30 = vand.u32 4294901760, %v25637_v16  ;;  %v25646_v13 = vand.u32 4294901760, %v25550_v1 }
 0x68c   :  { %14244 = vmatprep.subr.bf16.mxu0 %v25611_v19  ;;  %9135 = vmatmul.mubr.f32.vlgmr.msra.gmra.mrb[6].mxu1 %v25614_v0  ;;  %v14041_v19 = vpack.c.bf16 %v25620_v46, %v25619_v45  ;;  %v14045_v23 = vpack.c.bf16 %v25626_v20, %v25625_v4  ;;  %v25633_v46 = vld [vmem:[#allocation96_spill] sm:$0xff]  ;;  %v25644_v4 = vand.u32 4294901760, %v25551_v57 }
 0x68d   :  { %14038 = vmatpush1.bf16.msra.mxu1 %v14037_v60  ;;  %9314 = vmatprep.mubr.f32.mxu1 %v25458_v51  ;;  %v25624_v60 = vand.u32 4294901760, %v25534_v39  ;;  %v25629_v39 = vand.u32 4294901760, %v25539_v6  ;;  %v25634_v14 = vand.u32 4294901760, %v25633_v46  ;;  %v25641_v6 = vld [vmem:[#allocation56_spill] sm:$0xff]  ;;  %v25653_v46 = vand.u32 4294901760, %v21037_v33  ;;  %v25666_v33 = vld [vmem:[#allocation2_spill] sm:$0xff] }
 0x68e   :  { %14040 = vmatprep.subr.bf16.mxu1 %v14039_v29  ;;  %v25631_v29 = vld [vmem:[#allocation130_spill] sm:$0xff] }
 0x68f   :  { %14246 = vmatpush1.bf16.msra.mxu0 %v25617_v5  ;;  %v14251_v32 = vpack.c.bf16 %v25624_v60, %v25623_v17  ;;  %v25632_v45 = vand.u32 4294901760, %v25631_v29  ;;  %v25642_v60 = vand.u32 4294901760, %v25641_v6  ;;  %v25664_v6 = vld [vmem:[#allocation141_spill] sm:$0xff] }
 0x690   :  { %14248 = vmatprep.subr.bf16.mxu0 %v25618_v21 }
 0x691   :  { %14042 = vmatpush1.bf16.msra.mxu1 %v14041_v19  ;;  %v25630_v19 = vand.u32 4294901760, %v25540_v53  ;;  %v14255_v18 = vpack.c.bf16 %v25634_v14, %v25632_v45 }
 0x692   :  { %14044 = vmatprep.subr.bf16.mxu1 %v14043_v31  ;;  %v14049_v31 = vpack.c.bf16 %v25638_v30, %v25636_v2  ;;  %v25658_v2 = vld [vmem:[#allocation9_spill] sm:$0xff] }
 0x693   :  { %14250 = vmatpush1.bf16.msra.mxu0 %v21092_v40  ;;  %v14047_v9 = vpack.c.bf16 %v25630_v19, %v25629_v39  ;;  %v25648_v39 = vand.u32 4294901760, %v25558_v35  ;;  %v25659_v16 = vand.u32 4294901760, %v25658_v2  ;;  %v25688_v2 = vand.u32 4294901760, %v25509_v47 }
 0x694   :  { %14252 = vmatprep.subr.bf16.mxu0 %v14251_v32  ;;  %v25643_v32 = vand.u32 4294901760, %v25552_v62  ;;  %v25651_v62 = vld [vmem:[#allocation81_spill] sm:$0xff] }
 0x695   :  { %14046 = vmatpush1.bf16.msra.mxu1 %v14045_v23  ;;  %v25645_v23 = vand.u32 4294901760, %v21005_v44  ;;  %v25652_v45 = vand.u32 4294901760, %v25651_v62  ;;  %v25654_v44 = vld [vmem:[#allocation24_spill] sm:$0xff]  ;;  %v25675_v62 = vand.u32 4294901760, %v25571_v22  ;;  %v25684_v22 = vand.u32 4294901760, %v20843_v63 }
 0x696   :  { %10055 = vmatmul.mubr.f32.vlgmr.msra.gmra.mrb[6].mxu0 %v25614_v0  ;;  %14048 = vmatprep.subr.bf16.mxu1 %v14047_v9  ;;  %v25639_v0 = vld [vmem:[#allocation126_spill] sm:$0xff]  ;;  %v14051_v20 = vpack.c.bf16 %v25644_v4, %v25643_v32  ;;  %v25649_v9 = vld [vmem:[#allocation104_spill] sm:$0xff]  ;;  %v25655_v14 = vand.u32 4294901760, %v25654_v44  ;;  %v25668_v4 = vand.u32 4294901760, %v21101_v59  ;;  %v25676_v59 = vand.u32 4294901760, %v25570_v48 }
 0x697   :  { %14254 = vmatpush1.bf16.msra.mxu0 %v14253_v25  ;;  %v25640_v17 = vand.u32 4294901760, %v25639_v0  ;;  %10234 = vmatprep.mubr.f32.mxu0 %v25458_v51  ;;  %v14259_v24 = vpack.c.bf16 %v25646_v13, %v25645_v23  ;;  %v25647_v25 = vand.u32 4294901760, %v25559_v7  ;;  %v25650_v29 = vand.u32 4294901760, %v25649_v9  ;;  %v25660_v7 = vld [vmem:[#allocation142_spill] sm:$0xff] }
 0x698   :  { %14256 = vmatprep.subr.bf16.mxu0 %v14255_v18  ;;  %v14055_v1 = vpack.c.bf16 %v25655_v14, %v25653_v46  ;;  %v25656_v18 = vld [vmem:[#allocation143_spill] sm:$0xff]  ;;  %v25661_v35 = vand.u32 4294901760, %v25660_v7  ;;  %v25674_v9 = vand.u32 4294901760, %v25567_v27  ;;  %v25685_v27 = vand.u32 4294901760, %v21088_v11 }
 0x699   :  { %v14257_v53 = vpack.c.bf16 %v25642_v60, %v25640_v17  ;;  %14050 = vmatpush1.bf16.msra.mxu1 %v14049_v31  ;;  %v14053_v19 = vpack.c.bf16 %v25648_v39, %v25647_v25  ;;  %v14261_v57 = vpack.c.bf16 %v25652_v45, %v25650_v29  ;;  %v25657_v36 = vand.u32 4294901760, %v25656_v18  ;;  %v25662_v31 = vld [vmem:[#allocation20_spill] sm:$0xff]  ;;  %v25679_v46 = vld [vmem:[#allocation79_spill] sm:$0xff] }
 0x69a   :  { %14052 = vmatprep.subr.bf16.mxu1 %v14051_v20  ;;  %v25663_v0 = vand.u32 4294901760, %v25662_v31  ;;  %v25665_v60 = vand.u32 4294901760, %v25664_v6  ;;  %v25669_v20 = vld [vmem:[#allocation109_spill] sm:$0xff]  ;;  %v25672_v25 = vand.u32 4294901760, %v25564_v43  ;;  %v14269_v45 = vpack.c.bf16 %v25676_v59, %v25675_v62  ;;  %v25681_v14 = vld [vmem:[#allocation91_spill] sm:$0xff]  ;;  %v25700_v6 = vld [vmem:[#allocation120_spill] sm:$0xff] }
 0x69b   :  { %14258 = vmatpush1.bf16.msra.mxu0 %v14257_v53  ;;  %v14263_v30 = vpack.c.bf16 %v25659_v16, %v25657_v36  ;;  %v25667_v53 = vand.u32 4294901760, %v25666_v33  ;;  %v25670_v23 = vand.u32 4294901760, %v25669_v20  ;;  %v25680_v44 = vand.u32 4294901760, %v25679_v46  ;;  %v25702_v33 = vld [vmem:[#allocation118_spill] sm:$0xff]  ;;  %v25723_v62 = vld [vmem:[#allocation121_spill] sm:$0xff]  ;;  %v25729_v46 = vld [vmem:[#allocation140_spill] sm:$0xff] }
 0x69c   :  { %14260 = vmatprep.subr.bf16.mxu0 %v14259_v24  ;;  %v14057_v17 = vpack.c.bf16 %v25663_v0, %v25661_v35  ;;  %v25671_v24 = vand.u32 4294901760, %v25565_v54  ;;  %v25678_v54 = vand.u32 4294901760, %v25568_v56  ;;  %v25687_v36 = vand.u32 4294901760, %v21192_v55  ;;  %v25694_v55 = vld [vmem:[#allocation114_spill] sm:$0xff]  ;;  %v25724_v59 = vld [vmem:[#allocation49_spill] sm:$0xff] }
 0x69d   :  { %14054 = vmatpush1.bf16.msra.mxu1 %v14053_v19  ;;  %v14265_v32 = vpack.c.bf16 %v25667_v53, %v25665_v60  ;;  %v14059_v13 = vpack.c.bf16 %v25670_v23, %v25668_v4  ;;  %v25673_v19 = vand.u32 4294901760, %v21106_v49  ;;  %v25683_v49 = vand.u32 4294901760, %v21161_v50  ;;  %v25707_v53 = vld [vmem:[#allocation70_spill] sm:$0xff]  ;;  %v25711_v4 = vld [vmem:[#allocation51_spill] sm:$0xff] }
 0x69e   :  { %14056 = vmatprep.subr.bf16.mxu1 %v14055_v1  ;;  %v14267_v39 = vpack.c.bf16 %v25672_v25, %v25671_v24  ;;  %v25682_v1 = vand.u32 4294901760, %v25681_v14  ;;  %v14067_v16 = vpack.c.bf16 %v25688_v2, %v25687_v36  ;;  %v25690_v7 = vand.u32 4294901760, %v25574_v37  ;;  %v25713_v20 = vld [vmem:[#allocation86_spill] sm:$0xff]  ;;  %v25716_v24 = vld [vmem:[#allocation4_spill] sm:$0xff]  ;;  %v25731_v14 = vld [vmem:[#allocation135_spill] sm:$0xff] }
 0x69f   :  { %14262 = vmatpush1.bf16.msra.mxu0 %v14261_v57  ;;  %v14061_v29 = vpack.c.bf16 %v25674_v9, %v25673_v19  ;;  %v25677_v57 = vand.u32 4294901760, %v21145_v42  ;;  %v14065_v48 = vpack.c.bf16 %v25684_v22, %v25683_v49  ;;  %v25686_v42 = vand.u32 4294901760, %v25573_v8  ;;  %v25714_v23 = vld [vmem:[#allocation30_spill] sm:$0xff]  ;;  %v25717_v25 = vld [vmem:[#allocation112_spill] sm:$0xff]  ;;  %v25719_v19 = vld [vmem:[#allocation111_spill] sm:$0xff] }
 0x6a0   :  { %14264 = vmatprep.subr.bf16.mxu0 %v14263_v30  ;;  %v14271_v18 = vpack.c.bf16 %v25682_v1, %v25680_v44  ;;  %v25689_v30 = vand.u32 4294901760, %v21175_v15  ;;  %v25691_v63 = vand.u32 4294901760, %v21230_v41  ;;  %v25692_v11 = vand.u32 4294901760, %v20992_v61  ;;  %v25720_v9 = vld [vmem:[#allocation108_spill] sm:$0xff]  ;;  %v25730_v44 = vld [vmem:[#allocation127_spill] sm:$0xff] }
 0x6a1   :  { %14058 = vmatpush1.bf16.msra.mxu1 %v14057_v17  ;;  %v14063_v43 = vpack.c.bf16 %v25678_v54, %v25677_v57  ;;  %v14273_v56 = vpack.c.bf16 %v25686_v42, %v25685_v27  ;;  %v25693_v8 = vand.u32 4294901760, %v21203_v58  ;;  %v25695_v31 = vand.u32 4294901760, %v25694_v55  ;;  %v25698_v17 = vld [vmem:[#allocation5_spill] sm:$0xff]  ;;  %v25726_v57 = vld [vmem:[#allocation116_spill] sm:$0xff] }
 0x6a2   :  { %14060 = vmatprep.subr.bf16.mxu1 %v14059_v13  ;;  %v14275_v35 = vpack.c.bf16 %v25690_v7, %v25689_v30  ;;  %v14069_v50 = vpack.c.bf16 %v25692_v11, %v25691_v63  ;;  %v25696_v0 = vand.u32 4294901760, %v21214_v12  ;;  %v25697_v15 = vand.u32 4294901760, %v20925_v10  ;;  %v25703_v58 = vld [vmem:[#allocation37_spill] sm:$0xff]  ;;  %v25704_v10 = vld [vmem:[#allocation28_spill] sm:$0xff]  ;;  %v25705_v12 = vld [vmem:[#allocation102_spill] sm:$0xff] }
 0x6a3   :  { %14266 = vmatpush1.bf16.msra.mxu0 %v14265_v32  ;;  %v14277_v47 = vpack.c.bf16 %v25695_v31, %v25693_v8  ;;  %v25699_v41 = vand.u32 4294901760, %v25698_v17  ;;  %v25701_v61 = vand.u32 4294901760, %v25700_v6  ;;  %v25709_v32 = vld [vmem:[#allocation106_spill] sm:$0xff]  ;;  %v25715_v13 = vld [vmem:[#allocation71_spill] sm:$0xff]  ;;  %v25727_v54 = vld [vmem:[#allocation132_spill] sm:$0xff]  ;;  %v25732_v1 = vmov 0.0  }
 0x6a4   :  { %14268 = vmatprep.subr.bf16.mxu0 %v14267_v39  ;;  %v14279_v37 = vpack.c.bf16 %v25697_v15, %v25696_v0  ;;  %v25718_v39 = vld [vmem:[#allocation107_spill] sm:$0xff]  ;;  %v10386_v11 = vld [vmem:[%s22485_s9] sm:$0xff] }
 0x6a5   :  { %14062 = vmatpush1.bf16.msra.mxu1 %v14061_v29  ;;  %v14281_v60 = vpack.c.bf16 %v25701_v61, %v25699_v41  ;;  %v25722_v29 = vld [vmem:[#allocation94_spill] sm:$0xff] }
 0x6a6   :  { %14064 = vmatprep.subr.bf16.mxu1 %v14063_v43  ;;  %v25728_v43 = vld [vmem:[#allocation117_spill] sm:$0xff] }
 0x6a7   :  { %14270 = vmatpush1.bf16.msra.mxu0 %v14269_v45  ;;  %v25725_v45 = vld [vmem:[#allocation133_spill] sm:$0xff] }
 0x6a8   :  { %14272 = vmatprep.subr.bf16.mxu0 %v14271_v18 }
 0x6a9   :  { %14066 = vmatpush1.bf16.msra.mxu1 %v14065_v48 }
 0x6aa   :  { %14068 = vmatprep.subr.bf16.mxu1 %v14067_v16 }
 0x6ab   :  { %14274 = vmatpush1.bf16.msra.mxu0 %v14273_v56 }
 0x6ac   :  { %14276 = vmatprep.subr.bf16.mxu0 %v14275_v35 }
 0x6ad   :  { %14070 = vmatpush1.bf16.msra.mxu1 %v14069_v50 }
 0x6ae   :  { %14072 = vmatprep.subr.bf16.mxu1 %v25575_v26  ;;  %v25706_v26 = vld [vmem:[#allocation32_spill] sm:$0xff] }
 0x6af   :  { %14278 = vmatpush1.bf16.msra.mxu0 %v14277_v47 }
 0x6b0   :  { %14280 = vmatprep.subr.bf16.mxu0 %v14279_v37  ;;  %9316 = vmatmul.mubr.f32.vlgmr.msra.gmra.mrb[6].mxu1 %v25702_v33  ;;  %v10369_v37 = vld [vmem:[%s22486_s8] sm:$0xff] }
 0x6b1   :  { %14074 = vmatpush1.bf16.msra.mxu1 %v25577_v3  ;;  %9423 = vmatprep.mubr.f32.mxu1 %v25458_v51  ;;  %v25708_v3 = vld [vmem:[#allocation6_spill] sm:$0xff] }
 0x6b2   :  { %14076 = vmatprep.subr.bf16.mxu1 %v25578_v52  ;;  %v25710_v52 = vld [vmem:[#allocation68_spill] sm:$0xff] }
 0x6b3   :  { %14282 = vmatpush1.bf16.msra.mxu0 %v14281_v60 }
 0x6b4   :  { %14284 = vmatprep.subr.bf16.mxu0 %v25703_v58 }
 0x6b5   :  { %14078 = vmatpush1.bf16.msra.mxu1 %v25580_v34  ;;  %v25712_v34 = vld [vmem:[#allocation105_spill] sm:$0xff] }
 0x6b6   :  { %14080 = vmatprep.subr.bf16.mxu1 %v25705_v12 }
 0x6b7   :  { %14286 = vmatpush1.bf16.msra.mxu0 %v25704_v10 }
 0x6b8   :  { %14288 = vmatprep.subr.bf16.mxu0 %v25706_v26 }
 0x6b9   :  { %14082 = vmatpush1.bf16.msra.mxu1 %v25707_v53 }
 0x6ba   :  { %10236 = vmatmul.mubr.f32.vlgmr.msra.gmra.mrb[6].mxu0 %v25702_v33  ;;  %14084 = vmatprep.subr.bf16.mxu1 %v25709_v32 }
 0x6bb   :  { %14290 = vmatpush1.bf16.msra.mxu0 %v25708_v3  ;;  %10343 = vmatprep.mubr.f32.mxu0 %v25458_v51  ;;  %v25721_v51 = vld [vmem:[#allocation122_spill] sm:$0xff] }
 0x6bc   :  { %14292 = vmatprep.subr.bf16.mxu0 %v25710_v52 }
 0x6bd   :  { %14086 = vmatpush1.bf16.msra.mxu1 %v25711_v4 }
 0x6be   :  { %14088 = vmatprep.subr.bf16.mxu1 %v25713_v20 }
 0x6bf   :  { %14294 = vmatpush1.bf16.msra.mxu0 %v25712_v34 }
 0x6c0   :  { %14296 = vmatprep.subr.bf16.mxu0 %v25714_v23 }
 0x6c1   :  { %14090 = vmatpush1.bf16.msra.mxu1 %v25715_v13 }
 0x6c2   :  { %14092 = vmatprep.subr.bf16.mxu1 %v25717_v25 }
 0x6c3   :  { %14298 = vmatpush1.bf16.msra.mxu0 %v25716_v24 }
 0x6c4   :  { %14300 = vmatprep.subr.bf16.mxu0 %v25718_v39 }
 0x6c5   :  { %14094 = vmatpush1.bf16.msra.mxu1 %v25719_v19 }
 0x6c6   :  { %14096 = vmatprep.subr.bf16.mxu1 %v25721_v51 }
 0x6c7   :  { %14302 = vmatpush1.bf16.msra.mxu0 %v25720_v9  ;;  %v25735_v9 = vld [vmem:[#allocation90_spill] sm:$0xff] }
 0x6c8   :  { %14304 = vmatprep.subr.bf16.mxu0 %v25722_v29 }
 0x6c9   :  { %14098 = vmatpush1.bf16.msra.mxu1 %v25723_v62 }
 0x6ca   :  { %14100 = vmatprep.subr.bf16.mxu1 %v25725_v45  ;;  %v25736_v45 = vld [vmem:[#allocation17_spill] sm:$0xff] }
 0x6cb   :  { %14306 = vmatpush1.bf16.msra.mxu0 %v25724_v59 }
 0x6cc   :  { %14308 = vmatprep.subr.bf16.mxu0 %v25726_v57 }
 0x6cd   :  { %14102 = vmatpush1.bf16.msra.mxu1 %v25727_v54  ;;  %v25737_v54 = vld [vmem:[#allocation22_spill] sm:$0xff] }
 0x6ce   :  { %14104 = vmatprep.subr.bf16.mxu1 %v25729_v46  ;;  %v25738_v46 = vld [vmem:[#allocation41_spill] sm:$0xff] }
 0x6cf   :  { %14310 = vmatpush1.bf16.msra.mxu0 %v25728_v43 }
 0x6d0   :  { %14312 = vmatprep.subr.bf16.mxu0 %v25730_v44 }
 0x6d1   :  { %14106 = vmatpush1.bf16.msra.mxu1 %v25609_v28 }
 0x6d3   :  { %14314 = vmatpush1.bf16.msra.mxu0 %v25610_v38 }
 0x6d4   :  { %14316 = vmatprep.subr.bf16.mxu0 %v25731_v14  ;;  %9425 = vmatmul.mubr.f32.vlgmr.msra.gmra.mrb[6].mxu1 %v25702_v33  ;;  %v25739_v14 = vld [vmem:[#allocation58_spill] sm:$0xff] }
 0x6d5   :  { %10715 = vmatprep.mubr.f32.mxu1 %v25732_v1 }
 0x6d7   :  { %14318 = vmatpush1.bf16.msra.mxu0 %v25617_v5 }
 0x6d8   :  { %14320 = vmatprep.subr.bf16.mxu0 %v25618_v21 }
 0x6da   :  { %v8506_v18 = vpop.permute.xlu1 %8505 }
 0x6db   :  { %14322 = vmatpush1.bf16.msra.mxu0 %v21092_v40 }
 0x6de   :  { %10345 = vmatmul.mubr.f32.vlgmr.msra.gmra.mrb[6].mxu0 %v25702_v33 }
 0x6df   :  { %11554 = vmatprep.mubr.f32.mxu0 %v25732_v1 }
 0x7a7   :  { %v9426_v28 = vpop.f32.mrb[6].mxu1 }
 0x7a8   :  { %v9428_v49 = vpop.f32.mrb[7].mxu1  ;;  %v14519_v38 = vadd.f32 %v9426_v28, %v8506_v18  ;;  %v25740_v28 = vld [vmem:[#allocation29_spill] sm:$0xff] }
 0x7a9   :  { %v14520_v22 = vadd.f32 %v9428_v49, %v8506_v18 }
 0x7aa   :  { %v10356_v48 = vmul.f32 %v14519_v38, %v14519_v38 }
 0x7ab   :  { %v10357_v27 = vmul.f32 %v14520_v22, %v14520_v22  ;;  %v10351_v56 = vadd.f32 %v14520_v22, %v14519_v38 }
 0x7ad   :  { %v10360_v16 = vadd.f32 %v10357_v27, %v10356_v48  ;;  %v25742_v48 = vld [vmem:[#allocation15_spill] sm:$0xff] }
 0x7b1   :  { %v10346_v42 = vpop.f32.mrb[6].mxu0 }
 0x7b2   :  { %v14521_v5 = vadd.f32 %v10346_v42, %v8506_v18  ;;  %v10348_v36 = vpop.f32.mrb[7].mxu0  ;;  %v25743_v42 = vld [vmem:[#allocation76_spill] sm:$0xff] }
 0x7b3   :  { %v14522_v2 = vadd.f32 %v10348_v36, %v8506_v18 }
 0x7b4   :  { %v10352_v21 = vadd.f32 %v14521_v5, %v10351_v56  ;;  %v10358_v30 = vmul.f32 %v14521_v5, %v14521_v5 }
 0x7b5   :  { %v10359_v40 = vmul.f32 %v14522_v2, %v14522_v2 }
 0x7b6   :  { %v10353_v7 = vadd.f32 %v14522_v2, %v10352_v21  ;;  %v10361_v35 = vadd.f32 %v10360_v16, %v10358_v30  ;;  %v25746_v21 = vld [vmem:[#allocation97_spill] sm:$0xff] }
 0x7b8   :  { %10354 = vadd.xlane.f32.xlu0 %v10353_v7  ;;  %v10362_v63 = vadd.f32 %v10361_v35, %v10359_v40  ;;  %v25747_v40 = vld [vmem:[#allocation103_spill] sm:$0xff] }
 0x7b9   :  { %v25748_v35 = vld [vmem:[#allocation67_spill] sm:$0xff] }
 0x7ba   :  { %10363 = vadd.xlane.f32.xlu1 %v10362_v63 }
 0x7cb   :  { %10389 = vperm.xlu1 %14693, %v10386_v11   ;;  %v25749_v11 = vld [vmem:[#allocation99_spill] sm:$0xff] }
 0x845   :  { %v10355_v50 = vpop.xlane.xlu0 %10354 }
 0x846   :  { %v10365_v8 = vmul.f32 0.001953125, %v10355_v50 }
 0x847   :  { %v10364_v55 = vpop.xlane.xlu1 %10363 }
 0x848   :  { %v10366_v31 = vmul.f32 0.001953125, %v10364_v55  ;;  %v10367_v47 = vmul.f32 %v10365_v8, %v10365_v8  ;;  %v10373_v6 = vsub.f32 %v14519_v38, %v10365_v8  ;;  %v10374_v61 = vsub.f32 %v14520_v22, %v10365_v8  ;;  %v25741_v38 = vld [vmem:[#allocation100_spill] sm:$0xff] }
 0x849   :  { %v10375_v60 = vsub.f32 %v14521_v5, %v10365_v8  ;;  %v10376_v33 = vsub.f32 %v14522_v2, %v10365_v8  ;;  %v25744_v5 = vld [vmem:[#allocation36_spill] sm:$0xff]  ;;  %v25745_v2 = vld [vmem:[#allocation74_spill] sm:$0xff]  ;;  %v25750_v8 = vld [vmem:[#allocation89_spill] sm:$0xff] }
 0x84a   :  { %v10368_v0 = vsub.f32 %v10366_v31, %v10367_v47  ;;  %v25751_v31 = vld [vmem:[#allocation14_spill] sm:$0xff] }
 0x84b   :  { %v10390_v3 = vpop.permute.xlu1 %10389 }
 0x84c   :  { %v10370_v15 = vadd.f32 1e-05, %v10368_v0  ;;  %v25752_v0 = vld [vmem:[#allocation82_spill] sm:$0xff] }
 0x84e   :  { %14694 = vrsqrt.f32 %v10370_v15 }
 0x858   :  { %v14695_v17 = vpop.eup %14694 }
 0x859   :  { %v10372_v41 = vmul.f32 %v14695_v17, %v10369_v37  ;;  %v25753_v37 = vld [vmem:[#allocation19_spill] sm:$0xff] }
 0x85b   :  { %10379 = vperm.xlu0 %14692, %v10372_v41  }
 0x8da   :  { %v10380_v58 = vpop.permute.xlu0 %10379 }
 0x8db   :  { %v10382_v10 = vmul.f32 %v10380_v58, %v10373_v6  ;;  %v10383_v12 = vmul.f32 %v10380_v58, %v10374_v61  ;;  %v10384_v26 = vmul.f32 %v10380_v58, %v10375_v60  ;;  %v10385_v53 = vmul.f32 %v10380_v58, %v10376_v33  ;;  %v25754_v6 = vld [vmem:[#allocation75_spill] sm:$0xff]  ;;  %v25755_v60 = vld [vmem:[#allocation48_spill] sm:$0xff] }
 0x8dd   :  { %v10392_v32 = vadd.f32 %v10390_v3, %v10382_v10  ;;  %v10393_v52 = vadd.f32 %v10390_v3, %v10383_v12  ;;  %v10394_v4 = vadd.f32 %v10390_v3, %v10384_v26  ;;  %v10395_v34 = vadd.f32 %v10390_v3, %v10385_v53  ;;  %v25756_v12 = vld [vmem:[#allocation8_spill] sm:$0xff] }
 0x8de   :  { %v25757_v53 = vld [vmem:[#allocation12_spill] sm:$0xff] }
 0x8df   :  { %v21647_v20 = vmax.f32 %v10393_v52, 0.0  ;;  %v21649_v23 = vmax.f32 %v10392_v32, 0.0  ;;  %v21655_v13 = vmax.f32 %v10395_v34, 0.0  ;;  %v21657_v24 = vmax.f32 %v10394_v4, 0.0  ;;  %v25758_v32 = vld [vmem:[#allocation59_spill] sm:$0xff] }
 0x8e0   :  { %v25759_v4 = vld [vmem:[#allocation87_spill] sm:$0xff] }
 0x8e1   :  { %10406 = vrot.lane.b32.xlu1 %v21647_v20, %s14700_s17  ;;  %10404 = vrot.lane.b32.xlu0 %v21649_v23, %s14700_s17  ;;  %25733 = vst [vmem:[#allocation63_spill] sm:$0xff] %v21655_v13  ;;  %25734 = vst [vmem:[#allocation84_spill] sm:$0xff] %v21657_v24 }
 0x8e5   :  { %10410 = vrot.lane.b32.xlu1 %v21655_v13, %s14700_s17  ;;  %10408 = vrot.lane.b32.xlu0 %v21657_v24, %s14700_s17 }
 0x953   :  { %v10407_v25 = vpop.permute.xlu1 %10406  ;;  %v10405_v39 = vpop.permute.xlu0 %10404 }
 0x954   :  { %v21664_v19 = vsel %vm7799_vm1, %v10405_v39, %v10407_v25  ;;  %v21669_v29 = vsel %vm7799_vm1, 0.0, %v10405_v39 }
 0x955   :  { %v10427_v51 = vmul.f32 %v21664_v19, %v25735_v9  ;;  %v10426_v57 = vmul.f32 %v21669_v29, %v25736_v45  ;;  %v10432_v18 = vmul.f32 %v21664_v19, %v25739_v14  ;;  %v10437_v22 = vmul.f32 %v21664_v19, %v25741_v38  ;;  %v25761_v9 = vld [vmem:[#allocation18_spill] sm:$0xff] }
 0x956   :  { %v10436_v27 = vmul.f32 %v21669_v29, %v25742_v48  ;;  %v10431_v56 = vmul.f32 %v21669_v29, %v25743_v42  ;;  %v10442_v16 = vmul.f32 %v21664_v19, %v25745_v2  ;;  %v10447_v30 = vmul.f32 %v21664_v19, %v25746_v21 }
 0x957   :  { %10468 = vrot.lane.b32.xlu0 %v10427_v51, %s14708_s0  ;;  %v10409_v62 = vpop.permute.xlu0 %10408  ;;  %v10441_v7 = vmul.f32 %v21669_v29, %v25747_v40  ;;  %v10452_v63 = vmul.f32 %v21664_v19, %v25748_v35  ;;  %v10446_v55 = vmul.f32 %v21669_v29, %v25750_v8  ;;  %v10457_v15 = vmul.f32 %v21664_v19, %v25752_v0  ;;  %v10411_v41 = vpop.permute.xlu1 %10410 }
 0x958   :  { %v21673_v59 = vsel %vm7799_vm1, %v10407_v25, %v10409_v62  ;;  %v10451_v17 = vmul.f32 %v21669_v29, %v25753_v37  ;;  %v10456_v61 = vmul.f32 %v21669_v29, %v25754_v6  ;;  %v10421_v58 = vsel %vm7799_vm1, %v10411_v41, 0.0  ;;  %v25760_v25 = vld [vmem:[#allocation57_spill] sm:$0xff] }
 0x959   :  { %v10428_v43 = vmul.f32 %v21673_v59, %v25737_v54  ;;  %v10433_v44 = vmul.f32 %v21673_v59, %v25738_v46  ;;  %v10438_v49 = vmul.f32 %v21673_v59, %v25740_v28  ;;  %v10443_v36 = vmul.f32 %v21673_v59, %v25744_v5 }
 0x95a   :  { %v10448_v50 = vmul.f32 %v21673_v59, %v25749_v11  ;;  %v10453_v47 = vmul.f32 %v21673_v59, %v25751_v31  ;;  %v10458_v33 = vmul.f32 %v21673_v59, %v25755_v60  ;;  %v10414_v10 = vsel %vm7799_vm1, %v10409_v62, %v10411_v41  ;;  %v25762_v62 = vld [vmem:[#allocation83_spill] sm:$0xff]  ;;  %v25773_v60 = vld [vmem:[#allocation65_spill] sm:$0xff] }
 0x95b   :  { %10466 = vrot.lane.b32.xlu0 %v10426_v57, %s14708_s0  ;;  %10470 = vrot.lane.b32.xlu1 %v10428_v43, %s14708_s0  ;;  %v10430_v26 = vmul.f32 %v10421_v58, %v25756_v12  ;;  %v10429_v3 = vmul.f32 %v10414_v10, %v25757_v53  ;;  %v10435_v52 = vmul.f32 %v10421_v58, %v25758_v32  ;;  %v25763_v57 = vld [vmem:[#allocation39_spill] sm:$0xff]  ;;  %v10651_v37 = vand.u32 4294901760, %v21649_v23 }
 0x95c   :  { %v10434_v34 = vmul.f32 %v10414_v10, %v25759_v4  ;;  %v10440_v39 = vmul.f32 %v10421_v58, %v25760_v25  ;;  %v10439_v51 = vmul.f32 %v10414_v10, %v25761_v9  ;;  %v10445_v45 = vmul.f32 %v10421_v58, %v25762_v62  ;;  %v25764_v43 = vld [vmem:[#allocation43_spill] sm:$0xff]  ;;  %v10622_v25 = vld [vmem:[%s22488_s10] sm:$0xff] }
 0x95d   :  { %v10444_v54 = vmul.f32 %v10414_v10, %v25763_v57  ;;  %v10450_v46 = vmul.f32 %v10421_v58, %v25764_v43  ;;  %v10649_v41 = vand.u32 4294901760, %v21647_v20  ;;  %v23531_v53 = vand.u32 4294901760, %v21655_v13 }
 0x95e   :  { %v21818_v4 = vsub.f32 %v21649_v23, %v10651_v37  ;;  %v10631_v43 = vsel %vm10629_vm15, %v10622_v25, 0 }
 0x95f   :  { %10493 = vrot.lane.b32.xlu0 %v10433_v44, %s14709_s25  ;;  %10491 = vrot.lane.b32.xlu1 %v10432_v18, %s14709_s25  ;;  %v25765_v44 = vld [vmem:[#allocation31_spill] sm:$0xff] }
 0x960   :  { %v10449_v14 = vmul.f32 %v10414_v10, %v25765_v44  ;;  %v25766_v18 = vld [vmem:[#allocation55_spill] sm:$0xff] }
 0x961   :  { %v10455_v28 = vmul.f32 %v10421_v58, %v25766_v18 }
 0x963   :  { %10516 = vrot.lane.b32.xlu0 %v10438_v49, %s14710_s1  ;;  %10514 = vrot.lane.b32.xlu1 %v10437_v22, %s14710_s1  ;;  %v25767_v49 = vld [vmem:[#allocation80_spill] sm:$0xff]  ;;  %v25768_v22 = vld [vmem:[#allocation7_spill] sm:$0xff] }
 0x964   :  { %v10454_v38 = vmul.f32 %v10414_v10, %v25767_v49  ;;  %v10460_v48 = vmul.f32 %v10421_v58, %v25768_v22  ;;  %v25775_v58 = vld [vmem:[#allocation52_spill] sm:$0xff] }
 0x965   :  { %v21809_v12 = vmul.f32 %v10414_v10, %v25775_v58 }
 0x967   :  { %10512 = vrot.lane.b32.xlu0 %v10436_v27, %s14710_s1  ;;  %10489 = vrot.lane.b32.xlu1 %v10431_v56, %s14709_s25  ;;  %v25769_v27 = vld [vmem:[#allocation13_spill] sm:$0xff]  ;;  %v10623_v56 = vld [vmem:[%s22487_s11] sm:$0xff]  ;;  %25776 = vst [vmem:[#allocation134_spill] sm:$0xff] %v21809_v12  ;;  %v23536_v23 = vand.u32 4294901760, %v21809_v12 }
 0x968   :  { %v10459_v42 = vmul.f32 %v10414_v10, %v25769_v27  ;;  %v21823_v10 = vsub.f32 %v21647_v20, %v10649_v41 }
 0x969   :  { %v21862_v22 = vsub.f32 %v21809_v12, %v23536_v23 }
 0x96a   :  { %v23533_v18 = vand.u32 4294901760, %v21823_v10 }
 0x96b   :  { %10539 = vrot.lane.b32.xlu0 %v10443_v36, %s14711_s2  ;;  %10537 = vrot.lane.b32.xlu1 %v10442_v16, %s14711_s2  ;;  %v25770_v36 = vld [vmem:[#allocation98_spill] sm:$0xff]  ;;  %v25771_v16 = vld [vmem:[#allocation3_spill] sm:$0xff] }
 0x96c   :  { %v10422_v2 = vmul.f32 %v21669_v29, %v25770_v36  ;;  %v10423_v21 = vmul.f32 %v21664_v19, %v25771_v16 }
 0x96e   :  { %v10635_v11 = vand.u32 4294901760, %v10422_v2  ;;  %v10633_v8 = vand.u32 4294901760, %v10423_v21 }
 0x96f   :  { %10560 = vrot.lane.b32.xlu0 %v10447_v30, %s14712_s26  ;;  %10535 = vrot.lane.b32.xlu1 %v10441_v7, %s14711_s2 }
 0x970   :  { %v21836_v20 = vsub.f32 %v10422_v2, %v10635_v11  ;;  %v21847_v44 = vsub.f32 %v10423_v21, %v10633_v8 }
 0x973   :  { %10583 = vrot.lane.b32.xlu0 %v10452_v63, %s14713_s27  ;;  %10562 = vrot.lane.b32.xlu1 %v10448_v50, %s14712_s26 }
 0x977   :  { %10558 = vrot.lane.b32.xlu0 %v10446_v55, %s14712_s26  ;;  %10585 = vrot.lane.b32.xlu1 %v10453_v47, %s14713_s27 }
 0x97b   :  { %10606 = vrot.lane.b32.xlu0 %v10457_v15, %s14714_s28  ;;  %10581 = vrot.lane.b32.xlu1 %v10451_v17, %s14713_s27 }
 0x97f   :  { %10604 = vrot.lane.b32.xlu0 %v10456_v61, %s14714_s28  ;;  %10608 = vrot.lane.b32.xlu1 %v10458_v33, %s14714_s28  ;;  %v21806_v33 = vmul.f32 %v21673_v59, %v25773_v60 }
 0x981   :  { %25774 = vst [vmem:[#allocation46_spill] sm:$0xff] %v21806_v33 }
 0x983   :  { %10474 = vrot.lane.b32.xlu0 %v10430_v26, %s14708_s0  ;;  %10472 = vrot.lane.b32.xlu1 %v10429_v3, %s14708_s0  ;;  %v23528_v26 = vand.u32 4294901760, %v21657_v24 }
 0x985   :  { %v21834_v62 = vsub.f32 %v21657_v24, %v23528_v26 }
 0x987   :  { %10497 = vrot.lane.b32.xlu0 %v10435_v52, %s14709_s25  ;;  %10495 = vrot.lane.b32.xlu1 %v10434_v34, %s14709_s25  ;;  %25778 = vst [vmem:[#allocation77_spill] sm:$0xff] %v21834_v62  ;;  %v23530_v2 = vand.u32 4294901760, %v21834_v62 }
 0x98b   :  { %10520 = vrot.lane.b32.xlu0 %v10440_v39, %s14710_s1  ;;  %10518 = vrot.lane.b32.xlu1 %v10439_v51, %s14710_s1  ;;  %v23535_v51 = vand.u32 4294901760, %v21806_v33 }
 0x98d   :  { %v21856_v49 = vsub.f32 %v21806_v33, %v23535_v51 }
 0x98f   :  { %10543 = vrot.lane.b32.xlu0 %v10445_v45, %s14711_s2  ;;  %10541 = vrot.lane.b32.xlu1 %v10444_v54, %s14711_s2 }
 0x993   :  { %10566 = vrot.lane.b32.xlu0 %v10450_v46, %s14712_s26  ;;  %10564 = vrot.lane.b32.xlu1 %v10449_v14, %s14712_s26  ;;  %v21845_v46 = vsub.f32 %v21655_v13, %v23531_v53 }
 0x995   :  { %25780 = vst [vmem:[#allocation47_spill] sm:$0xff] %v21845_v46  ;;  %v23527_v36 = vand.u32 4294901760, %v21845_v46 }
 0x997   :  { %10589 = vrot.lane.b32.xlu0 %v10455_v28, %s14713_s27  ;;  %10587 = vrot.lane.b32.xlu1 %v10454_v38, %s14713_s27  ;;  %v23529_v38 = vand.u32 4294901760, %v21818_v4  ;;  %v21908_v25 = vsub.f32 %v21845_v46, %v23527_v36 }
 0x99b   :  { %10612 = vrot.lane.b32.xlu0 %v10460_v48, %s14714_s28  ;;  %10610 = vrot.lane.b32.xlu1 %v10459_v42, %s14714_s28  ;;  %v21864_v48 = vand.u32 4294901760, %v10631_v43 }
 0x99f   :  { %10626 = vperm.xlu1 %14693, %v10623_v56  }
 0x9c9   :  { %v10469_v5 = vpop.permute.xlu0 %10468 }
 0x9cd   :  { %v21772_v30 = vpop.permute.xlu1 %10470  ;;  %v10467_v40 = vpop.permute.xlu0 %10466 }
 0x9ce   :  { %v10477_v7 = vsel %vm8201_vm9, %v10469_v5, %v21772_v30  ;;  %v21777_v35 = vsel %vm8201_vm9, %v10467_v40, %v10469_v5  ;;  %v23537_v5 = vand.u32 4294901760, %v21836_v20  ;;  %v23539_v40 = vand.u32 4294901760, %v21847_v44 }
 0x9cf   :  { %v10637_v63 = vand.u32 4294901760, %v10477_v7  ;;  %v10639_v50 = vand.u32 4294901760, %v21777_v35 }
 0x9d1   :  { %v21782_v29 = vpack.c.bf16 %v10639_v50, %v10635_v11  ;;  %v10492_v55 = vpop.permute.xlu1 %10491  ;;  %v21784_v19 = vpop.permute.xlu0 %10493  ;;  %v21786_v31 = vpack.c.bf16 %v10637_v63, %v10633_v8  ;;  %v21871_v16 = vsub.f32 %v10477_v7, %v10637_v63  ;;  %v21878_v11 = vsub.f32 %v21823_v10, %v23533_v18 }
 0x9d2   :  { %v21791_v47 = vsel %vm8248_vm10, %v10492_v55, %v21784_v19  ;;  %v23532_v7 = vand.u32 4294901760, %v21862_v22  ;;  %v23534_v63 = vand.u32 4294901760, %v21856_v49 }
 0x9d3   :  { %25772 = vst [vmem:[#allocation10_spill] sm:$0xff] %v21782_v29  ;;  %14324 = vmatprep.subr.bf16.mxu1 %v21786_v31  ;;  %v10641_v6 = vand.u32 4294901760, %v21791_v47 }
 0x9d4   :  { %14326 = vmatpush1.bf16.msra.mxu1 %v21782_v29  ;;  %v21930_v36 = vsub.f32 %v21862_v22, %v23532_v7  ;;  %v21935_v26 = vsub.f32 %v21856_v49, %v23534_v63 }
 0x9d5   :  { %v10515_v0 = vpop.permute.xlu1 %10514  ;;  %v21794_v15 = vpop.permute.xlu0 %10516  ;;  %v21950_v7 = vsub.f32 %v21791_v47, %v10641_v6 }
 0x9d6   :  { %v21799_v17 = vsel %vm8295_vm11, %v10515_v0, %v21794_v15 }
 0x9d7   :  { %v10645_v61 = vand.u32 4294901760, %v21799_v17 }
 0x9d9   :  { %v10490_v3 = vpop.permute.xlu1 %10489  ;;  %v10513_v32 = vpop.permute.xlu0 %10512  ;;  %v21815_v52 = vpack.c.bf16 %v10645_v61, %v10641_v6 }
 0x9da   :  { %v10499_v34 = vsel %vm8248_vm10, %v10490_v3, %v10492_v55  ;;  %v10522_v59 = vsel %vm8295_vm11, %v10513_v32, %v10515_v0  ;;  %v21884_v55 = vsub.f32 %v21818_v4, %v23529_v38  ;;  %v21889_v0 = vsub.f32 %v10631_v43, %v21864_v48 }
 0x9db   :  { %25777 = vst [vmem:[#allocation110_spill] sm:$0xff] %v21815_v52  ;;  %v10643_v39 = vand.u32 4294901760, %v10499_v34  ;;  %v10647_v9 = vand.u32 4294901760, %v10522_v59  ;;  %14328 = vmatprep.subr.bf16.mxu1 %v21815_v52  ;;  %v21903_v32 = vsub.f32 %v21836_v20, %v23537_v5  ;;  %v21923_v43 = vsub.f32 %v21799_v17, %v10645_v61 }
 0x9dc   :  { %v21944_v61 = vand.u32 4294901760, %v21889_v0 }
 0x9dd   :  { %v21838_v45 = vpack.c.bf16 %v10647_v9, %v10643_v39  ;;  %v10538_v57 = vpop.permute.xlu1 %10537  ;;  %v21840_v54 = vpop.permute.xlu0 %10539  ;;  %v21937_v38 = vsub.f32 %v10499_v34, %v10643_v39 }
 0x9de   :  { %v10546_v14 = vsel %vm8342_vm12, %v10538_v57, %v21840_v54  ;;  %25783 = vst [vmem:[#allocation119_spill] sm:$0xff] %v21944_v61 }
 0x9df   :  { %25779 = vst [vmem:[#allocation123_spill] sm:$0xff] %v21838_v45  ;;  %v10653_v28 = vand.u32 4294901760, %v10546_v14  ;;  %14330 = vmatpush1.bf16.msra.mxu1 %v21838_v45 }
 0x9e1   :  { %v10536_v27 = vpop.permute.xlu1 %10535  ;;  %v10561_v42 = vpop.permute.xlu0 %10560  ;;  %v21866_v56 = vpack.c.bf16 %v10653_v28, %v10649_v41  ;;  %v21894_v41 = vsub.f32 %v21777_v35, %v10639_v50  ;;  %v21914_v35 = vsub.f32 %v21847_v44, %v23539_v40  ;;  %v21952_v18 = vsub.f32 %v10546_v14, %v10653_v28 }
 0x9e2   :  { %v10545_v21 = vsel %vm8342_vm12, %v10536_v27, %v10538_v57  ;;  %v23538_v57 = vand.u32 4294901760, %v21871_v16 }
 0x9e3   :  { %25781 = vst [vmem:[#allocation95_spill] sm:$0xff] %v21866_v56  ;;  %v10655_v8 = vand.u32 4294901760, %v10545_v21  ;;  %14332 = vmatprep.subr.bf16.mxu1 %v21866_v56  ;;  %v23542_v53 = vand.u32 4294901760, %v21894_v41  ;;  %v10731_v51 = vand.u32 4294901760, %v21914_v35 }
 0x9e4   :  { %v10742_v23 = vsub.f32 %v21871_v16, %v23538_v57  ;;  %v25786_v57 = vand.u32 4294901760, %v21937_v38 }
 0x9e5   :  { %v21896_v60 = vpack.c.bf16 %v10655_v8, %v10651_v37  ;;  %v21898_v58 = vpop.permute.xlu1 %10562  ;;  %v10584_v3 = vpop.permute.xlu0 %10583  ;;  %v21920_v37 = vsub.f32 %v21834_v62, %v23530_v2  ;;  %v21939_v2 = vsub.f32 %v10522_v59, %v10647_v9  ;;  %v10737_v59 = vand.u32 4294901760, %v21903_v32 }
 0x9e6   :  { %v10569_v17 = vsel %vm8389_vm13, %v10561_v42, %v21898_v58  ;;  %v21957_v39 = vsub.f32 %v10545_v21, %v10655_v8  ;;  %v10719_v32 = vsub.f32 %v21889_v0, %v21944_v61  ;;  %v10748_v35 = vsub.f32 %v21894_v41, %v23542_v53 }
 0x9e7   :  { %25782 = vst [vmem:[#allocation27_spill] sm:$0xff] %v21896_v60  ;;  %14334 = vmatpush1.bf16.msra.mxu1 %v21896_v60  ;;  %v10657_v6 = vand.u32 4294901760, %v10569_v17  ;;  %v25785_v53 = vand.u32 4294901760, %v21923_v43  ;;  %v10760_v33 = vsub.f32 %v21937_v38, %v25786_v57  ;;  %v25787_v5 = vand.u32 4294901760, %v21939_v2 }
 0x9e8   :  { %v25791_v57 = vand.u32 4294901760, %v21952_v18 }
 0x9e9   :  { %v21954_v63 = vpop.permute.xlu1 %10585  ;;  %v10559_v34 = vpop.permute.xlu0 %10558  ;;  %v21982_v47 = vsub.f32 %v10569_v17, %v10657_v6  ;;  %v10766_v40 = vsub.f32 %v21923_v43, %v25785_v53  ;;  %v10749_v17 = vand.u32 4294901760, %v10748_v35  ;;  %v25790_v53 = vand.u32 4294901760, %v21950_v7 }
 0x9ea   :  { %v10592_v9 = vsel %vm8436_vm8, %v10584_v3, %v21954_v63  ;;  %v10568_v8 = vsel %vm8389_vm13, %v10559_v34, %v10561_v42  ;;  %v10743_v42 = vand.u32 4294901760, %v10742_v23  ;;  %v10772_v23 = vsub.f32 %v21939_v2, %v25787_v5 }
 0x9eb   :  { %v10661_v14 = vand.u32 4294901760, %v10592_v9  ;;  %v10659_v24 = vand.u32 4294901760, %v10568_v8  ;;  %v10754_v61 = vsub.f32 %v21950_v7, %v25790_v53  ;;  %v25792_v5 = vand.u32 4294901760, %v21957_v39 }
 0x9ec   :  { %v14339_v53 = vpack.c.bf16 %v10743_v42, %v10731_v51  ;;  %v10767_v46 = vand.u32 4294901760, %v10766_v40  ;;  %v10773_v56 = vand.u32 4294901760, %v10772_v23 }
 0x9ed   :  { %v10582_v27 = vpop.permute.xlu1 %10581  ;;  %v10607_v50 = vpop.permute.xlu0 %10606  ;;  %v21977_v28 = vpack.c.bf16 %v10661_v14, %v10657_v6 }
 0x9ee   :  { %v10591_v21 = vsel %vm8436_vm8, %v10582_v27, %v10584_v3  ;;  %v21994_v3 = vsub.f32 %v10592_v9, %v10661_v14  ;;  %v21996_v27 = vand.u32 4294901760, %v10719_v32  ;;  %v10796_v9 = vsub.f32 %v21957_v39, %v25792_v5 }
 0x9ef   :  { %25784 = vst [vmem:[#allocation101_spill] sm:$0xff] %v21977_v28  ;;  %v10663_v13 = vand.u32 4294901760, %v10591_v21  ;;  %14336 = vmatprep.subr.bf16.mxu1 %v21977_v28  ;;  %v10790_v28 = vsub.f32 %v21952_v18, %v25791_v57  ;;  %v10761_v57 = vand.u32 4294901760, %v10760_v33  ;;  %v22021_v5 = vsub.f32 %v10568_v8, %v10659_v24 }
 0x9f0   :  { %25788 = vst [vmem:[#allocation42_spill] sm:$0xff] %v21996_v27  ;;  %v23567_v45 = vand.u32 4294901760, %v21994_v3  ;;  %v10797_v29 = vand.u32 4294901760, %v10796_v9 }
 0x9f1   :  { %v21998_v6 = vpack.c.bf16 %v10663_v13, %v10659_v24  ;;  %v22000_v34 = vpop.permute.xlu1 %10608  ;;  %v10605_v12 = vpop.permute.xlu0 %10604  ;;  %v22011_v14 = vsub.f32 %v10591_v21, %v10663_v13  ;;  %v10791_v60 = vand.u32 4294901760, %v10790_v28  ;;  %v23566_v28 = vand.u32 4294901760, %v22021_v5 }
 0x9f2   :  { %v10615_v32 = vsel %vm8483_vm14, %v10607_v50, %v22000_v34  ;;  %v10614_v35 = vsel %vm8483_vm14, %v10605_v12, %v10607_v50  ;;  %v14341_v12 = vpack.c.bf16 %v10749_v17, %v10737_v59  ;;  %v10755_v50 = vand.u32 4294901760, %v10754_v61 }
 0x9f3   :  { %25789 = vst [vmem:[#allocation78_spill] sm:$0xff] %v21998_v6  ;;  %v22017_v62 = vand.u32 4294901760, %v10615_v32  ;;  %14338 = vmatpush1.bf16.msra.mxu1 %v21998_v6  ;;  %v22023_v13 = vand.u32 4294901760, %v10614_v35  ;;  %v23565_v6 = vand.u32 4294901760, %v22011_v14  ;;  %v25793_v61 = vand.u32 4294901760, %v21982_v47 }
 0x9f4   :  { %v14343_v8 = vpack.c.bf16 %v10767_v46, %v10755_v50  ;;  %v25795_v50 = vand.u32 4294901760, %v21884_v55 }
 0x9f5   :  { %v10473_v21 = vpop.permute.xlu1 %10472  ;;  %v10475_v52 = vpop.permute.xlu0 %10474  ;;  %10666 = vmatprep.subr.mxu1 %v22017_v62  ;;  %v10802_v59 = vsub.f32 %v21982_v47, %v25793_v61  ;;  %v22042_v42 = vsub.f32 %v10615_v32, %v22017_v62  ;;  %v22049_v23 = vsub.f32 %v10614_v35, %v22023_v13  ;;  %v10820_v35 = vsub.f32 %v22011_v14, %v23565_v6 }
 0x9f6   :  { %v22029_v33 = vsel %vm8201_vm9, %v21772_v30, %v10473_v21  ;;  %v22032_v51 = vsel %vm8201_vm9, %v10473_v21, %v10475_v52  ;;  %v14345_v30 = vpack.c.bf16 %v10773_v56, %v10761_v57  ;;  %v10814_v52 = vsub.f32 %v21994_v3, %v23567_v45 }
 0x9f7   :  { %v23570_v24 = vand.u32 4294901760, %v22029_v33  ;;  %v23571_v40 = vand.u32 4294901760, %v22032_v51  ;;  %10668 = vmatpush1.msra.mxu1 %v22023_v13  ;;  %v25794_v56 = vand.u32 4294901760, %v21878_v11  ;;  %v14349_v61 = vpack.c.bf16 %v10797_v29, %v25795_v50 }
 0x9f8   :  { %14340 = vmatprep.subr.bf16.mxu1 %v14339_v53  ;;  %10721 = vmatmul.mubr.f32.vlgmr.msra.gmra.mrb[8].mxu1 %v21996_v27 }
 0x9f9   :  { %v22054_v46 = vsub.f32 %v22029_v33, %v23570_v24  ;;  %v22059_v17 = vsub.f32 %v22032_v51, %v23571_v40  ;;  %v10496_v9 = vpop.permute.xlu1 %10495  ;;  %v10498_v32 = vpop.permute.xlu0 %10497  ;;  %14342 = vmatpush1.bf16.msra.mxu1 %v14341_v12  ;;  %v14347_v53 = vpack.c.bf16 %v10791_v60, %v25794_v56  ;;  %v10803_v56 = vand.u32 4294901760, %v10802_v59  ;;  %10881 = vmatprep.mubr.f32.mxu1 %v25732_v1 }
 0x9fa   :  { %v22068_v57 = vsel %vm8248_vm10, %v21784_v19, %v10496_v9  ;;  %v22071_v21 = vsel %vm8248_vm10, %v10496_v9, %v10498_v32  ;;  %14344 = vmatprep.subr.bf16.mxu1 %v14343_v8  ;;  %v10808_v19 = vsub.f32 %v22021_v5, %v23566_v28  ;;  %v10815_v32 = vand.u32 4294901760, %v10814_v52 }
 0x9fb   :  { %v23568_v12 = vand.u32 4294901760, %v22054_v46  ;;  %v23572_v11 = vand.u32 4294901760, %v22059_v17  ;;  %v23569_v60 = vand.u32 4294901760, %v22068_v57  ;;  %v23573_v9 = vand.u32 4294901760, %v22071_v21 }
 0x9fc   :  { %v10821_v28 = vand.u32 4294901760, %v10820_v35  ;;  %v14351_v29 = vpack.c.bf16 %v10815_v32, %v10803_v56 }
 0x9fd   :  { %v11421_v55 = vsub.f32 %v22054_v46, %v23568_v12  ;;  %v22091_v59 = vsub.f32 %v22068_v57, %v23569_v60  ;;  %v10519_v50 = vpop.permute.xlu1 %10518  ;;  %v10521_v6 = vpop.permute.xlu0 %10520  ;;  %14346 = vmatpush1.bf16.msra.mxu1 %v14345_v30  ;;  %v11415_v52 = vsub.f32 %v22059_v17, %v23572_v11  ;;  %v22099_v45 = vsub.f32 %v22071_v21, %v23573_v9 }
 0x9fe   :  { %v22103_v12 = vsel %vm8295_vm11, %v21794_v15, %v10519_v50  ;;  %v22106_v60 = vsel %vm8295_vm11, %v10519_v50, %v10521_v6  ;;  %14348 = vmatprep.subr.bf16.mxu1 %v14347_v53  ;;  %v10809_v11 = vand.u32 4294901760, %v10808_v19  ;;  %v25797_v9 = vand.u32 4294901760, %v22042_v42 }
 0x9ff   :  { %25796 = vst [vmem:[#allocation125_spill] sm:$0xff] %v22103_v12  ;;  %v11422_v24 = vand.u32 4294901760, %v11421_v55  ;;  %v23581_v30 = vand.u32 4294901760, %v22091_v59  ;;  %v23575_v40 = vand.u32 4294901760, %v22103_v12  ;;  %v23576_v35 = vand.u32 4294901760, %v22106_v60 }
 0xa00   :  { %v11416_v8 = vand.u32 4294901760, %v11415_v52  ;;  %v10826_v27 = vsub.f32 %v22042_v42, %v25797_v9  ;;  %v25798_v15 = vand.u32 4294901760, %v22049_v23  ;;  %v25801_v52 = vand.u32 4294901760, %v21930_v36 }
 0xa01   :  { %v22121_v55 = vsub.f32 %v22103_v12, %v23575_v40  ;;  %v22126_v56 = vsub.f32 %v22106_v60, %v23576_v35  ;;  %v10542_v19 = vpop.permute.xlu1 %10541  ;;  %v10544_v32 = vpop.permute.xlu0 %10543  ;;  %14350 = vmatpush1.bf16.msra.mxu1 %v14349_v61  ;;  %v25802_v40 = vand.u32 4294901760, %v21935_v26  ;;  %v11433_v35 = vsub.f32 %v22091_v59, %v23581_v30 }
 0xa02   :  { %v10832_v6 = vsub.f32 %v22049_v23, %v25798_v15  ;;  %v22130_v9 = vsel %vm8342_vm12, %v21840_v54, %v10542_v19  ;;  %v22133_v50 = vsel %vm8342_vm12, %v10542_v19, %v10544_v32  ;;  %14352 = vmatprep.subr.bf16.mxu1 %v14351_v29  ;;  %v14435_v15 = vpack.c.bf16 %v11416_v8, %v25801_v52 }
 0xa03   :  { %25799 = vst [vmem:[#allocation33_spill] sm:$0xff] %v22130_v9  ;;  %25800 = vst [vmem:[#allocation21_spill] sm:$0xff] %v22133_v50  ;;  %v14437_v53 = vpack.c.bf16 %v11422_v24, %v25802_v40  ;;  %v23579_v61 = vand.u32 4294901760, %v22121_v55  ;;  %v23578_v12 = vand.u32 4294901760, %v22126_v56  ;;  %v14353_v54 = vpack.c.bf16 %v10821_v28, %v10809_v11 }
 0xa04   :  { %v14357_v19 = vpack.c.bf16 %v21894_v41, %v21836_v20  ;;  %v23580_v29 = vand.u32 4294901760, %v22130_v9  ;;  %v23582_v36 = vand.u32 4294901760, %v22133_v50  ;;  %14436 = vmatprep.subr.bf16.mxu0 %v14435_v15  ;;  %v10827_v8 = vand.u32 4294901760, %v10826_v27 }
 0xa05   :  { %v11445_v26 = vsub.f32 %v22121_v55, %v23579_v61  ;;  %14438 = vmatpush1.bf16.msra.mxu0 %v14437_v53  ;;  %v10565_v24 = vpop.permute.xlu1 %10564  ;;  %v10567_v40 = vpop.permute.xlu0 %10566  ;;  %14354 = vmatpush1.bf16.msra.mxu1 %v14353_v54  ;;  %v25803_v32 = vand.u32 4294901760, %v22099_v45  ;;  %v11439_v11 = vsub.f32 %v22126_v56, %v23578_v12  ;;  %v11452_v52 = vand.u32 4294901760, %v21908_v25 }
 0xa06   :  { %v22161_v27 = vsub.f32 %v22130_v9, %v23580_v29  ;;  %v22166_v53 = vsub.f32 %v22133_v50, %v23582_v36  ;;  %v22170_v15 = vsel %vm8389_vm13, %v21898_v58, %v10565_v24  ;;  %10828 = vmatprep.subr.mxu1 %v10827_v8  ;;  %v10833_v54 = vand.u32 4294901760, %v10832_v6 }
 0xa07   :  { %v11427_v28 = vsub.f32 %v22099_v45, %v25803_v32  ;;  %25804 = vst [vmem:[#allocation131_spill] sm:$0xff] %v22170_v15  ;;  %v11434_v32 = vand.u32 4294901760, %v11433_v35  ;;  %v11446_v12 = vand.u32 4294901760, %v11445_v26  ;;  %v23585_v25 = vand.u32 4294901760, %v22170_v15 }
 0xa08   :  { %v22174_v61 = vsel %vm8389_vm13, %v10565_v24, %v10567_v40  ;;  %v23586_v29 = vand.u32 4294901760, %v22161_v27  ;;  %v14355_v9 = vpack.c.bf16 %v21871_v16, %v21847_v44  ;;  %v11440_v26 = vand.u32 4294901760, %v11439_v11 }
 0xa09   :  { %25805 = vst [vmem:[#allocation45_spill] sm:$0xff] %v22174_v61  ;;  %v23587_v36 = vand.u32 4294901760, %v22174_v61  ;;  %v22184_v58 = vsub.f32 %v22170_v15, %v23585_v25  ;;  %v10588_v35 = vpop.permute.xlu1 %10587  ;;  %v10590_v6 = vpop.permute.xlu0 %10589  ;;  %10834 = vmatpush1.msra.mxu1 %v10833_v54  ;;  %v11428_v8 = vand.u32 4294901760, %v11427_v28  ;;  %v14441_v24 = vpack.c.bf16 %v11446_v12, %v11434_v32 }
 0xa0a   :  { %v11469_v40 = vsub.f32 %v22161_v27, %v23586_v29  ;;  %v22196_v50 = vsel %vm8436_vm8, %v21954_v63, %v10588_v35  ;;  %v22199_v25 = vsel %vm8436_vm8, %v10588_v35, %v10590_v6  ;;  %14356 = vmatprep.subr.bf16.mxu1 %v14355_v9  ;;  %10883 = vmatmul.mubr.f32.vlgmr.msra.gmra.mrb[8].mxu1 %v21864_v48  ;;  %v25808_v35 = vand.u32 4294901760, %v22166_v53 }
 0xa0b   :  { %v22192_v30 = vsub.f32 %v22174_v61, %v23587_v36  ;;  %25806 = vst [vmem:[#allocation66_spill] sm:$0xff] %v22196_v50  ;;  %25807 = vst [vmem:[#allocation23_spill] sm:$0xff] %v22199_v25  ;;  %v23595_v28 = vand.u32 4294901760, %v22184_v58  ;;  %v23588_v12 = vand.u32 4294901760, %v22196_v50  ;;  %v23590_v11 = vand.u32 4294901760, %v22199_v25  ;;  %14358 = vmatpush1.bf16.msra.mxu1 %v14357_v19  ;;  %10989 = vmatprep.mubr.f32.mxu1 %v25732_v1 }
 0xa0c   :  { %v14439_v54 = vpack.c.bf16 %v11440_v26, %v11428_v8  ;;  %v11470_v32 = vand.u32 4294901760, %v11469_v40  ;;  %v14359_v63 = vpack.c.bf16 %v21923_v43, %v21950_v7  ;;  %v11463_v9 = vsub.f32 %v22166_v53, %v25808_v35 }
 0xa0d   :  { %v14361_v6 = vpack.c.bf16 %v21939_v2, %v21937_v38  ;;  %v22217_v8 = vsub.f32 %v22196_v50, %v23588_v12  ;;  %v22222_v19 = vsub.f32 %v22199_v25, %v23590_v11  ;;  %v10611_v26 = vpop.permute.xlu1 %10610  ;;  %v10613_v40 = vpop.permute.xlu0 %10612  ;;  %v11458_v35 = vand.u32 4294901760, %v21920_v37 }
 0xa0e   :  { %14440 = vmatprep.subr.bf16.mxu0 %v14439_v54  ;;  %v11481_v36 = vsub.f32 %v22184_v58, %v23595_v28  ;;  %14360 = vmatprep.subr.bf16.mxu1 %v14359_v63  ;;  %v10616_v12 = vsel %vm8483_vm14, %v22000_v34, %v10611_v26  ;;  %v10617_v29 = vsel %vm8483_vm14, %v10611_v26, %v10613_v40  ;;  %v11464_v50 = vand.u32 4294901760, %v11463_v9 }
 0xa0f   :  { %25809 = vst [vmem:[#allocation72_spill] sm:$0xff] %v22217_v8  ;;  %14442 = vmatpush1.bf16.msra.mxu0 %v14441_v24  ;;  %v23594_v11 = vand.u32 4294901760, %v22217_v8  ;;  %v23596_v54 = vand.u32 4294901760, %v22222_v19  ;;  %v14363_v15 = vpack.c.bf16 %v21952_v18, %v21823_v10  ;;  %v14445_v37 = vpack.c.bf16 %v11470_v32, %v11458_v35  ;;  %14362 = vmatpush1.bf16.msra.mxu1 %v14361_v6 }
 0xa10   :  { %v22235_v25 = vand.u32 4294901760, %v10616_v12  ;;  %v22237_v61 = vand.u32 4294901760, %v10617_v29  ;;  %v14443_v24 = vpack.c.bf16 %v11464_v50, %v11452_v52  ;;  %v25810_v63 = vand.u32 4294901760, %v22192_v30 }
 0xa11   :  { %v14365_v9 = vpack.c.bf16 %v21957_v39, %v21818_v4  ;;  %v11493_v26 = vsub.f32 %v22217_v8, %v23594_v11  ;;  %14364 = vmatprep.subr.bf16.mxu1 %v14363_v15  ;;  %v11487_v32 = vsub.f32 %v22222_v19, %v23596_v54  ;;  %v11482_v40 = vand.u32 4294901760, %v11481_v36 }
 0xa12   :  { %v11475_v34 = vsub.f32 %v22192_v30, %v25810_v63  ;;  %v22251_v6 = vsub.f32 %v10616_v12, %v22235_v25  ;;  %v22254_v50 = vsub.f32 %v10617_v29, %v22237_v61  ;;  %14444 = vmatprep.subr.bf16.mxu0 %v14443_v24  ;;  %v14367_v52 = vpack.c.bf16 %v21994_v3, %v21982_v47 }
 0xa13   :  { %v11494_v35 = vand.u32 4294901760, %v11493_v26  ;;  %14446 = vmatpush1.bf16.msra.mxu0 %v14445_v37  ;;  %v11488_v11 = vand.u32 4294901760, %v11487_v32  ;;  %v25812_v15 = vand.u32 4294901760, %v22091_v59  ;;  %v25813_v28 = vand.u32 4294901760, %v22121_v55  ;;  %14366 = vmatpush1.bf16.msra.mxu1 %v14365_v9 }
 0xa14   :  { %25811 = vst [vmem:[#allocation44_spill] sm:$0xff] %v22254_v50  ;;  %v11476_v63 = vand.u32 4294901760, %v11475_v34  ;;  %v23597_v36 = vand.u32 4294901760, %v22251_v6  ;;  %v23598_v29 = vand.u32 4294901760, %v22254_v50  ;;  %14368 = vmatprep.subr.bf16.mxu1 %v14367_v52  ;;  %v14369_v26 = vpack.c.bf16 %v22011_v14, %v22021_v5  ;;  %v25815_v52 = vld [vmem:[#allocation110_spill] sm:$0xff] }
 0xa15   :  { %v22262_v54 = vpack.c.bf16 %v25813_v28, %v25812_v15  ;;  %v14449_v24 = vpack.c.bf16 %v11494_v35, %v11482_v40  ;;  %v14451_v9 = vpack.c.bf16 %v22059_v17, %v21862_v22  ;;  %v14453_v32 = vpack.c.bf16 %v22054_v46, %v21856_v49  ;;  %v25814_v40 = vld [vmem:[#allocation10_spill] sm:$0xff]  ;;  %v25816_v15 = vld [vmem:[#allocation123_spill] sm:$0xff] }
 0xa16   :  { %v14447_v12 = vpack.c.bf16 %v11488_v11, %v11476_v63  ;;  %v11505_v37 = vsub.f32 %v22251_v6, %v23597_v36  ;;  %v11499_v28 = vsub.f32 %v22254_v50, %v23598_v29  ;;  %v14455_v35 = vpack.c.bf16 %v22126_v56, %v22099_v45  ;;  %v25827_v36 = vld [vmem:[#allocation119_spill] sm:$0xff]  ;;  %v25828_v29 = vld [vmem:[#allocation134_spill] sm:$0xff] }
 0xa17   :  { %14370 = vmatpush1.bf16.msra.mxu1 %v14369_v26  ;;  %v14457_v63 = vpack.c.bf16 %v22121_v55, %v22091_v59  ;;  %v14465_v59 = vpack.c.bf16 %v22217_v8, %v22184_v58  ;;  %v25822_v55 = vld [vmem:[#allocation78_spill] sm:$0xff]  ;;  %v25829_v8 = vand.u32 4294901760, %v25828_v29  ;;  %v25839_v29 = vand.u32 4294901760, %v21939_v2 }
 0xa18   :  { %14448 = vmatprep.subr.bf16.mxu0 %v14447_v12  ;;  %v11500_v34 = vand.u32 4294901760, %v11499_v28  ;;  %10939 = vmatprep.subr.mxu1 %v22042_v42  ;;  %v11506_v11 = vand.u32 4294901760, %v11505_v37  ;;  %v25817_v12 = vld [vmem:[#allocation95_spill] sm:$0xff]  ;;  %v25819_v37 = vld [vmem:[#allocation77_spill] sm:$0xff] }
 0xa19   :  { %14450 = vmatpush1.bf16.msra.mxu0 %v14449_v24  ;;  %v25818_v24 = vld [vmem:[#allocation47_spill] sm:$0xff]  ;;  %v14461_v28 = vpack.c.bf16 %v22161_v27, %v25819_v37 }
 0xa1a   :  { %11501 = vmatprep.subr.mxu0 %v11500_v34  ;;  %v14459_v26 = vpack.c.bf16 %v22166_v53, %v25818_v24  ;;  %v25820_v34 = vld [vmem:[#allocation27_spill] sm:$0xff] }
 0xa1b   :  { %10942 = vmatpush1.msra.mxu1 %v22049_v23 }
 0xa1c   :  { %14372 = vmatprep.subr.bf16.mxu1 %v21786_v31  ;;  %10992 = vmatmul.mubr.f32.vlgmr.msra.gmra.mrb[8].mxu1 %v21889_v0 }
 0xa1d   :  { %11507 = vmatpush1.msra.mxu0 %v11506_v11  ;;  %14374 = vmatpush1.bf16.msra.mxu1 %v25814_v40  ;;  %v25821_v11 = vld [vmem:[#allocation101_spill] sm:$0xff] }
 0xa1e   :  { %14452 = vmatprep.subr.bf16.mxu0 %v14451_v9  ;;  %14376 = vmatprep.subr.bf16.mxu1 %v25815_v52  ;;  %v14463_v9 = vpack.c.bf16 %v22222_v19, %v22192_v30 }
 0xa1f   :  { %11556 = vmatmul.mubr.f32.vlgmr.msra.gmra.mrb[8].mxu0 %v21864_v48  ;;  %11080 = vmatprep.mubr.f32.mxu1 %v25732_v1 }
 0xa20   :  { %14454 = vmatpush1.bf16.msra.mxu0 %v14453_v32  ;;  %11662 = vmatprep.mubr.f32.mxu0 %v25732_v1  ;;  %v25823_v32 = vand.u32 4294901760, %v21847_v44  ;;  %v25831_v44 = vand.u32 4294901760, %v21950_v7  ;;  %v25837_v7 = vand.u32 4294901760, %v22106_v60 }
 0xa21   :  { %14456 = vmatprep.subr.bf16.mxu0 %v14455_v35  ;;  %14378 = vmatpush1.bf16.msra.mxu1 %v25816_v15  ;;  %v25824_v35 = vand.u32 4294901760, %v21871_v16  ;;  %v25832_v16 = vand.u32 4294901760, %v21923_v43 }
 0xa22   :  { %14380 = vmatprep.subr.bf16.mxu1 %v25817_v12 }
 0xa24   :  { %14458 = vmatpush1.bf16.msra.mxu0 %v14457_v63  ;;  %v14387_v63 = vpack.c.bf16 %v25824_v35, %v25823_v32  ;;  %v14391_v32 = vpack.c.bf16 %v25832_v16, %v25831_v44  ;;  %v25835_v35 = vand.u32 4294901760, %v22029_v33  ;;  %v25840_v33 = vand.u32 4294901760, %v21823_v10  ;;  %v25847_v44 = vld [vmem:[#allocation21_spill] sm:$0xff] }
 0xa25   :  { %14460 = vmatprep.subr.bf16.mxu0 %v14459_v26  ;;  %14382 = vmatpush1.bf16.msra.mxu1 %v25820_v34  ;;  %v25825_v26 = vand.u32 4294901760, %v21836_v20  ;;  %v25833_v20 = vld [vmem:[#allocation46_spill] sm:$0xff]  ;;  %v25848_v16 = vand.u32 4294901760, %v25847_v44 }
 0xa26   :  { %14384 = vmatprep.subr.bf16.mxu1 %v25821_v11 }
 0xa28   :  { %14462 = vmatpush1.bf16.msra.mxu0 %v14461_v28  ;;  %v25826_v28 = vand.u32 4294901760, %v21894_v41  ;;  %v25834_v41 = vand.u32 4294901760, %v25833_v20 }
 0xa29   :  { %14464 = vmatprep.subr.bf16.mxu0 %v14463_v9  ;;  %14386 = vmatpush1.bf16.msra.mxu1 %v25822_v55 }
 0xa2a   :  { %11031 = vmatprep.subr.mxu1 %v22017_v62  ;;  %v14389_v9 = vpack.c.bf16 %v25826_v28, %v25825_v26  ;;  %v25841_v28 = vand.u32 4294901760, %v21952_v18  ;;  %v25849_v18 = vand.u32 4294901760, %v21818_v4 }
 0xa2c   :  { %14466 = vmatpush1.bf16.msra.mxu0 %v14465_v59  ;;  %v25830_v59 = vand.u32 4294901760, %v22032_v51  ;;  %v25836_v51 = vand.u32 4294901760, %v22071_v21  ;;  %v25842_v21 = vand.u32 4294901760, %v22068_v57  ;;  %v25852_v57 = vand.u32 4294901760, %v21994_v3  ;;  %v25863_v3 = vld [vmem:[#allocation131_spill] sm:$0xff] }
 0xa2d   :  { %11612 = vmatprep.subr.mxu0 %v22254_v50  ;;  %11033 = vmatpush1.msra.mxu1 %v22023_v13 }
 0xa2e   :  { %14388 = vmatprep.subr.bf16.mxu1 %v14387_v63  ;;  %11084 = vmatmul.mubr.f32.vlgmr.msra.gmra.mrb[8].mxu1 %v25827_v36  ;;  %v22320_v50 = vpack.c.bf16 %v25830_v59, %v25829_v8  ;;  %v22331_v63 = vpack.c.bf16 %v25835_v35, %v25834_v41  ;;  %v22339_v43 = vpack.c.bf16 %v25837_v7, %v25836_v51  ;;  %v25838_v8 = vand.u32 4294901760, %v21937_v38  ;;  %v25843_v38 = vld [vmem:[#allocation125_spill] sm:$0xff]  ;;  %v25853_v51 = vld [vmem:[#allocation84_spill] sm:$0xff] }
 0xa2f   :  { %14390 = vmatpush1.bf16.msra.mxu1 %v14389_v9  ;;  %11208 = vmatprep.mubr.f32.mxu1 %v25732_v1  ;;  %v25844_v60 = vand.u32 4294901760, %v25843_v38  ;;  %v25845_v9 = vld [vmem:[#allocation63_spill] sm:$0xff]  ;;  %v25851_v41 = vand.u32 4294901760, %v21982_v47  ;;  %v25854_v7 = vand.u32 4294901760, %v25853_v51  ;;  %v25862_v47 = vand.u32 4294901760, %v22011_v14 }
 0xa30   :  { %11615 = vmatpush1.msra.mxu0 %v22251_v6  ;;  %14392 = vmatprep.subr.bf16.mxu1 %v14391_v32  ;;  %v14393_v26 = vpack.c.bf16 %v25839_v29, %v25838_v8  ;;  %v25846_v59 = vand.u32 4294901760, %v25845_v9  ;;  %v25850_v32 = vand.u32 4294901760, %v21957_v39  ;;  %v25855_v8 = vld [vmem:[#allocation33_spill] sm:$0xff]  ;;  %v25865_v9 = vld [vmem:[#allocation66_spill] sm:$0xff]  ;;  %v25869_v14 = vand.u32 4294901760, %v21862_v22 }
 0xa31   :  { %14468 = vmatprep.subr.bf16.mxu0 %v22320_v50  ;;  %11665 = vmatmul.mubr.f32.vlgmr.msra.gmra.mrb[8].mxu0 %v21889_v0  ;;  %v14395_v0 = vpack.c.bf16 %v25841_v28, %v25840_v33  ;;  %v22357_v2 = vpack.c.bf16 %v25844_v60, %v25842_v21  ;;  %v14399_v35 = vpack.c.bf16 %v25852_v57, %v25851_v41  ;;  %v25856_v29 = vand.u32 4294901760, %v25855_v8  ;;  %v25857_v33 = vld [vmem:[#allocation45_spill] sm:$0xff]  ;;  %v25859_v28 = vld [vmem:[#allocation23_spill] sm:$0xff] }
 0xa32   :  { %14470 = vmatpush1.bf16.msra.mxu0 %v22331_v63  ;;  %11753 = vmatprep.mubr.f32.mxu0 %v25732_v1  ;;  %v14427_v10 = vpack.c.bf16 %v25848_v16, %v25846_v59  ;;  %v14397_v20 = vpack.c.bf16 %v25850_v32, %v25849_v18  ;;  %v25858_v4 = vand.u32 4294901760, %v25857_v33  ;;  %v25860_v39 = vand.u32 4294901760, %v25859_v28  ;;  %v12014_v33 = vld [vmem:[%s22489_s13] sm:$0xff] }
 0xa33   :  { %14472 = vmatprep.subr.bf16.mxu0 %v22339_v43  ;;  %14394 = vmatpush1.bf16.msra.mxu1 %v14393_v26  ;;  %v14429_v26 = vpack.c.bf16 %v25856_v29, %v25854_v7  ;;  %v25861_v21 = vand.u32 4294901760, %v22021_v5  ;;  %v25864_v60 = vand.u32 4294901760, %v25863_v3  ;;  %v25866_v59 = vand.u32 4294901760, %v25865_v9  ;;  %v11997_v3 = vld [vmem:[%s22490_s12] sm:$0xff] }
 0xa34   :  { %14396 = vmatprep.subr.bf16.mxu1 %v14395_v0  ;;  %v14431_v0 = vpack.c.bf16 %v25860_v39, %v25858_v4  ;;  %v25867_v16 = vand.u32 4294901760, %v22042_v42  ;;  %v25868_v18 = vand.u32 4294901760, %v22049_v23  ;;  %v25870_v5 = vand.u32 4294901760, %v22059_v17 }
 0xa35   :  { %v14401_v38 = vpack.c.bf16 %v25862_v47, %v25861_v21  ;;  %v14433_v44 = vpack.c.bf16 %v25866_v59, %v25864_v60  ;;  %v25871_v42 = vand.u32 4294901760, %v21856_v49  ;;  %v25872_v23 = vand.u32 4294901760, %v22054_v46 }
 0xa36   :  { %14474 = vmatpush1.bf16.msra.mxu0 %v22357_v2  ;;  %v14483_v32 = vpack.c.bf16 %v25870_v5, %v25869_v14  ;;  %v25874_v22 = vand.u32 4294901760, %v22126_v56  ;;  %v25875_v49 = vand.u32 4294901760, %v25818_v24  ;;  %v25876_v46 = vand.u32 4294901760, %v22166_v53 }
 0xa37   :  { %14476 = vmatprep.subr.bf16.mxu0 %v14427_v10  ;;  %14398 = vmatpush1.bf16.msra.mxu1 %v14397_v20  ;;  %v25878_v56 = vand.u32 4294901760, %v22161_v27  ;;  %v25881_v53 = vand.u32 4294901760, %v22184_v58  ;;  %v10627_v58 = vpop.permute.xlu1 %10626 }
 0xa38   :  { %14400 = vmatprep.subr.bf16.mxu1 %v14399_v35 }
 0xa3a   :  { %14478 = vmatpush1.bf16.msra.mxu0 %v14429_v26 }
 0xa3b   :  { %14480 = vmatprep.subr.bf16.mxu0 %v14431_v0  ;;  %14402 = vmatpush1.bf16.msra.mxu1 %v14401_v38 }
 0xa3c   :  { %11157 = vmatprep.subr.mxu1 %v25867_v16 }
 0xa3e   :  { %14482 = vmatpush1.bf16.msra.mxu0 %v14433_v44 }
 0xa3f   :  { %11704 = vmatprep.subr.mxu0 %v22237_v61  ;;  %11161 = vmatpush1.msra.mxu1 %v25868_v18 }
 0xa40   :  { %14404 = vmatprep.subr.bf16.mxu1 %v21786_v31  ;;  %11210 = vmatmul.mubr.f32.vlgmr.msra.gmra.mrb[8].mxu1 %v21864_v48  ;;  %v14485_v31 = vpack.c.bf16 %v25872_v23, %v25871_v42 }
 0xa41   :  { %14406 = vmatpush1.bf16.msra.mxu1 %v25814_v40  ;;  %11298 = vmatprep.mubr.f32.mxu1 %v25732_v1  ;;  %v25873_v40 = vand.u32 4294901760, %v22099_v45  ;;  %v25877_v45 = vand.u32 4294901760, %v25819_v37  ;;  %v25884_v37 = vld [vmem:[#allocation44_spill] sm:$0xff] }
 0xa42   :  { %11706 = vmatpush1.msra.mxu0 %v22235_v25  ;;  %14408 = vmatprep.subr.bf16.mxu1 %v25815_v52  ;;  %v14491_v52 = vpack.c.bf16 %v25876_v46, %v25875_v49  ;;  %v25885_v27 = vand.u32 4294901760, %v25884_v37 }
 0xa43   :  { %14484 = vmatprep.subr.bf16.mxu0 %v14483_v32  ;;  %11757 = vmatmul.mubr.f32.vlgmr.msra.gmra.mrb[8].mxu0 %v25827_v36  ;;  %v14487_v17 = vpack.c.bf16 %v25874_v22, %v25873_v40  ;;  %v14493_v36 = vpack.c.bf16 %v25878_v56, %v25877_v45 }
 0xa44   :  { %14486 = vmatpush1.bf16.msra.mxu0 %v14485_v31  ;;  %11881 = vmatprep.mubr.f32.mxu0 %v25732_v1 }
 0xa45   :  { %14488 = vmatprep.subr.bf16.mxu0 %v14487_v17  ;;  %14410 = vmatpush1.bf16.msra.mxu1 %v25816_v15  ;;  %v25879_v15 = vand.u32 4294901760, %v22192_v30 }
 0xa46   :  { %14412 = vmatprep.subr.bf16.mxu1 %v25817_v12  ;;  %v25880_v12 = vand.u32 4294901760, %v22222_v19 }
 0xa48   :  { %14490 = vmatpush1.bf16.msra.mxu0 %v22262_v54  ;;  %v14495_v24 = vpack.c.bf16 %v25880_v12, %v25879_v15  ;;  %v25882_v54 = vld [vmem:[#allocation72_spill] sm:$0xff] }
 0xa49   :  { %14492 = vmatprep.subr.bf16.mxu0 %v14491_v52  ;;  %14414 = vmatpush1.bf16.msra.mxu1 %v25820_v34  ;;  %v25883_v34 = vand.u32 4294901760, %v25882_v54 }
 0xa4a   :  { %14416 = vmatprep.subr.bf16.mxu1 %v25821_v11 }
 0xa4b   :  { %v14497_v11 = vpack.c.bf16 %v25883_v34, %v25881_v53 }
 0xa4c   :  { %14494 = vmatpush1.bf16.msra.mxu0 %v14493_v36 }
 0xa4d   :  { %14496 = vmatprep.subr.bf16.mxu0 %v14495_v24  ;;  %14418 = vmatpush1.bf16.msra.mxu1 %v25822_v55 }
 0xa4e   :  { %11249 = vmatprep.subr.mxu1 %v22017_v62  ;;  %v25886_v62 = vand.u32 4294901760, %v22251_v6 }
 0xa50   :  { %14498 = vmatpush1.bf16.msra.mxu0 %v14497_v11 }
 0xa51   :  { %11830 = vmatprep.subr.mxu0 %v25885_v27  ;;  %11251 = vmatpush1.msra.mxu1 %v22023_v13 }
 0xa52   :  { %11300 = vmatmul.mubr.f32.vlgmr.msra.gmra.mrb[8].mxu1 %v21864_v48  ;;  %14420 = vmatprep.subr.bf16.mxu1 %v22320_v50 }
 0xa53   :  { %14422 = vmatpush1.bf16.msra.mxu1 %v22331_v63  ;;  %11388 = vmatprep.mubr.f32.mxu1 %v25732_v1 }
 0xa54   :  { %11834 = vmatpush1.msra.mxu0 %v25886_v62  ;;  %14424 = vmatprep.subr.bf16.mxu1 %v22339_v43 }
 0xa55   :  { %14500 = vmatprep.subr.bf16.mxu0 %v22320_v50  ;;  %11883 = vmatmul.mubr.f32.vlgmr.msra.gmra.mrb[8].mxu0 %v21864_v48 }
 0xa56   :  { %14502 = vmatpush1.bf16.msra.mxu0 %v22331_v63  ;;  %11971 = vmatprep.mubr.f32.mxu0 %v25732_v1  ;;  %v25887_v1 = vld [vmem:[#allocation42_spill] sm:$0xff] }
 0xa57   :  { %14504 = vmatprep.subr.bf16.mxu0 %v22339_v43  ;;  %14426 = vmatpush1.bf16.msra.mxu1 %v22357_v2 }
 0xa58   :  { %14428 = vmatprep.subr.bf16.mxu1 %v14427_v10 }
 0xa5a   :  { %14506 = vmatpush1.bf16.msra.mxu0 %v22357_v2 }
 0xa5b   :  { %14508 = vmatprep.subr.bf16.mxu0 %v14427_v10  ;;  %14430 = vmatpush1.bf16.msra.mxu1 %v14429_v26 }
 0xa5c   :  { %14432 = vmatprep.subr.bf16.mxu1 %v14431_v0 }
 0xa5e   :  { %14510 = vmatpush1.bf16.msra.mxu0 %v14429_v26 }
 0xa5f   :  { %14512 = vmatprep.subr.bf16.mxu0 %v14431_v0  ;;  %14434 = vmatpush1.bf16.msra.mxu1 %v14433_v44 }
 0xa60   :  { %11339 = vmatprep.subr.mxu1 %v22237_v61 }
 0xa62   :  { %14514 = vmatpush1.bf16.msra.mxu0 %v14433_v44 }
 0xa63   :  { %11922 = vmatprep.subr.mxu0 %v22237_v61  ;;  %11341 = vmatpush1.msra.mxu1 %v22235_v25 }
 0xa64   :  { %11394 = vmatmul.mubr.f32.vlgmr.msra.gmra.mrb[10].mxu1 %v25887_v1 }
 0xa66   :  { %11924 = vmatpush1.msra.mxu0 %v22235_v25 }
 0xa67   :  { %11973 = vmatmul.mubr.f32.vlgmr.msra.gmra.mrb[8].mxu0 %v21864_v48 }
 0xb25   :  { %v11301_v13 = vpop.f32.mrb[8].mxu1 }
 0xb26   :  { %v11303_v30 = vpop.f32.mrb[9].mxu1  ;;  %v14523_v19 = vadd.f32 %v11301_v13, %v10627_v58 }
 0xb27   :  { %v14524_v6 = vadd.f32 %v11303_v30, %v10627_v58 }
 0xb28   :  { %v11984_v43 = vmul.f32 %v14523_v19, %v14523_v19 }
 0xb29   :  { %v11985_v2 = vmul.f32 %v14524_v6, %v14524_v6  ;;  %v11979_v20 = vadd.f32 %v14524_v6, %v14523_v19 }
 0xb2b   :  { %v11988_v51 = vadd.f32 %v11985_v2, %v11984_v43 }
 0xb37   :  { %v11395_v50 = vpop.f32.mrb[10].mxu1 }
 0xb38   :  { %v11396_v55 = vadd.f32 %v11395_v50, %v10627_v58  ;;  %v11397_v63 = vpop.f32.mrb[11].mxu1 }
 0xb39   :  { %v11398_v10 = vadd.f32 %v11397_v63, %v10627_v58 }
 0xb3a   :  { %v11974_v61 = vpop.f32.mrb[8].mxu0 }
 0xb3b   :  { %v14526_v41 = vadd.f32 %v11974_v61, %v11396_v55  ;;  %v11976_v57 = vpop.f32.mrb[9].mxu0 }
 0xb3c   :  { %v14528_v35 = vadd.f32 %v11976_v57, %v11398_v10 }
 0xb3d   :  { %v11980_v25 = vadd.f32 %v14526_v41, %v11979_v20  ;;  %v11986_v7 = vmul.f32 %v14526_v41, %v14526_v41 }
 0xb3e   :  { %v11987_v48 = vmul.f32 %v14528_v35, %v14528_v35 }
 0xb3f   :  { %v11981_v8 = vadd.f32 %v14528_v35, %v11980_v25  ;;  %v11989_v29 = vadd.f32 %v11988_v51, %v11986_v7 }
 0xb41   :  { %11982 = vadd.xlane.f32.xlu0 %v11981_v8  ;;  %v11990_v26 = vadd.f32 %v11989_v29, %v11987_v48 }
 0xb43   :  { %11991 = vadd.xlane.f32.xlu1 %v11990_v26 }
 0xb54   :  { %12017 = vperm.xlu1 %14693, %v12014_v33  }
 0xbce   :  { %v11983_v4 = vpop.xlane.xlu0 %11982 }
 0xbcf   :  { %v11993_v28 = vmul.f32 0.001953125, %v11983_v4 }
 0xbd0   :  { %v11992_v39 = vpop.xlane.xlu1 %11991 }
 0xbd1   :  { %v11994_v0 = vmul.f32 0.001953125, %v11992_v39  ;;  %v11995_v21 = vmul.f32 %v11993_v28, %v11993_v28  ;;  %v12001_v59 = vsub.f32 %v14523_v19, %v11993_v28  ;;  %v12002_v44 = vsub.f32 %v14524_v6, %v11993_v28 }
 0xbd2   :  { %v12003_v16 = vsub.f32 %v14526_v41, %v11993_v28  ;;  %v12004_v18 = vsub.f32 %v14528_v35, %v11993_v28 }
 0xbd3   :  { %v11996_v47 = vsub.f32 %v11994_v0, %v11995_v21 }
 0xbd4   :  { %v12018_v31 = vpop.permute.xlu1 %12017 }
 0xbd5   :  { %v11998_v38 = vadd.f32 1e-05, %v11996_v47 }
 0xbd7   :  { %14696 = vrsqrt.f32 %v11998_v38 }
 0xbe1   :  { %v14697_v60 = vpop.eup %14696 }
 0xbe2   :  { %v12000_v9 = vmul.f32 %v14697_v60, %v11997_v3 }
 0xbe4   :  { %12007 = vperm.xlu0 %14692, %v12000_v9  }
 0xc63   :  { %v12008_v14 = vpop.permute.xlu0 %12007 }
 0xc64   :  { %v12010_v5 = vmul.f32 %v12008_v14, %v12001_v59  ;;  %v12011_v32 = vmul.f32 %v12008_v14, %v12002_v44  ;;  %v12012_v42 = vmul.f32 %v12008_v14, %v12003_v16  ;;  %v12013_v23 = vmul.f32 %v12008_v14, %v12004_v18 }
 0xc66   :  { %v12020_v40 = vadd.f32 %v12018_v31, %v12010_v5  ;;  %v12021_v22 = vadd.f32 %v12018_v31, %v12011_v32  ;;  %v12022_v17 = vadd.f32 %v12018_v31, %v12012_v42  ;;  %v12023_v49 = vadd.f32 %v12018_v31, %v12013_v23 }
 0xc68   :  { %v12024_v46 = vmax.f32 %v12020_v40, 0.0  ;;  %v12025_v52 = vmax.f32 %v12021_v22, 0.0  ;;  %v12026_v45 = vmax.f32 %v12022_v17, 0.0  ;;  %v12027_v56 = vmax.f32 %v12023_v49, 0.0 }
 0xc6a   :  { %12028 = vst [vmem:[%s22491_s14] sm:$0xff] %v12024_v46  ;;  %12029 = vst [vmem:[%s22491_s14 + $0x8] sm:$0xff] %v12025_v52 }
 0xc6b   :  { %12030 = vst [vmem:[%s22491_s14 + $0x10] sm:$0xff] %v12026_v45  ;;  %12031 = vst [vmem:[%s22491_s14 + $0x18] sm:$0xff] %v12027_v56 }

</bundles_post_ra>
